<compile_context>
chip_gen: v7x
topology: tpu7x:2x2x1
jax: 0.10.0
libtpu: 0.0.40
codegen_flags: <defaults>
</compile_context>

<pallas_src>
import functools

import jax
import jax.numpy as jnp
from jax.experimental import pallas as pl
from jax.experimental.pallas import tpu as pltpu

EPS_BN = 1e-5
EPS_PRIOR = 1e-5
TILE_B = 128     # batch rows per grid step
NC_PAD = 128     # lane-dense padded class count for the output head


# ----------------------------------------------------------------------------
# Shared math (used by both the Pallas kernel and the plain-JAX references)
# ----------------------------------------------------------------------------
def _glu_folded(h, wl, wg, bl, bg):
    """Folded-BN GLU block: two (D,D) bf16 matmuls + f32 bias / sigmoid."""
    hb = h.astype(jnp.bfloat16)
    lin = jnp.dot(hb, wl, preferred_element_type=jnp.float32) + bl[None, :]
    gate = jnp.dot(hb, wg, preferred_element_type=jnp.float32) + bg[None, :]
    return lin * jax.nn.sigmoid(gate)


# ----------------------------------------------------------------------------
# The Pallas kernel: full TabNet encoder + (padded) output head per batch tile
# ----------------------------------------------------------------------------
def tabnet_kernel(
    x_ref,          # (TILE_B, D)  f32, initial BN already applied
    shared_wl_ref,  # (n_shared, D, D)          bf16
    shared_wg_ref,  # (n_shared, D, D)          bf16
    shared_bl_ref,  # (n_shared, D)             f32
    shared_bg_ref,  # (n_shared, D)             f32
    step_wl_ref,    # (n_steps*n_indep, D, D)   bf16
    step_wg_ref,    # (n_steps*n_indep, D, D)   bf16
    step_bl_ref,    # (n_steps*n_indep, D)      f32
    step_bg_ref,    # (n_steps*n_indep, D)      f32
    att_w_ref,      # (n_steps, D, D)           bf16  (only first n_steps-1 used)
    att_b_ref,      # (n_steps, D)              f32
    out_w_ref,      # (D, NC_PAD)               bf16
    out_b_ref,      # (1, NC_PAD)               f32
    logits_ref,     # out: (TILE_B, NC_PAD)     f32
):
    n_shared = shared_wl_ref.shape[0]
    n_steps = att_w_ref.shape[0]
    n_indep = step_wl_ref.shape[0] // n_steps

    x = x_ref[...]
    prior = jnp.ones_like(x)
    masked_x = x
    total = jnp.zeros_like(x)

    for step in range(n_steps):
        out = masked_x
        # Shared feature transformer blocks (folded BN, pre-split GLU weights).
        for s in range(n_shared):
            out = _glu_folded(out, shared_wl_ref[s], shared_wg_ref[s],
                              shared_bl_ref[s], shared_bg_ref[s])
        # Step-specific (independent) feature transformer blocks.
        for i in range(n_indep):
            idx = step * n_indep + i
            out = _glu_folded(out, step_wl_ref[idx], step_wg_ref[idx],
                              step_bl_ref[idx], step_bg_ref[idx])
        total = total + out

        if step < n_steps - 1:
            # Attentive transformer (folded FC+BN) -> prior-weighted softmax.
            a = jnp.dot(out.astype(jnp.bfloat16), att_w_ref[step],
                        preferred_element_type=jnp.float32)
            a = (a + att_b_ref[step][None, :]) * prior
            m = jnp.max(a, axis=-1, keepdims=True)
            e = jnp.exp(a - m)
            denom = jnp.sum(e, axis=-1, keepdims=True)
            mask = e * pl.reciprocal(denom, approx=True)
            masked_x = mask * x
            prior = prior * (1.0 - mask + EPS_PRIOR)

    # Output head (lane-dense: padded to NC_PAD classes).
    logits = jnp.dot(total.astype(jnp.bfloat16), out_w_ref[...],
                     preferred_element_type=jnp.float32)
    logits_ref[...] = logits + out_b_ref[...]


# ----------------------------------------------------------------------------
# Wrapper (embeddings + init-BN affine + batch-tiled pallas_call)
# ----------------------------------------------------------------------------
def _embed_concat(x_num, x_cat, folded):
    x_emb = jnp.concatenate(
        [
            jnp.take(folded["region_emb"], x_cat[:, 0], axis=0),
            jnp.take(folded["station_emb"], x_cat[:, 1], axis=0),
            jnp.take(folded["cepages_emb"], x_cat[:, 2], axis=0),
        ],
        axis=1,
    )
    x = jnp.concatenate([x_num, x_emb], axis=1).astype(jnp.float32)
    # emb_dropout with p=0.0 (eval mode) is the identity.
    # Initial BatchNorm folded to a per-feature affine.
    return x * folded["init_scale"][None, :] + folded["init_shift"][None, :]


_WEIGHT_KEYS = ("shared_wl", "shared_wg", "shared_bl", "shared_bg",
                "step_wl", "step_wg", "step_bl", "step_bg",
                "att_w", "att_b", "out_w", "out_b")


@functools.partial(jax.jit, static_argnames=("n_classes",))
def tabnet_classifier_forward(x_num, x_cat, folded, n_classes=2):
    x = _embed_concat(x_num, x_cat, folded)
    b, d = x.shape
    pad_b = (-b) % TILE_B
    if pad_b:
        x = jnp.pad(x, ((0, pad_b), (0, 0)))
    bp = b + pad_b
    nb = bp // TILE_B

    weights = [folded[k] for k in _WEIGHT_KEYS]

    def full_spec(a):
        nd = a.ndim
        return pl.BlockSpec(a.shape, lambda i, _nd=nd: (0,) * _nd)

    logits_pad = pl.pallas_call(
        tabnet_kernel,
        out_shape=jax.ShapeDtypeStruct((bp, NC_PAD), jnp.float32),
        grid=(nb,),
        in_specs=[pl.BlockSpec((TILE_B, d), lambda i: (i, 0))]
                 + [full_spec(w) for w in weights],
        out_specs=pl.BlockSpec((TILE_B, NC_PAD), lambda i: (i, 0)),
        compiler_params=pltpu.CompilerParams(
            dimension_semantics=("parallel",)),
        # TODO(synk): for production-sized D, stream per-step weight stacks
        # (grid axis over steps or pl.ANY + manual DMA) instead of keeping all
        # steps resident -- v7x has only 64 MiB physical VMEM.
    )(x, *weights)
    return logits_pad[:b, :n_classes]


# ----------------------------------------------------------------------------
# Parameter construction (raw "PyTorch-like" params) and inference-BN folding
# ----------------------------------------------------------------------------
def make_params(key, *, embedding_sizes, num_numeric, n_classes, n_steps,
                n_shared, n_indep):
    emb_dims = {k: v[1] for k, v in embedding_sizes.items()}
    d = num_numeric + emb_dims["region"] + emb_dims["station"] + emb_dims["cepages"]

    keys = jax.random.split(key, 16)
    it = iter(keys)

    def normal(k, shape, scale=0.1):
        return scale * jax.random.normal(k, shape, dtype=jnp.float32)

    def bn_params(k, n, c):
        # stack of [gamma, beta, running_mean, running_var] per layer
        ks = jax.random.split(k, 4)
        gamma = 1.0 + 0.05 * jax.random.normal(ks[0], (n, 1, c), dtype=jnp.float32)
        beta = 0.05 * jax.random.normal(ks[1], (n, 1, c), dtype=jnp.float32)
        mean = 0.05 * jax.random.normal(ks[2], (n, 1, c), dtype=jnp.float32)
        var = 1.0 + 0.05 * jnp.abs(jax.random.normal(ks[3], (n, 1, c), dtype=jnp.float32))
        return jnp.concatenate([gamma, beta, mean, var], axis=1)  # (n, 4, c)

    params = {
        "region_emb": normal(next(it), embedding_sizes["region"]),
        "station_emb": normal(next(it), embedding_sizes["station"]),
        "cepages_emb": normal(next(it), embedding_sizes["cepages"]),
        "init_bn": bn_params(next(it), 1, d)[0],                      # (4, D)
        "shared_w": normal(next(it), (n_shared, d, 2 * d)),
        "shared_b": normal(next(it), (n_shared, 2 * d)),
        "shared_bn": bn_params(next(it), n_shared, 2 * d),
        "step_w": normal(next(it), (n_steps * n_indep, d, 2 * d)),
        "step_b": normal(next(it), (n_steps * n_indep, 2 * d)),
        "step_bn": bn_params(next(it), n_steps * n_indep, 2 * d),
        "att_w": normal(next(it), (n_steps, d, d)),
        "att_b": normal(next(it), (n_steps, d)),
        "att_bn": bn_params(next(it), n_steps, d),
        "out_w": normal(next(it), (d, n_classes)),
        "out_b": normal(next(it), (1, n_classes)),
    }
    return params, d


def fold_params(params, n_classes):
    """Fold inference-mode BN into FC weights, pre-split GLU halves, pad head."""
    d = params["init_bn"].shape[-1]

    def bn_scale_shift(bn):
        gamma, beta = bn[..., 0, :], bn[..., 1, :]
        mean, var = bn[..., 2, :], bn[..., 3, :]
        s = gamma * jax.lax.rsqrt(var + EPS_BN)
        return s, beta - mean * s

    def fold_fc(w, b, bn):
        # BN(x@W + b) == x@(W*s) + (b*s + t)
        s, t = bn_scale_shift(bn)
        return w * s[:, None, :], b * s + t

    init_s, init_t = bn_scale_shift(params["init_bn"])        # (D,), (D,)
    sh_w, sh_b = fold_fc(params["shared_w"], params["shared_b"], params["shared_bn"])
    st_w, st_b = fold_fc(params["step_w"], params["step_b"], params["step_bn"])
    at_w, at_b = fold_fc(params["att_w"], params["att_b"], params["att_bn"])

    out_w = jnp.zeros((d, NC_PAD), jnp.float32).at[:, :n_classes].set(params["out_w"])
    out_b = jnp.zeros((1, NC_PAD), jnp.float32).at[:, :n_classes].set(params["out_b"])

    bf16 = jnp.bfloat16
    return {
        "region_emb": params["region_emb"],
        "station_emb": params["station_emb"],
        "cepages_emb": params["cepages_emb"],
        "init_scale": init_s,
        "init_shift": init_t,
        "shared_wl": sh_w[:, :, :d].astype(bf16),
        "shared_wg": sh_w[:, :, d:].astype(bf16),
        "shared_bl": sh_b[:, :d],
        "shared_bg": sh_b[:, d:],
        "step_wl": st_w[:, :, :d].astype(bf16),
        "step_wg": st_w[:, :, d:].astype(bf16),
        "step_bl": st_b[:, :d],
        "step_bg": st_b[:, d:],
        "att_w": at_w.astype(bf16),
        "att_b": at_b,
        "out_w": out_w.astype(bf16),
        "out_b": out_b,
    }


# ----------------------------------------------------------------------------
# Pure-JAX references
# ----------------------------------------------------------------------------
def _bn_eval(h, bn):
    gamma, beta = bn[0][None, :], bn[1][None, :]
    mean, var = bn[2][None, :], bn[3][None, :]
    return (h - mean) * gamma * jax.lax.rsqrt(var + EPS_BN) + beta


def _feature_transformer_block(h, w, b, bn, d_out):
    z = jnp.dot(h, w) + b[None, :]
    z = _bn_eval(z, bn)
    return z[:, :d_out] * jax.nn.sigmoid(z[:, d_out:])


def reference_original(x_num, x_cat, params, n_steps, n_shared, n_indep):
    """Original f32 math (unfolded BN, unsplit GLU, exact softmax)."""
    x_emb = jnp.concatenate(
        [jnp.take(params["region_emb"], x_cat[:, 0], axis=0),
         jnp.take(params["station_emb"], x_cat[:, 1], axis=0),
         jnp.take(params["cepages_emb"], x_cat[:, 2], axis=0)], axis=1)
    x = jnp.concatenate([x_num, x_emb], axis=1).astype(jnp.float32)
    d = x.shape[1]
    x = _bn_eval(x, params["init_bn"])
    prior = jnp.ones_like(x)
    masked_x = x
    total = jnp.zeros_like(x)
    for step in range(n_steps):
        out = masked_x
        for s in range(n_shared):
            out = _feature_transformer_block(
                out, params["shared_w"][s], params["shared_b"][s],
                params["shared_bn"][s], d)
        for i in range(n_indep):
            idx = step * n_indep + i
            out = _feature_transformer_block(
                out, params["step_w"][idx], params["step_b"][idx],
                params["step_bn"][idx], d)
        total = total + out
        if step < n_steps - 1:
            a = out @ params["att_w"][step] + params["att_b"][step][None, :]
            a = _bn_eval(a, params["att_bn"][step]) * prior
            a = a - jnp.max(a, axis=-1, keepdims=True)
            e = jnp.exp(a)
            mask = e / jnp.sum(e, axis=-1, keepdims=True)
            masked_x = mask * x
            prior = prior * (1.0 - mask + EPS_PRIOR)
    return total @ params["out_w"] + params["out_b"]


def reference_folded(x_num, x_cat, folded, n_steps, n_shared, n_indep, n_classes):
    """Same math as the kernel (folded BN, bf16 matmul inputs), exact divide."""
    x = _embed_concat(x_num, x_cat, folded)
    prior = jnp.ones_like(x)
    masked_x = x
    total = jnp.zeros_like(x)
    for step in range(n_steps):
        out = masked_x
        for s in range(n_shared):
            out = _glu_folded(out, folded["shared_wl"][s], folded["shared_wg"][s],
                              folded["shared_bl"][s], folded["shared_bg"][s])
        for i in range(n_indep):
            idx = step * n_indep + i
            out = _glu_folded(out, folded["step_wl"][idx], folded["step_wg"][idx],
                              folded["step_bl"][idx], folded["step_bg"][idx])
        total = total + out
        if step < n_steps - 1:
            a = jnp.dot(out.astype(jnp.bfloat16), folded["att_w"][step],
                        preferred_element_type=jnp.float32)
            a = (a + folded["att_b"][step][None, :]) * prior
            a = a - jnp.max(a, axis=-1, keepdims=True)
            e = jnp.exp(a)
            mask = e / jnp.sum(e, axis=-1, keepdims=True)
            masked_x = mask * x
            prior = prior * (1.0 - mask + EPS_PRIOR)
    logits = jnp.dot(total.astype(jnp.bfloat16), folded["out_w"],
                     preferred_element_type=jnp.float32) + folded["out_b"]
    return logits[:, :n_classes]


if __name__ == "__main__":
    key = jax.random.PRNGKey(0)

    # Small, module-consistent configuration.
    embedding_sizes = {"region": (10, 8), "station": (12, 8), "cepages": (7, 8)}
    num_numeric = 8          # total_input_dim D = 8 + 8 + 8 + 8 = 32
    n_classes = 2
    n_steps, n_shared, n_indep = 5, 2, 2
    batch = 200              # padded to 256 inside the wrapper -> grid = (2,)

    kp, kx, kc = jax.random.split(key, 3)
    params, d = make_params(
        kp, embedding_sizes=embedding_sizes, num_numeric=num_numeric,
        n_classes=n_classes, n_steps=n_steps, n_shared=n_shared, n_indep=n_indep)
    folded = fold_params(params, n_classes)

    x_num = jax.random.normal(kx, (batch, num_numeric), dtype=jnp.float32)
    x_cat = jnp.stack(
        [
            jax.random.randint(kc, (batch,), 0, embedding_sizes["region"][0]),
            jax.random.randint(jax.random.fold_in(kc, 1), (batch,), 0,
                               embedding_sizes["station"][0]),
            jax.random.randint(jax.random.fold_in(kc, 2), (batch,), 0,
                               embedding_sizes["cepages"][0]),
        ],
        axis=1,
    ).astype(jnp.int32)

    logits = tabnet_classifier_forward(x_num, x_cat, folded, n_classes=n_classes)
    logits = jax.block_until_ready(logits)
    assert logits.shape == (batch, n_classes)

    # Check 1: kernel vs. same-math plain-JAX reference (folded bf16 weights,
    # exact softmax divide). Differences stem only from the approximate
    # reciprocal on the EUP and accumulation-order effects.
    ref_same = reference_folded(x_num, x_cat, folded, n_steps, n_shared,
                                n_indep, n_classes)
    err_same = jnp.max(jnp.abs(logits - ref_same))
    assert jnp.allclose(logits, ref_same, rtol=1e-2, atol=1e-2), (
        f"kernel vs folded-ref mismatch: max abs err {err_same}")

    # Check 2: kernel vs. original f32 BN-unfolded math (validates the BN fold
    # and GLU split); looser tolerance covers bf16 weight/activation rounding.
    ref_f32 = reference_original(x_num, x_cat, params, n_steps, n_shared, n_indep)
    err_f32 = jnp.max(jnp.abs(logits - ref_f32))
    assert jnp.allclose(logits, ref_f32, rtol=1e-1, atol=1e-1), (
        f"kernel vs f32-ref mismatch: max abs err {err_f32}")

    print("KERNEL_OK")
</pallas_src>

<mosaic_0001>
module attributes {stable_mosaic.version = 11 : i64} {
  func.func @tabnet_kernel(%arg0: i32, %arg1: memref<128x32xf32, #tpu.memory_space<vmem>>, %arg2: memref<2x32x32xbf16, #tpu.memory_space<vmem>>, %arg3: memref<2x32x32xbf16, #tpu.memory_space<vmem>>, %arg4: memref<2x32xf32, #tpu.memory_space<vmem>>, %arg5: memref<2x32xf32, #tpu.memory_space<vmem>>, %arg6: memref<10x32x32xbf16, #tpu.memory_space<vmem>>, %arg7: memref<10x32x32xbf16, #tpu.memory_space<vmem>>, %arg8: memref<10x32xf32, #tpu.memory_space<vmem>>, %arg9: memref<10x32xf32, #tpu.memory_space<vmem>>, %arg10: memref<5x32x32xbf16, #tpu.memory_space<vmem>>, %arg11: memref<5x32xf32, #tpu.memory_space<vmem>>, %arg12: memref<32x128xbf16, #tpu.memory_space<vmem>>, %arg13: memref<1x128xf32, #tpu.memory_space<vmem>>, %arg14: memref<128x128xf32, #tpu.memory_space<vmem>>) attributes {dimension_semantics = [#tpu.dimension_semantics<parallel>], iteration_bounds = array<i64: 2>, scalar_prefetch = 0 : i64, scratch_operands = 0 : i64, tpu.core_type = #tpu.core_type<tc>, window_params = [{transform_indices = @transform_0, window_bounds = array<i64: 128, 32>}, {pipeline_mode = #tpu.pipeline_mode<synchronous>, transform_indices = @transform_1, window_bounds = array<i64: 2, 32, 32>}, {pipeline_mode = #tpu.pipeline_mode<synchronous>, transform_indices = @transform_2, window_bounds = array<i64: 2, 32, 32>}, {pipeline_mode = #tpu.pipeline_mode<synchronous>, transform_indices = @transform_3, window_bounds = array<i64: 2, 32>}, {pipeline_mode = #tpu.pipeline_mode<synchronous>, transform_indices = @transform_4, window_bounds = array<i64: 2, 32>}, {pipeline_mode = #tpu.pipeline_mode<synchronous>, transform_indices = @transform_5, window_bounds = array<i64: 10, 32, 32>}, {pipeline_mode = #tpu.pipeline_mode<synchronous>, transform_indices = @transform_6, window_bounds = array<i64: 10, 32, 32>}, {pipeline_mode = #tpu.pipeline_mode<synchronous>, transform_indices = @transform_7, window_bounds = array<i64: 10, 32>}, {pipeline_mode = #tpu.pipeline_mode<synchronous>, transform_indices = @transform_8, window_bounds = array<i64: 10, 32>}, {pipeline_mode = #tpu.pipeline_mode<synchronous>, transform_indices = @transform_9, window_bounds = array<i64: 5, 32, 32>}, {pipeline_mode = #tpu.pipeline_mode<synchronous>, transform_indices = @transform_10, window_bounds = array<i64: 5, 32>}, {pipeline_mode = #tpu.pipeline_mode<synchronous>, transform_indices = @transform_11, window_bounds = array<i64: 32, 128>}, {pipeline_mode = #tpu.pipeline_mode<synchronous>, transform_indices = @transform_12, window_bounds = array<i64: 1, 128>}, {transform_indices = @transform_13, window_bounds = array<i64: 128, 128>}]} {
    %c0 = arith.constant 0 : index
    %c0_0 = arith.constant 0 : index
    %0 = vector.load %arg1[%c0, %c0_0] : memref<128x32xf32, #tpu.memory_space<vmem>>, vector<128x32xf32>
    %cst = arith.constant 1.000000e+00 : f32
    %1 = vector.broadcast %cst : f32 to vector<128x32xf32>
    %cst_1 = arith.constant 0.000000e+00 : f32
    %2 = vector.broadcast %cst_1 : f32 to vector<128x32xf32>
    %c0_2 = arith.constant 0 : index
    %c0_3 = arith.constant 0 : index
    %c0_4 = arith.constant 0 : index
    %3 = vector.load %arg2[%c0_2, %c0_3, %c0_4] : memref<2x32x32xbf16, #tpu.memory_space<vmem>>, vector<1x32x32xbf16>
    %4 = vector.shape_cast %3 : vector<1x32x32xbf16> to vector<32x32xbf16>
    %c0_5 = arith.constant 0 : index
    %c0_6 = arith.constant 0 : index
    %c0_7 = arith.constant 0 : index
    %5 = vector.load %arg3[%c0_5, %c0_6, %c0_7] : memref<2x32x32xbf16, #tpu.memory_space<vmem>>, vector<1x32x32xbf16>
    %6 = vector.shape_cast %5 : vector<1x32x32xbf16> to vector<32x32xbf16>
    %c0_8 = arith.constant 0 : index
    %c0_9 = arith.constant 0 : index
    %7 = vector.load %arg4[%c0_8, %c0_9] : memref<2x32xf32, #tpu.memory_space<vmem>>, vector<1x32xf32>
    %8 = vector.shape_cast %7 : vector<1x32xf32> to vector<32xf32>
    %c0_10 = arith.constant 0 : index
    %c0_11 = arith.constant 0 : index
    %9 = vector.load %arg5[%c0_10, %c0_11] : memref<2x32xf32, #tpu.memory_space<vmem>>, vector<1x32xf32>
    %10 = vector.shape_cast %9 : vector<1x32xf32> to vector<32xf32>
    %11 = arith.truncf %0 : vector<128x32xf32> to vector<128x32xbf16>
    %cst_12 = arith.constant dense<0.000000e+00> : vector<128x32xf32>
    %12 = tpu.matmul %11, %4, %cst_12 {dimension_numbers = #tpu.dot_dimension_numbers<[1], [0], [0], [1], [0, 0, 1, 1], [], []>} : vector<128x32xbf16>, vector<32x32xbf16>, vector<128x32xf32> -> vector<128x32xf32>
    %13 = vector.shape_cast %8 : vector<32xf32> to vector<1x32xf32>
    %14 = vector.broadcast %13 : vector<1x32xf32> to vector<128x32xf32>
    %15 = arith.addf %12, %14 : vector<128x32xf32>
    %cst_13 = arith.constant dense<0.000000e+00> : vector<128x32xf32>
    %16 = tpu.matmul %11, %6, %cst_13 {dimension_numbers = #tpu.dot_dimension_numbers<[1], [0], [0], [1], [0, 0, 1, 1], [], []>} : vector<128x32xbf16>, vector<32x32xbf16>, vector<128x32xf32> -> vector<128x32xf32>
    %17 = vector.shape_cast %10 : vector<32xf32> to vector<1x32xf32>
    %18 = vector.broadcast %17 : vector<1x32xf32> to vector<128x32xf32>
    %19 = arith.addf %16, %18 : vector<128x32xf32>
    %20 = arith.negf %19 : vector<128x32xf32>
    %21 = math.exp %20 : vector<128x32xf32>
    %cst_14 = arith.constant 1.000000e+00 : f32
    %22 = vector.broadcast %cst_14 : f32 to vector<128x32xf32>
    %23 = arith.addf %22, %21 : vector<128x32xf32>
    %24 = arith.divf %22, %23 : vector<128x32xf32>
    %25 = arith.mulf %15, %24 : vector<128x32xf32>
    %c1 = arith.constant 1 : index
    %c0_15 = arith.constant 0 : index
    %c0_16 = arith.constant 0 : index
    %26 = vector.load %arg2[%c1, %c0_15, %c0_16] : memref<2x32x32xbf16, #tpu.memory_space<vmem>>, vector<1x32x32xbf16>
    %27 = vector.shape_cast %26 : vector<1x32x32xbf16> to vector<32x32xbf16>
    %c1_17 = arith.constant 1 : index
    %c0_18 = arith.constant 0 : index
    %c0_19 = arith.constant 0 : index
    %28 = vector.load %arg3[%c1_17, %c0_18, %c0_19] : memref<2x32x32xbf16, #tpu.memory_space<vmem>>, vector<1x32x32xbf16>
    %29 = vector.shape_cast %28 : vector<1x32x32xbf16> to vector<32x32xbf16>
    %c1_20 = arith.constant 1 : index
    %c0_21 = arith.constant 0 : index
    %30 = vector.load %arg4[%c1_20, %c0_21] : memref<2x32xf32, #tpu.memory_space<vmem>>, vector<1x32xf32>
    %31 = vector.shape_cast %30 : vector<1x32xf32> to vector<32xf32>
    %c1_22 = arith.constant 1 : index
    %c0_23 = arith.constant 0 : index
    %32 = vector.load %arg5[%c1_22, %c0_23] : memref<2x32xf32, #tpu.memory_space<vmem>>, vector<1x32xf32>
    %33 = vector.shape_cast %32 : vector<1x32xf32> to vector<32xf32>
    %34 = arith.truncf %25 : vector<128x32xf32> to vector<128x32xbf16>
    %cst_24 = arith.constant dense<0.000000e+00> : vector<128x32xf32>
    %35 = tpu.matmul %34, %27, %cst_24 {dimension_numbers = #tpu.dot_dimension_numbers<[1], [0], [0], [1], [0, 0, 1, 1], [], []>} : vector<128x32xbf16>, vector<32x32xbf16>, vector<128x32xf32> -> vector<128x32xf32>
    %36 = vector.shape_cast %31 : vector<32xf32> to vector<1x32xf32>
    %37 = vector.broadcast %36 : vector<1x32xf32> to vector<128x32xf32>
    %38 = arith.addf %35, %37 : vector<128x32xf32>
    %cst_25 = arith.constant dense<0.000000e+00> : vector<128x32xf32>
    %39 = tpu.matmul %34, %29, %cst_25 {dimension_numbers = #tpu.dot_dimension_numbers<[1], [0], [0], [1], [0, 0, 1, 1], [], []>} : vector<128x32xbf16>, vector<32x32xbf16>, vector<128x32xf32> -> vector<128x32xf32>
    %40 = vector.shape_cast %33 : vector<32xf32> to vector<1x32xf32>
    %41 = vector.broadcast %40 : vector<1x32xf32> to vector<128x32xf32>
    %42 = arith.addf %39, %41 : vector<128x32xf32>
    %43 = arith.negf %42 : vector<128x32xf32>
    %44 = math.exp %43 : vector<128x32xf32>
    %cst_26 = arith.constant 1.000000e+00 : f32
    %45 = vector.broadcast %cst_26 : f32 to vector<128x32xf32>
    %46 = arith.addf %45, %44 : vector<128x32xf32>
    %47 = arith.divf %45, %46 : vector<128x32xf32>
    %48 = arith.mulf %38, %47 : vector<128x32xf32>
    %c0_27 = arith.constant 0 : index
    %c0_28 = arith.constant 0 : index
    %c0_29 = arith.constant 0 : index
    %49 = vector.load %arg6[%c0_27, %c0_28, %c0_29] : memref<10x32x32xbf16, #tpu.memory_space<vmem>>, vector<1x32x32xbf16>
    %50 = vector.shape_cast %49 : vector<1x32x32xbf16> to vector<32x32xbf16>
    %c0_30 = arith.constant 0 : index
    %c0_31 = arith.constant 0 : index
    %c0_32 = arith.constant 0 : index
    %51 = vector.load %arg7[%c0_30, %c0_31, %c0_32] : memref<10x32x32xbf16, #tpu.memory_space<vmem>>, vector<1x32x32xbf16>
    %52 = vector.shape_cast %51 : vector<1x32x32xbf16> to vector<32x32xbf16>
    %c0_33 = arith.constant 0 : index
    %c0_34 = arith.constant 0 : index
    %53 = vector.load %arg8[%c0_33, %c0_34] : memref<10x32xf32, #tpu.memory_space<vmem>>, vector<1x32xf32>
    %54 = vector.shape_cast %53 : vector<1x32xf32> to vector<32xf32>
    %c0_35 = arith.constant 0 : index
    %c0_36 = arith.constant 0 : index
    %55 = vector.load %arg9[%c0_35, %c0_36] : memref<10x32xf32, #tpu.memory_space<vmem>>, vector<1x32xf32>
    %56 = vector.shape_cast %55 : vector<1x32xf32> to vector<32xf32>
    %57 = arith.truncf %48 : vector<128x32xf32> to vector<128x32xbf16>
    %cst_37 = arith.constant dense<0.000000e+00> : vector<128x32xf32>
    %58 = tpu.matmul %57, %50, %cst_37 {dimension_numbers = #tpu.dot_dimension_numbers<[1], [0], [0], [1], [0, 0, 1, 1], [], []>} : vector<128x32xbf16>, vector<32x32xbf16>, vector<128x32xf32> -> vector<128x32xf32>
    %59 = vector.shape_cast %54 : vector<32xf32> to vector<1x32xf32>
    %60 = vector.broadcast %59 : vector<1x32xf32> to vector<128x32xf32>
    %61 = arith.addf %58, %60 : vector<128x32xf32>
    %cst_38 = arith.constant dense<0.000000e+00> : vector<128x32xf32>
    %62 = tpu.matmul %57, %52, %cst_38 {dimension_numbers = #tpu.dot_dimension_numbers<[1], [0], [0], [1], [0, 0, 1, 1], [], []>} : vector<128x32xbf16>, vector<32x32xbf16>, vector<128x32xf32> -> vector<128x32xf32>
    %63 = vector.shape_cast %56 : vector<32xf32> to vector<1x32xf32>
    %64 = vector.broadcast %63 : vector<1x32xf32> to vector<128x32xf32>
    %65 = arith.addf %62, %64 : vector<128x32xf32>
    %66 = arith.negf %65 : vector<128x32xf32>
    %67 = math.exp %66 : vector<128x32xf32>
    %cst_39 = arith.constant 1.000000e+00 : f32
    %68 = vector.broadcast %cst_39 : f32 to vector<128x32xf32>
    %69 = arith.addf %68, %67 : vector<128x32xf32>
    %70 = arith.divf %68, %69 : vector<128x32xf32>
    %71 = arith.mulf %61, %70 : vector<128x32xf32>
    %c1_40 = arith.constant 1 : index
    %c0_41 = arith.constant 0 : index
    %c0_42 = arith.constant 0 : index
    %72 = vector.load %arg6[%c1_40, %c0_41, %c0_42] : memref<10x32x32xbf16, #tpu.memory_space<vmem>>, vector<1x32x32xbf16>
    %73 = vector.shape_cast %72 : vector<1x32x32xbf16> to vector<32x32xbf16>
    %c1_43 = arith.constant 1 : index
    %c0_44 = arith.constant 0 : index
    %c0_45 = arith.constant 0 : index
    %74 = vector.load %arg7[%c1_43, %c0_44, %c0_45] : memref<10x32x32xbf16, #tpu.memory_space<vmem>>, vector<1x32x32xbf16>
    %75 = vector.shape_cast %74 : vector<1x32x32xbf16> to vector<32x32xbf16>
    %c1_46 = arith.constant 1 : index
    %c0_47 = arith.constant 0 : index
    %76 = vector.load %arg8[%c1_46, %c0_47] : memref<10x32xf32, #tpu.memory_space<vmem>>, vector<1x32xf32>
    %77 = vector.shape_cast %76 : vector<1x32xf32> to vector<32xf32>
    %c1_48 = arith.constant 1 : index
    %c0_49 = arith.constant 0 : index
    %78 = vector.load %arg9[%c1_48, %c0_49] : memref<10x32xf32, #tpu.memory_space<vmem>>, vector<1x32xf32>
    %79 = vector.shape_cast %78 : vector<1x32xf32> to vector<32xf32>
    %80 = arith.truncf %71 : vector<128x32xf32> to vector<128x32xbf16>
    %cst_50 = arith.constant dense<0.000000e+00> : vector<128x32xf32>
    %81 = tpu.matmul %80, %73, %cst_50 {dimension_numbers = #tpu.dot_dimension_numbers<[1], [0], [0], [1], [0, 0, 1, 1], [], []>} : vector<128x32xbf16>, vector<32x32xbf16>, vector<128x32xf32> -> vector<128x32xf32>
    %82 = vector.shape_cast %77 : vector<32xf32> to vector<1x32xf32>
    %83 = vector.broadcast %82 : vector<1x32xf32> to vector<128x32xf32>
    %84 = arith.addf %81, %83 : vector<128x32xf32>
    %cst_51 = arith.constant dense<0.000000e+00> : vector<128x32xf32>
    %85 = tpu.matmul %80, %75, %cst_51 {dimension_numbers = #tpu.dot_dimension_numbers<[1], [0], [0], [1], [0, 0, 1, 1], [], []>} : vector<128x32xbf16>, vector<32x32xbf16>, vector<128x32xf32> -> vector<128x32xf32>
    %86 = vector.shape_cast %79 : vector<32xf32> to vector<1x32xf32>
    %87 = vector.broadcast %86 : vector<1x32xf32> to vector<128x32xf32>
    %88 = arith.addf %85, %87 : vector<128x32xf32>
    %89 = arith.negf %88 : vector<128x32xf32>
    %90 = math.exp %89 : vector<128x32xf32>
    %cst_52 = arith.constant 1.000000e+00 : f32
    %91 = vector.broadcast %cst_52 : f32 to vector<128x32xf32>
    %92 = arith.addf %91, %90 : vector<128x32xf32>
    %93 = arith.divf %91, %92 : vector<128x32xf32>
    %94 = arith.mulf %84, %93 : vector<128x32xf32>
    %95 = arith.addf %2, %94 : vector<128x32xf32>
    %96 = arith.truncf %94 : vector<128x32xf32> to vector<128x32xbf16>
    %c0_53 = arith.constant 0 : index
    %c0_54 = arith.constant 0 : index
    %c0_55 = arith.constant 0 : index
    %97 = vector.load %arg10[%c0_53, %c0_54, %c0_55] : memref<5x32x32xbf16, #tpu.memory_space<vmem>>, vector<1x32x32xbf16>
    %98 = vector.shape_cast %97 : vector<1x32x32xbf16> to vector<32x32xbf16>
    %cst_56 = arith.constant dense<0.000000e+00> : vector<128x32xf32>
    %99 = tpu.matmul %96, %98, %cst_56 {dimension_numbers = #tpu.dot_dimension_numbers<[1], [0], [0], [1], [0, 0, 1, 1], [], []>} : vector<128x32xbf16>, vector<32x32xbf16>, vector<128x32xf32> -> vector<128x32xf32>
    %c0_57 = arith.constant 0 : index
    %c0_58 = arith.constant 0 : index
    %100 = vector.load %arg11[%c0_57, %c0_58] : memref<5x32xf32, #tpu.memory_space<vmem>>, vector<1x32xf32>
    %101 = vector.shape_cast %100 : vector<1x32xf32> to vector<32xf32>
    %102 = vector.shape_cast %101 : vector<32xf32> to vector<1x32xf32>
    %103 = vector.broadcast %102 : vector<1x32xf32> to vector<128x32xf32>
    %104 = arith.addf %99, %103 : vector<128x32xf32>
    %105 = arith.mulf %104, %1 : vector<128x32xf32>
    %cst_59 = arith.constant dense<0xFF800000> : vector<128xf32>
    %106 = vector.multi_reduction <maximumf>, %105, %cst_59 [1] : vector<128x32xf32> to vector<128xf32>
    %107 = vector.shape_cast %106 : vector<128xf32> to vector<128x1xf32>
    %108 = vector.broadcast %107 : vector<128x1xf32> to vector<128x32xf32>
    %109 = arith.subf %105, %108 : vector<128x32xf32>
    %110 = math.exp %109 : vector<128x32xf32>
    %cst_60 = arith.constant dense<0.000000e+00> : vector<128xf32>
    %111 = vector.multi_reduction <add>, %110, %cst_60 [1] : vector<128x32xf32> to vector<128xf32>
    %112 = vector.shape_cast %111 : vector<128xf32> to vector<128x1xf32>
    %113 = tpu.reciprocal %112 {approx = true} : vector<128x1xf32> -> vector<128x1xf32>
    %114 = vector.broadcast %113 : vector<128x1xf32> to vector<128x32xf32>
    %115 = arith.mulf %110, %114 : vector<128x32xf32>
    %116 = arith.mulf %115, %0 : vector<128x32xf32>
    %cst_61 = arith.constant 1.000000e+00 : f32
    %117 = vector.broadcast %cst_61 : f32 to vector<128x32xf32>
    %118 = arith.subf %117, %115 : vector<128x32xf32>
    %cst_62 = arith.constant 9.99999974E-6 : f32
    %119 = vector.broadcast %cst_62 : f32 to vector<128x32xf32>
    %120 = arith.addf %118, %119 : vector<128x32xf32>
    %121 = arith.mulf %1, %120 : vector<128x32xf32>
    %c0_63 = arith.constant 0 : index
    %c0_64 = arith.constant 0 : index
    %c0_65 = arith.constant 0 : index
    %122 = vector.load %arg2[%c0_63, %c0_64, %c0_65] : memref<2x32x32xbf16, #tpu.memory_space<vmem>>, vector<1x32x32xbf16>
    %123 = vector.shape_cast %122 : vector<1x32x32xbf16> to vector<32x32xbf16>
    %c0_66 = arith.constant 0 : index
    %c0_67 = arith.constant 0 : index
    %c0_68 = arith.constant 0 : index
    %124 = vector.load %arg3[%c0_66, %c0_67, %c0_68] : memref<2x32x32xbf16, #tpu.memory_space<vmem>>, vector<1x32x32xbf16>
    %125 = vector.shape_cast %124 : vector<1x32x32xbf16> to vector<32x32xbf16>
    %c0_69 = arith.constant 0 : index
    %c0_70 = arith.constant 0 : index
    %126 = vector.load %arg4[%c0_69, %c0_70] : memref<2x32xf32, #tpu.memory_space<vmem>>, vector<1x32xf32>
    %127 = vector.shape_cast %126 : vector<1x32xf32> to vector<32xf32>
    %c0_71 = arith.constant 0 : index
    %c0_72 = arith.constant 0 : index
    %128 = vector.load %arg5[%c0_71, %c0_72] : memref<2x32xf32, #tpu.memory_space<vmem>>, vector<1x32xf32>
    %129 = vector.shape_cast %128 : vector<1x32xf32> to vector<32xf32>
    %130 = arith.truncf %116 : vector<128x32xf32> to vector<128x32xbf16>
    %cst_73 = arith.constant dense<0.000000e+00> : vector<128x32xf32>
    %131 = tpu.matmul %130, %123, %cst_73 {dimension_numbers = #tpu.dot_dimension_numbers<[1], [0], [0], [1], [0, 0, 1, 1], [], []>} : vector<128x32xbf16>, vector<32x32xbf16>, vector<128x32xf32> -> vector<128x32xf32>
    %132 = vector.shape_cast %127 : vector<32xf32> to vector<1x32xf32>
    %133 = vector.broadcast %132 : vector<1x32xf32> to vector<128x32xf32>
    %134 = arith.addf %131, %133 : vector<128x32xf32>
    %cst_74 = arith.constant dense<0.000000e+00> : vector<128x32xf32>
    %135 = tpu.matmul %130, %125, %cst_74 {dimension_numbers = #tpu.dot_dimension_numbers<[1], [0], [0], [1], [0, 0, 1, 1], [], []>} : vector<128x32xbf16>, vector<32x32xbf16>, vector<128x32xf32> -> vector<128x32xf32>
    %136 = vector.shape_cast %129 : vector<32xf32> to vector<1x32xf32>
    %137 = vector.broadcast %136 : vector<1x32xf32> to vector<128x32xf32>
    %138 = arith.addf %135, %137 : vector<128x32xf32>
    %139 = arith.negf %138 : vector<128x32xf32>
    %140 = math.exp %139 : vector<128x32xf32>
    %cst_75 = arith.constant 1.000000e+00 : f32
    %141 = vector.broadcast %cst_75 : f32 to vector<128x32xf32>
    %142 = arith.addf %141, %140 : vector<128x32xf32>
    %143 = arith.divf %141, %142 : vector<128x32xf32>
    %144 = arith.mulf %134, %143 : vector<128x32xf32>
    %c1_76 = arith.constant 1 : index
    %c0_77 = arith.constant 0 : index
    %c0_78 = arith.constant 0 : index
    %145 = vector.load %arg2[%c1_76, %c0_77, %c0_78] : memref<2x32x32xbf16, #tpu.memory_space<vmem>>, vector<1x32x32xbf16>
    %146 = vector.shape_cast %145 : vector<1x32x32xbf16> to vector<32x32xbf16>
    %c1_79 = arith.constant 1 : index
    %c0_80 = arith.constant 0 : index
    %c0_81 = arith.constant 0 : index
    %147 = vector.load %arg3[%c1_79, %c0_80, %c0_81] : memref<2x32x32xbf16, #tpu.memory_space<vmem>>, vector<1x32x32xbf16>
    %148 = vector.shape_cast %147 : vector<1x32x32xbf16> to vector<32x32xbf16>
    %c1_82 = arith.constant 1 : index
    %c0_83 = arith.constant 0 : index
    %149 = vector.load %arg4[%c1_82, %c0_83] : memref<2x32xf32, #tpu.memory_space<vmem>>, vector<1x32xf32>
    %150 = vector.shape_cast %149 : vector<1x32xf32> to vector<32xf32>
    %c1_84 = arith.constant 1 : index
    %c0_85 = arith.constant 0 : index
    %151 = vector.load %arg5[%c1_84, %c0_85] : memref<2x32xf32, #tpu.memory_space<vmem>>, vector<1x32xf32>
    %152 = vector.shape_cast %151 : vector<1x32xf32> to vector<32xf32>
    %153 = arith.truncf %144 : vector<128x32xf32> to vector<128x32xbf16>
    %cst_86 = arith.constant dense<0.000000e+00> : vector<128x32xf32>
    %154 = tpu.matmul %153, %146, %cst_86 {dimension_numbers = #tpu.dot_dimension_numbers<[1], [0], [0], [1], [0, 0, 1, 1], [], []>} : vector<128x32xbf16>, vector<32x32xbf16>, vector<128x32xf32> -> vector<128x32xf32>
    %155 = vector.shape_cast %150 : vector<32xf32> to vector<1x32xf32>
    %156 = vector.broadcast %155 : vector<1x32xf32> to vector<128x32xf32>
    %157 = arith.addf %154, %156 : vector<128x32xf32>
    %cst_87 = arith.constant dense<0.000000e+00> : vector<128x32xf32>
    %158 = tpu.matmul %153, %148, %cst_87 {dimension_numbers = #tpu.dot_dimension_numbers<[1], [0], [0], [1], [0, 0, 1, 1], [], []>} : vector<128x32xbf16>, vector<32x32xbf16>, vector<128x32xf32> -> vector<128x32xf32>
    %159 = vector.shape_cast %152 : vector<32xf32> to vector<1x32xf32>
    %160 = vector.broadcast %159 : vector<1x32xf32> to vector<128x32xf32>
    %161 = arith.addf %158, %160 : vector<128x32xf32>
    %162 = arith.negf %161 : vector<128x32xf32>
    %163 = math.exp %162 : vector<128x32xf32>
    %cst_88 = arith.constant 1.000000e+00 : f32
    %164 = vector.broadcast %cst_88 : f32 to vector<128x32xf32>
    %165 = arith.addf %164, %163 : vector<128x32xf32>
    %166 = arith.divf %164, %165 : vector<128x32xf32>
    %167 = arith.mulf %157, %166 : vector<128x32xf32>
    %c2 = arith.constant 2 : index
    %c0_89 = arith.constant 0 : index
    %c0_90 = arith.constant 0 : index
    %168 = vector.load %arg6[%c2, %c0_89, %c0_90] : memref<10x32x32xbf16, #tpu.memory_space<vmem>>, vector<1x32x32xbf16>
    %169 = vector.shape_cast %168 : vector<1x32x32xbf16> to vector<32x32xbf16>
    %c2_91 = arith.constant 2 : index
    %c0_92 = arith.constant 0 : index
    %c0_93 = arith.constant 0 : index
    %170 = vector.load %arg7[%c2_91, %c0_92, %c0_93] : memref<10x32x32xbf16, #tpu.memory_space<vmem>>, vector<1x32x32xbf16>
    %171 = vector.shape_cast %170 : vector<1x32x32xbf16> to vector<32x32xbf16>
    %c2_94 = arith.constant 2 : index
    %c0_95 = arith.constant 0 : index
    %172 = vector.load %arg8[%c2_94, %c0_95] : memref<10x32xf32, #tpu.memory_space<vmem>>, vector<1x32xf32>
    %173 = vector.shape_cast %172 : vector<1x32xf32> to vector<32xf32>
    %c2_96 = arith.constant 2 : index
    %c0_97 = arith.constant 0 : index
    %174 = vector.load %arg9[%c2_96, %c0_97] : memref<10x32xf32, #tpu.memory_space<vmem>>, vector<1x32xf32>
    %175 = vector.shape_cast %174 : vector<1x32xf32> to vector<32xf32>
    %176 = arith.truncf %167 : vector<128x32xf32> to vector<128x32xbf16>
    %cst_98 = arith.constant dense<0.000000e+00> : vector<128x32xf32>
    %177 = tpu.matmul %176, %169, %cst_98 {dimension_numbers = #tpu.dot_dimension_numbers<[1], [0], [0], [1], [0, 0, 1, 1], [], []>} : vector<128x32xbf16>, vector<32x32xbf16>, vector<128x32xf32> -> vector<128x32xf32>
    %178 = vector.shape_cast %173 : vector<32xf32> to vector<1x32xf32>
    %179 = vector.broadcast %178 : vector<1x32xf32> to vector<128x32xf32>
    %180 = arith.addf %177, %179 : vector<128x32xf32>
    %cst_99 = arith.constant dense<0.000000e+00> : vector<128x32xf32>
    %181 = tpu.matmul %176, %171, %cst_99 {dimension_numbers = #tpu.dot_dimension_numbers<[1], [0], [0], [1], [0, 0, 1, 1], [], []>} : vector<128x32xbf16>, vector<32x32xbf16>, vector<128x32xf32> -> vector<128x32xf32>
    %182 = vector.shape_cast %175 : vector<32xf32> to vector<1x32xf32>
    %183 = vector.broadcast %182 : vector<1x32xf32> to vector<128x32xf32>
    %184 = arith.addf %181, %183 : vector<128x32xf32>
    %185 = arith.negf %184 : vector<128x32xf32>
    %186 = math.exp %185 : vector<128x32xf32>
    %cst_100 = arith.constant 1.000000e+00 : f32
    %187 = vector.broadcast %cst_100 : f32 to vector<128x32xf32>
    %188 = arith.addf %187, %186 : vector<128x32xf32>
    %189 = arith.divf %187, %188 : vector<128x32xf32>
    %190 = arith.mulf %180, %189 : vector<128x32xf32>
    %c3 = arith.constant 3 : index
    %c0_101 = arith.constant 0 : index
    %c0_102 = arith.constant 0 : index
    %191 = vector.load %arg6[%c3, %c0_101, %c0_102] : memref<10x32x32xbf16, #tpu.memory_space<vmem>>, vector<1x32x32xbf16>
    %192 = vector.shape_cast %191 : vector<1x32x32xbf16> to vector<32x32xbf16>
    %c3_103 = arith.constant 3 : index
    %c0_104 = arith.constant 0 : index
    %c0_105 = arith.constant 0 : index
    %193 = vector.load %arg7[%c3_103, %c0_104, %c0_105] : memref<10x32x32xbf16, #tpu.memory_space<vmem>>, vector<1x32x32xbf16>
    %194 = vector.shape_cast %193 : vector<1x32x32xbf16> to vector<32x32xbf16>
    %c3_106 = arith.constant 3 : index
    %c0_107 = arith.constant 0 : index
    %195 = vector.load %arg8[%c3_106, %c0_107] : memref<10x32xf32, #tpu.memory_space<vmem>>, vector<1x32xf32>
    %196 = vector.shape_cast %195 : vector<1x32xf32> to vector<32xf32>
    %c3_108 = arith.constant 3 : index
    %c0_109 = arith.constant 0 : index
    %197 = vector.load %arg9[%c3_108, %c0_109] : memref<10x32xf32, #tpu.memory_space<vmem>>, vector<1x32xf32>
    %198 = vector.shape_cast %197 : vector<1x32xf32> to vector<32xf32>
    %199 = arith.truncf %190 : vector<128x32xf32> to vector<128x32xbf16>
    %cst_110 = arith.constant dense<0.000000e+00> : vector<128x32xf32>
    %200 = tpu.matmul %199, %192, %cst_110 {dimension_numbers = #tpu.dot_dimension_numbers<[1], [0], [0], [1], [0, 0, 1, 1], [], []>} : vector<128x32xbf16>, vector<32x32xbf16>, vector<128x32xf32> -> vector<128x32xf32>
    %201 = vector.shape_cast %196 : vector<32xf32> to vector<1x32xf32>
    %202 = vector.broadcast %201 : vector<1x32xf32> to vector<128x32xf32>
    %203 = arith.addf %200, %202 : vector<128x32xf32>
    %cst_111 = arith.constant dense<0.000000e+00> : vector<128x32xf32>
    %204 = tpu.matmul %199, %194, %cst_111 {dimension_numbers = #tpu.dot_dimension_numbers<[1], [0], [0], [1], [0, 0, 1, 1], [], []>} : vector<128x32xbf16>, vector<32x32xbf16>, vector<128x32xf32> -> vector<128x32xf32>
    %205 = vector.shape_cast %198 : vector<32xf32> to vector<1x32xf32>
    %206 = vector.broadcast %205 : vector<1x32xf32> to vector<128x32xf32>
    %207 = arith.addf %204, %206 : vector<128x32xf32>
    %208 = arith.negf %207 : vector<128x32xf32>
    %209 = math.exp %208 : vector<128x32xf32>
    %cst_112 = arith.constant 1.000000e+00 : f32
    %210 = vector.broadcast %cst_112 : f32 to vector<128x32xf32>
    %211 = arith.addf %210, %209 : vector<128x32xf32>
    %212 = arith.divf %210, %211 : vector<128x32xf32>
    %213 = arith.mulf %203, %212 : vector<128x32xf32>
    %214 = arith.addf %95, %213 : vector<128x32xf32>
    %215 = arith.truncf %213 : vector<128x32xf32> to vector<128x32xbf16>
    %c1_113 = arith.constant 1 : index
    %c0_114 = arith.constant 0 : index
    %c0_115 = arith.constant 0 : index
    %216 = vector.load %arg10[%c1_113, %c0_114, %c0_115] : memref<5x32x32xbf16, #tpu.memory_space<vmem>>, vector<1x32x32xbf16>
    %217 = vector.shape_cast %216 : vector<1x32x32xbf16> to vector<32x32xbf16>
    %cst_116 = arith.constant dense<0.000000e+00> : vector<128x32xf32>
    %218 = tpu.matmul %215, %217, %cst_116 {dimension_numbers = #tpu.dot_dimension_numbers<[1], [0], [0], [1], [0, 0, 1, 1], [], []>} : vector<128x32xbf16>, vector<32x32xbf16>, vector<128x32xf32> -> vector<128x32xf32>
    %c1_117 = arith.constant 1 : index
    %c0_118 = arith.constant 0 : index
    %219 = vector.load %arg11[%c1_117, %c0_118] : memref<5x32xf32, #tpu.memory_space<vmem>>, vector<1x32xf32>
    %220 = vector.shape_cast %219 : vector<1x32xf32> to vector<32xf32>
    %221 = vector.shape_cast %220 : vector<32xf32> to vector<1x32xf32>
    %222 = vector.broadcast %221 : vector<1x32xf32> to vector<128x32xf32>
    %223 = arith.addf %218, %222 : vector<128x32xf32>
    %224 = arith.mulf %223, %121 : vector<128x32xf32>
    %cst_119 = arith.constant dense<0xFF800000> : vector<128xf32>
    %225 = vector.multi_reduction <maximumf>, %224, %cst_119 [1] : vector<128x32xf32> to vector<128xf32>
    %226 = vector.shape_cast %225 : vector<128xf32> to vector<128x1xf32>
    %227 = vector.broadcast %226 : vector<128x1xf32> to vector<128x32xf32>
    %228 = arith.subf %224, %227 : vector<128x32xf32>
    %229 = math.exp %228 : vector<128x32xf32>
    %cst_120 = arith.constant dense<0.000000e+00> : vector<128xf32>
    %230 = vector.multi_reduction <add>, %229, %cst_120 [1] : vector<128x32xf32> to vector<128xf32>
    %231 = vector.shape_cast %230 : vector<128xf32> to vector<128x1xf32>
    %232 = tpu.reciprocal %231 {approx = true} : vector<128x1xf32> -> vector<128x1xf32>
    %233 = vector.broadcast %232 : vector<128x1xf32> to vector<128x32xf32>
    %234 = arith.mulf %229, %233 : vector<128x32xf32>
    %235 = arith.mulf %234, %0 : vector<128x32xf32>
    %cst_121 = arith.constant 1.000000e+00 : f32
    %236 = vector.broadcast %cst_121 : f32 to vector<128x32xf32>
    %237 = arith.subf %236, %234 : vector<128x32xf32>
    %cst_122 = arith.constant 9.99999974E-6 : f32
    %238 = vector.broadcast %cst_122 : f32 to vector<128x32xf32>
    %239 = arith.addf %237, %238 : vector<128x32xf32>
    %240 = arith.mulf %121, %239 : vector<128x32xf32>
    %c0_123 = arith.constant 0 : index
    %c0_124 = arith.constant 0 : index
    %c0_125 = arith.constant 0 : index
    %241 = vector.load %arg2[%c0_123, %c0_124, %c0_125] : memref<2x32x32xbf16, #tpu.memory_space<vmem>>, vector<1x32x32xbf16>
    %242 = vector.shape_cast %241 : vector<1x32x32xbf16> to vector<32x32xbf16>
    %c0_126 = arith.constant 0 : index
    %c0_127 = arith.constant 0 : index
    %c0_128 = arith.constant 0 : index
    %243 = vector.load %arg3[%c0_126, %c0_127, %c0_128] : memref<2x32x32xbf16, #tpu.memory_space<vmem>>, vector<1x32x32xbf16>
    %244 = vector.shape_cast %243 : vector<1x32x32xbf16> to vector<32x32xbf16>
    %c0_129 = arith.constant 0 : index
    %c0_130 = arith.constant 0 : index
    %245 = vector.load %arg4[%c0_129, %c0_130] : memref<2x32xf32, #tpu.memory_space<vmem>>, vector<1x32xf32>
    %246 = vector.shape_cast %245 : vector<1x32xf32> to vector<32xf32>
    %c0_131 = arith.constant 0 : index
    %c0_132 = arith.constant 0 : index
    %247 = vector.load %arg5[%c0_131, %c0_132] : memref<2x32xf32, #tpu.memory_space<vmem>>, vector<1x32xf32>
    %248 = vector.shape_cast %247 : vector<1x32xf32> to vector<32xf32>
    %249 = arith.truncf %235 : vector<128x32xf32> to vector<128x32xbf16>
    %cst_133 = arith.constant dense<0.000000e+00> : vector<128x32xf32>
    %250 = tpu.matmul %249, %242, %cst_133 {dimension_numbers = #tpu.dot_dimension_numbers<[1], [0], [0], [1], [0, 0, 1, 1], [], []>} : vector<128x32xbf16>, vector<32x32xbf16>, vector<128x32xf32> -> vector<128x32xf32>
    %251 = vector.shape_cast %246 : vector<32xf32> to vector<1x32xf32>
    %252 = vector.broadcast %251 : vector<1x32xf32> to vector<128x32xf32>
    %253 = arith.addf %250, %252 : vector<128x32xf32>
    %cst_134 = arith.constant dense<0.000000e+00> : vector<128x32xf32>
    %254 = tpu.matmul %249, %244, %cst_134 {dimension_numbers = #tpu.dot_dimension_numbers<[1], [0], [0], [1], [0, 0, 1, 1], [], []>} : vector<128x32xbf16>, vector<32x32xbf16>, vector<128x32xf32> -> vector<128x32xf32>
    %255 = vector.shape_cast %248 : vector<32xf32> to vector<1x32xf32>
    %256 = vector.broadcast %255 : vector<1x32xf32> to vector<128x32xf32>
    %257 = arith.addf %254, %256 : vector<128x32xf32>
    %258 = arith.negf %257 : vector<128x32xf32>
    %259 = math.exp %258 : vector<128x32xf32>
    %cst_135 = arith.constant 1.000000e+00 : f32
    %260 = vector.broadcast %cst_135 : f32 to vector<128x32xf32>
    %261 = arith.addf %260, %259 : vector<128x32xf32>
    %262 = arith.divf %260, %261 : vector<128x32xf32>
    %263 = arith.mulf %253, %262 : vector<128x32xf32>
    %c1_136 = arith.constant 1 : index
    %c0_137 = arith.constant 0 : index
    %c0_138 = arith.constant 0 : index
    %264 = vector.load %arg2[%c1_136, %c0_137, %c0_138] : memref<2x32x32xbf16, #tpu.memory_space<vmem>>, vector<1x32x32xbf16>
    %265 = vector.shape_cast %264 : vector<1x32x32xbf16> to vector<32x32xbf16>
    %c1_139 = arith.constant 1 : index
    %c0_140 = arith.constant 0 : index
    %c0_141 = arith.constant 0 : index
    %266 = vector.load %arg3[%c1_139, %c0_140, %c0_141] : memref<2x32x32xbf16, #tpu.memory_space<vmem>>, vector<1x32x32xbf16>
    %267 = vector.shape_cast %266 : vector<1x32x32xbf16> to vector<32x32xbf16>
    %c1_142 = arith.constant 1 : index
    %c0_143 = arith.constant 0 : index
    %268 = vector.load %arg4[%c1_142, %c0_143] : memref<2x32xf32, #tpu.memory_space<vmem>>, vector<1x32xf32>
    %269 = vector.shape_cast %268 : vector<1x32xf32> to vector<32xf32>
    %c1_144 = arith.constant 1 : index
    %c0_145 = arith.constant 0 : index
    %270 = vector.load %arg5[%c1_144, %c0_145] : memref<2x32xf32, #tpu.memory_space<vmem>>, vector<1x32xf32>
    %271 = vector.shape_cast %270 : vector<1x32xf32> to vector<32xf32>
    %272 = arith.truncf %263 : vector<128x32xf32> to vector<128x32xbf16>
    %cst_146 = arith.constant dense<0.000000e+00> : vector<128x32xf32>
    %273 = tpu.matmul %272, %265, %cst_146 {dimension_numbers = #tpu.dot_dimension_numbers<[1], [0], [0], [1], [0, 0, 1, 1], [], []>} : vector<128x32xbf16>, vector<32x32xbf16>, vector<128x32xf32> -> vector<128x32xf32>
    %274 = vector.shape_cast %269 : vector<32xf32> to vector<1x32xf32>
    %275 = vector.broadcast %274 : vector<1x32xf32> to vector<128x32xf32>
    %276 = arith.addf %273, %275 : vector<128x32xf32>
    %cst_147 = arith.constant dense<0.000000e+00> : vector<128x32xf32>
    %277 = tpu.matmul %272, %267, %cst_147 {dimension_numbers = #tpu.dot_dimension_numbers<[1], [0], [0], [1], [0, 0, 1, 1], [], []>} : vector<128x32xbf16>, vector<32x32xbf16>, vector<128x32xf32> -> vector<128x32xf32>
    %278 = vector.shape_cast %271 : vector<32xf32> to vector<1x32xf32>
    %279 = vector.broadcast %278 : vector<1x32xf32> to vector<128x32xf32>
    %280 = arith.addf %277, %279 : vector<128x32xf32>
    %281 = arith.negf %280 : vector<128x32xf32>
    %282 = math.exp %281 : vector<128x32xf32>
    %cst_148 = arith.constant 1.000000e+00 : f32
    %283 = vector.broadcast %cst_148 : f32 to vector<128x32xf32>
    %284 = arith.addf %283, %282 : vector<128x32xf32>
    %285 = arith.divf %283, %284 : vector<128x32xf32>
    %286 = arith.mulf %276, %285 : vector<128x32xf32>
    %c4 = arith.constant 4 : index
    %c0_149 = arith.constant 0 : index
    %c0_150 = arith.constant 0 : index
    %287 = vector.load %arg6[%c4, %c0_149, %c0_150] : memref<10x32x32xbf16, #tpu.memory_space<vmem>>, vector<1x32x32xbf16>
    %288 = vector.shape_cast %287 : vector<1x32x32xbf16> to vector<32x32xbf16>
    %c4_151 = arith.constant 4 : index
    %c0_152 = arith.constant 0 : index
    %c0_153 = arith.constant 0 : index
    %289 = vector.load %arg7[%c4_151, %c0_152, %c0_153] : memref<10x32x32xbf16, #tpu.memory_space<vmem>>, vector<1x32x32xbf16>
    %290 = vector.shape_cast %289 : vector<1x32x32xbf16> to vector<32x32xbf16>
    %c4_154 = arith.constant 4 : index
    %c0_155 = arith.constant 0 : index
    %291 = vector.load %arg8[%c4_154, %c0_155] : memref<10x32xf32, #tpu.memory_space<vmem>>, vector<1x32xf32>
    %292 = vector.shape_cast %291 : vector<1x32xf32> to vector<32xf32>
    %c4_156 = arith.constant 4 : index
    %c0_157 = arith.constant 0 : index
    %293 = vector.load %arg9[%c4_156, %c0_157] : memref<10x32xf32, #tpu.memory_space<vmem>>, vector<1x32xf32>
    %294 = vector.shape_cast %293 : vector<1x32xf32> to vector<32xf32>
    %295 = arith.truncf %286 : vector<128x32xf32> to vector<128x32xbf16>
    %cst_158 = arith.constant dense<0.000000e+00> : vector<128x32xf32>
    %296 = tpu.matmul %295, %288, %cst_158 {dimension_numbers = #tpu.dot_dimension_numbers<[1], [0], [0], [1], [0, 0, 1, 1], [], []>} : vector<128x32xbf16>, vector<32x32xbf16>, vector<128x32xf32> -> vector<128x32xf32>
    %297 = vector.shape_cast %292 : vector<32xf32> to vector<1x32xf32>
    %298 = vector.broadcast %297 : vector<1x32xf32> to vector<128x32xf32>
    %299 = arith.addf %296, %298 : vector<128x32xf32>
    %cst_159 = arith.constant dense<0.000000e+00> : vector<128x32xf32>
    %300 = tpu.matmul %295, %290, %cst_159 {dimension_numbers = #tpu.dot_dimension_numbers<[1], [0], [0], [1], [0, 0, 1, 1], [], []>} : vector<128x32xbf16>, vector<32x32xbf16>, vector<128x32xf32> -> vector<128x32xf32>
    %301 = vector.shape_cast %294 : vector<32xf32> to vector<1x32xf32>
    %302 = vector.broadcast %301 : vector<1x32xf32> to vector<128x32xf32>
    %303 = arith.addf %300, %302 : vector<128x32xf32>
    %304 = arith.negf %303 : vector<128x32xf32>
    %305 = math.exp %304 : vector<128x32xf32>
    %cst_160 = arith.constant 1.000000e+00 : f32
    %306 = vector.broadcast %cst_160 : f32 to vector<128x32xf32>
    %307 = arith.addf %306, %305 : vector<128x32xf32>
    %308 = arith.divf %306, %307 : vector<128x32xf32>
    %309 = arith.mulf %299, %308 : vector<128x32xf32>
    %c5 = arith.constant 5 : index
    %c0_161 = arith.constant 0 : index
    %c0_162 = arith.constant 0 : index
    %310 = vector.load %arg6[%c5, %c0_161, %c0_162] : memref<10x32x32xbf16, #tpu.memory_space<vmem>>, vector<1x32x32xbf16>
    %311 = vector.shape_cast %310 : vector<1x32x32xbf16> to vector<32x32xbf16>
    %c5_163 = arith.constant 5 : index
    %c0_164 = arith.constant 0 : index
    %c0_165 = arith.constant 0 : index
    %312 = vector.load %arg7[%c5_163, %c0_164, %c0_165] : memref<10x32x32xbf16, #tpu.memory_space<vmem>>, vector<1x32x32xbf16>
    %313 = vector.shape_cast %312 : vector<1x32x32xbf16> to vector<32x32xbf16>
    %c5_166 = arith.constant 5 : index
    %c0_167 = arith.constant 0 : index
    %314 = vector.load %arg8[%c5_166, %c0_167] : memref<10x32xf32, #tpu.memory_space<vmem>>, vector<1x32xf32>
    %315 = vector.shape_cast %314 : vector<1x32xf32> to vector<32xf32>
    %c5_168 = arith.constant 5 : index
    %c0_169 = arith.constant 0 : index
    %316 = vector.load %arg9[%c5_168, %c0_169] : memref<10x32xf32, #tpu.memory_space<vmem>>, vector<1x32xf32>
    %317 = vector.shape_cast %316 : vector<1x32xf32> to vector<32xf32>
    %318 = arith.truncf %309 : vector<128x32xf32> to vector<128x32xbf16>
    %cst_170 = arith.constant dense<0.000000e+00> : vector<128x32xf32>
    %319 = tpu.matmul %318, %311, %cst_170 {dimension_numbers = #tpu.dot_dimension_numbers<[1], [0], [0], [1], [0, 0, 1, 1], [], []>} : vector<128x32xbf16>, vector<32x32xbf16>, vector<128x32xf32> -> vector<128x32xf32>
    %320 = vector.shape_cast %315 : vector<32xf32> to vector<1x32xf32>
    %321 = vector.broadcast %320 : vector<1x32xf32> to vector<128x32xf32>
    %322 = arith.addf %319, %321 : vector<128x32xf32>
    %cst_171 = arith.constant dense<0.000000e+00> : vector<128x32xf32>
    %323 = tpu.matmul %318, %313, %cst_171 {dimension_numbers = #tpu.dot_dimension_numbers<[1], [0], [0], [1], [0, 0, 1, 1], [], []>} : vector<128x32xbf16>, vector<32x32xbf16>, vector<128x32xf32> -> vector<128x32xf32>
    %324 = vector.shape_cast %317 : vector<32xf32> to vector<1x32xf32>
    %325 = vector.broadcast %324 : vector<1x32xf32> to vector<128x32xf32>
    %326 = arith.addf %323, %325 : vector<128x32xf32>
    %327 = arith.negf %326 : vector<128x32xf32>
    %328 = math.exp %327 : vector<128x32xf32>
    %cst_172 = arith.constant 1.000000e+00 : f32
    %329 = vector.broadcast %cst_172 : f32 to vector<128x32xf32>
    %330 = arith.addf %329, %328 : vector<128x32xf32>
    %331 = arith.divf %329, %330 : vector<128x32xf32>
    %332 = arith.mulf %322, %331 : vector<128x32xf32>
    %333 = arith.addf %214, %332 : vector<128x32xf32>
    %334 = arith.truncf %332 : vector<128x32xf32> to vector<128x32xbf16>
    %c2_173 = arith.constant 2 : index
    %c0_174 = arith.constant 0 : index
    %c0_175 = arith.constant 0 : index
    %335 = vector.load %arg10[%c2_173, %c0_174, %c0_175] : memref<5x32x32xbf16, #tpu.memory_space<vmem>>, vector<1x32x32xbf16>
    %336 = vector.shape_cast %335 : vector<1x32x32xbf16> to vector<32x32xbf16>
    %cst_176 = arith.constant dense<0.000000e+00> : vector<128x32xf32>
    %337 = tpu.matmul %334, %336, %cst_176 {dimension_numbers = #tpu.dot_dimension_numbers<[1], [0], [0], [1], [0, 0, 1, 1], [], []>} : vector<128x32xbf16>, vector<32x32xbf16>, vector<128x32xf32> -> vector<128x32xf32>
    %c2_177 = arith.constant 2 : index
    %c0_178 = arith.constant 0 : index
    %338 = vector.load %arg11[%c2_177, %c0_178] : memref<5x32xf32, #tpu.memory_space<vmem>>, vector<1x32xf32>
    %339 = vector.shape_cast %338 : vector<1x32xf32> to vector<32xf32>
    %340 = vector.shape_cast %339 : vector<32xf32> to vector<1x32xf32>
    %341 = vector.broadcast %340 : vector<1x32xf32> to vector<128x32xf32>
    %342 = arith.addf %337, %341 : vector<128x32xf32>
    %343 = arith.mulf %342, %240 : vector<128x32xf32>
    %cst_179 = arith.constant dense<0xFF800000> : vector<128xf32>
    %344 = vector.multi_reduction <maximumf>, %343, %cst_179 [1] : vector<128x32xf32> to vector<128xf32>
    %345 = vector.shape_cast %344 : vector<128xf32> to vector<128x1xf32>
    %346 = vector.broadcast %345 : vector<128x1xf32> to vector<128x32xf32>
    %347 = arith.subf %343, %346 : vector<128x32xf32>
    %348 = math.exp %347 : vector<128x32xf32>
    %cst_180 = arith.constant dense<0.000000e+00> : vector<128xf32>
    %349 = vector.multi_reduction <add>, %348, %cst_180 [1] : vector<128x32xf32> to vector<128xf32>
    %350 = vector.shape_cast %349 : vector<128xf32> to vector<128x1xf32>
    %351 = tpu.reciprocal %350 {approx = true} : vector<128x1xf32> -> vector<128x1xf32>
    %352 = vector.broadcast %351 : vector<128x1xf32> to vector<128x32xf32>
    %353 = arith.mulf %348, %352 : vector<128x32xf32>
    %354 = arith.mulf %353, %0 : vector<128x32xf32>
    %cst_181 = arith.constant 1.000000e+00 : f32
    %355 = vector.broadcast %cst_181 : f32 to vector<128x32xf32>
    %356 = arith.subf %355, %353 : vector<128x32xf32>
    %cst_182 = arith.constant 9.99999974E-6 : f32
    %357 = vector.broadcast %cst_182 : f32 to vector<128x32xf32>
    %358 = arith.addf %356, %357 : vector<128x32xf32>
    %359 = arith.mulf %240, %358 : vector<128x32xf32>
    %c0_183 = arith.constant 0 : index
    %c0_184 = arith.constant 0 : index
    %c0_185 = arith.constant 0 : index
    %360 = vector.load %arg2[%c0_183, %c0_184, %c0_185] : memref<2x32x32xbf16, #tpu.memory_space<vmem>>, vector<1x32x32xbf16>
    %361 = vector.shape_cast %360 : vector<1x32x32xbf16> to vector<32x32xbf16>
    %c0_186 = arith.constant 0 : index
    %c0_187 = arith.constant 0 : index
    %c0_188 = arith.constant 0 : index
    %362 = vector.load %arg3[%c0_186, %c0_187, %c0_188] : memref<2x32x32xbf16, #tpu.memory_space<vmem>>, vector<1x32x32xbf16>
    %363 = vector.shape_cast %362 : vector<1x32x32xbf16> to vector<32x32xbf16>
    %c0_189 = arith.constant 0 : index
    %c0_190 = arith.constant 0 : index
    %364 = vector.load %arg4[%c0_189, %c0_190] : memref<2x32xf32, #tpu.memory_space<vmem>>, vector<1x32xf32>
    %365 = vector.shape_cast %364 : vector<1x32xf32> to vector<32xf32>
    %c0_191 = arith.constant 0 : index
    %c0_192 = arith.constant 0 : index
    %366 = vector.load %arg5[%c0_191, %c0_192] : memref<2x32xf32, #tpu.memory_space<vmem>>, vector<1x32xf32>
    %367 = vector.shape_cast %366 : vector<1x32xf32> to vector<32xf32>
    %368 = arith.truncf %354 : vector<128x32xf32> to vector<128x32xbf16>
    %cst_193 = arith.constant dense<0.000000e+00> : vector<128x32xf32>
    %369 = tpu.matmul %368, %361, %cst_193 {dimension_numbers = #tpu.dot_dimension_numbers<[1], [0], [0], [1], [0, 0, 1, 1], [], []>} : vector<128x32xbf16>, vector<32x32xbf16>, vector<128x32xf32> -> vector<128x32xf32>
    %370 = vector.shape_cast %365 : vector<32xf32> to vector<1x32xf32>
    %371 = vector.broadcast %370 : vector<1x32xf32> to vector<128x32xf32>
    %372 = arith.addf %369, %371 : vector<128x32xf32>
    %cst_194 = arith.constant dense<0.000000e+00> : vector<128x32xf32>
    %373 = tpu.matmul %368, %363, %cst_194 {dimension_numbers = #tpu.dot_dimension_numbers<[1], [0], [0], [1], [0, 0, 1, 1], [], []>} : vector<128x32xbf16>, vector<32x32xbf16>, vector<128x32xf32> -> vector<128x32xf32>
    %374 = vector.shape_cast %367 : vector<32xf32> to vector<1x32xf32>
    %375 = vector.broadcast %374 : vector<1x32xf32> to vector<128x32xf32>
    %376 = arith.addf %373, %375 : vector<128x32xf32>
    %377 = arith.negf %376 : vector<128x32xf32>
    %378 = math.exp %377 : vector<128x32xf32>
    %cst_195 = arith.constant 1.000000e+00 : f32
    %379 = vector.broadcast %cst_195 : f32 to vector<128x32xf32>
    %380 = arith.addf %379, %378 : vector<128x32xf32>
    %381 = arith.divf %379, %380 : vector<128x32xf32>
    %382 = arith.mulf %372, %381 : vector<128x32xf32>
    %c1_196 = arith.constant 1 : index
    %c0_197 = arith.constant 0 : index
    %c0_198 = arith.constant 0 : index
    %383 = vector.load %arg2[%c1_196, %c0_197, %c0_198] : memref<2x32x32xbf16, #tpu.memory_space<vmem>>, vector<1x32x32xbf16>
    %384 = vector.shape_cast %383 : vector<1x32x32xbf16> to vector<32x32xbf16>
    %c1_199 = arith.constant 1 : index
    %c0_200 = arith.constant 0 : index
    %c0_201 = arith.constant 0 : index
    %385 = vector.load %arg3[%c1_199, %c0_200, %c0_201] : memref<2x32x32xbf16, #tpu.memory_space<vmem>>, vector<1x32x32xbf16>
    %386 = vector.shape_cast %385 : vector<1x32x32xbf16> to vector<32x32xbf16>
    %c1_202 = arith.constant 1 : index
    %c0_203 = arith.constant 0 : index
    %387 = vector.load %arg4[%c1_202, %c0_203] : memref<2x32xf32, #tpu.memory_space<vmem>>, vector<1x32xf32>
    %388 = vector.shape_cast %387 : vector<1x32xf32> to vector<32xf32>
    %c1_204 = arith.constant 1 : index
    %c0_205 = arith.constant 0 : index
    %389 = vector.load %arg5[%c1_204, %c0_205] : memref<2x32xf32, #tpu.memory_space<vmem>>, vector<1x32xf32>
    %390 = vector.shape_cast %389 : vector<1x32xf32> to vector<32xf32>
    %391 = arith.truncf %382 : vector<128x32xf32> to vector<128x32xbf16>
    %cst_206 = arith.constant dense<0.000000e+00> : vector<128x32xf32>
    %392 = tpu.matmul %391, %384, %cst_206 {dimension_numbers = #tpu.dot_dimension_numbers<[1], [0], [0], [1], [0, 0, 1, 1], [], []>} : vector<128x32xbf16>, vector<32x32xbf16>, vector<128x32xf32> -> vector<128x32xf32>
    %393 = vector.shape_cast %388 : vector<32xf32> to vector<1x32xf32>
    %394 = vector.broadcast %393 : vector<1x32xf32> to vector<128x32xf32>
    %395 = arith.addf %392, %394 : vector<128x32xf32>
    %cst_207 = arith.constant dense<0.000000e+00> : vector<128x32xf32>
    %396 = tpu.matmul %391, %386, %cst_207 {dimension_numbers = #tpu.dot_dimension_numbers<[1], [0], [0], [1], [0, 0, 1, 1], [], []>} : vector<128x32xbf16>, vector<32x32xbf16>, vector<128x32xf32> -> vector<128x32xf32>
    %397 = vector.shape_cast %390 : vector<32xf32> to vector<1x32xf32>
    %398 = vector.broadcast %397 : vector<1x32xf32> to vector<128x32xf32>
    %399 = arith.addf %396, %398 : vector<128x32xf32>
    %400 = arith.negf %399 : vector<128x32xf32>
    %401 = math.exp %400 : vector<128x32xf32>
    %cst_208 = arith.constant 1.000000e+00 : f32
    %402 = vector.broadcast %cst_208 : f32 to vector<128x32xf32>
    %403 = arith.addf %402, %401 : vector<128x32xf32>
    %404 = arith.divf %402, %403 : vector<128x32xf32>
    %405 = arith.mulf %395, %404 : vector<128x32xf32>
    %c6 = arith.constant 6 : index
    %c0_209 = arith.constant 0 : index
    %c0_210 = arith.constant 0 : index
    %406 = vector.load %arg6[%c6, %c0_209, %c0_210] : memref<10x32x32xbf16, #tpu.memory_space<vmem>>, vector<1x32x32xbf16>
    %407 = vector.shape_cast %406 : vector<1x32x32xbf16> to vector<32x32xbf16>
    %c6_211 = arith.constant 6 : index
    %c0_212 = arith.constant 0 : index
    %c0_213 = arith.constant 0 : index
    %408 = vector.load %arg7[%c6_211, %c0_212, %c0_213] : memref<10x32x32xbf16, #tpu.memory_space<vmem>>, vector<1x32x32xbf16>
    %409 = vector.shape_cast %408 : vector<1x32x32xbf16> to vector<32x32xbf16>
    %c6_214 = arith.constant 6 : index
    %c0_215 = arith.constant 0 : index
    %410 = vector.load %arg8[%c6_214, %c0_215] : memref<10x32xf32, #tpu.memory_space<vmem>>, vector<1x32xf32>
    %411 = vector.shape_cast %410 : vector<1x32xf32> to vector<32xf32>
    %c6_216 = arith.constant 6 : index
    %c0_217 = arith.constant 0 : index
    %412 = vector.load %arg9[%c6_216, %c0_217] : memref<10x32xf32, #tpu.memory_space<vmem>>, vector<1x32xf32>
    %413 = vector.shape_cast %412 : vector<1x32xf32> to vector<32xf32>
    %414 = arith.truncf %405 : vector<128x32xf32> to vector<128x32xbf16>
    %cst_218 = arith.constant dense<0.000000e+00> : vector<128x32xf32>
    %415 = tpu.matmul %414, %407, %cst_218 {dimension_numbers = #tpu.dot_dimension_numbers<[1], [0], [0], [1], [0, 0, 1, 1], [], []>} : vector<128x32xbf16>, vector<32x32xbf16>, vector<128x32xf32> -> vector<128x32xf32>
    %416 = vector.shape_cast %411 : vector<32xf32> to vector<1x32xf32>
    %417 = vector.broadcast %416 : vector<1x32xf32> to vector<128x32xf32>
    %418 = arith.addf %415, %417 : vector<128x32xf32>
    %cst_219 = arith.constant dense<0.000000e+00> : vector<128x32xf32>
    %419 = tpu.matmul %414, %409, %cst_219 {dimension_numbers = #tpu.dot_dimension_numbers<[1], [0], [0], [1], [0, 0, 1, 1], [], []>} : vector<128x32xbf16>, vector<32x32xbf16>, vector<128x32xf32> -> vector<128x32xf32>
    %420 = vector.shape_cast %413 : vector<32xf32> to vector<1x32xf32>
    %421 = vector.broadcast %420 : vector<1x32xf32> to vector<128x32xf32>
    %422 = arith.addf %419, %421 : vector<128x32xf32>
    %423 = arith.negf %422 : vector<128x32xf32>
    %424 = math.exp %423 : vector<128x32xf32>
    %cst_220 = arith.constant 1.000000e+00 : f32
    %425 = vector.broadcast %cst_220 : f32 to vector<128x32xf32>
    %426 = arith.addf %425, %424 : vector<128x32xf32>
    %427 = arith.divf %425, %426 : vector<128x32xf32>
    %428 = arith.mulf %418, %427 : vector<128x32xf32>
    %c7 = arith.constant 7 : index
    %c0_221 = arith.constant 0 : index
    %c0_222 = arith.constant 0 : index
    %429 = vector.load %arg6[%c7, %c0_221, %c0_222] : memref<10x32x32xbf16, #tpu.memory_space<vmem>>, vector<1x32x32xbf16>
    %430 = vector.shape_cast %429 : vector<1x32x32xbf16> to vector<32x32xbf16>
    %c7_223 = arith.constant 7 : index
    %c0_224 = arith.constant 0 : index
    %c0_225 = arith.constant 0 : index
    %431 = vector.load %arg7[%c7_223, %c0_224, %c0_225] : memref<10x32x32xbf16, #tpu.memory_space<vmem>>, vector<1x32x32xbf16>
    %432 = vector.shape_cast %431 : vector<1x32x32xbf16> to vector<32x32xbf16>
    %c7_226 = arith.constant 7 : index
    %c0_227 = arith.constant 0 : index
    %433 = vector.load %arg8[%c7_226, %c0_227] : memref<10x32xf32, #tpu.memory_space<vmem>>, vector<1x32xf32>
    %434 = vector.shape_cast %433 : vector<1x32xf32> to vector<32xf32>
    %c7_228 = arith.constant 7 : index
    %c0_229 = arith.constant 0 : index
    %435 = vector.load %arg9[%c7_228, %c0_229] : memref<10x32xf32, #tpu.memory_space<vmem>>, vector<1x32xf32>
    %436 = vector.shape_cast %435 : vector<1x32xf32> to vector<32xf32>
    %437 = arith.truncf %428 : vector<128x32xf32> to vector<128x32xbf16>
    %cst_230 = arith.constant dense<0.000000e+00> : vector<128x32xf32>
    %438 = tpu.matmul %437, %430, %cst_230 {dimension_numbers = #tpu.dot_dimension_numbers<[1], [0], [0], [1], [0, 0, 1, 1], [], []>} : vector<128x32xbf16>, vector<32x32xbf16>, vector<128x32xf32> -> vector<128x32xf32>
    %439 = vector.shape_cast %434 : vector<32xf32> to vector<1x32xf32>
    %440 = vector.broadcast %439 : vector<1x32xf32> to vector<128x32xf32>
    %441 = arith.addf %438, %440 : vector<128x32xf32>
    %cst_231 = arith.constant dense<0.000000e+00> : vector<128x32xf32>
    %442 = tpu.matmul %437, %432, %cst_231 {dimension_numbers = #tpu.dot_dimension_numbers<[1], [0], [0], [1], [0, 0, 1, 1], [], []>} : vector<128x32xbf16>, vector<32x32xbf16>, vector<128x32xf32> -> vector<128x32xf32>
    %443 = vector.shape_cast %436 : vector<32xf32> to vector<1x32xf32>
    %444 = vector.broadcast %443 : vector<1x32xf32> to vector<128x32xf32>
    %445 = arith.addf %442, %444 : vector<128x32xf32>
    %446 = arith.negf %445 : vector<128x32xf32>
    %447 = math.exp %446 : vector<128x32xf32>
    %cst_232 = arith.constant 1.000000e+00 : f32
    %448 = vector.broadcast %cst_232 : f32 to vector<128x32xf32>
    %449 = arith.addf %448, %447 : vector<128x32xf32>
    %450 = arith.divf %448, %449 : vector<128x32xf32>
    %451 = arith.mulf %441, %450 : vector<128x32xf32>
    %452 = arith.addf %333, %451 : vector<128x32xf32>
    %453 = arith.truncf %451 : vector<128x32xf32> to vector<128x32xbf16>
    %c3_233 = arith.constant 3 : index
    %c0_234 = arith.constant 0 : index
    %c0_235 = arith.constant 0 : index
    %454 = vector.load %arg10[%c3_233, %c0_234, %c0_235] : memref<5x32x32xbf16, #tpu.memory_space<vmem>>, vector<1x32x32xbf16>
    %455 = vector.shape_cast %454 : vector<1x32x32xbf16> to vector<32x32xbf16>
    %cst_236 = arith.constant dense<0.000000e+00> : vector<128x32xf32>
    %456 = tpu.matmul %453, %455, %cst_236 {dimension_numbers = #tpu.dot_dimension_numbers<[1], [0], [0], [1], [0, 0, 1, 1], [], []>} : vector<128x32xbf16>, vector<32x32xbf16>, vector<128x32xf32> -> vector<128x32xf32>
    %c3_237 = arith.constant 3 : index
    %c0_238 = arith.constant 0 : index
    %457 = vector.load %arg11[%c3_237, %c0_238] : memref<5x32xf32, #tpu.memory_space<vmem>>, vector<1x32xf32>
    %458 = vector.shape_cast %457 : vector<1x32xf32> to vector<32xf32>
    %459 = vector.shape_cast %458 : vector<32xf32> to vector<1x32xf32>
    %460 = vector.broadcast %459 : vector<1x32xf32> to vector<128x32xf32>
    %461 = arith.addf %456, %460 : vector<128x32xf32>
    %462 = arith.mulf %461, %359 : vector<128x32xf32>
    %cst_239 = arith.constant dense<0xFF800000> : vector<128xf32>
    %463 = vector.multi_reduction <maximumf>, %462, %cst_239 [1] : vector<128x32xf32> to vector<128xf32>
    %464 = vector.shape_cast %463 : vector<128xf32> to vector<128x1xf32>
    %465 = vector.broadcast %464 : vector<128x1xf32> to vector<128x32xf32>
    %466 = arith.subf %462, %465 : vector<128x32xf32>
    %467 = math.exp %466 : vector<128x32xf32>
    %cst_240 = arith.constant dense<0.000000e+00> : vector<128xf32>
    %468 = vector.multi_reduction <add>, %467, %cst_240 [1] : vector<128x32xf32> to vector<128xf32>
    %469 = vector.shape_cast %468 : vector<128xf32> to vector<128x1xf32>
    %470 = tpu.reciprocal %469 {approx = true} : vector<128x1xf32> -> vector<128x1xf32>
    %471 = vector.broadcast %470 : vector<128x1xf32> to vector<128x32xf32>
    %472 = arith.mulf %467, %471 : vector<128x32xf32>
    %473 = arith.mulf %472, %0 : vector<128x32xf32>
    %c0_241 = arith.constant 0 : index
    %c0_242 = arith.constant 0 : index
    %c0_243 = arith.constant 0 : index
    %474 = vector.load %arg2[%c0_241, %c0_242, %c0_243] : memref<2x32x32xbf16, #tpu.memory_space<vmem>>, vector<1x32x32xbf16>
    %475 = vector.shape_cast %474 : vector<1x32x32xbf16> to vector<32x32xbf16>
    %c0_244 = arith.constant 0 : index
    %c0_245 = arith.constant 0 : index
    %c0_246 = arith.constant 0 : index
    %476 = vector.load %arg3[%c0_244, %c0_245, %c0_246] : memref<2x32x32xbf16, #tpu.memory_space<vmem>>, vector<1x32x32xbf16>
    %477 = vector.shape_cast %476 : vector<1x32x32xbf16> to vector<32x32xbf16>
    %c0_247 = arith.constant 0 : index
    %c0_248 = arith.constant 0 : index
    %478 = vector.load %arg4[%c0_247, %c0_248] : memref<2x32xf32, #tpu.memory_space<vmem>>, vector<1x32xf32>
    %479 = vector.shape_cast %478 : vector<1x32xf32> to vector<32xf32>
    %c0_249 = arith.constant 0 : index
    %c0_250 = arith.constant 0 : index
    %480 = vector.load %arg5[%c0_249, %c0_250] : memref<2x32xf32, #tpu.memory_space<vmem>>, vector<1x32xf32>
    %481 = vector.shape_cast %480 : vector<1x32xf32> to vector<32xf32>
    %482 = arith.truncf %473 : vector<128x32xf32> to vector<128x32xbf16>
    %cst_251 = arith.constant dense<0.000000e+00> : vector<128x32xf32>
    %483 = tpu.matmul %482, %475, %cst_251 {dimension_numbers = #tpu.dot_dimension_numbers<[1], [0], [0], [1], [0, 0, 1, 1], [], []>} : vector<128x32xbf16>, vector<32x32xbf16>, vector<128x32xf32> -> vector<128x32xf32>
    %484 = vector.shape_cast %479 : vector<32xf32> to vector<1x32xf32>
    %485 = vector.broadcast %484 : vector<1x32xf32> to vector<128x32xf32>
    %486 = arith.addf %483, %485 : vector<128x32xf32>
    %cst_252 = arith.constant dense<0.000000e+00> : vector<128x32xf32>
    %487 = tpu.matmul %482, %477, %cst_252 {dimension_numbers = #tpu.dot_dimension_numbers<[1], [0], [0], [1], [0, 0, 1, 1], [], []>} : vector<128x32xbf16>, vector<32x32xbf16>, vector<128x32xf32> -> vector<128x32xf32>
    %488 = vector.shape_cast %481 : vector<32xf32> to vector<1x32xf32>
    %489 = vector.broadcast %488 : vector<1x32xf32> to vector<128x32xf32>
    %490 = arith.addf %487, %489 : vector<128x32xf32>
    %491 = arith.negf %490 : vector<128x32xf32>
    %492 = math.exp %491 : vector<128x32xf32>
    %cst_253 = arith.constant 1.000000e+00 : f32
    %493 = vector.broadcast %cst_253 : f32 to vector<128x32xf32>
    %494 = arith.addf %493, %492 : vector<128x32xf32>
    %495 = arith.divf %493, %494 : vector<128x32xf32>
    %496 = arith.mulf %486, %495 : vector<128x32xf32>
    %c1_254 = arith.constant 1 : index
    %c0_255 = arith.constant 0 : index
    %c0_256 = arith.constant 0 : index
    %497 = vector.load %arg2[%c1_254, %c0_255, %c0_256] : memref<2x32x32xbf16, #tpu.memory_space<vmem>>, vector<1x32x32xbf16>
    %498 = vector.shape_cast %497 : vector<1x32x32xbf16> to vector<32x32xbf16>
    %c1_257 = arith.constant 1 : index
    %c0_258 = arith.constant 0 : index
    %c0_259 = arith.constant 0 : index
    %499 = vector.load %arg3[%c1_257, %c0_258, %c0_259] : memref<2x32x32xbf16, #tpu.memory_space<vmem>>, vector<1x32x32xbf16>
    %500 = vector.shape_cast %499 : vector<1x32x32xbf16> to vector<32x32xbf16>
    %c1_260 = arith.constant 1 : index
    %c0_261 = arith.constant 0 : index
    %501 = vector.load %arg4[%c1_260, %c0_261] : memref<2x32xf32, #tpu.memory_space<vmem>>, vector<1x32xf32>
    %502 = vector.shape_cast %501 : vector<1x32xf32> to vector<32xf32>
    %c1_262 = arith.constant 1 : index
    %c0_263 = arith.constant 0 : index
    %503 = vector.load %arg5[%c1_262, %c0_263] : memref<2x32xf32, #tpu.memory_space<vmem>>, vector<1x32xf32>
    %504 = vector.shape_cast %503 : vector<1x32xf32> to vector<32xf32>
    %505 = arith.truncf %496 : vector<128x32xf32> to vector<128x32xbf16>
    %cst_264 = arith.constant dense<0.000000e+00> : vector<128x32xf32>
    %506 = tpu.matmul %505, %498, %cst_264 {dimension_numbers = #tpu.dot_dimension_numbers<[1], [0], [0], [1], [0, 0, 1, 1], [], []>} : vector<128x32xbf16>, vector<32x32xbf16>, vector<128x32xf32> -> vector<128x32xf32>
    %507 = vector.shape_cast %502 : vector<32xf32> to vector<1x32xf32>
    %508 = vector.broadcast %507 : vector<1x32xf32> to vector<128x32xf32>
    %509 = arith.addf %506, %508 : vector<128x32xf32>
    %cst_265 = arith.constant dense<0.000000e+00> : vector<128x32xf32>
    %510 = tpu.matmul %505, %500, %cst_265 {dimension_numbers = #tpu.dot_dimension_numbers<[1], [0], [0], [1], [0, 0, 1, 1], [], []>} : vector<128x32xbf16>, vector<32x32xbf16>, vector<128x32xf32> -> vector<128x32xf32>
    %511 = vector.shape_cast %504 : vector<32xf32> to vector<1x32xf32>
    %512 = vector.broadcast %511 : vector<1x32xf32> to vector<128x32xf32>
    %513 = arith.addf %510, %512 : vector<128x32xf32>
    %514 = arith.negf %513 : vector<128x32xf32>
    %515 = math.exp %514 : vector<128x32xf32>
    %cst_266 = arith.constant 1.000000e+00 : f32
    %516 = vector.broadcast %cst_266 : f32 to vector<128x32xf32>
    %517 = arith.addf %516, %515 : vector<128x32xf32>
    %518 = arith.divf %516, %517 : vector<128x32xf32>
    %519 = arith.mulf %509, %518 : vector<128x32xf32>
    %c8 = arith.constant 8 : index
    %c0_267 = arith.constant 0 : index
    %c0_268 = arith.constant 0 : index
    %520 = vector.load %arg6[%c8, %c0_267, %c0_268] : memref<10x32x32xbf16, #tpu.memory_space<vmem>>, vector<1x32x32xbf16>
    %521 = vector.shape_cast %520 : vector<1x32x32xbf16> to vector<32x32xbf16>
    %c8_269 = arith.constant 8 : index
    %c0_270 = arith.constant 0 : index
    %c0_271 = arith.constant 0 : index
    %522 = vector.load %arg7[%c8_269, %c0_270, %c0_271] : memref<10x32x32xbf16, #tpu.memory_space<vmem>>, vector<1x32x32xbf16>
    %523 = vector.shape_cast %522 : vector<1x32x32xbf16> to vector<32x32xbf16>
    %c8_272 = arith.constant 8 : index
    %c0_273 = arith.constant 0 : index
    %524 = vector.load %arg8[%c8_272, %c0_273] : memref<10x32xf32, #tpu.memory_space<vmem>>, vector<1x32xf32>
    %525 = vector.shape_cast %524 : vector<1x32xf32> to vector<32xf32>
    %c8_274 = arith.constant 8 : index
    %c0_275 = arith.constant 0 : index
    %526 = vector.load %arg9[%c8_274, %c0_275] : memref<10x32xf32, #tpu.memory_space<vmem>>, vector<1x32xf32>
    %527 = vector.shape_cast %526 : vector<1x32xf32> to vector<32xf32>
    %528 = arith.truncf %519 : vector<128x32xf32> to vector<128x32xbf16>
    %cst_276 = arith.constant dense<0.000000e+00> : vector<128x32xf32>
    %529 = tpu.matmul %528, %521, %cst_276 {dimension_numbers = #tpu.dot_dimension_numbers<[1], [0], [0], [1], [0, 0, 1, 1], [], []>} : vector<128x32xbf16>, vector<32x32xbf16>, vector<128x32xf32> -> vector<128x32xf32>
    %530 = vector.shape_cast %525 : vector<32xf32> to vector<1x32xf32>
    %531 = vector.broadcast %530 : vector<1x32xf32> to vector<128x32xf32>
    %532 = arith.addf %529, %531 : vector<128x32xf32>
    %cst_277 = arith.constant dense<0.000000e+00> : vector<128x32xf32>
    %533 = tpu.matmul %528, %523, %cst_277 {dimension_numbers = #tpu.dot_dimension_numbers<[1], [0], [0], [1], [0, 0, 1, 1], [], []>} : vector<128x32xbf16>, vector<32x32xbf16>, vector<128x32xf32> -> vector<128x32xf32>
    %534 = vector.shape_cast %527 : vector<32xf32> to vector<1x32xf32>
    %535 = vector.broadcast %534 : vector<1x32xf32> to vector<128x32xf32>
    %536 = arith.addf %533, %535 : vector<128x32xf32>
    %537 = arith.negf %536 : vector<128x32xf32>
    %538 = math.exp %537 : vector<128x32xf32>
    %cst_278 = arith.constant 1.000000e+00 : f32
    %539 = vector.broadcast %cst_278 : f32 to vector<128x32xf32>
    %540 = arith.addf %539, %538 : vector<128x32xf32>
    %541 = arith.divf %539, %540 : vector<128x32xf32>
    %542 = arith.mulf %532, %541 : vector<128x32xf32>
    %c9 = arith.constant 9 : index
    %c0_279 = arith.constant 0 : index
    %c0_280 = arith.constant 0 : index
    %543 = vector.load %arg6[%c9, %c0_279, %c0_280] : memref<10x32x32xbf16, #tpu.memory_space<vmem>>, vector<1x32x32xbf16>
    %544 = vector.shape_cast %543 : vector<1x32x32xbf16> to vector<32x32xbf16>
    %c9_281 = arith.constant 9 : index
    %c0_282 = arith.constant 0 : index
    %c0_283 = arith.constant 0 : index
    %545 = vector.load %arg7[%c9_281, %c0_282, %c0_283] : memref<10x32x32xbf16, #tpu.memory_space<vmem>>, vector<1x32x32xbf16>
    %546 = vector.shape_cast %545 : vector<1x32x32xbf16> to vector<32x32xbf16>
    %c9_284 = arith.constant 9 : index
    %c0_285 = arith.constant 0 : index
    %547 = vector.load %arg8[%c9_284, %c0_285] : memref<10x32xf32, #tpu.memory_space<vmem>>, vector<1x32xf32>
    %548 = vector.shape_cast %547 : vector<1x32xf32> to vector<32xf32>
    %c9_286 = arith.constant 9 : index
    %c0_287 = arith.constant 0 : index
    %549 = vector.load %arg9[%c9_286, %c0_287] : memref<10x32xf32, #tpu.memory_space<vmem>>, vector<1x32xf32>
    %550 = vector.shape_cast %549 : vector<1x32xf32> to vector<32xf32>
    %551 = arith.truncf %542 : vector<128x32xf32> to vector<128x32xbf16>
    %cst_288 = arith.constant dense<0.000000e+00> : vector<128x32xf32>
    %552 = tpu.matmul %551, %544, %cst_288 {dimension_numbers = #tpu.dot_dimension_numbers<[1], [0], [0], [1], [0, 0, 1, 1], [], []>} : vector<128x32xbf16>, vector<32x32xbf16>, vector<128x32xf32> -> vector<128x32xf32>
    %553 = vector.shape_cast %548 : vector<32xf32> to vector<1x32xf32>
    %554 = vector.broadcast %553 : vector<1x32xf32> to vector<128x32xf32>
    %555 = arith.addf %552, %554 : vector<128x32xf32>
    %cst_289 = arith.constant dense<0.000000e+00> : vector<128x32xf32>
    %556 = tpu.matmul %551, %546, %cst_289 {dimension_numbers = #tpu.dot_dimension_numbers<[1], [0], [0], [1], [0, 0, 1, 1], [], []>} : vector<128x32xbf16>, vector<32x32xbf16>, vector<128x32xf32> -> vector<128x32xf32>
    %557 = vector.shape_cast %550 : vector<32xf32> to vector<1x32xf32>
    %558 = vector.broadcast %557 : vector<1x32xf32> to vector<128x32xf32>
    %559 = arith.addf %556, %558 : vector<128x32xf32>
    %560 = arith.negf %559 : vector<128x32xf32>
    %561 = math.exp %560 : vector<128x32xf32>
    %cst_290 = arith.constant 1.000000e+00 : f32
    %562 = vector.broadcast %cst_290 : f32 to vector<128x32xf32>
    %563 = arith.addf %562, %561 : vector<128x32xf32>
    %564 = arith.divf %562, %563 : vector<128x32xf32>
    %565 = arith.mulf %555, %564 : vector<128x32xf32>
    %566 = arith.addf %452, %565 : vector<128x32xf32>
    %567 = arith.truncf %566 : vector<128x32xf32> to vector<128x32xbf16>
    %c0_291 = arith.constant 0 : index
    %c0_292 = arith.constant 0 : index
    %568 = vector.load %arg12[%c0_291, %c0_292] : memref<32x128xbf16, #tpu.memory_space<vmem>>, vector<32x128xbf16>
    %cst_293 = arith.constant dense<0.000000e+00> : vector<128x128xf32>
    %569 = tpu.matmul %567, %568, %cst_293 {dimension_numbers = #tpu.dot_dimension_numbers<[1], [0], [0], [1], [0, 0, 1, 1], [], []>} : vector<128x32xbf16>, vector<32x128xbf16>, vector<128x128xf32> -> vector<128x128xf32>
    %c0_294 = arith.constant 0 : index
    %c0_295 = arith.constant 0 : index
    %570 = vector.load %arg13[%c0_294, %c0_295] : memref<1x128xf32, #tpu.memory_space<vmem>>, vector<1x128xf32>
    %571 = vector.broadcast %570 : vector<1x128xf32> to vector<128x128xf32>
    %572 = arith.addf %569, %571 : vector<128x128xf32>
    %c0_296 = arith.constant 0 : index
    %c0_297 = arith.constant 0 : index
    %573 = vector.load %arg14[%c0_296, %c0_297] : memref<128x128xf32, #tpu.memory_space<vmem>>, vector<128x128xf32>
    tpu.vector_store %arg14[%c0_296, %c0_297], %572 {strides = array<i32>} : memref<128x128xf32, #tpu.memory_space<vmem>>, vector<128x128xf32>,
    return
  }
  func.func @transform_0(%arg0: i32) -> (i32, i32) {
    %c0_i32 = arith.constant 0 : i32
    %c0_i32_0 = arith.constant 0 : i32
    return %arg0, %c0_i32 : i32, i32
  }
  func.func @transform_1(%arg0: i32) -> (i32, i32, i32) {
    %c0_i32 = arith.constant 0 : i32
    %c0_i32_0 = arith.constant 0 : i32
    %c0_i32_1 = arith.constant 0 : i32
    %c0_i32_2 = arith.constant 0 : i32
    return %c0_i32, %c0_i32_0, %c0_i32_1 : i32, i32, i32
  }
  func.func @transform_2(%arg0: i32) -> (i32, i32, i32) {
    %c0_i32 = arith.constant 0 : i32
    %c0_i32_0 = arith.constant 0 : i32
    %c0_i32_1 = arith.constant 0 : i32
    %c0_i32_2 = arith.constant 0 : i32
    return %c0_i32, %c0_i32_0, %c0_i32_1 : i32, i32, i32
  }
  func.func @transform_3(%arg0: i32) -> (i32, i32) {
    %c0_i32 = arith.constant 0 : i32
    %c0_i32_0 = arith.constant 0 : i32
    %c0_i32_1 = arith.constant 0 : i32
    return %c0_i32, %c0_i32_0 : i32, i32
  }
  func.func @transform_4(%arg0: i32) -> (i32, i32) {
    %c0_i32 = arith.constant 0 : i32
    %c0_i32_0 = arith.constant 0 : i32
    %c0_i32_1 = arith.constant 0 : i32
    return %c0_i32, %c0_i32_0 : i32, i32
  }
  func.func @transform_5(%arg0: i32) -> (i32, i32, i32) {
    %c0_i32 = arith.constant 0 : i32
    %c0_i32_0 = arith.constant 0 : i32
    %c0_i32_1 = arith.constant 0 : i32
    %c0_i32_2 = arith.constant 0 : i32
    return %c0_i32, %c0_i32_0, %c0_i32_1 : i32, i32, i32
  }
  func.func @transform_6(%arg0: i32) -> (i32, i32, i32) {
    %c0_i32 = arith.constant 0 : i32
    %c0_i32_0 = arith.constant 0 : i32
    %c0_i32_1 = arith.constant 0 : i32
    %c0_i32_2 = arith.constant 0 : i32
    return %c0_i32, %c0_i32_0, %c0_i32_1 : i32, i32, i32
  }
  func.func @transform_7(%arg0: i32) -> (i32, i32) {
    %c0_i32 = arith.constant 0 : i32
    %c0_i32_0 = arith.constant 0 : i32
    %c0_i32_1 = arith.constant 0 : i32
    return %c0_i32, %c0_i32_0 : i32, i32
  }
  func.func @transform_8(%arg0: i32) -> (i32, i32) {
    %c0_i32 = arith.constant 0 : i32
    %c0_i32_0 = arith.constant 0 : i32
    %c0_i32_1 = arith.constant 0 : i32
    return %c0_i32, %c0_i32_0 : i32, i32
  }
  func.func @transform_9(%arg0: i32) -> (i32, i32, i32) {
    %c0_i32 = arith.constant 0 : i32
    %c0_i32_0 = arith.constant 0 : i32
    %c0_i32_1 = arith.constant 0 : i32
    %c0_i32_2 = arith.constant 0 : i32
    return %c0_i32, %c0_i32_0, %c0_i32_1 : i32, i32, i32
  }
  func.func @transform_10(%arg0: i32) -> (i32, i32) {
    %c0_i32 = arith.constant 0 : i32
    %c0_i32_0 = arith.constant 0 : i32
    %c0_i32_1 = arith.constant 0 : i32
    return %c0_i32, %c0_i32_0 : i32, i32
  }
  func.func @transform_11(%arg0: i32) -> (i32, i32) {
    %c0_i32 = arith.constant 0 : i32
    %c0_i32_0 = arith.constant 0 : i32
    %c0_i32_1 = arith.constant 0 : i32
    return %c0_i32, %c0_i32_0 : i32, i32
  }
  func.func @transform_12(%arg0: i32) -> (i32, i32) {
    %c0_i32 = arith.constant 0 : i32
    %c0_i32_0 = arith.constant 0 : i32
    %c0_i32_1 = arith.constant 0 : i32
    return %c0_i32, %c0_i32_0 : i32, i32
  }
  func.func @transform_13(%arg0: i32) -> (i32, i32) {
    %c0_i32 = arith.constant 0 : i32
    %c0_i32_0 = arith.constant 0 : i32
    return %arg0, %c0_i32 : i32, i32
  }
}

</mosaic_0001>

<bundles_post_ra>
// kernel: tabnet_classifier_forward.1
= control target key start
LH: loop header
LB: loop body
LE: loop exit
PB: predicated region body
PF: predicated region fallthrough
CT: control target
= control target key end

     0   :  { %s13616_s25 = smov 0   ;;  %s17466_s0 = inlined_call_operand.vmem [shape: f32[256,32], index: 0, kind: input, shape index: {}]   ;;  %s17467_s1 = inlined_call_operand.vmem [shape: bf16[2,32,32], index: 1, kind: input, shape index: {}]   ;;  %s17468_s2 = inlined_call_operand.vmem [shape: bf16[2,32,32], index: 2, kind: input, shape index: {}]   ;;  %s17469_s3 = inlined_call_operand.vmem [shape: f32[2,32], index: 3, kind: input, shape index: {}]   ;;  %s17470_s4 = inlined_call_operand.vmem [shape: f32[2,32], index: 4, kind: input, shape index: {}]   ;;  %s17471_s5 = inlined_call_operand.vmem [shape: bf16[10,32,32], index: 5, kind: input, shape index: {}]   ;;  %s17472_s6 = inlined_call_operand.vmem [shape: bf16[10,32,32], index: 6, kind: input, shape index: {}]   ;;  %s17473_s7 = inlined_call_operand.vmem [shape: f32[10,32], index: 7, kind: input, shape index: {}]   ;;  %s17474_s8 = inlined_call_operand.vmem [shape: f32[10,32], index: 8, kind: input, shape index: {}]   ;;  %s17475_s9 = inlined_call_operand.vmem [shape: bf16[5,32,32], index: 9, kind: input, shape index: {}]   ;;  %s17476_s10 = inlined_call_operand.vmem [shape: f32[5,32], index: 10, kind: input, shape index: {}]   ;;  %s17477_s11 = inlined_call_operand.vmem [shape: bf16[32,128], index: 11, kind: input, shape index: {}]   ;;  %s17478_s12 = inlined_call_operand.vmem [shape: f32[1,128], index: 12, kind: input, shape index: {}]   ;;  %s17479_s13 = inlined_call_operand.vmem [shape: f32[256,128], index: 13, kind: output, shape index: {}]  }
   0x1 LB: > { %s9597_s26 = sadd.s32 4294967295, %s13544_s25   ;;  %p9601_p0 = scmp.ge.s32.totalorder %s13544_s25, 1  ;;  %s13544_s25 = sphi %s13616_s25, %s23_s25  }
   0x2   : > { %p388_p1 = scmp.lt.s32.totalorder %s13544_s25, 3 }
   0x4   : > { %p389_p2 = pnand %p9601_p0, %p388_p1 }
   0x6   : > { %392 = sbr.rel (%p389_p2) target bundleno = 7451 (0x1d1b), region = 72 }
   0xd   : > { %v11829_v0 = vld [vmem:[%s17467_s1] sm:$0xff]   ;;  %s9602_s29 = sshll.u32 %s9597_s26, 4  ;;  %v11830_v1 = vld [vmem:[%s17467_s1 + $0x8] sm:$0xff]   ;;  %vm495_vm0 = vcmask 261120   ;;  %v11833_v28 = vld [vmem:[%s17468_s2 + $0x10] sm:$0xff]  }
   0xe   : > { %p433_p3 = scmp.lt.s32.totalorder %s9602_s29, 31  ;;  %11817 = vmatprep.subr.bf16.mxu1 %v11829_v0  ;;  %10917 = vmatprep.subr.bf16.mxu0 %v11829_v0  ;;  %v11831_v2 = vld [vmem:[%s17468_s2] sm:$0xff]   ;;  %v11832_v12 = vld [vmem:[%s17468_s2 + $0x8] sm:$0xff]   ;;  %v11835_v29 = vld [vmem:[%s17467_s1 + $0x10] sm:$0xff]  }
   0xf   : > { %11819 = vmatpush3.bf16.msra.mxu1 %v11829_v0  ;;  %10918 = vmatpush3.bf16.msra.mxu0 %v11829_v0  ;;  %v11834_v30 = vld [vmem:[%s17468_s2 + $0x18] sm:$0xff]   ;;  %v13723_v47 = vld [vmem:[%s17470_s4] ss:$0 sm:$0xff] }
  0x10   : > { %s17637_s29 = smov (!%p433_p3, %s9602_s29), 31  ;;  %11818 = vmatprep.subr.bf16.mxu1 %v11830_v1  ;;  %10919 = vmatprep.subr.bf16.mxu0 %v11830_v1  ;;  %v11836_v31 = vld [vmem:[%s17467_s1 + $0x18] sm:$0xff]  }
  0x11   : > { %s9603_s17 = sshll.u32 %s17637_s29, 3 }
  0x12   : > { %s13641_s20 = scalar_lea.vmem %s17466_s0, %s9603_s17  ;;  %s17445_s15 = scalar_lea.vmem %s17479_s13, %s9603_s17 }
  0x13   : > { %11820 = vmatpush3.bf16.msra.mxu1 %v11830_v1  ;;  %v453_v3 = vld [vmem:[%s13641_s20 + $0x40] sm:$0xff]  ;;  %v454_v4 = vld [vmem:[%s13641_s20 + $0x48] sm:$0xff]  ;;  %v455_v5 = vld [vmem:[%s13641_s20 + $0x50] sm:$0xff]  ;;  %10920 = vmatpush3.bf16.msra.mxu0 %v11830_v1 }
  0x14   : > { %v475_v6 = vpack.c.bf16 %v454_v4, %v453_v3  ;;  %v456_v7 = vld [vmem:[%s13641_s20 + $0x58] sm:$0xff]  ;;  %10937 = vmatprep.subr.bf16.mxu1 %v11831_v2  ;;  %v457_v8 = vld [vmem:[%s13641_s20 + $0x60] sm:$0xff]  ;;  %v458_v9 = vld [vmem:[%s13641_s20 + $0x68] sm:$0xff]  ;;  %10957 = vmatprep.subr.bf16.mxu0 %v11835_v29 }
  0x15   : > { %v476_v10 = vpack.c.bf16 %v456_v7, %v455_v5  ;;  %v477_v11 = vpack.c.bf16 %v458_v9, %v457_v8  ;;  %v445_v13 = vld [vmem:[%s13641_s20] sm:$0xff]  ;;  %v446_v14 = vld [vmem:[%s13641_s20 + $0x8] sm:$0xff]  ;;  %v447_v15 = vld [vmem:[%s13641_s20 + $0x10] sm:$0xff] }
  0x16   : > { %10929 = vmatprep.mubr.msk.bf16.mxu1 %vm495_vm0, %v475_v6  ;;  %v448_v16 = vld [vmem:[%s13641_s20 + $0x18] sm:$0xff]  ;;  %v459_v17 = vld [vmem:[%s13641_s20 + $0x70] sm:$0xff]  ;;  %v471_v18 = vpack.c.bf16 %v446_v14, %v445_v13  ;;  %v449_v19 = vld [vmem:[%s13641_s20 + $0x20] sm:$0xff] }
  0x17   : > { %10930 = vmatmul.mubr.msk.bf16.vlgmr.msra.gmra.mrb[0].mxu1 %vm495_vm0, %v476_v10  ;;  %v450_v20 = vld [vmem:[%s13641_s20 + $0x28] sm:$0xff]  ;;  %v460_v21 = vld [vmem:[%s13641_s20 + $0x78] sm:$0xff]  ;;  %v472_v22 = vpack.c.bf16 %v448_v16, %v447_v15  ;;  %v451_v25 = vld [vmem:[%s13641_s20 + $0x30] sm:$0xff] }
  0x18   : > { %10938 = vmatpush3.bf16.msra.mxu1 %v11831_v2  ;;  %10933 = vmatprep.mubr.msk.bf16.mxu1 %vm495_vm0, %v477_v11  ;;  %v473_v23 = vpack.c.bf16 %v450_v20, %v449_v19  ;;  %v478_v24 = vpack.c.bf16 %v460_v21, %v459_v17  ;;  %v452_v26 = vld [vmem:[%s13641_s20 + $0x38] sm:$0xff] }
  0x19   : > { %10939 = vmatprep.subr.bf16.mxu1 %v11832_v12  ;;  %10921 = vmatprep.mubr.msk.bf16.mxu0 %vm495_vm0, %v471_v18  ;;  %v474_v27 = vpack.c.bf16 %v452_v26, %v451_v25 }
  0x1a   : > { %10922 = vmatmul.mubr.msk.bf16.vlgmr.msra.gmra.mrb[0].mxu0 %vm495_vm0, %v472_v22 }
  0x1b   : > { %10925 = vmatprep.mubr.msk.bf16.mxu0 %vm495_vm0, %v473_v23  ;;  %10958 = vmatpush3.bf16.msra.mxu0 %v11835_v29 }
  0x1c   : > { %10940 = vmatpush3.bf16.msra.mxu1 %v11832_v12  ;;  %10959 = vmatprep.subr.bf16.mxu0 %v11836_v31 }
  0x1d   : > { %10977 = vmatprep.subr.bf16.mxu1 %v11833_v28 }
  0x1f   : > { %10934 = vmatmul.mubr.msk.bf16.gmra.mrb[4].mxu1 %vm495_vm0, %v478_v24  ;;  %10960 = vmatpush3.bf16.msra.mxu0 %v11836_v31  ;;  %v13742_v31 = vld [vmem:[%s17469_s3] ss:$0 sm:$0xff] }
  0x20   : > { %10941 = vmatprep.mubr.msk.bf16.mxu1 %vm495_vm0, %v471_v18 }
  0x22   : > { %10926 = vmatmul.mubr.msk.bf16.gmra.mrb[4].mxu0 %vm495_vm0, %v474_v27 }
  0x27   : > { %10942 = vmatmul.mubr.msk.bf16.vlgmr.msra.gmra.mrb[8].mxu1 %vm495_vm0, %v472_v22 }
  0x28   : > { %10945 = vmatprep.mubr.msk.bf16.mxu1 %vm495_vm0, %v473_v23  ;;  %10978 = vmatpush3.bf16.msra.mxu1 %v11833_v28 }
  0x29   : > { %10979 = vmatprep.subr.bf16.mxu1 %v11834_v30 }
  0x2c   : > { %10980 = vmatpush3.bf16.msra.mxu1 %v11834_v30 }
  0x2f   : > { %10946 = vmatmul.mubr.msk.bf16.gmra.mrb[12].mxu1 %vm495_vm0, %v474_v27 }
  0x30   : > { %10949 = vmatprep.mubr.msk.bf16.mxu1 %vm495_vm0, %v475_v6 }
  0x37   : > { %10950 = vmatmul.mubr.msk.bf16.gmra.mrb[16].mxu1 %vm495_vm0, %v476_v10 }
  0x38   : > { %10953 = vmatprep.mubr.msk.bf16.mxu1 %vm495_vm0, %v477_v11 }
  0x3f   : > { %10954 = vmatmul.mubr.msk.bf16.gmra.mrb[20].mxu1 %vm495_vm0, %v478_v24 }
  0xea   : > { %v13690_v32 = vpop.f32.mrb[0].mxu1 }
  0xeb   : > { %v13692_v33 = vpop.f32.mrb[1].mxu1 }
  0xec   : > { %v13694_v34 = vpop.f32.mrb[2].mxu1 }
  0xed   : > { %v13696_v35 = vpop.f32.mrb[3].mxu1  ;;  %v13698_v36 = vpop.f32.mrb[0].mxu0 }
  0xee   : > { %v13700_v37 = vpop.f32.mrb[1].mxu0 }
  0xef   : > { %v13702_v38 = vpop.f32.mrb[2].mxu0 }
  0xf0   : > { %v13704_v39 = vpop.f32.mrb[3].mxu0 }
  0xf2   : > { %v13706_v40 = vpop.f32.mrb[4].mxu1 }
  0xf3   : > { %v13708_v41 = vpop.f32.mrb[5].mxu1 }
  0xf4   : > { %v13710_v42 = vpop.f32.mrb[6].mxu1 }
  0xf5   : > { %v13712_v43 = vpop.f32.mrb[7].mxu1  ;;  %v13714_v44 = vpop.f32.mrb[4].mxu0 }
  0xf6   : > { %v13716_v45 = vpop.f32.mrb[5].mxu0 }
  0xf7   : > { %v13718_v46 = vpop.f32.mrb[6].mxu0 }
  0xf8   : > { %v13725_v48 = vpop.f32.mrb[7].mxu0 }
  0xfa   : > { %v10943_v49 = vpop.f32.mrb[8].mxu1 }
  0xfb   : > { %v676_v50 = vadd.f32 %v10943_v49, %v13723_v47  ;;  %v667_v51 = vpop.f32.mrb[9].mxu1 }
  0xfc   : > { %v668_v52 = vadd.f32 %v13723_v47, %v667_v51  ;;  %v10944_v53 = vpop.f32.mrb[10].mxu1 }
  0xfd   : > { %v9630_v54 = vmul.f32 -1.442695, %v676_v50  ;;  %v679_v55 = vadd.f32 %v10944_v53, %v13723_v47  ;;  %v670_v56 = vpop.f32.mrb[11].mxu1  ;;  %v563_v53 = vadd.f32 %v13698_v36, %v13742_v31 }
  0xfe   : > { %v9628_v57 = vmul.f32 -1.442695, %v668_v52  ;;  %v671_v58 = vadd.f32 %v13723_v47, %v670_v56 }
  0xff   : > { %11887 = vpow2.f32 %v9630_v54  ;;  %v9631_v59 = vmul.f32 -1.442695, %v679_v55 }
 0x100   : > { %11889 = vpow2.f32 %v9628_v57  ;;  %v9629_v60 = vmul.f32 -1.442695, %v671_v58  ;;  %v555_v58 = vadd.f32 %v13742_v31, %v13700_v37  ;;  %v566_v37 = vadd.f32 %v13702_v38, %v13742_v31 }
 0x101   : > { %11891 = vpow2.f32 %v9631_v59  ;;  %v579_v38 = vadd.f32 %v13714_v44, %v13742_v31  ;;  %v574_v44 = vadd.f32 %v13742_v31, %v13725_v48 }
 0x102   : > { %11893 = vpow2.f32 %v9629_v60  ;;  %v10947_v61 = vpop.f32.mrb[12].mxu1 }
 0x103   : > { %v692_v62 = vadd.f32 %v10947_v61, %v13723_v47  ;;  %v683_v63 = vpop.f32.mrb[13].mxu1 }
 0x104   : > { %v684_v0 = vadd.f32 %v13723_v47, %v683_v63  ;;  %v10948_v1 = vpop.f32.mrb[14].mxu1 }
 0x105   : > { %v9634_v2 = vmul.f32 -1.442695, %v692_v62  ;;  %v695_v3 = vadd.f32 %v10948_v1, %v13723_v47  ;;  %v686_v4 = vpop.f32.mrb[15].mxu1 }
 0x106   : > { %v9632_v5 = vmul.f32 -1.442695, %v684_v0  ;;  %v687_v6 = vadd.f32 %v13723_v47, %v686_v4 }
 0x107   : > { %11895 = vpow2.f32 %v9634_v2  ;;  %v9635_v7 = vmul.f32 -1.442695, %v695_v3 }
 0x108   : > { %11897 = vpow2.f32 %v9632_v5  ;;  %v9633_v8 = vmul.f32 -1.442695, %v687_v6 }
 0x109   : > { %v11888_v9 = vpop.eup %11887  ;;  %11899 = vpow2.f32 %v9635_v7 }
 0x10a   : > { %v11890_v10 = vpop.eup %11889  ;;  %v780_v11 = vadd.f32 1.0, %v11888_v9  ;;  %11901 = vpow2.f32 %v9633_v8  ;;  %v10951_v12 = vpop.f32.mrb[16].mxu1  ;;  %v558_v8 = vadd.f32 %v13742_v31, %v13704_v39 }
 0x10b   : > { %v11892_v13 = vpop.eup %11891  ;;  %v778_v14 = vadd.f32 1.0, %v11890_v10  ;;  %v708_v15 = vadd.f32 %v10951_v12, %v13723_v47  ;;  %v699_v16 = vpop.f32.mrb[17].mxu1 }
 0x10c   : > { %v11894_v17 = vpop.eup %11893  ;;  %11903 = vrcp.f32 %v780_v11  ;;  %v781_v18 = vadd.f32 1.0, %v11892_v13  ;;  %v700_v19 = vadd.f32 %v13723_v47, %v699_v16  ;;  %v10952_v20 = vpop.f32.mrb[18].mxu1 }
 0x10d   : > { %11905 = vrcp.f32 %v778_v14  ;;  %v779_v21 = vadd.f32 1.0, %v11894_v17  ;;  %v9638_v22 = vmul.f32 -1.442695, %v708_v15  ;;  %v711_v23 = vadd.f32 %v10952_v20, %v13723_v47  ;;  %v702_v24 = vpop.f32.mrb[19].mxu1 }
 0x10e   : > { %11907 = vrcp.f32 %v781_v18  ;;  %v9636_v25 = vmul.f32 -1.442695, %v700_v19  ;;  %v703_v26 = vadd.f32 %v13723_v47, %v702_v24  ;;  %v571_v18 = vadd.f32 %v13742_v31, %v13716_v45 }
 0x10f   : > { %11909 = vrcp.f32 %v779_v21  ;;  %v9639_v27 = vmul.f32 -1.442695, %v711_v23  ;;  %v582_v21 = vadd.f32 %v13718_v46, %v13742_v31 }
 0x110   : > { %11911 = vpow2.f32 %v9638_v22  ;;  %v9637_v28 = vmul.f32 -1.442695, %v703_v26 }
 0x111   : > { %v11896_v29 = vpop.eup %11895  ;;  %11913 = vpow2.f32 %v9636_v25 }
 0x112   : > { %v11898_v30 = vpop.eup %11897  ;;  %v784_v49 = vadd.f32 1.0, %v11896_v29  ;;  %11915 = vpow2.f32 %v9639_v27  ;;  %v10955_v50 = vpop.f32.mrb[20].mxu1 }
 0x113   : > { %v11900_v51 = vpop.eup %11899  ;;  %v782_v52 = vadd.f32 1.0, %v11898_v30  ;;  %11917 = vpow2.f32 %v9637_v28  ;;  %v724_v54 = vadd.f32 %v10955_v50, %v13723_v47  ;;  %v715_v55 = vpop.f32.mrb[21].mxu1 }
 0x114   : > { %v11902_v56 = vpop.eup %11901  ;;  %11919 = vrcp.f32 %v784_v49  ;;  %v785_v57 = vadd.f32 1.0, %v11900_v51  ;;  %v716_v59 = vadd.f32 %v13723_v47, %v715_v55  ;;  %v10956_v60 = vpop.f32.mrb[22].mxu1  ;;  %v595_v55 = vadd.f32 %v13690_v32, %v13742_v31 }
 0x115   : > { %11921 = vrcp.f32 %v782_v52  ;;  %v783_v61 = vadd.f32 1.0, %v11902_v56  ;;  %v9642_v62 = vmul.f32 -1.442695, %v724_v54  ;;  %v727_v63 = vadd.f32 %v10956_v60, %v13723_v47  ;;  %v718_v0 = vpop.f32.mrb[23].mxu1 }
 0x116   : > { %v11904_v1 = vpop.eup %11903  ;;  %11923 = vrcp.f32 %v785_v57  ;;  %v9640_v36 = vmul.f32 -1.442695, %v716_v59  ;;  %v719_v2 = vadd.f32 %v13723_v47, %v718_v0  ;;  %v598_v60 = vadd.f32 %v13694_v34, %v13742_v31 }
 0x117   : > { %v11906_v3 = vpop.eup %11905  ;;  %11925 = vrcp.f32 %v783_v61  ;;  %v828_v4 = vmul.f32 %v11904_v1, %v563_v53  ;;  %v9643_v5 = vmul.f32 -1.442695, %v727_v63 }
 0x118   : > { %v11908_v6 = vpop.eup %11907  ;;  %11927 = vpow2.f32 %v9642_v62  ;;  %v826_v7 = vmul.f32 %v11906_v3, %v555_v58  ;;  %v9641_v9 = vmul.f32 -1.442695, %v719_v2  ;;  %v587_v58 = vadd.f32 %v13742_v31, %v13692_v33 }
 0x119   : > { %v11910_v10 = vpop.eup %11909  ;;  %11929 = vpow2.f32 %v9640_v36  ;;  %v829_v11 = vmul.f32 %v11908_v6, %v566_v37  ;;  %v590_v62 = vadd.f32 %v13742_v31, %v13696_v35  ;;  %v611_v3 = vadd.f32 %v13706_v40, %v13742_v31 }
 0x11a   : > { %v11912_v12 = vpop.eup %11911  ;;  %11931 = vpow2.f32 %v9643_v5  ;;  %v827_v47 = vmul.f32 %v11910_v10, %v558_v8  ;;  %v603_v37 = vadd.f32 %v13742_v31, %v13708_v41  ;;  %v614_v35 = vadd.f32 %v13710_v42, %v13742_v31  ;;  %v11837_v42 = vld [vmem:[%s17472_s6] sm:$0xff]  }
 0x11b   : > { %v11914_v13 = vpop.eup %11913  ;;  %v788_v14 = vadd.f32 1.0, %v11912_v12  ;;  %v855_v15 = vpack.c.bf16 %v829_v11, %v828_v4  ;;  %11933 = vpow2.f32 %v9641_v9  ;;  %v606_v40 = vadd.f32 %v13742_v31, %v13712_v43  ;;  %v11839_v43 = vld [vmem:[%s17471_s5] sm:$0xff]   ;;  %11017 = vmatprep.subr.bf16.mxu1 %v11837_v42  ;;  %v11838_v31 = vld [vmem:[%s17472_s6 + $0x8] sm:$0xff]  }
 0x11c   : > { %v11916_v16 = vpop.eup %11915  ;;  %v786_v17 = vadd.f32 1.0, %v11914_v13  ;;  %v854_v39 = vpack.c.bf16 %v827_v47, %v826_v7  ;;  %10997 = vmatprep.subr.bf16.mxu0 %v11839_v43  ;;  %v11840_v12 = vld [vmem:[%s17471_s5 + $0x8] sm:$0xff]   ;;  %v13811_v47 = vld [vmem:[%s17470_s4 + $0x1] ss:$0 sm:$0xff] }
 0x11d   : > { %v11918_v19 = vpop.eup %11917  ;;  %11935 = vrcp.f32 %v788_v14  ;;  %v789_v20 = vadd.f32 1.0, %v11916_v16 }
 0x11e   : > { %v11920_v22 = vpop.eup %11919  ;;  %11937 = vrcp.f32 %v786_v17  ;;  %v787_v23 = vadd.f32 1.0, %v11918_v19  ;;  %10961 = vmatprep.mubr.msk.bf16.mxu0 %vm495_vm0, %v854_v39  ;;  %10981 = vmatprep.mubr.msk.bf16.mxu1 %vm495_vm0, %v854_v39 }
 0x11f   : > { %v11922_v24 = vpop.eup %11921  ;;  %11939 = vrcp.f32 %v789_v20  ;;  %v832_v45 = vmul.f32 %v11920_v22, %v579_v38  ;;  %10962 = vmatmul.mubr.msk.bf16.vlgmr.msra.gmra.mrb[8].mxu0 %vm495_vm0, %v855_v15  ;;  %10982 = vmatmul.mubr.msk.bf16.vlgmr.msra.gmra.mrb[24].mxu1 %vm495_vm0, %v855_v15 }
 0x120   : > { %v11924_v25 = vpop.eup %11923  ;;  %11941 = vrcp.f32 %v787_v23  ;;  %v830_v46 = vmul.f32 %v11922_v24, %v571_v18  ;;  %11018 = vmatpush3.bf16.msra.mxu1 %v11837_v42  ;;  %10998 = vmatpush3.bf16.msra.mxu0 %v11839_v43 }
 0x121   : > { %v11926_v26 = vpop.eup %11925  ;;  %v833_v27 = vmul.f32 %v11924_v25, %v582_v21  ;;  %11019 = vmatprep.subr.bf16.mxu1 %v11838_v31  ;;  %10999 = vmatprep.subr.bf16.mxu0 %v11840_v12 }
 0x122   : > { %v11928_v28 = vpop.eup %11927  ;;  %v831_v29 = vmul.f32 %v11926_v26, %v574_v44 }
 0x123   : > { %v11930_v30 = vpop.eup %11929  ;;  %v792_v49 = vadd.f32 1.0, %v11928_v28  ;;  %v857_v50 = vpack.c.bf16 %v833_v27, %v832_v45 }
 0x124   : > { %v11932_v51 = vpop.eup %11931  ;;  %v790_v52 = vadd.f32 1.0, %v11930_v30  ;;  %v856_v48 = vpack.c.bf16 %v831_v29, %v830_v46  ;;  %11020 = vmatpush3.bf16.msra.mxu1 %v11838_v31  ;;  %11000 = vmatpush3.bf16.msra.mxu0 %v11840_v12 }
 0x125   : > { %v11934_v53 = vpop.eup %11933  ;;  %11943 = vrcp.f32 %v792_v49  ;;  %v793_v54 = vadd.f32 1.0, %v11932_v51 }
 0x126   : > { %11945 = vrcp.f32 %v790_v52  ;;  %v791_v56 = vadd.f32 1.0, %v11934_v53  ;;  %10965 = vmatprep.mubr.msk.bf16.mxu0 %vm495_vm0, %v856_v48  ;;  %10985 = vmatprep.mubr.msk.bf16.mxu1 %vm495_vm0, %v856_v48 }
 0x127   : > { %v11936_v57 = vpop.eup %11935  ;;  %11947 = vrcp.f32 %v793_v54  ;;  %10966 = vmatmul.mubr.msk.bf16.gmra.mrb[12].mxu0 %vm495_vm0, %v857_v50  ;;  %10986 = vmatmul.mubr.msk.bf16.gmra.mrb[28].mxu1 %vm495_vm0, %v857_v50 }
 0x128   : > { %v11938_v59 = vpop.eup %11937  ;;  %11949 = vrcp.f32 %v791_v56  ;;  %v836_v32 = vmul.f32 %v11936_v57, %v595_v55 }
 0x129   : > { %v11940_v61 = vpop.eup %11939  ;;  %v834_v63 = vmul.f32 %v11938_v59, %v587_v58 }
 0x12a   : > { %v11942_v0 = vpop.eup %11941  ;;  %v837_v1 = vmul.f32 %v11940_v61, %v598_v60 }
 0x12b   : > { %v835_v36 = vmul.f32 %v11942_v0, %v590_v62 }
 0x12c   : > { %v859_v33 = vpack.c.bf16 %v837_v1, %v836_v32 }
 0x12d   : > { %v858_v2 = vpack.c.bf16 %v835_v36, %v834_v63 }
 0x12f   : > { %v11944_v4 = vpop.eup %11943  ;;  %10969 = vmatprep.mubr.msk.bf16.mxu0 %vm495_vm0, %v858_v2  ;;  %10989 = vmatprep.mubr.msk.bf16.mxu1 %vm495_vm0, %v858_v2 }
 0x130   : > { %v11946_v34 = vpop.eup %11945  ;;  %10970 = vmatmul.mubr.msk.bf16.gmra.mrb[16].mxu0 %vm495_vm0, %v859_v33  ;;  %10990 = vmatmul.mubr.msk.bf16.gmra.mrb[32].mxu1 %vm495_vm0, %v859_v33  ;;  %v840_v5 = vmul.f32 %v11944_v4, %v611_v3 }
 0x131   : > { %v11948_v6 = vpop.eup %11947  ;;  %v838_v7 = vmul.f32 %v11946_v34, %v603_v37 }
 0x132   : > { %v11950_v8 = vpop.eup %11949  ;;  %v841_v41 = vmul.f32 %v11948_v6, %v614_v35 }
 0x133   : > { %v839_v9 = vmul.f32 %v11950_v8, %v606_v40 }
 0x134   : > { %v861_v10 = vpack.c.bf16 %v841_v41, %v840_v5 }
 0x135   : > { %v860_v11 = vpack.c.bf16 %v839_v9, %v838_v7  ;;  %v13852_v9 = vld [vmem:[%s17469_s3 + $0x1] ss:$0 sm:$0xff] }
 0x137   : > { %10973 = vmatprep.mubr.msk.bf16.mxu0 %vm495_vm0, %v860_v11  ;;  %10993 = vmatprep.mubr.msk.bf16.mxu1 %vm495_vm0, %v860_v11 }
 0x138   : > { %10974 = vmatmul.mubr.msk.bf16.gmra.mrb[20].mxu0 %vm495_vm0, %v861_v10  ;;  %10994 = vmatmul.mubr.msk.bf16.gmra.mrb[36].mxu1 %vm495_vm0, %v861_v10 }
 0x1f2   : > { %v13813_v13 = vpop.f32.mrb[8].mxu0  ;;  %v10983_v14 = vpop.f32.mrb[24].mxu1 }
 0x1f3   : > { %v1058_v15 = vadd.f32 %v10983_v14, %v13811_v47  ;;  %v13816_v38 = vpop.f32.mrb[9].mxu0  ;;  %v1049_v16 = vpop.f32.mrb[25].mxu1 }
 0x1f4   : > { %v1050_v17 = vadd.f32 %v13811_v47, %v1049_v16  ;;  %v13819_v18 = vpop.f32.mrb[10].mxu0  ;;  %v10984_v39 = vpop.f32.mrb[26].mxu1  ;;  %v945_v16 = vadd.f32 %v13813_v13, %v13852_v9 }
 0x1f5   : > { %v9676_v19 = vmul.f32 -1.442695, %v1058_v15  ;;  %v1061_v20 = vadd.f32 %v10984_v39, %v13811_v47  ;;  %v13822_v21 = vpop.f32.mrb[11].mxu0  ;;  %v1052_v22 = vpop.f32.mrb[27].mxu1  ;;  %v948_v13 = vadd.f32 %v13819_v18, %v13852_v9 }
 0x1f6   : > { %v9674_v23 = vmul.f32 -1.442695, %v1050_v17  ;;  %v1053_v44 = vadd.f32 %v13811_v47, %v1052_v22  ;;  %v937_v22 = vadd.f32 %v13852_v9, %v13816_v38 }
 0x1f7   : > { %11951 = vpow2.f32 %v9676_v19  ;;  %v9677_v24 = vmul.f32 -1.442695, %v1061_v20 }
 0x1f8   : > { %11953 = vpow2.f32 %v9674_v23  ;;  %v9675_v45 = vmul.f32 -1.442695, %v1053_v44 }
 0x1f9   : > { %11955 = vpow2.f32 %v9677_v24 }
 0x1fa   : > { %11957 = vpow2.f32 %v9675_v45  ;;  %v13825_v25 = vpop.f32.mrb[12].mxu0  ;;  %v10987_v46 = vpop.f32.mrb[28].mxu1 }
 0x1fb   : > { %v1074_v26 = vadd.f32 %v10987_v46, %v13811_v47  ;;  %v13828_v27 = vpop.f32.mrb[13].mxu0  ;;  %v1065_v28 = vpop.f32.mrb[29].mxu1 }
 0x1fc   : > { %v1066_v29 = vadd.f32 %v13811_v47, %v1065_v28  ;;  %v13831_v30 = vpop.f32.mrb[14].mxu0  ;;  %v10988_v49 = vpop.f32.mrb[30].mxu1 }
 0x1fd   : > { %v9680_v50 = vmul.f32 -1.442695, %v1074_v26  ;;  %v1077_v51 = vadd.f32 %v10988_v49, %v13811_v47  ;;  %v13834_v52 = vpop.f32.mrb[15].mxu0  ;;  %v1068_v48 = vpop.f32.mrb[31].mxu1 }
 0x1fe   : > { %v9678_v53 = vmul.f32 -1.442695, %v1066_v29  ;;  %v1069_v54 = vadd.f32 %v13811_v47, %v1068_v48 }
 0x1ff   : > { %11959 = vpow2.f32 %v9680_v50  ;;  %v9681_v55 = vmul.f32 -1.442695, %v1077_v51  ;;  %v940_v51 = vadd.f32 %v13852_v9, %v13822_v21 }
 0x200   : > { %11961 = vpow2.f32 %v9678_v53  ;;  %v9679_v56 = vmul.f32 -1.442695, %v1069_v54 }
 0x201   : > { %v11952_v57 = vpop.eup %11951  ;;  %11963 = vpow2.f32 %v9681_v55 }
 0x202   : > { %v11954_v58 = vpop.eup %11953  ;;  %v1162_v59 = vadd.f32 1.0, %v11952_v57  ;;  %11965 = vpow2.f32 %v9679_v56 }
 0x203   : > { %v11956_v60 = vpop.eup %11955  ;;  %v1160_v32 = vadd.f32 1.0, %v11954_v58  ;;  %v13837_v61 = vpop.f32.mrb[16].mxu0 }
 0x204   : > { %v10991_v62 = vpop.f32.mrb[32].mxu1  ;;  %v11958_v63 = vpop.eup %11957  ;;  %11967 = vrcp.f32 %v1162_v59  ;;  %v1163_v0 = vadd.f32 1.0, %v11956_v60 }
 0x205   : > { %v1090_v1 = vadd.f32 %v10991_v62, %v13811_v47  ;;  %v13840_v36 = vpop.f32.mrb[17].mxu0  ;;  %v1081_v33 = vpop.f32.mrb[33].mxu1  ;;  %11969 = vrcp.f32 %v1160_v32  ;;  %v1161_v2 = vadd.f32 1.0, %v11958_v63 }
 0x206   : > { %v1082_v3 = vadd.f32 %v13811_v47, %v1081_v33  ;;  %v13843_v4 = vpop.f32.mrb[18].mxu0  ;;  %v10992_v37 = vpop.f32.mrb[34].mxu1  ;;  %11971 = vrcp.f32 %v1163_v0 }
 0x207   : > { %v9684_v34 = vmul.f32 -1.442695, %v1090_v1  ;;  %v1093_v35 = vadd.f32 %v10992_v37, %v13811_v47  ;;  %v13846_v5 = vpop.f32.mrb[19].mxu0  ;;  %v1084_v6 = vpop.f32.mrb[35].mxu1  ;;  %11973 = vrcp.f32 %v1161_v2  ;;  %v961_v2 = vadd.f32 %v13825_v25, %v13852_v9 }
 0x208   : > { %v9682_v40 = vmul.f32 -1.442695, %v1082_v3  ;;  %v1085_v7 = vadd.f32 %v13811_v47, %v1084_v6  ;;  %v953_v37 = vadd.f32 %v13852_v9, %v13828_v27  ;;  %v964_v6 = vadd.f32 %v13831_v30, %v13852_v9 }
 0x209   : > { %11975 = vpow2.f32 %v9684_v34  ;;  %v9685_v8 = vmul.f32 -1.442695, %v1093_v35  ;;  %v11960_v41 = vpop.eup %11959  ;;  %v956_v27 = vadd.f32 %v13852_v9, %v13834_v52 }
 0x20a   : > { %11977 = vpow2.f32 %v9682_v40  ;;  %v9683_v10 = vmul.f32 -1.442695, %v1085_v7  ;;  %v11962_v11 = vpop.eup %11961  ;;  %v1166_v42 = vadd.f32 1.0, %v11960_v41 }
 0x20b   : > { %11979 = vpow2.f32 %v9685_v8  ;;  %v11964_v43 = vpop.eup %11963  ;;  %v1164_v31 = vadd.f32 1.0, %v11962_v11  ;;  %v13854_v12 = vpop.f32.mrb[20].mxu0 }
 0x20c   : > { %11981 = vpow2.f32 %v9683_v10  ;;  %v10995_v14 = vpop.f32.mrb[36].mxu1  ;;  %v11966_v15 = vpop.eup %11965  ;;  %v1167_v17 = vadd.f32 1.0, %v11964_v43 }
 0x20d   : > { %11983 = vrcp.f32 %v1166_v42  ;;  %v1106_v39 = vadd.f32 %v10995_v14, %v13811_v47  ;;  %v13859_v19 = vpop.f32.mrb[21].mxu0  ;;  %v1097_v20 = vpop.f32.mrb[37].mxu1  ;;  %v1165_v23 = vadd.f32 1.0, %v11966_v15 }
 0x20e   : > { %11985 = vrcp.f32 %v1164_v31  ;;  %v1098_v44 = vadd.f32 %v13811_v47, %v1097_v20  ;;  %v13864_v24 = vpop.f32.mrb[22].mxu0  ;;  %v10996_v45 = vpop.f32.mrb[38].mxu1  ;;  %v969_v20 = vadd.f32 %v13852_v9, %v13840_v36 }
 0x20f   : > { %v11968_v46 = vpop.eup %11967  ;;  %11987 = vrcp.f32 %v1167_v17  ;;  %v9688_v26 = vmul.f32 -1.442695, %v1106_v39  ;;  %v1109_v28 = vadd.f32 %v10996_v45, %v13811_v47  ;;  %v13869_v29 = vpop.f32.mrb[23].mxu0  ;;  %v977_v39 = vadd.f32 %v13837_v61, %v13852_v9 }
 0x210   : > { %v1100_v49 = vpop.f32.mrb[39].mxu1  ;;  %v11970_v50 = vpop.eup %11969  ;;  %v1210_v38 = vmul.f32 %v11968_v46, %v945_v16  ;;  %11989 = vrcp.f32 %v1165_v23  ;;  %v9686_v48 = vmul.f32 -1.442695, %v1098_v44  ;;  %v980_v44 = vadd.f32 %v13843_v4, %v13852_v9 }
 0x211   : > { %v11972_v53 = vpop.eup %11971  ;;  %11991 = vpow2.f32 %v9688_v26  ;;  %v9689_v54 = vmul.f32 -1.442695, %v1109_v28  ;;  %v1101_v55 = vadd.f32 %v13811_v47, %v1100_v49  ;;  %v1208_v18 = vmul.f32 %v11970_v50, %v937_v22 }
 0x212   : > { %v11974_v56 = vpop.eup %11973  ;;  %v1211_v57 = vmul.f32 %v11972_v53, %v948_v13  ;;  %11993 = vpow2.f32 %v9686_v48  ;;  %v972_v46 = vadd.f32 %v13852_v9, %v13846_v5  ;;  %v985_v48 = vadd.f32 %v13852_v9, %v13859_v19 }
 0x213   : > { %v11976_v58 = vpop.eup %11975  ;;  %11995 = vpow2.f32 %v9689_v54  ;;  %v9687_v59 = vmul.f32 -1.442695, %v1101_v55  ;;  %v1209_v60 = vmul.f32 %v11974_v56, %v940_v51  ;;  %v996_v5 = vadd.f32 %v13864_v24, %v13852_v9  ;;  %v11841_v24 = vld [vmem:[%s17472_s6 + $0x10] sm:$0xff]  }
 0x214   : > { %v11978_v32 = vpop.eup %11977  ;;  %v1170_v62 = vadd.f32 1.0, %v11976_v58  ;;  %v1235_v63 = vpack.c.bf16 %v1211_v57, %v1210_v38  ;;  %v993_v38 = vadd.f32 %v13854_v12, %v13852_v9  ;;  %v988_v12 = vadd.f32 %v13852_v9, %v13869_v29  ;;  %11057 = vmatprep.subr.bf16.mxu1 %v11841_v24  ;;  %v11842_v9 = vld [vmem:[%s17472_s6 + $0x18] sm:$0xff]   ;;  %v11843_v29 = vld [vmem:[%s17471_s5 + $0x10] sm:$0xff]  }
 0x215   : > { %v11980_v0 = vpop.eup %11979  ;;  %v1168_v21 = vadd.f32 1.0, %v11978_v32  ;;  %11997 = vpow2.f32 %v9687_v59  ;;  %v1234_v1 = vpack.c.bf16 %v1209_v60, %v1208_v18  ;;  %11037 = vmatprep.subr.bf16.mxu0 %v11843_v29  ;;  %v13926_v59 = vld [vmem:[%s17467_s1] sm:$0xff]   ;;  %v11844_v60 = vld [vmem:[%s17471_s5 + $0x18] sm:$0xff]  }
 0x216   : > { %v11982_v33 = vpop.eup %11981  ;;  %11999 = vrcp.f32 %v1170_v62  ;;  %v1171_v47 = vadd.f32 1.0, %v11980_v0  ;;  %v13935_v32 = vld [vmem:[%s17474_s8] ss:$0 sm:$0xff] }
 0x217   : > { %v11984_v3 = vpop.eup %11983  ;;  %12001 = vrcp.f32 %v1168_v21  ;;  %v1169_v34 = vadd.f32 1.0, %v11982_v33  ;;  %11001 = vmatprep.mubr.msk.bf16.mxu0 %vm495_vm0, %v1234_v1  ;;  %11021 = vmatprep.mubr.msk.bf16.mxu1 %vm495_vm0, %v1234_v1 }
 0x218   : > { %v11986_v35 = vpop.eup %11985  ;;  %12003 = vrcp.f32 %v1171_v47  ;;  %11002 = vmatmul.mubr.msk.bf16.vlgmr.msra.gmra.mrb[24].mxu0 %vm495_vm0, %v1235_v63  ;;  %11022 = vmatmul.mubr.msk.bf16.vlgmr.msra.gmra.mrb[40].mxu1 %vm495_vm0, %v1235_v63  ;;  %v1214_v25 = vmul.f32 %v11984_v3, %v961_v2 }
 0x219   : > { %v11988_v40 = vpop.eup %11987  ;;  %12005 = vrcp.f32 %v1169_v34  ;;  %v1212_v7 = vmul.f32 %v11986_v35, %v953_v37  ;;  %11058 = vmatpush3.bf16.msra.mxu1 %v11841_v24  ;;  %11038 = vmatpush3.bf16.msra.mxu0 %v11843_v29  ;;  %v13976_v24 = vld [vmem:[%s17473_s7] ss:$0 sm:$0xff] }
 0x21a   : > { %v11990_v8 = vpop.eup %11989  ;;  %v1215_v41 = vmul.f32 %v11988_v40, %v964_v6  ;;  %11059 = vmatprep.subr.bf16.mxu1 %v11842_v9  ;;  %11039 = vmatprep.subr.bf16.mxu0 %v11844_v60 }
 0x21b   : > { %v11992_v10 = vpop.eup %11991  ;;  %v1213_v11 = vmul.f32 %v11990_v8, %v956_v27 }
 0x21c   : > { %v11994_v42 = vpop.eup %11993  ;;  %v1174_v43 = vadd.f32 1.0, %v11992_v10  ;;  %v1237_v31 = vpack.c.bf16 %v1215_v41, %v1214_v25 }
 0x21d   : > { %v11996_v30 = vpop.eup %11995  ;;  %v1172_v14 = vadd.f32 1.0, %v11994_v42  ;;  %v1236_v15 = vpack.c.bf16 %v1213_v11, %v1212_v7  ;;  %11060 = vmatpush3.bf16.msra.mxu1 %v11842_v9  ;;  %11040 = vmatpush3.bf16.msra.mxu0 %v11844_v60 }
 0x21e   : > { %12007 = vrcp.f32 %v1174_v43  ;;  %v1175_v16 = vadd.f32 1.0, %v11996_v30  ;;  %11097 = vmatprep.subr.bf16.mxu1 %v13926_v59 }
 0x21f   : > { %v11998_v17 = vpop.eup %11997  ;;  %12009 = vrcp.f32 %v1172_v14  ;;  %11005 = vmatprep.mubr.msk.bf16.mxu0 %vm495_vm0, %v1236_v15  ;;  %11025 = vmatprep.mubr.msk.bf16.mxu1 %vm495_vm0, %v1236_v15 }
 0x220   : > { %v12000_v52 = vpop.eup %11999  ;;  %12011 = vrcp.f32 %v1175_v16  ;;  %v1173_v22 = vadd.f32 1.0, %v11998_v17  ;;  %11006 = vmatmul.mubr.msk.bf16.gmra.mrb[28].mxu0 %vm495_vm0, %v1237_v31  ;;  %11026 = vmatmul.mubr.msk.bf16.gmra.mrb[44].mxu1 %vm495_vm0, %v1237_v31 }
 0x221   : > { %v12002_v23 = vpop.eup %12001  ;;  %v1218_v61 = vmul.f32 %v12000_v52, %v977_v39 }
 0x222   : > { %v12004_v45 = vpop.eup %12003  ;;  %12013 = vrcp.f32 %v1173_v22  ;;  %v1216_v13 = vmul.f32 %v12002_v23, %v969_v20 }
 0x223   : > { %v12006_v26 = vpop.eup %12005  ;;  %v1219_v28 = vmul.f32 %v12004_v45, %v980_v44 }
 0x224   : > { %v1217_v36 = vmul.f32 %v12006_v26, %v972_v46 }
 0x225   : > { %v1239_v49 = vpack.c.bf16 %v1219_v28, %v1218_v61 }
 0x226   : > { %v1238_v50 = vpack.c.bf16 %v1217_v36, %v1216_v13 }
 0x228   : > { %v12008_v51 = vpop.eup %12007  ;;  %11009 = vmatprep.mubr.msk.bf16.mxu0 %vm495_vm0, %v1238_v50  ;;  %11029 = vmatprep.mubr.msk.bf16.mxu1 %vm495_vm0, %v1238_v50 }
 0x229   : > { %v12010_v4 = vpop.eup %12009  ;;  %11010 = vmatmul.mubr.msk.bf16.gmra.mrb[32].mxu0 %vm495_vm0, %v1239_v49  ;;  %11030 = vmatmul.mubr.msk.bf16.gmra.mrb[48].mxu1 %vm495_vm0, %v1239_v49  ;;  %v1222_v53 = vmul.f32 %v12008_v51, %v993_v38 }
 0x22a   : > { %v12012_v54 = vpop.eup %12011  ;;  %v1220_v55 = vmul.f32 %v12010_v4, %v985_v48 }
 0x22b   : > { %v1223_v18 = vmul.f32 %v12012_v54, %v996_v5 }
 0x22c   : > { %v12014_v19 = vpop.eup %12013 }
 0x22d   : > { %v1221_v56 = vmul.f32 %v12014_v19, %v988_v12  ;;  %v1241_v57 = vpack.c.bf16 %v1223_v18, %v1222_v53 }
 0x22f   : > { %v1240_v58 = vpack.c.bf16 %v1221_v56, %v1220_v55 }
 0x231   : > { %11013 = vmatprep.mubr.msk.bf16.mxu0 %vm495_vm0, %v1240_v58  ;;  %11033 = vmatprep.mubr.msk.bf16.mxu1 %vm495_vm0, %v1240_v58 }
 0x232   : > { %11014 = vmatmul.mubr.msk.bf16.gmra.mrb[36].mxu0 %vm495_vm0, %v1241_v57  ;;  %11034 = vmatmul.mubr.msk.bf16.gmra.mrb[52].mxu1 %vm495_vm0, %v1241_v57 }
 0x2eb   : > { %v13937_v62 = vpop.f32.mrb[24].mxu0  ;;  %v11023_v63 = vpop.f32.mrb[40].mxu1 }
 0x2ec   : > { %v1438_v0 = vadd.f32 %v11023_v63, %v13935_v32  ;;  %v13940_v21 = vpop.f32.mrb[25].mxu0  ;;  %v1429_v1 = vpop.f32.mrb[41].mxu1 }
 0x2ed   : > { %v1430_v33 = vadd.f32 %v13935_v32, %v1429_v1  ;;  %v13943_v2 = vpop.f32.mrb[26].mxu0  ;;  %v11024_v47 = vpop.f32.mrb[42].mxu1 }
 0x2ee   : > { %v9714_v3 = vmul.f32 -1.442695, %v1438_v0  ;;  %v1441_v37 = vadd.f32 %v11024_v47, %v13935_v32  ;;  %v13946_v34 = vpop.f32.mrb[27].mxu0  ;;  %v1432_v35 = vpop.f32.mrb[43].mxu1  ;;  %v1325_v47 = vadd.f32 %v13937_v62, %v13976_v24  ;;  %v1328_v62 = vadd.f32 %v13943_v2, %v13976_v24 }
 0x2ef   : > { %v9712_v6 = vmul.f32 -1.442695, %v1430_v33  ;;  %v1433_v25 = vadd.f32 %v13935_v32, %v1432_v35 }
 0x2f0   : > { %12015 = vpow2.f32 %v9714_v3  ;;  %v9715_v40 = vmul.f32 -1.442695, %v1441_v37 }
 0x2f1   : > { %12017 = vpow2.f32 %v9712_v6  ;;  %v9713_v27 = vmul.f32 -1.442695, %v1433_v25 }
 0x2f2   : > { %12019 = vpow2.f32 %v9715_v40  ;;  %v1317_v40 = vadd.f32 %v13976_v24, %v13940_v21  ;;  %v1320_v21 = vadd.f32 %v13976_v24, %v13946_v34 }
 0x2f3   : > { %12021 = vpow2.f32 %v9713_v27  ;;  %v13949_v7 = vpop.f32.mrb[28].mxu0  ;;  %v11027_v8 = vpop.f32.mrb[44].mxu1 }
 0x2f4   : > { %v1454_v41 = vadd.f32 %v11027_v8, %v13935_v32  ;;  %v13952_v10 = vpop.f32.mrb[29].mxu0  ;;  %v1445_v11 = vpop.f32.mrb[45].mxu1 }
 0x2f5   : > { %v1446_v42 = vadd.f32 %v13935_v32, %v1445_v11  ;;  %v13955_v43 = vpop.f32.mrb[30].mxu0  ;;  %v11028_v31 = vpop.f32.mrb[46].mxu1 }
 0x2f6   : > { %v9718_v30 = vmul.f32 -1.442695, %v1454_v41  ;;  %v1457_v14 = vadd.f32 %v11028_v31, %v13935_v32  ;;  %v13958_v15 = vpop.f32.mrb[31].mxu0  ;;  %v1448_v16 = vpop.f32.mrb[47].mxu1 }
 0x2f7   : > { %v9716_v17 = vmul.f32 -1.442695, %v1446_v42  ;;  %v1449_v39 = vadd.f32 %v13935_v32, %v1448_v16 }
 0x2f8   : > { %12023 = vpow2.f32 %v9718_v30  ;;  %v9719_v52 = vmul.f32 -1.442695, %v1457_v14 }
 0x2f9   : > { %12025 = vpow2.f32 %v9716_v17  ;;  %v9717_v20 = vmul.f32 -1.442695, %v1449_v39 }
 0x2fa   : > { %v12016_v22 = vpop.eup %12015  ;;  %12027 = vpow2.f32 %v9719_v52 }
 0x2fb   : > { %v12018_v23 = vpop.eup %12017  ;;  %v1542_v44 = vadd.f32 1.0, %v12016_v22  ;;  %12029 = vpow2.f32 %v9717_v20 }
 0x2fc   : > { %v12020_v61 = vpop.eup %12019  ;;  %v1540_v45 = vadd.f32 1.0, %v12018_v23  ;;  %v13961_v46 = vpop.f32.mrb[32].mxu0 }
 0x2fd   : > { %v11031_v13 = vpop.f32.mrb[48].mxu1  ;;  %v12022_v26 = vpop.eup %12021  ;;  %12031 = vrcp.f32 %v1542_v44  ;;  %v1543_v28 = vadd.f32 1.0, %v12020_v61 }
 0x2fe   : > { %v1470_v36 = vadd.f32 %v11031_v13, %v13935_v32  ;;  %v13964_v49 = vpop.f32.mrb[33].mxu0  ;;  %v1461_v50 = vpop.f32.mrb[49].mxu1  ;;  %12033 = vrcp.f32 %v1540_v45  ;;  %v1541_v38 = vadd.f32 1.0, %v12022_v26 }
 0x2ff   : > { %v1462_v51 = vadd.f32 %v13935_v32, %v1461_v50  ;;  %v13967_v48 = vpop.f32.mrb[34].mxu0  ;;  %v11032_v4 = vpop.f32.mrb[50].mxu1  ;;  %12035 = vrcp.f32 %v1543_v28 }
 0x300   : > { %v9722_v5 = vmul.f32 -1.442695, %v1470_v36  ;;  %v1473_v53 = vadd.f32 %v11032_v4, %v13935_v32  ;;  %v13970_v54 = vpop.f32.mrb[35].mxu0  ;;  %v1464_v55 = vpop.f32.mrb[51].mxu1  ;;  %12037 = vrcp.f32 %v1541_v38  ;;  %v1341_v38 = vadd.f32 %v13949_v7, %v13976_v24 }
 0x301   : > { %v9720_v12 = vmul.f32 -1.442695, %v1462_v51  ;;  %v1465_v18 = vadd.f32 %v13935_v32, %v1464_v55 }
 0x302   : > { %12039 = vpow2.f32 %v9722_v5  ;;  %v9723_v19 = vmul.f32 -1.442695, %v1473_v53  ;;  %v12024_v56 = vpop.eup %12023  ;;  %v1333_v5 = vadd.f32 %v13976_v24, %v13952_v10  ;;  %v1336_v10 = vadd.f32 %v13976_v24, %v13958_v15 }
 0x303   : > { %12041 = vpow2.f32 %v9720_v12  ;;  %v9721_v57 = vmul.f32 -1.442695, %v1465_v18  ;;  %v12026_v58 = vpop.eup %12025  ;;  %v1546_v9 = vadd.f32 1.0, %v12024_v56  ;;  %v1344_v12 = vadd.f32 %v13955_v43, %v13976_v24  ;;  %v13424_v43 = vld [vmem:[%s17467_s1 + $0x8] sm:$0xff]  }
 0x304   : > { %12043 = vpow2.f32 %v9723_v19  ;;  %v12028_v29 = vpop.eup %12027  ;;  %v1544_v60 = vadd.f32 1.0, %v12026_v58 }
 0x305   : > { %12045 = vpow2.f32 %v9721_v57  ;;  %v12030_v63 = vpop.eup %12029  ;;  %v1547_v0 = vadd.f32 1.0, %v12028_v29  ;;  %v13978_v1 = vpop.f32.mrb[36].mxu0 }
 0x306   : > { %12047 = vrcp.f32 %v1546_v9  ;;  %v11035_v33 = vpop.f32.mrb[52].mxu1  ;;  %v1545_v3 = vadd.f32 1.0, %v12030_v63  ;;  %v13983_v35 = vpop.f32.mrb[37].mxu0 }
 0x307   : > { %12049 = vrcp.f32 %v1544_v60  ;;  %v1486_v37 = vadd.f32 %v11035_v33, %v13935_v32  ;;  %v1477_v6 = vpop.f32.mrb[53].mxu1  ;;  %v12032_v25 = vpop.eup %12031 }
 0x308   : > { %12051 = vrcp.f32 %v1547_v0  ;;  %v1478_v27 = vadd.f32 %v13935_v32, %v1477_v6  ;;  %v13988_v8 = vpop.f32.mrb[38].mxu0  ;;  %v11036_v41 = vpop.f32.mrb[54].mxu1  ;;  %v1590_v42 = vmul.f32 %v12032_v25, %v1325_v47  ;;  %v1357_v47 = vadd.f32 %v13961_v46, %v13976_v24 }
 0x309   : > { %v12034_v11 = vpop.eup %12033  ;;  %12053 = vrcp.f32 %v1545_v3  ;;  %v9726_v31 = vmul.f32 -1.442695, %v1486_v37  ;;  %v13992_v30 = vpop.f32.mrb[39].mxu0  ;;  %v1489_v39 = vadd.f32 %v11036_v41, %v13935_v32  ;;  %v1349_v37 = vadd.f32 %v13976_v24, %v13964_v49 }
 0x30a   : > { %v1480_v14 = vpop.f32.mrb[55].mxu1  ;;  %v12036_v16 = vpop.eup %12035  ;;  %v9724_v17 = vmul.f32 -1.442695, %v1478_v27  ;;  %v1588_v23 = vmul.f32 %v12034_v11, %v1317_v40  ;;  %v1360_v40 = vadd.f32 %v13967_v48, %v13976_v24  ;;  %v1352_v41 = vadd.f32 %v13976_v24, %v13970_v54 }
 0x30b   : > { %v12038_v52 = vpop.eup %12037  ;;  %v1591_v20 = vmul.f32 %v12036_v16, %v1328_v62  ;;  %12055 = vpow2.f32 %v9726_v31  ;;  %v1481_v22 = vadd.f32 %v13935_v32, %v1480_v14  ;;  %v9727_v2 = vmul.f32 -1.442695, %v1489_v39 }
 0x30c   : > { %v12040_v44 = vpop.eup %12039  ;;  %12057 = vpow2.f32 %v9724_v17  ;;  %v1589_v61 = vmul.f32 %v12038_v52, %v1320_v21  ;;  %v1373_v17 = vadd.f32 %v13978_v1, %v13976_v24  ;;  %v1365_v54 = vadd.f32 %v13976_v24, %v13983_v35  ;;  %v11845_v35 = vld [vmem:[%s17475_s9] sm:$0xff]  }
 0x30d   : > { %v12042_v45 = vpop.eup %12041  ;;  %v1550_v13 = vadd.f32 1.0, %v12040_v44  ;;  %v1617_v26 = vpack.c.bf16 %v1591_v20, %v1590_v42  ;;  %12059 = vpow2.f32 %v9727_v2  ;;  %v9725_v4 = vmul.f32 -1.442695, %v1481_v22  ;;  %11077 = vmatprep.subr.bf16.mxu0 %v11845_v35 }
 0x30e   : > { %v12044_v28 = vpop.eup %12043  ;;  %v1548_v36 = vadd.f32 1.0, %v12042_v45  ;;  %v1616_v34 = vpack.c.bf16 %v1589_v61, %v1588_v23  ;;  %v1376_v20 = vadd.f32 %v13988_v8, %v13976_v24  ;;  %v1368_v2 = vadd.f32 %v13976_v24, %v13992_v30  ;;  %v11846_v24 = vld [vmem:[%s17475_s9 + $0x8] sm:$0xff]   ;;  %v14057_v8 = vld [vmem:[%s17468_s2] sm:$0xff]  }
 0x30f   : > { %v12046_v50 = vpop.eup %12045  ;;  %12061 = vrcp.f32 %v1550_v13  ;;  %v1551_v51 = vadd.f32 1.0, %v12044_v28  ;;  %v14063_v30 = vld [vmem:[%s17474_s8 + $0x1] ss:$0 sm:$0xff] }
 0x310   : > { %v12048_v32 = vpop.eup %12047  ;;  %12063 = vrcp.f32 %v1548_v36  ;;  %v1549_v53 = vadd.f32 1.0, %v12046_v50  ;;  %11041 = vmatprep.mubr.msk.bf16.mxu0 %vm495_vm0, %v1616_v34  ;;  %11061 = vmatprep.mubr.msk.bf16.mxu1 %vm495_vm0, %v1616_v34 }
 0x311   : > { %v12050_v55 = vpop.eup %12049  ;;  %12065 = vrcp.f32 %v1551_v51  ;;  %11042 = vmatmul.mubr.msk.bf16.vlgmr.msra.gmra.mrb[40].mxu0 %vm495_vm0, %v1617_v26  ;;  %11062 = vmatmul.mubr.msk.bf16.vlgmr.msra.gmra.mrb[56].mxu1 %vm495_vm0, %v1617_v26  ;;  %v1594_v7 = vmul.f32 %v12048_v32, %v1341_v38 }
 0x312   : > { %v12052_v18 = vpop.eup %12051  ;;  %12067 = vrcp.f32 %v1549_v53  ;;  %v1592_v19 = vmul.f32 %v12050_v55, %v1333_v5  ;;  %11098 = vmatpush3.bf16.msra.mxu1 %v13926_v59  ;;  %v14017_v59 = vld [vmem:[%s17467_s1 + $0x10] sm:$0xff]   ;;  %11078 = vmatpush3.bf16.msra.mxu0 %v11845_v35 }
 0x313   : > { %v12054_v56 = vpop.eup %12053  ;;  %12069 = vpow2.f32 %v9725_v4  ;;  %v1595_v57 = vmul.f32 %v12052_v18, %v1344_v12  ;;  %11099 = vmatprep.subr.bf16.mxu1 %v13424_v43  ;;  %11079 = vmatprep.subr.bf16.mxu0 %v11846_v24 }
 0x314   : > { %v1593_v58 = vmul.f32 %v12054_v56, %v1336_v10 }
 0x315   : > { %v12056_v9 = vpop.eup %12055  ;;  %v1619_v29 = vpack.c.bf16 %v1595_v57, %v1594_v7 }
 0x316   : > { %v12058_v60 = vpop.eup %12057  ;;  %v1554_v63 = vadd.f32 1.0, %v12056_v9  ;;  %v1618_v0 = vpack.c.bf16 %v1593_v58, %v1592_v19  ;;  %11100 = vmatpush3.bf16.msra.mxu1 %v13424_v43  ;;  %11080 = vmatpush3.bf16.msra.mxu0 %v11846_v24 }
 0x317   : > { %v1552_v15 = vadd.f32 1.0, %v12058_v60  ;;  %11137 = vmatprep.subr.bf16.mxu1 %v14017_v59  ;;  %v12060_v33 = vpop.eup %12059  ;;  %11117 = vmatprep.subr.bf16.mxu0 %v14057_v8 }
 0x318   : > { %12071 = vrcp.f32 %v1554_v63  ;;  %11045 = vmatprep.mubr.msk.bf16.mxu0 %vm495_vm0, %v1618_v0  ;;  %11065 = vmatprep.mubr.msk.bf16.mxu1 %vm495_vm0, %v1618_v0  ;;  %v1555_v6 = vadd.f32 1.0, %v12060_v33 }
 0x319   : > { %v12062_v3 = vpop.eup %12061  ;;  %12073 = vrcp.f32 %v1552_v15  ;;  %11046 = vmatmul.mubr.msk.bf16.gmra.mrb[44].mxu0 %vm495_vm0, %v1619_v29  ;;  %11066 = vmatmul.mubr.msk.bf16.gmra.mrb[60].mxu1 %vm495_vm0, %v1619_v29 }
 0x31a   : > { %v12064_v25 = vpop.eup %12063  ;;  %v1598_v46 = vmul.f32 %v12062_v3, %v1357_v47  ;;  %12075 = vrcp.f32 %v1555_v6 }
 0x31b   : > { %v12066_v27 = vpop.eup %12065  ;;  %v1596_v11 = vmul.f32 %v12064_v25, %v1349_v37 }
 0x31c   : > { %v12068_v42 = vpop.eup %12067  ;;  %v1599_v62 = vmul.f32 %v12066_v27, %v1360_v40 }
 0x31d   : > { %v12070_v49 = vpop.eup %12069  ;;  %v1597_v31 = vmul.f32 %v12068_v42, %v1352_v41 }
 0x31e   : > { %v1553_v14 = vadd.f32 1.0, %v12070_v49  ;;  %v1621_v16 = vpack.c.bf16 %v1599_v62, %v1598_v46 }
 0x31f   : > { %v1620_v21 = vpack.c.bf16 %v1597_v31, %v1596_v11 }
 0x320   : > { %12077 = vrcp.f32 %v1553_v14 }
 0x321   : > { %11049 = vmatprep.mubr.msk.bf16.mxu0 %vm495_vm0, %v1620_v21  ;;  %11069 = vmatprep.mubr.msk.bf16.mxu1 %vm495_vm0, %v1620_v21 }
 0x322   : > { %v12072_v48 = vpop.eup %12071  ;;  %11050 = vmatmul.mubr.msk.bf16.gmra.mrb[48].mxu0 %vm495_vm0, %v1621_v16  ;;  %11070 = vmatmul.mubr.msk.bf16.gmra.mrb[64].mxu1 %vm495_vm0, %v1621_v16 }
 0x323   : > { %v12074_v39 = vpop.eup %12073  ;;  %v1602_v52 = vmul.f32 %v12072_v48, %v1373_v17 }
 0x324   : > { %v1600_v22 = vmul.f32 %v12074_v39, %v1365_v54  ;;  %v12076_v23 = vpop.eup %12075 }
 0x325   : > { %v1603_v1 = vmul.f32 %v12076_v23, %v1376_v20 }
 0x327   : > { %v1623_v44 = vpack.c.bf16 %v1603_v1, %v1602_v52 }
 0x32a   : > { %v12078_v61 = vpop.eup %12077 }
 0x32b   : > { %v1601_v45 = vmul.f32 %v12078_v61, %v1368_v2 }
 0x32d   : > { %v1622_v13 = vpack.c.bf16 %v1601_v45, %v1600_v22 }
 0x32f   : > { %11053 = vmatprep.mubr.msk.bf16.mxu0 %vm495_vm0, %v1622_v13  ;;  %11073 = vmatprep.mubr.msk.bf16.mxu1 %vm495_vm0, %v1622_v13  ;;  %v14104_v13 = vld [vmem:[%s17473_s7 + $0x1] ss:$0 sm:$0xff] }
 0x330   : > { %11054 = vmatmul.mubr.msk.bf16.gmra.mrb[52].mxu0 %vm495_vm0, %v1623_v44  ;;  %11074 = vmatmul.mubr.msk.bf16.gmra.mrb[68].mxu1 %vm495_vm0, %v1623_v44 }
 0x3e4   : > { %v14065_v26 = vpop.f32.mrb[40].mxu0  ;;  %v11063_v28 = vpop.f32.mrb[56].mxu1 }
 0x3e5   : > { %v1820_v36 = vadd.f32 %v11063_v28, %v14063_v30  ;;  %v14068_v34 = vpop.f32.mrb[41].mxu0  ;;  %v1811_v50 = vpop.f32.mrb[57].mxu1 }
 0x3e6   : > { %v1812_v38 = vadd.f32 %v14063_v30, %v1811_v50  ;;  %v14071_v51 = vpop.f32.mrb[42].mxu0  ;;  %v11064_v4 = vpop.f32.mrb[58].mxu1 }
 0x3e7   : > { %v9760_v32 = vmul.f32 -1.442695, %v1820_v36  ;;  %v1823_v5 = vadd.f32 %v11064_v4, %v14063_v30  ;;  %v14074_v53 = vpop.f32.mrb[43].mxu0  ;;  %v1814_v55 = vpop.f32.mrb[59].mxu1 }
 0x3e8   : > { %v9758_v12 = vmul.f32 -1.442695, %v1812_v38  ;;  %v1815_v7 = vadd.f32 %v14063_v30, %v1814_v55  ;;  %v1707_v38 = vadd.f32 %v14065_v26, %v14104_v13 }
 0x3e9   : > { %12079 = vpow2.f32 %v9760_v32  ;;  %v9761_v18 = vmul.f32 -1.442695, %v1823_v5  ;;  %v1699_v5 = vadd.f32 %v14104_v13, %v14068_v34 }
 0x3ea   : > { %12081 = vpow2.f32 %v9758_v12  ;;  %v9759_v10 = vmul.f32 -1.442695, %v1815_v7  ;;  %v1710_v7 = vadd.f32 %v14071_v51, %v14104_v13 }
 0x3eb   : > { %12083 = vpow2.f32 %v9761_v18 }
 0x3ec   : > { %12085 = vpow2.f32 %v9759_v10  ;;  %v14077_v19 = vpop.f32.mrb[44].mxu0  ;;  %v11067_v56 = vpop.f32.mrb[60].mxu1  ;;  %v1702_v10 = vadd.f32 %v14104_v13, %v14074_v53 }
 0x3ed   : > { %v1836_v57 = vadd.f32 %v11067_v56, %v14063_v30  ;;  %v14080_v43 = vpop.f32.mrb[45].mxu0  ;;  %v1827_v58 = vpop.f32.mrb[61].mxu1  ;;  %v1723_v53 = vadd.f32 %v14077_v19, %v14104_v13 }
 0x3ee   : > { %v1828_v9 = vadd.f32 %v14063_v30, %v1827_v58  ;;  %v14083_v29 = vpop.f32.mrb[46].mxu0  ;;  %v11068_v60 = vpop.f32.mrb[62].mxu1 }
 0x3ef   : > { %v9764_v63 = vmul.f32 -1.442695, %v1836_v57  ;;  %v1839_v0 = vadd.f32 %v11068_v60, %v14063_v30  ;;  %v14086_v15 = vpop.f32.mrb[47].mxu0  ;;  %v1830_v33 = vpop.f32.mrb[63].mxu1 }
 0x3f0   : > { %v9762_v47 = vmul.f32 -1.442695, %v1828_v9  ;;  %v1831_v3 = vadd.f32 %v14063_v30, %v1830_v33 }
 0x3f1   : > { %12087 = vpow2.f32 %v9764_v63  ;;  %v9765_v37 = vmul.f32 -1.442695, %v1839_v0 }
 0x3f2   : > { %12089 = vpow2.f32 %v9762_v47  ;;  %v9763_v6 = vmul.f32 -1.442695, %v1831_v3 }
 0x3f3   : > { %v12080_v25 = vpop.eup %12079  ;;  %12091 = vpow2.f32 %v9765_v37 }
 0x3f4   : > { %v12082_v40 = vpop.eup %12081  ;;  %v1924_v46 = vadd.f32 1.0, %v12080_v25  ;;  %12093 = vpow2.f32 %v9763_v6 }
 0x3f5   : > { %v12084_v27 = vpop.eup %12083  ;;  %v1922_v41 = vadd.f32 1.0, %v12082_v40  ;;  %v14089_v11 = vpop.f32.mrb[48].mxu0  ;;  %v1715_v40 = vadd.f32 %v14104_v13, %v14080_v43 }
 0x3f6   : > { %v11071_v42 = vpop.f32.mrb[64].mxu1  ;;  %v12086_v62 = vpop.eup %12085  ;;  %12095 = vrcp.f32 %v1924_v46  ;;  %v1925_v49 = vadd.f32 1.0, %v12084_v27  ;;  %v1726_v46 = vadd.f32 %v14083_v29, %v14104_v13 }
 0x3f7   : > { %v1852_v31 = vadd.f32 %v11071_v42, %v14063_v30  ;;  %v14092_v14 = vpop.f32.mrb[49].mxu0  ;;  %v1843_v16 = vpop.f32.mrb[65].mxu1  ;;  %12097 = vrcp.f32 %v1922_v41  ;;  %v1923_v21 = vadd.f32 1.0, %v12086_v62 }
 0x3f8   : > { %v1844_v17 = vadd.f32 %v14063_v30, %v1843_v16  ;;  %v14095_v48 = vpop.f32.mrb[50].mxu0  ;;  %v11072_v54 = vpop.f32.mrb[66].mxu1  ;;  %12099 = vrcp.f32 %v1925_v49  ;;  %v1718_v49 = vadd.f32 %v14104_v13, %v14086_v15 }
 0x3f9   : > { %v9768_v39 = vmul.f32 -1.442695, %v1852_v31  ;;  %v1855_v52 = vadd.f32 %v11072_v54, %v14063_v30  ;;  %v14098_v20 = vpop.f32.mrb[51].mxu0  ;;  %v1846_v22 = vpop.f32.mrb[67].mxu1  ;;  %12101 = vrcp.f32 %v1923_v21 }
 0x3fa   : > { %v9766_v23 = vmul.f32 -1.442695, %v1844_v17  ;;  %v1847_v1 = vadd.f32 %v14063_v30, %v1846_v22 }
 0x3fb   : > { %12103 = vpow2.f32 %v9768_v39  ;;  %v9769_v44 = vmul.f32 -1.442695, %v1855_v52  ;;  %v12088_v2 = vpop.eup %12087 }
 0x3fc   : > { %12105 = vpow2.f32 %v9766_v23  ;;  %v9767_v61 = vmul.f32 -1.442695, %v1847_v1  ;;  %v12090_v45 = vpop.eup %12089  ;;  %v1928_v35 = vadd.f32 1.0, %v12088_v2 }
 0x3fd   : > { %12107 = vpow2.f32 %v9769_v44  ;;  %v12092_v24 = vpop.eup %12091  ;;  %v1926_v28 = vadd.f32 1.0, %v12090_v45 }
 0x3fe   : > { %12109 = vpow2.f32 %v9767_v61  ;;  %v12094_v36 = vpop.eup %12093  ;;  %v1929_v50 = vadd.f32 1.0, %v12092_v24  ;;  %v1739_v24 = vadd.f32 %v14089_v11, %v14104_v13  ;;  %v14176_v11 = vld [vmem:[%s17468_s2 + $0x10] sm:$0xff]  }
 0x3ff   : > { %12111 = vrcp.f32 %v1928_v35  ;;  %v1927_v4 = vadd.f32 1.0, %v12094_v36  ;;  %v13427_v35 = vld [vmem:[%s17468_s2 + $0x8] sm:$0xff]   ;;  %v1731_v36 = vadd.f32 %v14104_v13, %v14092_v14  ;;  %v1734_v14 = vadd.f32 %v14104_v13, %v14098_v20 }
 0x400   : > { %12113 = vrcp.f32 %v1926_v28  ;;  %v12096_v32 = vpop.eup %12095 }
 0x401   : > { %12115 = vrcp.f32 %v1929_v50  ;;  %v12098_v55 = vpop.eup %12097  ;;  %v14110_v12 = vmul.f32 %v12096_v32, %v1707_v38  ;;  %v1742_v50 = vadd.f32 %v14095_v48, %v14104_v13 }
 0x402   : > { %12117 = vrcp.f32 %v1927_v4  ;;  %v12100_v18 = vpop.eup %12099  ;;  %v14116_v56 = vmul.f32 %v12098_v55, %v1699_v5 }
 0x403   : > { %v12102_v26 = vpop.eup %12101  ;;  %v14118_v57 = vmul.f32 %v12100_v18, %v1710_v7  ;;  %v14120_v58 = vpop.f32.mrb[52].mxu0 }
 0x404   : > { %v11075_v34 = vpop.f32.mrb[68].mxu1  ;;  %v14123_v63 = vpop.f32.mrb[53].mxu0  ;;  %v14125_v51 = vmul.f32 %v12102_v26, %v1702_v10 }
 0x405   : > { %v12104_v9 = vpop.eup %12103  ;;  %v1868_v60 = vadd.f32 %v11075_v34, %v14063_v30  ;;  %v1859_v0 = vpop.f32.mrb[69].mxu1  ;;  %v2003_v1 = vpack.c.bf16 %v14118_v57, %v14110_v12 }
 0x406   : > { %v12106_v33 = vpop.eup %12105  ;;  %v1932_v47 = vadd.f32 1.0, %v12104_v9  ;;  %v1860_v3 = vadd.f32 %v14063_v30, %v1859_v0  ;;  %v14130_v37 = vpop.f32.mrb[54].mxu0  ;;  %v2002_v52 = vpack.c.bf16 %v14125_v51, %v14116_v56 }
 0x407   : > { %v11076_v6 = vpop.f32.mrb[70].mxu1  ;;  %v12108_v25 = vpop.eup %12107  ;;  %v1930_v27 = vadd.f32 1.0, %v12106_v33  ;;  %v9772_v16 = vmul.f32 -1.442695, %v1868_v60 }
 0x408   : > { %v1871_v41 = vadd.f32 %v11076_v6, %v14063_v30  ;;  %v14137_v42 = vpop.f32.mrb[55].mxu0  ;;  %v1862_v62 = vpop.f32.mrb[71].mxu1  ;;  %12119 = vrcp.f32 %v1932_v47  ;;  %v1933_v31 = vadd.f32 1.0, %v12108_v25  ;;  %v9770_v43 = vmul.f32 -1.442695, %v1860_v3  ;;  %11081 = vmatprep.mubr.msk.bf16.mxu0 %vm495_vm0, %v2002_v52 }
 0x409   : > { %v12110_v19 = vpop.eup %12109  ;;  %12121 = vrcp.f32 %v1930_v27  ;;  %v1863_v54 = vadd.f32 %v14063_v30, %v1862_v62  ;;  %11082 = vmatmul.mubr.msk.bf16.vlgmr.msra.gmra.mrb[56].mxu0 %vm495_vm0, %v2003_v1  ;;  %v1755_v47 = vadd.f32 %v14120_v58, %v14104_v13  ;;  %v1747_v6 = vadd.f32 %v14104_v13, %v14123_v63 }
 0x40a   : > { %v12112_v21 = vpop.eup %12111  ;;  %v1931_v17 = vadd.f32 1.0, %v12110_v19  ;;  %12123 = vrcp.f32 %v1933_v31  ;;  %v9773_v39 = vmul.f32 -1.442695, %v1871_v41  ;;  %11118 = vmatpush3.bf16.msra.mxu0 %v14057_v8  ;;  %v1750_v41 = vadd.f32 %v14104_v13, %v14137_v42 }
 0x40b   : > { %v12114_v29 = vpop.eup %12113  ;;  %v14144_v22 = vmul.f32 %v12112_v21, %v1723_v53  ;;  %v9771_v15 = vmul.f32 -1.442695, %v1863_v54  ;;  %11119 = vmatprep.subr.bf16.mxu0 %v13427_v35 }
 0x40c   : > { %v12116_v23 = vpop.eup %12115  ;;  %12125 = vrcp.f32 %v1931_v17  ;;  %v14148_v44 = vmul.f32 %v12114_v29, %v1715_v40  ;;  %v1758_v40 = vadd.f32 %v14130_v37, %v14104_v13  ;;  %v9774_v13 = vld [vmem:[%s17476_s10] ss:$0 sm:$0xff] }
 0x40d   : > { %v12118_v2 = vpop.eup %12117  ;;  %12127 = vpow2.f32 %v9772_v16  ;;  %v14151_v30 = vmul.f32 %v12116_v23, %v1726_v46 }
 0x40e   : > { %12129 = vpow2.f32 %v9770_v43  ;;  %v14154_v61 = vmul.f32 %v12118_v2, %v1718_v49  ;;  %11120 = vmatpush3.bf16.msra.mxu0 %v13427_v35 }
 0x40f   : > { %12131 = vpow2.f32 %v9773_v39  ;;  %v2005_v38 = vpack.c.bf16 %v14151_v30, %v14144_v22  ;;  %11157 = vmatprep.subr.bf16.mxu0 %v14176_v11 }
 0x410   : > { %12133 = vpow2.f32 %v9771_v15  ;;  %v2004_v45 = vpack.c.bf16 %v14154_v61, %v14148_v44 }
 0x412   : > { %11085 = vmatprep.mubr.msk.bf16.mxu0 %vm495_vm0, %v2004_v45  ;;  %v12120_v28 = vpop.eup %12119 }
 0x413   : > { %v12122_v8 = vpop.eup %12121  ;;  %v14171_v4 = vmul.f32 %v12120_v28, %v1739_v24  ;;  %11086 = vmatmul.mubr.msk.bf16.gmra.mrb[60].mxu0 %vm495_vm0, %v2005_v38 }
 0x414   : > { %v12124_v32 = vpop.eup %12123  ;;  %v14181_v5 = vmul.f32 %v12122_v8, %v1731_v36 }
 0x415   : > { %v14184_v48 = vmul.f32 %v12124_v32, %v1742_v50 }
 0x416   : > { %v12126_v55 = vpop.eup %12125 }
 0x417   : > { %v12128_v7 = vpop.eup %12127  ;;  %v14186_v18 = vmul.f32 %v12126_v55, %v1734_v14  ;;  %v2007_v53 = vpack.c.bf16 %v14184_v48, %v14171_v4 }
 0x418   : > { %v12130_v10 = vpop.eup %12129  ;;  %v1936_v26 = vadd.f32 1.0, %v12128_v7 }
 0x419   : > { %17532 = vst [vmem:[#allocation2_spill] sm:$0xff] %v14186_v18  ;;  %v12132_v34 = vpop.eup %12131  ;;  %v1934_v9 = vadd.f32 1.0, %v12130_v10  ;;  %v2006_v60 = vpack.c.bf16 %v14186_v18, %v14181_v5 }
 0x41a   : > { %v12134_v0 = vpop.eup %12133  ;;  %12135 = vrcp.f32 %v1936_v26  ;;  %v1937_v20 = vadd.f32 1.0, %v12132_v34 }
 0x41b   : > { %12137 = vrcp.f32 %v1934_v9  ;;  %v1935_v33 = vadd.f32 1.0, %v12134_v0  ;;  %11089 = vmatprep.mubr.msk.bf16.mxu0 %vm495_vm0, %v2006_v60 }
 0x41c   : > { %12139 = vrcp.f32 %v1937_v20  ;;  %11090 = vmatmul.mubr.msk.bf16.gmra.mrb[64].mxu0 %vm495_vm0, %v2007_v53 }
 0x41d   : > { %12141 = vrcp.f32 %v1935_v33 }
 0x424   : > { %v12136_v3 = vpop.eup %12135 }
 0x425   : > { %v12138_v25 = vpop.eup %12137  ;;  %v14200_v46 = vmul.f32 %v12136_v3, %v1755_v47 }
 0x426   : > { %v12140_v27 = vpop.eup %12139  ;;  %v14204_v62 = vmul.f32 %v12138_v25, %v1747_v6 }
 0x427   : > { %17533 = vst [vmem:[#allocation3_spill] sm:$0xff] %v14200_v46  ;;  %v12142_v19 = vpop.eup %12141  ;;  %v14206_v49 = vmul.f32 %v12140_v27, %v1758_v40 }
 0x428   : > { %17534 = vst [vmem:[#allocation4_spill] sm:$0xff] %v14204_v62  ;;  %v14208_v58 = vmul.f32 %v12142_v19, %v1750_v41 }
 0x429   : > { %17535 = vst [vmem:[#allocation5_spill] sm:$0xff] %v14206_v49  ;;  %v2009_v31 = vpack.c.bf16 %v14206_v49, %v14200_v46 }
 0x42a   : > { %17536 = vst [vmem:[#allocation6_spill] sm:$0xff] %v14208_v58  ;;  %v2008_v63 = vpack.c.bf16 %v14208_v58, %v14204_v62 }
 0x42c   : > { %11093 = vmatprep.mubr.msk.bf16.mxu0 %vm495_vm0, %v2008_v63 }
 0x42d   : > { %11094 = vmatmul.mubr.msk.bf16.gmra.mrb[68].mxu0 %vm495_vm0, %v2009_v31 }
 0x4dc   : > { %v11083_v37 = vpop.f32.mrb[56].mxu0 }
 0x4dd   : > { %v2089_v42 = vpop.f32.mrb[57].mxu0  ;;  %v14219_v16 = vadd.f32 %v11083_v37, %v9774_v13 }
 0x4de   : > { %v11084_v21 = vpop.f32.mrb[58].mxu0  ;;  %v14221_v17 = vadd.f32 %v9774_v13, %v2089_v42 }
 0x4df   : > { %v2092_v43 = vpop.f32.mrb[59].mxu0  ;;  %v2158_v54 = vsel %vm495_vm0, %v14219_v16, -inf  ;;  %v14225_v29 = vadd.f32 %v11084_v21, %v9774_v13 }
 0x4e0   : > { %2159 = vmax.xlane.f32.xlu1 %v2158_v54  ;;  %v2152_v39 = vsel %vm495_vm0, %v14221_v17, -inf  ;;  %v14229_v52 = vadd.f32 %v9774_v13, %v2092_v43 }
 0x4e1   : > { %2153 = vmax.xlane.f32.xlu0 %v2152_v39  ;;  %v2161_v23 = vsel %vm495_vm0, %v14225_v29, -inf }
 0x4e2   : > { %v2155_v1 = vsel %vm495_vm0, %v14229_v52, -inf }
 0x4e4   : > { %2162 = vmax.xlane.f32.xlu1 %v2161_v23 }
 0x4e5   : > { %2156 = vmax.xlane.f32.xlu0 %v2155_v1 }
 0x4e6   : > { %v11087_v15 = vpop.f32.mrb[60].mxu0 }
 0x4e7   : > { %v2105_v2 = vpop.f32.mrb[61].mxu0  ;;  %v14241_v8 = vadd.f32 %v11087_v15, %v9774_v13 }
 0x4e8   : > { %v11088_v45 = vpop.f32.mrb[62].mxu0  ;;  %v14235_v35 = vadd.f32 %v9774_v13, %v2105_v2 }
 0x4e9   : > { %v2108_v24 = vpop.f32.mrb[63].mxu0  ;;  %v14245_v38 = vadd.f32 %v11088_v45, %v9774_v13  ;;  %v2170_v14 = vsel %vm495_vm0, %v14241_v8, -inf }
 0x4ea   : > { %v2164_v28 = vsel %vm495_vm0, %v14235_v35, -inf  ;;  %v14239_v36 = vadd.f32 %v9774_v13, %v2108_v24 }
 0x4eb   : > { %2165 = vmax.xlane.f32.xlu0 %v2164_v28  ;;  %v2173_v10 = vsel %vm495_vm0, %v14245_v38, -inf }
 0x4ec   : > { %v2167_v50 = vsel %vm495_vm0, %v14239_v36, -inf }
 0x4ed   : > { %2168 = vmax.xlane.f32.xlu1 %v2167_v50 }
 0x4ef   : > { %v11091_v32 = vpop.f32.mrb[64].mxu0  ;;  %2171 = vmax.xlane.f32.xlu0 %v2170_v14 }
 0x4f0   : > { %v2121_v55 = vpop.f32.mrb[65].mxu0  ;;  %v14257_v0 = vadd.f32 %v11091_v32, %v9774_v13 }
 0x4f1   : > { %v11092_v7 = vpop.f32.mrb[66].mxu0  ;;  %v14251_v26 = vadd.f32 %v9774_v13, %v2121_v55  ;;  %2174 = vmax.xlane.f32.xlu1 %v2173_v10 }
 0x4f2   : > { %v2124_v34 = vpop.f32.mrb[67].mxu0  ;;  %v14261_v33 = vadd.f32 %v11092_v7, %v9774_v13  ;;  %v2182_v53 = vsel %vm495_vm0, %v14257_v0, -inf }
 0x4f3   : > { %v2176_v9 = vsel %vm495_vm0, %v14251_v26, -inf  ;;  %v14255_v60 = vadd.f32 %v9774_v13, %v2124_v34 }
 0x4f4   : > { %2177 = vmax.xlane.f32.xlu0 %v2176_v9  ;;  %v2185_v47 = vsel %vm495_vm0, %v14261_v33, -inf }
 0x4f5   : > { %v2179_v20 = vsel %vm495_vm0, %v14255_v60, -inf }
 0x4f6   : > { %2180 = vmax.xlane.f32.xlu1 %v2179_v20 }
 0x4f8   : > { %2183 = vmax.xlane.f32.xlu0 %v2182_v53 }
 0x4fa   : > { %2186 = vmax.xlane.f32.xlu1 %v2185_v47 }
 0x500   : > { %v11095_v3 = vpop.f32.mrb[68].mxu0 }
 0x501   : > { %v2137_v6 = vpop.f32.mrb[69].mxu0  ;;  %v14273_v63 = vadd.f32 %v11095_v3, %v9774_v13 }
 0x502   : > { %v11096_v25 = vpop.f32.mrb[70].mxu0  ;;  %v14267_v40 = vadd.f32 %v9774_v13, %v2137_v6 }
 0x503   : > { %v2140_v27 = vpop.f32.mrb[71].mxu0  ;;  %v14277_v37 = vadd.f32 %v11096_v25, %v9774_v13  ;;  %v2194_v42 = vsel %vm495_vm0, %v14273_v63, -inf }
 0x504   : > { %v2188_v41 = vsel %vm495_vm0, %v14267_v40, -inf  ;;  %v14271_v19 = vadd.f32 %v9774_v13, %v2140_v27 }
 0x505   : > { %2189 = vmax.xlane.f32.xlu0 %v2188_v41  ;;  %v2197_v21 = vsel %vm495_vm0, %v14277_v37, -inf }
 0x506   : > { %v2191_v31 = vsel %vm495_vm0, %v14271_v19, -inf }
 0x507   : > { %2192 = vmax.xlane.f32.xlu1 %v2191_v31 }
 0x509   : > { %2195 = vmax.xlane.f32.xlu0 %v2194_v42 }
 0x50b   : > { %2198 = vmax.xlane.f32.xlu1 %v2197_v21 }
 0x56d   : > { %v2160_v43 = vpop.xlane.xlu1 %2159 }
 0x56e   : > { %v2202_v54 = vsub.f32 %v14219_v16, %v2160_v43  ;;  %v2154_v39 = vpop.xlane.xlu0 %2153 }
 0x56f   : > { %v2200_v23 = vsub.f32 %v14221_v17, %v2154_v39 }
 0x570   : > { %v2220_v15 = vmul.f32 1.442695, %v2202_v54 }
 0x571   : > { %v2216_v1 = vmul.f32 1.442695, %v2200_v23  ;;  %v2163_v2 = vpop.xlane.xlu1 %2162 }
 0x572   : > { %v2203_v13 = vsub.f32 %v14225_v29, %v2163_v2  ;;  %v2157_v45 = vpop.xlane.xlu0 %2156 }
 0x573   : > { %12143 = vpow2.f32 %v2216_v1  ;;  %v2201_v24 = vsub.f32 %v14229_v52, %v2157_v45 }
 0x574   : > { %12145 = vpow2.f32 %v2220_v15  ;;  %v2222_v28 = vmul.f32 1.442695, %v2203_v13 }
 0x575   : > { %v2218_v50 = vmul.f32 1.442695, %v2201_v24 }
 0x577   : > { %12147 = vpow2.f32 %v2218_v50 }
 0x578   : > { %v2166_v32 = vpop.xlane.xlu0 %2165  ;;  %12149 = vpow2.f32 %v2222_v28 }
 0x579   : > { %v2204_v14 = vsub.f32 %v14235_v35, %v2166_v32 }
 0x57a   : > { %v2169_v16 = vpop.xlane.xlu1 %2168 }
 0x57b   : > { %v2224_v55 = vmul.f32 1.442695, %v2204_v14  ;;  %v2205_v17 = vsub.f32 %v14239_v36, %v2169_v16 }
 0x57c   : > { %v2172_v7 = vpop.xlane.xlu0 %2171 }
 0x57d   : > { %12151 = vpow2.f32 %v2224_v55  ;;  %v2226_v10 = vmul.f32 1.442695, %v2205_v17  ;;  %v2206_v29 = vsub.f32 %v14241_v8, %v2172_v7  ;;  %v14290_v9 = vpop.eup %12143 }
 0x57e   : > { %v2175_v34 = vpop.xlane.xlu1 %2174  ;;  %v2248_v35 = vsel %vm495_vm0, %v14290_v9, 0.0  ;;  %v14295_v47 = vpop.eup %12145 }
 0x57f   : > { %12153 = vpow2.f32 %v2226_v10  ;;  %v2228_v52 = vmul.f32 1.442695, %v2206_v29  ;;  %v2207_v20 = vsub.f32 %v14245_v38, %v2175_v34  ;;  %2249 = vadd.xlane.f32.xlu0 %v2248_v35  ;;  %v2254_v38 = vsel %vm495_vm0, %v14295_v47, 0.0 }
 0x581   : > { %v2178_v53 = vpop.xlane.xlu0 %2177  ;;  %12155 = vpow2.f32 %v2228_v52  ;;  %v2230_v36 = vmul.f32 1.442695, %v2207_v20  ;;  %v14298_v8 = vpop.eup %12147 }
 0x582   : > { %v2208_v3 = vsub.f32 %v14251_v26, %v2178_v53  ;;  %v2251_v31 = vsel %vm495_vm0, %v14298_v8, 0.0  ;;  %v14305_v42 = vpop.eup %12149 }
 0x583   : > { %v2181_v6 = vpop.xlane.xlu1 %2180  ;;  %12157 = vpow2.f32 %v2230_v36  ;;  %2255 = vadd.xlane.f32.xlu0 %v2254_v38  ;;  %2252 = vadd.xlane.f32.xlu1 %v2251_v31  ;;  %v2257_v23 = vsel %vm495_vm0, %v14305_v42, 0.0 }
 0x584   : > { %v2232_v25 = vmul.f32 1.442695, %v2208_v3  ;;  %v2209_v27 = vsub.f32 %v14255_v60, %v2181_v6 }
 0x585   : > { %v2184_v41 = vpop.xlane.xlu0 %2183 }
 0x586   : > { %12159 = vpow2.f32 %v2232_v25  ;;  %v2234_v21 = vmul.f32 1.442695, %v2209_v27  ;;  %v2210_v26 = vsub.f32 %v14257_v0, %v2184_v41 }
 0x587   : > { %v2187_v43 = vpop.xlane.xlu1 %2186  ;;  %v14308_v54 = vpop.eup %12151  ;;  %2258 = vadd.xlane.f32.xlu1 %v2257_v23 }
 0x588   : > { %12161 = vpow2.f32 %v2234_v21  ;;  %v2236_v60 = vmul.f32 1.442695, %v2210_v26  ;;  %v2211_v39 = vsub.f32 %v14261_v33, %v2187_v43  ;;  %v2260_v15 = vsel %vm495_vm0, %v14308_v54, 0.0 }
 0x589   : > { %v14315_v1 = vpop.eup %12153  ;;  %2261 = vadd.xlane.f32.xlu0 %v2260_v15 }
 0x58a   : > { %12163 = vpow2.f32 %v2236_v60  ;;  %v2238_v2 = vmul.f32 1.442695, %v2211_v39  ;;  %v2263_v13 = vsel %vm495_vm0, %v14315_v1, 0.0 }
 0x58b   : > { %v14317_v0 = vpop.eup %12155  ;;  %2264 = vadd.xlane.f32.xlu1 %v2263_v13 }
 0x58c   : > { %12165 = vpow2.f32 %v2238_v2  ;;  %v2266_v33 = vsel %vm495_vm0, %v14317_v0, 0.0 }
 0x58d   : > { %v14323_v45 = vpop.eup %12157  ;;  %2267 = vadd.xlane.f32.xlu0 %v2266_v33 }
 0x58e   : > { %v2269_v32 = vsel %vm495_vm0, %v14323_v45, 0.0 }
 0x58f   : > { %2270 = vadd.xlane.f32.xlu1 %v2269_v32 }
 0x590   : > { %v14325_v24 = vpop.eup %12159 }
 0x591   : > { %v2272_v14 = vsel %vm495_vm0, %v14325_v24, 0.0 }
 0x592   : > { %v2190_v28 = vpop.xlane.xlu0 %2189  ;;  %v14332_v16 = vpop.eup %12161  ;;  %2273 = vadd.xlane.f32.xlu0 %v2272_v14 }
 0x593   : > { %v2212_v50 = vsub.f32 %v14267_v40, %v2190_v28  ;;  %v2275_v40 = vsel %vm495_vm0, %v14332_v16, 0.0 }
 0x594   : > { %v2193_v55 = vpop.xlane.xlu1 %2192  ;;  %v14335_v10 = vpop.eup %12163  ;;  %2276 = vadd.xlane.f32.xlu1 %v2275_v40  ;;  %v13430_v40 = vld [vmem:[%s13641_s20 + $0x8] sm:$0xff] }
 0x595   : > { %v2240_v17 = vmul.f32 1.442695, %v2212_v50  ;;  %v2213_v7 = vsub.f32 %v14271_v19, %v2193_v55  ;;  %v2278_v20 = vsel %vm495_vm0, %v14335_v10, 0.0 }
 0x596   : > { %v2196_v29 = vpop.xlane.xlu0 %2195  ;;  %v14342_v53 = vpop.eup %12165  ;;  %2279 = vadd.xlane.f32.xlu0 %v2278_v20 }
 0x597   : > { %12167 = vpow2.f32 %v2240_v17  ;;  %v2242_v34 = vmul.f32 1.442695, %v2213_v7  ;;  %v2214_v52 = vsub.f32 %v14273_v63, %v2196_v29  ;;  %v2281_v6 = vsel %vm495_vm0, %v14342_v53, 0.0  ;;  %v13429_v7 = vld [vmem:[%s13641_s20] sm:$0xff] }
 0x598   : > { %v2199_v35 = vpop.xlane.xlu1 %2198  ;;  %2282 = vadd.xlane.f32.xlu1 %v2281_v6 }
 0x599   : > { %12169 = vpow2.f32 %v2242_v34  ;;  %v2244_v19 = vmul.f32 1.442695, %v2214_v52  ;;  %v2215_v36 = vsub.f32 %v14277_v37, %v2199_v35 }
 0x59b   : > { %12171 = vpow2.f32 %v2244_v19  ;;  %v2246_v3 = vmul.f32 1.442695, %v2215_v36  ;;  %v13431_v36 = vld [vmem:[%s13641_s20 + $0x10] sm:$0xff] }
 0x59d   : > { %12173 = vpow2.f32 %v2246_v3  ;;  %v13432_v3 = vld [vmem:[%s13641_s20 + $0x18] sm:$0xff] }
 0x5a1   : > { %v14347_v63 = vpop.eup %12167 }
 0x5a2   : > { %v2284_v25 = vsel %vm495_vm0, %v14347_v63, 0.0 }
 0x5a3   : > { %v14351_v27 = vpop.eup %12169  ;;  %2285 = vadd.xlane.f32.xlu0 %v2284_v25 }
 0x5a4   : > { %v2287_v41 = vsel %vm495_vm0, %v14351_v27, 0.0 }
 0x5a5   : > { %v14355_v38 = vpop.eup %12171  ;;  %2288 = vadd.xlane.f32.xlu1 %v2287_v41 }
 0x5a6   : > { %v2290_v37 = vsel %vm495_vm0, %v14355_v38, 0.0 }
 0x5a7   : > { %v14359_v31 = vpop.eup %12173  ;;  %2291 = vadd.xlane.f32.xlu0 %v2290_v37 }
 0x5a8   : > { %v2293_v21 = vsel %vm495_vm0, %v14359_v31, 0.0 }
 0x5a9   : > { %2294 = vadd.xlane.f32.xlu1 %v2293_v21 }
 0x60c   : > { %v2250_v26 = vpop.xlane.xlu0 %2249 }
 0x60d   : > { %12175 = vrcp.f32 %v2250_v26 }
 0x610   : > { %v2253_v43 = vpop.xlane.xlu1 %2252  ;;  %v2256_v60 = vpop.xlane.xlu0 %2255 }
 0x611   : > { %12177 = vrcp.f32 %v2253_v43  ;;  %v13433_v43 = vld [vmem:[%s13641_s20 + $0x20] sm:$0xff] }
 0x612   : > { %12179 = vrcp.f32 %v2256_v60 }
 0x614   : > { %v2259_v39 = vpop.xlane.xlu1 %2258 }
 0x615   : > { %12181 = vrcp.f32 %v2259_v39  ;;  %v13434_v39 = vld [vmem:[%s13641_s20 + $0x28] sm:$0xff] }
 0x616   : > { %v2262_v23 = vpop.xlane.xlu0 %2261 }
 0x617   : > { %12183 = vrcp.f32 %v2262_v23  ;;  %v12176_v15 = vpop.eup %12175 }
 0x618   : > { %v2265_v2 = vpop.xlane.xlu1 %2264  ;;  %v14364_v33 = vmul.f32 %v12176_v15, %v14290_v9 }
 0x619   : > { %12185 = vrcp.f32 %v2265_v2 }
 0x61a   : > { %v2268_v13 = vpop.xlane.xlu0 %2267  ;;  %v2328_v29 = vmul.f32 %v13429_v7, %v14364_v33 }
 0x61b   : > { %12187 = vrcp.f32 %v2268_v13  ;;  %v12178_v28 = vpop.eup %12177 }
 0x61c   : > { %v12180_v50 = vpop.eup %12179  ;;  %v2271_v32 = vpop.xlane.xlu1 %2270  ;;  %v14367_v55 = vmul.f32 %v12178_v28, %v14298_v8  ;;  %v13435_v28 = vld [vmem:[%s17468_s2 + $0x18] sm:$0xff]  }
 0x61d   : > { %12189 = vrcp.f32 %v2271_v32  ;;  %v14370_v17 = vmul.f32 %v12180_v50, %v14295_v47 }
 0x61e   : > { %v2329_v9 = vmul.f32 %v13430_v40, %v14367_v55 }
 0x61f   : > { %v2274_v14 = vpop.xlane.xlu0 %2273  ;;  %v12182_v34 = vpop.eup %12181  ;;  %v2330_v47 = vmul.f32 %v13431_v36, %v14370_v17 }
 0x620   : > { %12191 = vrcp.f32 %v2274_v14  ;;  %v14377_v20 = vmul.f32 %v12182_v34, %v14305_v42  ;;  %v2376_v19 = vpack.c.bf16 %v2329_v9, %v2328_v29 }
 0x621   : > { %v12184_v52 = vpop.eup %12183  ;;  %v2277_v35 = vpop.xlane.xlu1 %2276 }
 0x622   : > { %12193 = vrcp.f32 %v2277_v35  ;;  %v2331_v6 = vmul.f32 %v13432_v3, %v14377_v20  ;;  %11101 = vmatprep.mubr.msk.bf16.mxu1 %vm495_vm0, %v2376_v19  ;;  %11121 = vmatprep.mubr.msk.bf16.mxu0 %vm495_vm0, %v2376_v19  ;;  %v14386_v42 = vmul.f32 %v12184_v52, %v14308_v54  ;;  %v13439_v52 = vld [vmem:[%s13641_s20 + $0x40] sm:$0xff]  ;;  %v13440_v35 = vld [vmem:[%s13641_s20 + $0x48] sm:$0xff] }
 0x623   : > { %v2280_v8 = vpop.xlane.xlu0 %2279  ;;  %v12186_v25 = vpop.eup %12185 }
 0x624   : > { %12195 = vrcp.f32 %v2280_v8  ;;  %v2377_v37 = vpack.c.bf16 %v2331_v6, %v2330_v47  ;;  %v14389_v26 = vmul.f32 %v12186_v25, %v14315_v1  ;;  %v2332_v60 = vmul.f32 %v13433_v43, %v14386_v42  ;;  %v13441_v25 = vld [vmem:[%s13641_s20 + $0x50] sm:$0xff] }
 0x625   : > { %v12188_v41 = vpop.eup %12187  ;;  %v2283_v21 = vpop.xlane.xlu1 %2282 }
 0x626   : > { %12197 = vrcp.f32 %v2283_v21  ;;  %11102 = vmatmul.mubr.msk.bf16.vlgmr.msra.gmra.mrb[72].mxu1 %vm495_vm0, %v2377_v37  ;;  %11122 = vmatmul.mubr.msk.bf16.vlgmr.msra.gmra.mrb[72].mxu0 %vm495_vm0, %v2377_v37  ;;  %v2333_v54 = vmul.f32 %v13434_v39, %v14389_v26  ;;  %v14398_v23 = vmul.f32 %v12188_v41, %v14317_v0  ;;  %v13436_v0 = vld [vmem:[%s17467_s1 + $0x18] sm:$0xff]  }
 0x627   : > { %v12190_v15 = vpop.eup %12189  ;;  %11158 = vmatpush3.bf16.msra.mxu0 %v14176_v11  ;;  %11138 = vmatpush3.bf16.msra.mxu1 %v14017_v59  ;;  %v13437_v59 = vld [vmem:[%s13641_s20 + $0x30] sm:$0xff] }
 0x628   : > { %v2378_v2 = vpack.c.bf16 %v2333_v54, %v2332_v60  ;;  %v14403_v13 = vmul.f32 %v12190_v15, %v14323_v45  ;;  %11159 = vmatprep.subr.bf16.mxu0 %v13435_v28  ;;  %11139 = vmatprep.subr.bf16.mxu1 %v13436_v0  ;;  %v2334_v11 = vmul.f32 %v13437_v59, %v14398_v23  ;;  %v13438_v45 = vld [vmem:[%s13641_s20 + $0x38] sm:$0xff]  ;;  %v13443_v15 = vld [vmem:[%s13641_s20 + $0x60] sm:$0xff] }
 0x62a   : > { %v12192_v1 = vpop.eup %12191  ;;  %11105 = vmatprep.mubr.msk.bf16.mxu1 %vm495_vm0, %v2378_v2  ;;  %11125 = vmatprep.mubr.msk.bf16.mxu0 %vm495_vm0, %v2378_v2  ;;  %v2335_v50 = vmul.f32 %v13438_v45, %v14403_v13  ;;  %v13444_v2 = vld [vmem:[%s13641_s20 + $0x68] sm:$0xff] }
 0x62b   : > { %v14418_v32 = vmul.f32 %v12192_v1, %v14325_v24  ;;  %11160 = vmatpush3.bf16.msra.mxu0 %v13435_v28  ;;  %11140 = vmatpush3.bf16.msra.mxu1 %v13436_v0 }
 0x62c   : > { %v12194_v14 = vpop.eup %12193  ;;  %v2379_v40 = vpack.c.bf16 %v2335_v50, %v2334_v11  ;;  %v13446_v50 = vld [vmem:[%s13641_s20 + $0x78] sm:$0xff] }
 0x62d   : > { %v14421_v9 = vmul.f32 %v12194_v14, %v14332_v16  ;;  %v2336_v24 = vmul.f32 %v13439_v52, %v14418_v32 }
 0x62e   : > { %v12196_v29 = vpop.eup %12195  ;;  %11106 = vmatmul.mubr.msk.bf16.gmra.mrb[76].mxu1 %vm495_vm0, %v2379_v40  ;;  %11126 = vmatmul.mubr.msk.bf16.gmra.mrb[76].mxu0 %vm495_vm0, %v2379_v40 }
 0x62f   : > { %v2337_v8 = vmul.f32 %v13440_v35, %v14421_v9  ;;  %v14430_v19 = vmul.f32 %v12196_v29, %v14335_v10  ;;  %v13442_v10 = vld [vmem:[%s13641_s20 + $0x58] sm:$0xff] }
 0x630   : > { %v2286_v7 = vpop.xlane.xlu0 %2285  ;;  %v12198_v36 = vpop.eup %12197 }
 0x631   : > { %12199 = vrcp.f32 %v2286_v7  ;;  %v2380_v47 = vpack.c.bf16 %v2337_v8, %v2336_v24  ;;  %v14433_v3 = vmul.f32 %v12198_v36, %v14342_v53  ;;  %v2338_v41 = vmul.f32 %v13441_v25, %v14430_v19 }
 0x632   : > { %v2289_v34 = vpop.xlane.xlu1 %2288 }
 0x633   : > { %12201 = vrcp.f32 %v2289_v34  ;;  %11109 = vmatprep.mubr.msk.bf16.mxu1 %vm495_vm0, %v2380_v47  ;;  %11129 = vmatprep.mubr.msk.bf16.mxu0 %vm495_vm0, %v2380_v47  ;;  %v2339_v37 = vmul.f32 %v13442_v10, %v14433_v3 }
 0x634   : > { %v2292_v16 = vpop.xlane.xlu0 %2291 }
 0x635   : > { %12203 = vrcp.f32 %v2292_v16  ;;  %v2381_v21 = vpack.c.bf16 %v2339_v37, %v2338_v41 }
 0x636   : > { %v2295_v6 = vpop.xlane.xlu1 %2294 }
 0x637   : > { %12205 = vrcp.f32 %v2295_v6  ;;  %11110 = vmatmul.mubr.msk.bf16.gmra.mrb[80].mxu1 %vm495_vm0, %v2381_v21  ;;  %11130 = vmatmul.mubr.msk.bf16.gmra.mrb[80].mxu0 %vm495_vm0, %v2381_v21 }
 0x63b   : > { %v12200_v43 = vpop.eup %12199 }
 0x63c   : > { %v14444_v53 = vmul.f32 %v12200_v43, %v14347_v63 }
 0x63d   : > { %v12202_v60 = vpop.eup %12201 }
 0x63e   : > { %v14447_v39 = vmul.f32 %v12202_v60, %v14351_v27  ;;  %v2340_v1 = vmul.f32 %v13443_v15, %v14444_v53  ;;  %v13445_v27 = vld [vmem:[%s13641_s20 + $0x70] sm:$0xff] }
 0x63f   : > { %v12204_v54 = vpop.eup %12203 }
 0x640   : > { %v2341_v28 = vmul.f32 %v13444_v2, %v14447_v39  ;;  %v14454_v0 = vmul.f32 %v12204_v54, %v14355_v38 }
 0x641   : > { %v12206_v59 = vpop.eup %12205 }
 0x642   : > { %v2382_v11 = vpack.c.bf16 %v2341_v28, %v2340_v1  ;;  %v14457_v63 = vmul.f32 %v12206_v59, %v14359_v31  ;;  %v2342_v45 = vmul.f32 %v13445_v27, %v14454_v0  ;;  %v14472_v31 = vld [vmem:[%s17470_s4] ss:$0 sm:$0xff] }
 0x644   : > { %11113 = vmatprep.mubr.msk.bf16.mxu1 %vm495_vm0, %v2382_v11  ;;  %11133 = vmatprep.mubr.msk.bf16.mxu0 %vm495_vm0, %v2382_v11  ;;  %v2343_v14 = vmul.f32 %v13446_v50, %v14457_v63 }
 0x646   : > { %v2383_v7 = vpack.c.bf16 %v2343_v14, %v2342_v45 }
 0x648   : > { %11114 = vmatmul.mubr.msk.bf16.gmra.mrb[84].mxu1 %vm495_vm0, %v2383_v7  ;;  %11134 = vmatmul.mubr.msk.bf16.gmra.mrb[84].mxu0 %vm495_vm0, %v2383_v7 }
 0x6f9   : > { %v14467_v38 = vpop.f32.mrb[72].mxu1  ;;  %v11123_v29 = vpop.f32.mrb[72].mxu0 }
 0x6fa   : > { %v2548_v40 = vadd.f32 %v14472_v31, %v11123_v29  ;;  %v14475_v34 = vpop.f32.mrb[73].mxu1  ;;  %v2539_v52 = vpop.f32.mrb[73].mxu0 }
 0x6fb   : > { %v2540_v24 = vadd.f32 %v14472_v31, %v2539_v52  ;;  %v14478_v35 = vpop.f32.mrb[74].mxu1  ;;  %v11124_v8 = vpop.f32.mrb[74].mxu0 }
 0x6fc   : > { %v9803_v36 = vmul.f32 -1.442695, %v2548_v40  ;;  %v2551_v16 = vadd.f32 %v14472_v31, %v11124_v8  ;;  %v14481_v47 = vpop.f32.mrb[75].mxu1  ;;  %v2542_v6 = vpop.f32.mrb[75].mxu0 }
 0x6fd   : > { %v9801_v25 = vmul.f32 -1.442695, %v2540_v24  ;;  %v2543_v41 = vadd.f32 %v14472_v31, %v2542_v6 }
 0x6fe   : > { %12207 = vpow2.f32 %v9803_v36  ;;  %v9804_v10 = vmul.f32 -1.442695, %v2551_v16 }
 0x6ff   : > { %12209 = vpow2.f32 %v9801_v25  ;;  %v9802_v37 = vmul.f32 -1.442695, %v2543_v41 }
 0x700   : > { %12211 = vpow2.f32 %v9804_v10 }
 0x701   : > { %12213 = vpow2.f32 %v9802_v37  ;;  %v14484_v21 = vpop.f32.mrb[76].mxu1  ;;  %v11127_v43 = vpop.f32.mrb[76].mxu0 }
 0x702   : > { %v2564_v60 = vadd.f32 %v14472_v31, %v11127_v43  ;;  %v14487_v54 = vpop.f32.mrb[77].mxu1  ;;  %v2555_v15 = vpop.f32.mrb[77].mxu0 }
 0x703   : > { %v2556_v1 = vadd.f32 %v14472_v31, %v2555_v15  ;;  %v14490_v2 = vpop.f32.mrb[78].mxu1  ;;  %v11128_v28 = vpop.f32.mrb[78].mxu0 }
 0x704   : > { %v9807_v59 = vmul.f32 -1.442695, %v2564_v60  ;;  %v2567_v11 = vadd.f32 %v14472_v31, %v11128_v28  ;;  %v14493_v27 = vpop.f32.mrb[79].mxu1  ;;  %v2558_v45 = vpop.f32.mrb[79].mxu0 }
 0x705   : > { %v9805_v50 = vmul.f32 -1.442695, %v2556_v1  ;;  %v2559_v14 = vadd.f32 %v14472_v31, %v2558_v45 }
 0x706   : > { %12215 = vpow2.f32 %v9807_v59  ;;  %v9808_v7 = vmul.f32 -1.442695, %v2567_v11 }
 0x707   : > { %12217 = vpow2.f32 %v9805_v50  ;;  %v9806_v29 = vmul.f32 -1.442695, %v2559_v14 }
 0x708   : > { %v12208_v40 = vpop.eup %12207  ;;  %12219 = vpow2.f32 %v9808_v7 }
 0x709   : > { %v12210_v52 = vpop.eup %12209  ;;  %v2652_v24 = vadd.f32 1.0, %v12208_v40  ;;  %12221 = vpow2.f32 %v9806_v29 }
 0x70a   : > { %v14496_v8 = vpop.f32.mrb[80].mxu1  ;;  %v11131_v36 = vpop.f32.mrb[80].mxu0  ;;  %v2650_v6 = vadd.f32 1.0, %v12210_v52 }
 0x70b   : > { %v12212_v16 = vpop.eup %12211  ;;  %v2580_v25 = vadd.f32 %v14472_v31, %v11131_v36  ;;  %v14499_v41 = vpop.f32.mrb[81].mxu1  ;;  %12223 = vrcp.f32 %v2652_v24 }
 0x70c   : > { %v2571_v10 = vpop.f32.mrb[81].mxu0  ;;  %v12214_v37 = vpop.eup %12213  ;;  %v2653_v43 = vadd.f32 1.0, %v12212_v16  ;;  %12225 = vrcp.f32 %v2650_v6 }
 0x70d   : > { %v2572_v60 = vadd.f32 %v14472_v31, %v2571_v10  ;;  %v14502_v15 = vpop.f32.mrb[82].mxu1  ;;  %v11132_v1 = vpop.f32.mrb[82].mxu0  ;;  %v2651_v28 = vadd.f32 1.0, %v12214_v37  ;;  %v9811_v59 = vmul.f32 -1.442695, %v2580_v25 }
 0x70e   : > { %v14504_v11 = vpop.f32.mrb[83].mxu1  ;;  %v2574_v45 = vpop.f32.mrb[83].mxu0  ;;  %12227 = vrcp.f32 %v2653_v43  ;;  %v2583_v14 = vadd.f32 %v14472_v31, %v11132_v1  ;;  %v14511_v37 = vld [vmem:[%s17469_s3] ss:$0 sm:$0xff] }
 0x70f   : > { %v9809_v50 = vmul.f32 -1.442695, %v2572_v60  ;;  %12229 = vrcp.f32 %v2651_v28  ;;  %v2575_v7 = vadd.f32 %v14472_v31, %v2574_v45  ;;  %v2451_v43 = vadd.f32 %v14511_v37, %v14467_v38 }
 0x710   : > { %12231 = vpow2.f32 %v9811_v59  ;;  %v9812_v29 = vmul.f32 -1.442695, %v2583_v14  ;;  %v12216_v40 = vpop.eup %12215  ;;  %v2443_v28 = vadd.f32 %v14511_v37, %v14475_v34  ;;  %v2446_v38 = vadd.f32 %v14511_v37, %v14481_v47 }
 0x711   : > { %12233 = vpow2.f32 %v9809_v50  ;;  %v9810_v52 = vmul.f32 -1.442695, %v2575_v7  ;;  %v12218_v24 = vpop.eup %12217  ;;  %v2656_v36 = vadd.f32 1.0, %v12216_v40  ;;  %v2454_v50 = vadd.f32 %v14511_v37, %v14478_v35 }
 0x712   : > { %12235 = vpow2.f32 %v9812_v29  ;;  %v12220_v16 = vpop.eup %12219  ;;  %v2654_v6 = vadd.f32 1.0, %v12218_v24 }
 0x713   : > { %12237 = vpow2.f32 %v9810_v52  ;;  %v12222_v25 = vpop.eup %12221  ;;  %v2657_v10 = vadd.f32 1.0, %v12220_v16 }
 0x714   : > { %12239 = vrcp.f32 %v2656_v36  ;;  %v2655_v60 = vadd.f32 1.0, %v12222_v25 }
 0x715   : > { %12241 = vrcp.f32 %v2654_v6  ;;  %v12224_v1 = vpop.eup %12223 }
 0x716   : > { %12243 = vrcp.f32 %v2657_v10  ;;  %v12226_v59 = vpop.eup %12225  ;;  %v2700_v45 = vmul.f32 %v12224_v1, %v2451_v43 }
 0x717   : > { %12245 = vrcp.f32 %v2655_v60  ;;  %v2698_v34 = vmul.f32 %v12226_v59, %v2443_v28  ;;  %v2467_v59 = vadd.f32 %v14511_v37, %v14484_v21 }
 0x718   : > { %v12228_v29 = vpop.eup %12227 }
 0x719   : > { %v12230_v36 = vpop.eup %12229  ;;  %v2701_v16 = vmul.f32 %v12228_v29, %v2454_v50 }
 0x71a   : > { %v12232_v10 = vpop.eup %12231  ;;  %v2699_v58 = vmul.f32 %v12230_v36, %v2446_v38  ;;  %v2459_v38 = vadd.f32 %v14511_v37, %v14487_v54  ;;  %v2462_v54 = vadd.f32 %v14511_v37, %v14493_v27  ;;  %v2475_v27 = vadd.f32 %v14511_v37, %v14499_v41 }
 0x71b   : > { %v14519_v14 = vpop.f32.mrb[84].mxu1  ;;  %v11135_v7 = vpop.f32.mrb[84].mxu0  ;;  %v2660_v49 = vadd.f32 1.0, %v12232_v10 }
 0x71c   : > { %v2596_v40 = vadd.f32 %v14472_v31, %v11135_v7  ;;  %v14524_v52 = vpop.f32.mrb[85].mxu1  ;;  %v2587_v24 = vpop.f32.mrb[85].mxu0  ;;  %v2714_v29 = vpack.c.bf16 %v2699_v58, %v2698_v34  ;;  %v2470_v58 = vadd.f32 %v14511_v37, %v14490_v2 }
 0x71d   : > { %v2588_v6 = vadd.f32 %v14472_v31, %v2587_v24  ;;  %v14527_v25 = vpop.f32.mrb[86].mxu1  ;;  %v11136_v35 = vpop.f32.mrb[86].mxu0 }
 0x71e   : > { %v9815_v43 = vmul.f32 -1.442695, %v2596_v40  ;;  %v2599_v60 = vadd.f32 %v14472_v31, %v11136_v35  ;;  %v14530_v1 = vpop.f32.mrb[87].mxu1  ;;  %v2590_v47 = vpop.f32.mrb[87].mxu0  ;;  %v2715_v35 = vpack.c.bf16 %v2701_v16, %v2700_v45  ;;  %11141 = vmatprep.mubr.msk.bf16.mxu1 %vm495_vm0, %v2714_v29  ;;  %11161 = vmatprep.mubr.msk.bf16.mxu0 %vm495_vm0, %v2714_v29 }
 0x71f   : > { %v12234_v7 = vpop.eup %12233  ;;  %v2591_v62 = vadd.f32 %v14472_v31, %v2590_v47  ;;  %v9813_v46 = vmul.f32 -1.442695, %v2588_v6  ;;  %v2483_v47 = vadd.f32 %v14511_v37, %v14496_v8  ;;  %v2478_v8 = vadd.f32 %v14511_v37, %v14504_v11 }
 0x720   : > { %v12236_v28 = vpop.eup %12235  ;;  %v2658_v50 = vadd.f32 1.0, %v12234_v7  ;;  %12247 = vpow2.f32 %v9815_v43  ;;  %v9816_v10 = vmul.f32 -1.442695, %v2599_v60  ;;  %11142 = vmatmul.mubr.msk.bf16.vlgmr.msra.gmra.mrb[88].mxu1 %vm495_vm0, %v2715_v35  ;;  %11162 = vmatmul.mubr.msk.bf16.vlgmr.msra.gmra.mrb[88].mxu0 %vm495_vm0, %v2715_v35 }
 0x721   : > { %v12238_v24 = vpop.eup %12237  ;;  %12249 = vrcp.f32 %v2660_v49  ;;  %v2661_v40 = vadd.f32 1.0, %v12236_v28  ;;  %v9814_v49 = vmul.f32 -1.442695, %v2591_v62  ;;  %v2486_v28 = vadd.f32 %v14511_v37, %v14502_v15 }
 0x722   : > { %v12240_v18 = vpop.eup %12239  ;;  %12251 = vrcp.f32 %v2658_v50  ;;  %v2659_v36 = vadd.f32 1.0, %v12238_v24  ;;  %v2499_v15 = vadd.f32 %v14511_v37, %v14519_v14  ;;  %v11847_v14 = vld [vmem:[%s17472_s6 + $0x20] sm:$0xff]  }
 0x723   : > { %v12242_v31 = vpop.eup %12241  ;;  %12253 = vrcp.f32 %v2661_v40  ;;  %v2704_v21 = vmul.f32 %v12240_v18, %v2467_v59  ;;  %11197 = vmatprep.subr.bf16.mxu0 %v11847_v14 }
 0x724   : > { %v12244_v45 = vpop.eup %12243  ;;  %12255 = vrcp.f32 %v2659_v36  ;;  %v2702_v34 = vmul.f32 %v12242_v31, %v2459_v38  ;;  %11198 = vmatpush3.bf16.msra.mxu0 %v11847_v14 }
 0x725   : > { %v12246_v16 = vpop.eup %12245  ;;  %12257 = vpow2.f32 %v9813_v46  ;;  %v2705_v6 = vmul.f32 %v12244_v45, %v2470_v58 }
 0x726   : > { %12259 = vpow2.f32 %v9816_v10  ;;  %v2703_v43 = vmul.f32 %v12246_v16, %v2462_v54  ;;  %v2491_v54 = vadd.f32 %v14511_v37, %v14524_v52  ;;  %v2502_v16 = vadd.f32 %v14511_v37, %v14527_v25  ;;  %v11848_v52 = vld [vmem:[%s17472_s6 + $0x28] sm:$0xff]  }
 0x727   : > { %12261 = vpow2.f32 %v9814_v49  ;;  %v2717_v2 = vpack.c.bf16 %v2705_v6, %v2704_v21  ;;  %11199 = vmatprep.subr.bf16.mxu0 %v11848_v52  ;;  %v11850_v25 = vld [vmem:[%s17471_s5 + $0x28] sm:$0xff]  }
 0x728   : > { %v2716_v60 = vpack.c.bf16 %v2703_v43, %v2702_v34  ;;  %v2494_v43 = vadd.f32 %v14511_v37, %v14530_v1  ;;  %v11849_v37 = vld [vmem:[%s17471_s5 + $0x20] sm:$0xff]   ;;  %11200 = vmatpush3.bf16.msra.mxu0 %v11848_v52 }
 0x729   : > { %11177 = vmatprep.subr.bf16.mxu1 %v11849_v37 }
 0x72a   : > { %v12248_v62 = vpop.eup %12247  ;;  %11145 = vmatprep.mubr.msk.bf16.mxu1 %vm495_vm0, %v2716_v60  ;;  %11165 = vmatprep.mubr.msk.bf16.mxu0 %vm495_vm0, %v2716_v60 }
 0x72b   : > { %v12250_v18 = vpop.eup %12249  ;;  %v2664_v7 = vadd.f32 1.0, %v12248_v62  ;;  %11146 = vmatmul.mubr.msk.bf16.gmra.mrb[92].mxu1 %vm495_vm0, %v2717_v2  ;;  %11166 = vmatmul.mubr.msk.bf16.gmra.mrb[92].mxu0 %vm495_vm0, %v2717_v2 }
 0x72c   : > { %v12252_v46 = vpop.eup %12251  ;;  %v2708_v59 = vmul.f32 %v12250_v18, %v2483_v47  ;;  %11178 = vmatpush3.bf16.msra.mxu1 %v11849_v37 }
 0x72d   : > { %v12254_v50 = vpop.eup %12253  ;;  %12263 = vrcp.f32 %v2664_v7  ;;  %v2706_v29 = vmul.f32 %v12252_v46, %v2475_v27  ;;  %11179 = vmatprep.subr.bf16.mxu1 %v11850_v25  ;;  %v14590_v46 = vld [vmem:[%s17470_s4 + $0x1] ss:$0 sm:$0xff] }
 0x72e   : > { %v12256_v24 = vpop.eup %12255  ;;  %v2709_v40 = vmul.f32 %v12254_v50, %v2486_v28 }
 0x72f   : > { %v12258_v35 = vpop.eup %12257  ;;  %v2707_v41 = vmul.f32 %v12256_v24, %v2478_v8 }
 0x730   : > { %v12260_v38 = vpop.eup %12259  ;;  %v2662_v36 = vadd.f32 1.0, %v12258_v35  ;;  %v2719_v10 = vpack.c.bf16 %v2709_v40, %v2708_v59  ;;  %11180 = vmatpush3.bf16.msra.mxu1 %v11850_v25 }
 0x731   : > { %v12262_v31 = vpop.eup %12261  ;;  %v2665_v58 = vadd.f32 1.0, %v12260_v38  ;;  %v2718_v49 = vpack.c.bf16 %v2707_v41, %v2706_v29 }
 0x732   : > { %12265 = vrcp.f32 %v2662_v36  ;;  %v2663_v21 = vadd.f32 1.0, %v12262_v31 }
 0x733   : > { %12267 = vrcp.f32 %v2665_v58  ;;  %11149 = vmatprep.mubr.msk.bf16.mxu1 %vm495_vm0, %v2718_v49  ;;  %11169 = vmatprep.mubr.msk.bf16.mxu0 %vm495_vm0, %v2718_v49 }
 0x734   : > { %12269 = vrcp.f32 %v2663_v21  ;;  %11150 = vmatmul.mubr.msk.bf16.gmra.mrb[96].mxu1 %vm495_vm0, %v2719_v10  ;;  %11170 = vmatmul.mubr.msk.bf16.gmra.mrb[96].mxu0 %vm495_vm0, %v2719_v10 }
 0x737   : > { %v12264_v11 = vpop.eup %12263 }
 0x738   : > { %v2712_v45 = vmul.f32 %v12264_v11, %v2499_v15 }
 0x73c   : > { %v12266_v34 = vpop.eup %12265 }
 0x73d   : > { %v12268_v6 = vpop.eup %12267  ;;  %v2710_v2 = vmul.f32 %v12266_v34, %v2491_v54 }
 0x73e   : > { %v12270_v60 = vpop.eup %12269  ;;  %v2713_v62 = vmul.f32 %v12268_v6, %v2502_v16 }
 0x73f   : > { %v2711_v47 = vmul.f32 %v12270_v60, %v2494_v43 }
 0x740   : > { %v2721_v18 = vpack.c.bf16 %v2713_v62, %v2712_v45 }
 0x741   : > { %v2720_v27 = vpack.c.bf16 %v2711_v47, %v2710_v2 }
 0x743   : > { %11153 = vmatprep.mubr.msk.bf16.mxu1 %vm495_vm0, %v2720_v27  ;;  %11173 = vmatprep.mubr.msk.bf16.mxu0 %vm495_vm0, %v2720_v27 }
 0x744   : > { %11154 = vmatmul.mubr.msk.bf16.gmra.mrb[100].mxu1 %vm495_vm0, %v2721_v18  ;;  %11174 = vmatmul.mubr.msk.bf16.gmra.mrb[100].mxu0 %vm495_vm0, %v2721_v18 }
 0x7f3   : > { %v14585_v1 = vpop.f32.mrb[88].mxu1  ;;  %v11163_v7 = vpop.f32.mrb[88].mxu0 }
 0x7f4   : > { %v2886_v28 = vadd.f32 %v14590_v46, %v11163_v7  ;;  %v14593_v59 = vpop.f32.mrb[89].mxu1  ;;  %v2877_v50 = vpop.f32.mrb[89].mxu0 }
 0x7f5   : > { %v2878_v8 = vadd.f32 %v14590_v46, %v2877_v50  ;;  %v14596_v29 = vpop.f32.mrb[90].mxu1  ;;  %v11164_v24 = vpop.f32.mrb[90].mxu0 }
 0x7f6   : > { %v9835_v40 = vmul.f32 -1.442695, %v2886_v28  ;;  %v2889_v35 = vadd.f32 %v14590_v46, %v11164_v24  ;;  %v14599_v41 = vpop.f32.mrb[91].mxu1  ;;  %v2880_v38 = vpop.f32.mrb[91].mxu0 }
 0x7f7   : > { %v9833_v36 = vmul.f32 -1.442695, %v2878_v8  ;;  %v2881_v10 = vadd.f32 %v14590_v46, %v2880_v38 }
 0x7f8   : > { %12271 = vpow2.f32 %v9835_v40  ;;  %v9836_v31 = vmul.f32 -1.442695, %v2889_v35 }
 0x7f9   : > { %12273 = vpow2.f32 %v9833_v36  ;;  %v9834_v58 = vmul.f32 -1.442695, %v2881_v10 }
 0x7fa   : > { %12275 = vpow2.f32 %v9836_v31 }
 0x7fb   : > { %12277 = vpow2.f32 %v9834_v58 }
 0x7fe   : > { %v14602_v49 = vpop.f32.mrb[92].mxu1  ;;  %v11167_v21 = vpop.f32.mrb[92].mxu0 }
 0x7ff   : > { %v2902_v15 = vadd.f32 %v14590_v46, %v11167_v21  ;;  %v14605_v11 = vpop.f32.mrb[93].mxu1  ;;  %v2893_v45 = vpop.f32.mrb[93].mxu0 }
 0x800   : > { %v2894_v54 = vadd.f32 %v14590_v46, %v2893_v45  ;;  %v14608_v34 = vpop.f32.mrb[94].mxu1  ;;  %v11168_v16 = vpop.f32.mrb[94].mxu0 }
 0x801   : > { %v9839_v6 = vmul.f32 -1.442695, %v2902_v15  ;;  %v2905_v43 = vadd.f32 %v14590_v46, %v11168_v16  ;;  %v14611_v2 = vpop.f32.mrb[95].mxu1  ;;  %v2896_v60 = vpop.f32.mrb[95].mxu0 }
 0x802   : > { %v9837_v62 = vmul.f32 -1.442695, %v2894_v54  ;;  %v2897_v47 = vadd.f32 %v14590_v46, %v2896_v60  ;;  %v12272_v14 = vpop.eup %12271 }
 0x803   : > { %12279 = vpow2.f32 %v9839_v6  ;;  %v9840_v18 = vmul.f32 -1.442695, %v2905_v43  ;;  %v12274_v37 = vpop.eup %12273  ;;  %v2990_v52 = vadd.f32 1.0, %v12272_v14 }
 0x804   : > { %12281 = vpow2.f32 %v9837_v62  ;;  %v9838_v27 = vmul.f32 -1.442695, %v2897_v47  ;;  %v12276_v25 = vpop.eup %12275  ;;  %v2988_v7 = vadd.f32 1.0, %v12274_v37 }
 0x805   : > { %12283 = vpow2.f32 %v9840_v18  ;;  %v12278_v8 = vpop.eup %12277  ;;  %v2991_v24 = vadd.f32 1.0, %v12276_v25  ;;  %v14629_v25 = vld [vmem:[%s17469_s3 + $0x1] ss:$0 sm:$0xff] }
 0x806   : > { %12285 = vpow2.f32 %v9838_v27  ;;  %v2989_v36 = vadd.f32 1.0, %v12278_v8 }
 0x807   : > { %v14614_v28 = vpop.f32.mrb[96].mxu1  ;;  %v11171_v50 = vpop.f32.mrb[96].mxu0  ;;  %12287 = vrcp.f32 %v2990_v52 }
 0x808   : > { %v2918_v40 = vadd.f32 %v14590_v46, %v11171_v50  ;;  %v14617_v35 = vpop.f32.mrb[97].mxu1  ;;  %v2909_v38 = vpop.f32.mrb[97].mxu0  ;;  %12289 = vrcp.f32 %v2988_v7  ;;  %v2789_v7 = vadd.f32 %v14629_v25, %v14585_v1 }
 0x809   : > { %v2910_v10 = vadd.f32 %v14590_v46, %v2909_v38  ;;  %v14620_v31 = vpop.f32.mrb[98].mxu1  ;;  %v11172_v58 = vpop.f32.mrb[98].mxu0  ;;  %12291 = vrcp.f32 %v2991_v24  ;;  %v2781_v24 = vadd.f32 %v14629_v25, %v14593_v59 }
 0x80a   : > { %v9843_v21 = vmul.f32 -1.442695, %v2918_v40  ;;  %v2921_v15 = vadd.f32 %v14590_v46, %v11172_v58  ;;  %v14623_v45 = vpop.f32.mrb[99].mxu1  ;;  %v2912_v54 = vpop.f32.mrb[99].mxu0  ;;  %12293 = vrcp.f32 %v2989_v36  ;;  %v2792_v36 = vadd.f32 %v14629_v25, %v14596_v29 }
 0x80b   : > { %v9841_v16 = vmul.f32 -1.442695, %v2910_v10  ;;  %v2913_v6 = vadd.f32 %v14590_v46, %v2912_v54  ;;  %v2784_v58 = vadd.f32 %v14629_v25, %v14599_v41  ;;  %v2805_v29 = vadd.f32 %v14629_v25, %v14602_v49 }
 0x80c   : > { %12295 = vpow2.f32 %v9843_v21  ;;  %v9844_v43 = vmul.f32 -1.442695, %v2921_v15  ;;  %v2808_v49 = vadd.f32 %v14629_v25, %v14608_v34 }
 0x80d   : > { %v12280_v60 = vpop.eup %12279  ;;  %12297 = vpow2.f32 %v9841_v16  ;;  %v9842_v62 = vmul.f32 -1.442695, %v2913_v6 }
 0x80e   : > { %v12282_v47 = vpop.eup %12281  ;;  %v2994_v18 = vadd.f32 1.0, %v12280_v60  ;;  %12299 = vpow2.f32 %v9844_v43 }
 0x80f   : > { %v12284_v27 = vpop.eup %12283  ;;  %v2992_v14 = vadd.f32 1.0, %v12282_v47  ;;  %12301 = vpow2.f32 %v9842_v62 }
 0x810   : > { %v12286_v37 = vpop.eup %12285  ;;  %12303 = vrcp.f32 %v2994_v18  ;;  %v2995_v52 = vadd.f32 1.0, %v12284_v27 }
 0x811   : > { %12305 = vrcp.f32 %v2992_v14  ;;  %v2993_v50 = vadd.f32 1.0, %v12286_v37  ;;  %v12288_v8 = vpop.eup %12287 }
 0x812   : > { %12307 = vrcp.f32 %v2995_v52  ;;  %v12290_v40 = vpop.eup %12289  ;;  %v3038_v38 = vmul.f32 %v12288_v8, %v2789_v7  ;;  %v2797_v7 = vadd.f32 %v14629_v25, %v14605_v11 }
 0x813   : > { %12309 = vrcp.f32 %v2993_v50  ;;  %v12292_v10 = vpop.eup %12291  ;;  %v3036_v21 = vmul.f32 %v12290_v40, %v2781_v24 }
 0x814   : > { %v12294_v15 = vpop.eup %12293  ;;  %v3039_v1 = vmul.f32 %v12292_v10, %v2792_v36 }
 0x815   : > { %v3037_v16 = vmul.f32 %v12294_v15, %v2784_v58  ;;  %v2800_v15 = vadd.f32 %v14629_v25, %v14611_v2 }
 0x816   : > { %v12296_v54 = vpop.eup %12295  ;;  %v3065_v62 = vpack.c.bf16 %v3039_v1, %v3038_v38 }
 0x817   : > { %v12298_v6 = vpop.eup %12297  ;;  %v2998_v43 = vadd.f32 1.0, %v12296_v54  ;;  %v14639_v60 = vpop.f32.mrb[100].mxu1  ;;  %v3064_v37 = vpack.c.bf16 %v3037_v16, %v3036_v21 }
 0x818   : > { %v11175_v59 = vpop.f32.mrb[100].mxu0  ;;  %v12300_v47 = vpop.eup %12299  ;;  %v2996_v18 = vadd.f32 1.0, %v12298_v6 }
 0x819   : > { %v2934_v27 = vadd.f32 %v14590_v46, %v11175_v59  ;;  %v14644_v14 = vpop.f32.mrb[101].mxu1  ;;  %v2925_v41 = vpop.f32.mrb[101].mxu0  ;;  %12311 = vrcp.f32 %v2998_v43  ;;  %v2999_v50 = vadd.f32 1.0, %v12300_v47  ;;  %11181 = vmatprep.mubr.msk.bf16.mxu1 %vm495_vm0, %v3064_v37  ;;  %11201 = vmatprep.mubr.msk.bf16.mxu0 %vm495_vm0, %v3064_v37 }
 0x81a   : > { %v12302_v52 = vpop.eup %12301  ;;  %v2926_v8 = vadd.f32 %v14590_v46, %v2925_v41  ;;  %v14649_v24 = vpop.f32.mrb[102].mxu1  ;;  %12313 = vrcp.f32 %v2996_v18  ;;  %11182 = vmatmul.mubr.msk.bf16.vlgmr.msra.gmra.mrb[104].mxu1 %vm495_vm0, %v3065_v62  ;;  %11202 = vmatmul.mubr.msk.bf16.vlgmr.msra.gmra.mrb[104].mxu0 %vm495_vm0, %v3065_v62  ;;  %v2821_v62 = vadd.f32 %v14629_v25, %v14614_v28  ;;  %v2816_v28 = vadd.f32 %v14629_v25, %v14623_v45 }
 0x81b   : > { %v11176_v40 = vpop.f32.mrb[102].mxu0  ;;  %v12304_v38 = vpop.eup %12303  ;;  %v2997_v36 = vadd.f32 1.0, %v12302_v52  ;;  %v9847_v10 = vmul.f32 -1.442695, %v2934_v27  ;;  %12315 = vrcp.f32 %v2999_v50  ;;  %v2837_v45 = vadd.f32 %v14629_v25, %v14639_v60  ;;  %v11851_v60 = vld [vmem:[%s17472_s6 + $0x30] sm:$0xff]  }
 0x81c   : > { %v14653_v58 = vpop.f32.mrb[103].mxu1  ;;  %v2928_v21 = vpop.f32.mrb[103].mxu0  ;;  %v9845_v1 = vmul.f32 -1.442695, %v2926_v8  ;;  %v2937_v54 = vadd.f32 %v14590_v46, %v11176_v40  ;;  %v3042_v43 = vmul.f32 %v12304_v38, %v2805_v29  ;;  %v2813_v29 = vadd.f32 %v14629_v25, %v14617_v35  ;;  %11237 = vmatprep.subr.bf16.mxu0 %v11851_v60 }
 0x81d   : > { %v12306_v11 = vpop.eup %12305  ;;  %12317 = vrcp.f32 %v2997_v36  ;;  %v2929_v16 = vadd.f32 %v14590_v46, %v2928_v21  ;;  %11238 = vmatpush3.bf16.msra.mxu0 %v11851_v60 }
 0x81e   : > { %v12308_v34 = vpop.eup %12307  ;;  %v3040_v6 = vmul.f32 %v12306_v11, %v2797_v7  ;;  %12319 = vpow2.f32 %v9847_v10  ;;  %v9848_v47 = vmul.f32 -1.442695, %v2937_v54  ;;  %v2824_v7 = vadd.f32 %v14629_v25, %v14620_v31 }
 0x81f   : > { %v12310_v59 = vpop.eup %12309  ;;  %v3043_v18 = vmul.f32 %v12308_v34, %v2808_v49  ;;  %12321 = vpow2.f32 %v9845_v1  ;;  %v9846_v2 = vmul.f32 -1.442695, %v2929_v16 }
 0x820   : > { %v3041_v27 = vmul.f32 %v12310_v59, %v2800_v15  ;;  %12323 = vpow2.f32 %v9848_v47  ;;  %v2840_v47 = vadd.f32 %v14629_v25, %v14649_v24  ;;  %v11854_v24 = vld [vmem:[%s17471_s5 + $0x38] sm:$0xff]  }
 0x821   : > { %v3067_v41 = vpack.c.bf16 %v3043_v18, %v3042_v43  ;;  %12325 = vpow2.f32 %v9846_v2  ;;  %v2829_v43 = vadd.f32 %v14629_v25, %v14644_v14  ;;  %v11852_v14 = vld [vmem:[%s17472_s6 + $0x38] sm:$0xff]  }
 0x822   : > { %v3066_v37 = vpack.c.bf16 %v3041_v27, %v3040_v6  ;;  %v2832_v27 = vadd.f32 %v14629_v25, %v14653_v58  ;;  %v11853_v25 = vld [vmem:[%s17471_s5 + $0x30] sm:$0xff]   ;;  %11239 = vmatprep.subr.bf16.mxu0 %v11852_v14  ;;  %v14706_v58 = vld [vmem:[%s17467_s1] sm:$0xff]  }
 0x823   : > { %v12312_v46 = vpop.eup %12311  ;;  %11217 = vmatprep.subr.bf16.mxu1 %v11853_v25  ;;  %11240 = vmatpush3.bf16.msra.mxu0 %v11852_v14 }
 0x824   : > { %11185 = vmatprep.mubr.msk.bf16.mxu1 %vm495_vm0, %v3066_v37  ;;  %11205 = vmatprep.mubr.msk.bf16.mxu0 %vm495_vm0, %v3066_v37  ;;  %v12314_v52 = vpop.eup %12313  ;;  %v3046_v50 = vmul.f32 %v12312_v46, %v2821_v62 }
 0x825   : > { %11186 = vmatmul.mubr.msk.bf16.gmra.mrb[108].mxu1 %vm495_vm0, %v3067_v41  ;;  %11206 = vmatmul.mubr.msk.bf16.gmra.mrb[108].mxu0 %vm495_vm0, %v3067_v41  ;;  %v12316_v8 = vpop.eup %12315  ;;  %v3044_v40 = vmul.f32 %v12314_v52, %v2813_v29 }
 0x826   : > { %v3047_v49 = vmul.f32 %v12316_v8, %v2824_v7  ;;  %11218 = vmatpush3.bf16.msra.mxu1 %v11853_v25  ;;  %11277 = vmatprep.subr.bf16.mxu0 %v14706_v58  ;;  %v14712_v7 = vld [vmem:[%s17474_s8 + $0x2] ss:$0 sm:$0xff] }
 0x827   : > { %v12318_v38 = vpop.eup %12317  ;;  %11219 = vmatprep.subr.bf16.mxu1 %v11854_v24 }
 0x828   : > { %v12320_v36 = vpop.eup %12319  ;;  %v3045_v10 = vmul.f32 %v12318_v38, %v2816_v28  ;;  %v3069_v11 = vpack.c.bf16 %v3047_v49, %v3046_v50 }
 0x829   : > { %v12322_v21 = vpop.eup %12321  ;;  %v3002_v35 = vadd.f32 1.0, %v12320_v36 }
 0x82a   : > { %v12324_v15 = vpop.eup %12323  ;;  %v3000_v1 = vadd.f32 1.0, %v12322_v21  ;;  %v3068_v54 = vpack.c.bf16 %v3045_v10, %v3044_v40  ;;  %11220 = vmatpush3.bf16.msra.mxu1 %v11854_v24 }
 0x82b   : > { %v12326_v34 = vpop.eup %12325  ;;  %12327 = vrcp.f32 %v3002_v35  ;;  %v3003_v16 = vadd.f32 1.0, %v12324_v15 }
 0x82c   : > { %12329 = vrcp.f32 %v3000_v1  ;;  %v3001_v31 = vadd.f32 1.0, %v12326_v34  ;;  %11189 = vmatprep.mubr.msk.bf16.mxu1 %vm495_vm0, %v3068_v54  ;;  %11209 = vmatprep.mubr.msk.bf16.mxu0 %vm495_vm0, %v3068_v54 }
 0x82d   : > { %12331 = vrcp.f32 %v3003_v16  ;;  %11190 = vmatmul.mubr.msk.bf16.gmra.mrb[112].mxu1 %vm495_vm0, %v3069_v11  ;;  %11210 = vmatmul.mubr.msk.bf16.gmra.mrb[112].mxu0 %vm495_vm0, %v3069_v11 }
 0x82e   : > { %12333 = vrcp.f32 %v3001_v31 }
 0x835   : > { %v12328_v6 = vpop.eup %12327 }
 0x836   : > { %v12330_v59 = vpop.eup %12329  ;;  %v3050_v18 = vmul.f32 %v12328_v6, %v2837_v45 }
 0x837   : > { %v12332_v2 = vpop.eup %12331  ;;  %v3048_v41 = vmul.f32 %v12330_v59, %v2829_v43 }
 0x838   : > { %v12334_v37 = vpop.eup %12333  ;;  %v3051_v62 = vmul.f32 %v12332_v2, %v2840_v47 }
 0x839   : > { %v3049_v46 = vmul.f32 %v12334_v37, %v2832_v27 }
 0x83a   : > { %v3071_v29 = vpack.c.bf16 %v3051_v62, %v3050_v18 }
 0x83b   : > { %v3070_v52 = vpack.c.bf16 %v3049_v46, %v3048_v41 }
 0x83d   : > { %11193 = vmatprep.mubr.msk.bf16.mxu1 %vm495_vm0, %v3070_v52  ;;  %11213 = vmatprep.mubr.msk.bf16.mxu0 %vm495_vm0, %v3070_v52 }
 0x83e   : > { %11194 = vmatmul.mubr.msk.bf16.gmra.mrb[116].mxu1 %vm495_vm0, %v3071_v29  ;;  %11214 = vmatmul.mubr.msk.bf16.gmra.mrb[116].mxu0 %vm495_vm0, %v3071_v29 }
 0x8ed   : > { %v14714_v50 = vpop.f32.mrb[104].mxu1  ;;  %v11203_v8 = vpop.f32.mrb[104].mxu0 }
 0x8ee   : > { %v3268_v28 = vadd.f32 %v11203_v8, %v14712_v7  ;;  %v14717_v40 = vpop.f32.mrb[105].mxu1  ;;  %v3259_v38 = vpop.f32.mrb[105].mxu0 }
 0x8ef   : > { %v3260_v49 = vadd.f32 %v14712_v7, %v3259_v38  ;;  %v14720_v36 = vpop.f32.mrb[106].mxu1  ;;  %v11204_v10 = vpop.f32.mrb[106].mxu0 }
 0x8f0   : > { %v9881_v21 = vmul.f32 -1.442695, %v3268_v28  ;;  %v3271_v35 = vadd.f32 %v11204_v10, %v14712_v7  ;;  %v14723_v11 = vpop.f32.mrb[107].mxu1  ;;  %v3262_v15 = vpop.f32.mrb[107].mxu0 }
 0x8f1   : > { %v9879_v1 = vmul.f32 -1.442695, %v3260_v49  ;;  %v3263_v54 = vadd.f32 %v14712_v7, %v3262_v15 }
 0x8f2   : > { %12335 = vpow2.f32 %v9881_v21  ;;  %v9882_v34 = vmul.f32 -1.442695, %v3271_v35 }
 0x8f3   : > { %12337 = vpow2.f32 %v9879_v1  ;;  %v9880_v16 = vmul.f32 -1.442695, %v3263_v54 }
 0x8f4   : > { %12339 = vpow2.f32 %v9882_v34 }
 0x8f5   : > { %12341 = vpow2.f32 %v9880_v16 }
 0x8f8   : > { %v14726_v31 = vpop.f32.mrb[108].mxu1  ;;  %v11207_v45 = vpop.f32.mrb[108].mxu0 }
 0x8f9   : > { %v3284_v6 = vadd.f32 %v11207_v45, %v14712_v7  ;;  %v14729_v43 = vpop.f32.mrb[109].mxu1  ;;  %v3275_v59 = vpop.f32.mrb[109].mxu0 }
 0x8fa   : > { %v3276_v47 = vadd.f32 %v14712_v7, %v3275_v59  ;;  %v14732_v18 = vpop.f32.mrb[110].mxu1  ;;  %v11208_v2 = vpop.f32.mrb[110].mxu0 }
 0x8fb   : > { %v9885_v27 = vmul.f32 -1.442695, %v3284_v6  ;;  %v3287_v41 = vadd.f32 %v11208_v2, %v14712_v7  ;;  %v14735_v37 = vpop.f32.mrb[111].mxu1  ;;  %v3278_v62 = vpop.f32.mrb[111].mxu0 }
 0x8fc   : > { %v9883_v46 = vmul.f32 -1.442695, %v3276_v47  ;;  %v3279_v29 = vadd.f32 %v14712_v7, %v3278_v62  ;;  %v12336_v25 = vpop.eup %12335 }
 0x8fd   : > { %12343 = vpow2.f32 %v9885_v27  ;;  %v9886_v52 = vmul.f32 -1.442695, %v3287_v41  ;;  %v12338_v14 = vpop.eup %12337  ;;  %v3372_v24 = vadd.f32 1.0, %v12336_v25 }
 0x8fe   : > { %12345 = vpow2.f32 %v9883_v46  ;;  %v9884_v60 = vmul.f32 -1.442695, %v3279_v29  ;;  %v12340_v8 = vpop.eup %12339  ;;  %v3370_v28 = vadd.f32 1.0, %v12338_v14 }
 0x8ff   : > { %12347 = vpow2.f32 %v9886_v52  ;;  %v12342_v10 = vpop.eup %12341  ;;  %v3373_v21 = vadd.f32 1.0, %v12340_v8 }
 0x900   : > { %12349 = vpow2.f32 %v9884_v60  ;;  %v14738_v38 = vpop.f32.mrb[112].mxu1  ;;  %v11211_v49 = vpop.f32.mrb[112].mxu0  ;;  %v3371_v54 = vadd.f32 1.0, %v12342_v10  ;;  %v14753_v60 = vld [vmem:[%s17473_s7 + $0x2] ss:$0 sm:$0xff] }
 0x901   : > { %12351 = vrcp.f32 %v3372_v24  ;;  %v3300_v35 = vadd.f32 %v11211_v49, %v14712_v7  ;;  %v14741_v15 = vpop.f32.mrb[113].mxu1  ;;  %v3291_v1 = vpop.f32.mrb[113].mxu0  ;;  %v3155_v49 = vadd.f32 %v14714_v50, %v14753_v60 }
 0x902   : > { %12353 = vrcp.f32 %v3370_v28  ;;  %v3292_v34 = vadd.f32 %v14712_v7, %v3291_v1  ;;  %v14744_v16 = vpop.f32.mrb[114].mxu1  ;;  %v11212_v45 = vpop.f32.mrb[114].mxu0 }
 0x903   : > { %12355 = vrcp.f32 %v3373_v21  ;;  %v9889_v6 = vmul.f32 -1.442695, %v3300_v35  ;;  %v3303_v59 = vadd.f32 %v11212_v45, %v14712_v7  ;;  %v14747_v47 = vpop.f32.mrb[115].mxu1  ;;  %v3294_v2 = vpop.f32.mrb[115].mxu0  ;;  %v3147_v35 = vadd.f32 %v14753_v60, %v14717_v40 }
 0x904   : > { %12357 = vrcp.f32 %v3371_v54  ;;  %v9887_v27 = vmul.f32 -1.442695, %v3292_v34  ;;  %v3295_v41 = vadd.f32 %v14712_v7, %v3294_v2  ;;  %v3158_v34 = vadd.f32 %v14720_v36, %v14753_v60 }
 0x905   : > { %12359 = vpow2.f32 %v9889_v6  ;;  %v9890_v62 = vmul.f32 -1.442695, %v3303_v59  ;;  %v3150_v6 = vadd.f32 %v14753_v60, %v14723_v11 }
 0x906   : > { %12361 = vpow2.f32 %v9887_v27  ;;  %v9888_v29 = vmul.f32 -1.442695, %v3295_v41 }
 0x907   : > { %v12344_v46 = vpop.eup %12343  ;;  %12363 = vpow2.f32 %v9890_v62 }
 0x908   : > { %v12346_v52 = vpop.eup %12345  ;;  %v3376_v25 = vadd.f32 1.0, %v12344_v46  ;;  %12365 = vpow2.f32 %v9888_v29 }
 0x909   : > { %v12348_v14 = vpop.eup %12347  ;;  %v3374_v24 = vadd.f32 1.0, %v12346_v52 }
 0x90a   : > { %v12350_v8 = vpop.eup %12349  ;;  %12367 = vrcp.f32 %v3376_v25  ;;  %v3377_v28 = vadd.f32 1.0, %v12348_v14 }
 0x90b   : > { %12369 = vrcp.f32 %v3374_v24  ;;  %v3375_v10 = vadd.f32 1.0, %v12350_v8  ;;  %v12352_v21 = vpop.eup %12351  ;;  %v3171_v8 = vadd.f32 %v14726_v31, %v14753_v60 }
 0x90c   : > { %12371 = vrcp.f32 %v3377_v28  ;;  %v12354_v1 = vpop.eup %12353  ;;  %v3420_v54 = vmul.f32 %v12352_v21, %v3155_v49 }
 0x90d   : > { %12373 = vrcp.f32 %v3375_v10  ;;  %v12356_v45 = vpop.eup %12355  ;;  %v3418_v59 = vmul.f32 %v12354_v1, %v3147_v35  ;;  %v3163_v35 = vadd.f32 %v14753_v60, %v14729_v43 }
 0x90e   : > { %v12358_v2 = vpop.eup %12357  ;;  %v3421_v50 = vmul.f32 %v12356_v45, %v3158_v34 }
 0x90f   : > { %v12360_v27 = vpop.eup %12359  ;;  %v3419_v41 = vmul.f32 %v12358_v2, %v3150_v6  ;;  %v3174_v6 = vadd.f32 %v14732_v18, %v14753_v60 }
 0x910   : > { %v12362_v62 = vpop.eup %12361  ;;  %v3380_v46 = vadd.f32 1.0, %v12360_v27  ;;  %v3447_v29 = vpack.c.bf16 %v3421_v50, %v3420_v54 }
 0x911   : > { %v12364_v40 = vpop.eup %12363  ;;  %v3378_v52 = vadd.f32 1.0, %v12362_v62  ;;  %v14763_v25 = vpop.f32.mrb[116].mxu1  ;;  %v3446_v24 = vpack.c.bf16 %v3419_v41, %v3418_v59  ;;  %v3166_v41 = vadd.f32 %v14753_v60, %v14735_v37 }
 0x912   : > { %v11215_v14 = vpop.f32.mrb[116].mxu0  ;;  %v12366_v36 = vpop.eup %12365  ;;  %12375 = vrcp.f32 %v3380_v46  ;;  %v3381_v11 = vadd.f32 1.0, %v12364_v40 }
 0x913   : > { %v3316_v28 = vadd.f32 %v11215_v14, %v14712_v7  ;;  %v14768_v49 = vpop.f32.mrb[117].mxu1  ;;  %v3307_v10 = vpop.f32.mrb[117].mxu0  ;;  %12377 = vrcp.f32 %v3378_v52  ;;  %v3379_v1 = vadd.f32 1.0, %v12366_v36  ;;  %11221 = vmatprep.mubr.msk.bf16.mxu1 %vm495_vm0, %v3446_v24  ;;  %11241 = vmatprep.mubr.msk.bf16.mxu0 %vm495_vm0, %v3446_v24  ;;  %v13452_v24 = vld [vmem:[%s17467_s1 + $0x8] sm:$0xff]  }
 0x914   : > { %v12368_v21 = vpop.eup %12367  ;;  %v3308_v54 = vadd.f32 %v14712_v7, %v3307_v10  ;;  %v14773_v34 = vpop.f32.mrb[118].mxu1  ;;  %12379 = vrcp.f32 %v3381_v11  ;;  %11222 = vmatmul.mubr.msk.bf16.vlgmr.msra.gmra.mrb[120].mxu1 %vm495_vm0, %v3447_v29  ;;  %11242 = vmatmul.mubr.msk.bf16.vlgmr.msra.gmra.mrb[120].mxu0 %vm495_vm0, %v3447_v29  ;;  %v3179_v10 = vadd.f32 %v14753_v60, %v14741_v15 }
 0x915   : > { %v11216_v45 = vpop.f32.mrb[118].mxu0  ;;  %v12370_v31 = vpop.eup %12369  ;;  %v9893_v59 = vmul.f32 -1.442695, %v3316_v28  ;;  %12381 = vrcp.f32 %v3379_v1  ;;  %11278 = vmatpush3.bf16.msra.mxu0 %v14706_v58  ;;  %v3424_v14 = vmul.f32 %v12368_v21, %v3171_v8  ;;  %v13453_v58 = vld [vmem:[%s17467_s1 + $0x10] sm:$0xff]   ;;  %v3187_v8 = vadd.f32 %v14738_v38, %v14753_v60 }
 0x916   : > { %v3319_v2 = vadd.f32 %v11216_v45, %v14712_v7  ;;  %v14780_v43 = vpop.f32.mrb[119].mxu1  ;;  %v3310_v50 = vpop.f32.mrb[119].mxu0  ;;  %v9891_v62 = vmul.f32 -1.442695, %v3308_v54  ;;  %v3422_v52 = vmul.f32 %v12370_v31, %v3163_v35  ;;  %11279 = vmatprep.subr.bf16.mxu0 %v13452_v24  ;;  %v3190_v35 = vadd.f32 %v14744_v16, %v14753_v60 }
 0x917   : > { %v12372_v27 = vpop.eup %12371  ;;  %v3311_v46 = vadd.f32 %v14712_v7, %v3310_v50  ;;  %12383 = vpow2.f32 %v9893_v59  ;;  %v3182_v38 = vadd.f32 %v14753_v60, %v14747_v47  ;;  %v3203_v47 = vadd.f32 %v14763_v25, %v14753_v60  ;;  %v11855_v25 = vld [vmem:[%s17475_s9 + $0x10] sm:$0xff]  }
 0x918   : > { %v12374_v18 = vpop.eup %12373  ;;  %v9894_v40 = vmul.f32 -1.442695, %v3319_v2  ;;  %12385 = vpow2.f32 %v9891_v62  ;;  %v3425_v37 = vmul.f32 %v12372_v27, %v3174_v6  ;;  %11257 = vmatprep.subr.bf16.mxu1 %v11855_v25 }
 0x919   : > { %v9892_v29 = vmul.f32 -1.442695, %v3311_v46  ;;  %v3423_v36 = vmul.f32 %v12374_v18, %v3166_v41  ;;  %11280 = vmatpush3.bf16.msra.mxu0 %v13452_v24  ;;  %11258 = vmatpush3.bf16.msra.mxu1 %v11855_v25 }
 0x91a   : > { %12387 = vpow2.f32 %v9894_v40  ;;  %v3449_v7 = vpack.c.bf16 %v3425_v37, %v3424_v14  ;;  %11317 = vmatprep.subr.bf16.mxu0 %v13453_v58  ;;  %v3195_v14 = vadd.f32 %v14753_v60, %v14768_v49  ;;  %v14831_v49 = vld [vmem:[%s17468_s2] sm:$0xff]  }
 0x91b   : > { %12389 = vpow2.f32 %v9892_v29  ;;  %v3448_v11 = vpack.c.bf16 %v3423_v36, %v3422_v52  ;;  %v3206_v29 = vadd.f32 %v14773_v34, %v14753_v60  ;;  %v14837_v34 = vld [vmem:[%s17474_s8 + $0x3] ss:$0 sm:$0xff] }
 0x91c   : > { %v12376_v28 = vpop.eup %12375 }
 0x91d   : > { %11225 = vmatprep.mubr.msk.bf16.mxu1 %vm495_vm0, %v3448_v11  ;;  %11245 = vmatprep.mubr.msk.bf16.mxu0 %vm495_vm0, %v3448_v11  ;;  %v12378_v21 = vpop.eup %12377  ;;  %v3428_v1 = vmul.f32 %v12376_v28, %v3187_v8  ;;  %v3198_v11 = vadd.f32 %v14753_v60, %v14780_v43  ;;  %v11856_v60 = vld [vmem:[%s17475_s9 + $0x18] sm:$0xff]  }
 0x91e   : > { %11226 = vmatmul.mubr.msk.bf16.gmra.mrb[124].mxu1 %vm495_vm0, %v3449_v7  ;;  %11246 = vmatmul.mubr.msk.bf16.gmra.mrb[124].mxu0 %vm495_vm0, %v3449_v7  ;;  %v12380_v54 = vpop.eup %12379  ;;  %v3426_v45 = vmul.f32 %v12378_v21, %v3179_v10 }
 0x91f   : > { %v12382_v31 = vpop.eup %12381  ;;  %v3429_v6 = vmul.f32 %v12380_v54, %v3190_v35  ;;  %11259 = vmatprep.subr.bf16.mxu1 %v11856_v60 }
 0x920   : > { %v3427_v2 = vmul.f32 %v12382_v31, %v3182_v38  ;;  %11260 = vmatpush3.bf16.msra.mxu1 %v11856_v60 }
 0x921   : > { %v12384_v59 = vpop.eup %12383  ;;  %v3451_v27 = vpack.c.bf16 %v3429_v6, %v3428_v1  ;;  %11297 = vmatprep.subr.bf16.mxu1 %v14831_v49 }
 0x922   : > { %v12386_v50 = vpop.eup %12385  ;;  %v3384_v15 = vadd.f32 1.0, %v12384_v59  ;;  %v3450_v46 = vpack.c.bf16 %v3427_v2, %v3426_v45 }
 0x923   : > { %v3382_v62 = vadd.f32 1.0, %v12386_v50 }
 0x924   : > { %v12388_v41 = vpop.eup %12387  ;;  %12391 = vrcp.f32 %v3384_v15  ;;  %11229 = vmatprep.mubr.msk.bf16.mxu1 %vm495_vm0, %v3450_v46  ;;  %11249 = vmatprep.mubr.msk.bf16.mxu0 %vm495_vm0, %v3450_v46 }
 0x925   : > { %v12390_v18 = vpop.eup %12389  ;;  %v3385_v40 = vadd.f32 1.0, %v12388_v41  ;;  %12393 = vrcp.f32 %v3382_v62 }
 0x926   : > { %v3383_v16 = vadd.f32 1.0, %v12390_v18  ;;  %11230 = vmatmul.mubr.msk.bf16.gmra.mrb[128].mxu1 %vm495_vm0, %v3451_v27  ;;  %11250 = vmatmul.mubr.msk.bf16.gmra.mrb[128].mxu0 %vm495_vm0, %v3451_v27 }
 0x927   : > { %12395 = vrcp.f32 %v3385_v40 }
 0x928   : > { %12397 = vrcp.f32 %v3383_v16 }
 0x92e   : > { %v12392_v52 = vpop.eup %12391 }
 0x92f   : > { %v12394_v24 = vpop.eup %12393  ;;  %v3432_v36 = vmul.f32 %v12392_v52, %v3203_v47 }
 0x930   : > { %v3430_v7 = vmul.f32 %v12394_v24, %v3195_v14 }
 0x931   : > { %v12396_v37 = vpop.eup %12395 }
 0x932   : > { %v12398_v58 = vpop.eup %12397  ;;  %v3433_v8 = vmul.f32 %v12396_v37, %v3206_v29 }
 0x933   : > { %v3431_v28 = vmul.f32 %v12398_v58, %v3198_v11 }
 0x934   : > { %v3453_v10 = vpack.c.bf16 %v3433_v8, %v3432_v36 }
 0x935   : > { %v3452_v21 = vpack.c.bf16 %v3431_v28, %v3430_v7 }
 0x937   : > { %11233 = vmatprep.mubr.msk.bf16.mxu1 %vm495_vm0, %v3452_v21  ;;  %11253 = vmatprep.mubr.msk.bf16.mxu0 %vm495_vm0, %v3452_v21 }
 0x938   : > { %11234 = vmatmul.mubr.msk.bf16.gmra.mrb[132].mxu1 %vm495_vm0, %v3453_v10  ;;  %11254 = vmatmul.mubr.msk.bf16.gmra.mrb[132].mxu0 %vm495_vm0, %v3453_v10 }
 0x9e7   : > { %v14839_v43 = vpop.f32.mrb[120].mxu1  ;;  %v11243_v35 = vpop.f32.mrb[120].mxu0 }
 0x9e8   : > { %v3650_v1 = vadd.f32 %v11243_v35, %v14837_v34  ;;  %v14842_v54 = vpop.f32.mrb[121].mxu1  ;;  %v3641_v38 = vpop.f32.mrb[121].mxu0 }
 0x9e9   : > { %v3642_v45 = vadd.f32 %v14837_v34, %v3641_v38  ;;  %v14845_v31 = vpop.f32.mrb[122].mxu1  ;;  %v11244_v6 = vpop.f32.mrb[122].mxu0 }
 0x9ea   : > { %v9927_v59 = vmul.f32 -1.442695, %v3650_v1  ;;  %v3653_v2 = vadd.f32 %v11244_v6, %v14837_v34  ;;  %v14848_v50 = vpop.f32.mrb[123].mxu1  ;;  %v3644_v15 = vpop.f32.mrb[123].mxu0 }
 0x9eb   : > { %v9925_v27 = vmul.f32 -1.442695, %v3642_v45  ;;  %v3645_v41 = vadd.f32 %v14837_v34, %v3644_v15 }
 0x9ec   : > { %12399 = vpow2.f32 %v9927_v59  ;;  %v9928_v62 = vmul.f32 -1.442695, %v3653_v2 }
 0x9ed   : > { %12401 = vpow2.f32 %v9925_v27  ;;  %v9926_v46 = vmul.f32 -1.442695, %v3645_v41 }
 0x9ee   : > { %12403 = vpow2.f32 %v9928_v62 }
 0x9ef   : > { %12405 = vpow2.f32 %v9926_v46 }
 0x9f1   : > { %v14851_v18 = vpop.f32.mrb[124].mxu1  ;;  %v11247_v40 = vpop.f32.mrb[124].mxu0 }
 0x9f2   : > { %v3666_v16 = vadd.f32 %v11247_v40, %v14837_v34  ;;  %v14854_v47 = vpop.f32.mrb[125].mxu1  ;;  %v3657_v52 = vpop.f32.mrb[125].mxu0 }
 0x9f3   : > { %v3658_v14 = vadd.f32 %v14837_v34, %v3657_v52  ;;  %v14857_v24 = vpop.f32.mrb[126].mxu1  ;;  %v11248_v29 = vpop.f32.mrb[126].mxu0 }
 0x9f4   : > { %v9931_v36 = vmul.f32 -1.442695, %v3666_v16  ;;  %v3669_v37 = vadd.f32 %v11248_v29, %v14837_v34  ;;  %v14860_v11 = vpop.f32.mrb[127].mxu1  ;;  %v3660_v7 = vpop.f32.mrb[127].mxu0 }
 0x9f5   : > { %v9929_v58 = vmul.f32 -1.442695, %v3658_v14  ;;  %v3661_v8 = vadd.f32 %v14837_v34, %v3660_v7 }
 0x9f6   : > { %12407 = vpow2.f32 %v9931_v36  ;;  %v9932_v28 = vmul.f32 -1.442695, %v3669_v37  ;;  %v12400_v21 = vpop.eup %12399 }
 0x9f7   : > { %12409 = vpow2.f32 %v9929_v58  ;;  %v9930_v10 = vmul.f32 -1.442695, %v3661_v8  ;;  %v12402_v25 = vpop.eup %12401  ;;  %v3754_v60 = vadd.f32 1.0, %v12400_v21 }
 0x9f8   : > { %12411 = vpow2.f32 %v9932_v28  ;;  %v12404_v35 = vpop.eup %12403  ;;  %v3752_v1 = vadd.f32 1.0, %v12402_v25 }
 0x9f9   : > { %12413 = vpow2.f32 %v9930_v10  ;;  %v14863_v38 = vpop.f32.mrb[128].mxu1  ;;  %v11251_v45 = vpop.f32.mrb[128].mxu0  ;;  %v3755_v59 = vadd.f32 1.0, %v12404_v35  ;;  %v14878_v10 = vld [vmem:[%s17473_s7 + $0x3] ss:$0 sm:$0xff] }
 0x9fa   : > { %v12406_v6 = vpop.eup %12405  ;;  %12415 = vrcp.f32 %v3754_v60  ;;  %v3682_v2 = vadd.f32 %v11251_v45, %v14837_v34  ;;  %v14866_v15 = vpop.f32.mrb[129].mxu1  ;;  %v3537_v45 = vadd.f32 %v14839_v43, %v14878_v10 }
 0x9fb   : > { %v3673_v27 = vpop.f32.mrb[129].mxu0  ;;  %12417 = vrcp.f32 %v3752_v1  ;;  %v3753_v41 = vadd.f32 1.0, %v12406_v6  ;;  %v14869_v46 = vpop.f32.mrb[130].mxu1 }
 0x9fc   : > { %v3674_v62 = vadd.f32 %v14837_v34, %v3673_v27  ;;  %v11252_v40 = vpop.f32.mrb[130].mxu0  ;;  %12419 = vrcp.f32 %v3755_v59  ;;  %v9935_v16 = vmul.f32 -1.442695, %v3682_v2  ;;  %v14872_v14 = vpop.f32.mrb[131].mxu1  ;;  %v3529_v2 = vadd.f32 %v14878_v10, %v14842_v54 }
 0x9fd   : > { %v3685_v52 = vadd.f32 %v11252_v40, %v14837_v34  ;;  %v3676_v29 = vpop.f32.mrb[131].mxu0  ;;  %12421 = vrcp.f32 %v3753_v41 }
 0x9fe   : > { %v9933_v36 = vmul.f32 -1.442695, %v3674_v62  ;;  %v3677_v37 = vadd.f32 %v14837_v34, %v3676_v29  ;;  %12423 = vpow2.f32 %v9935_v16  ;;  %v3540_v62 = vadd.f32 %v14845_v31, %v14878_v10 }
 0x9ff   : > { %v9936_v7 = vmul.f32 -1.442695, %v3685_v52  ;;  %v3532_v16 = vadd.f32 %v14878_v10, %v14848_v50 }
 0xa00   : > { %v12408_v58 = vpop.eup %12407  ;;  %12425 = vpow2.f32 %v9933_v36  ;;  %v9934_v8 = vmul.f32 -1.442695, %v3677_v37 }
 0xa01   : > { %v12410_v28 = vpop.eup %12409  ;;  %v3758_v21 = vadd.f32 1.0, %v12408_v58  ;;  %12427 = vpow2.f32 %v9936_v7 }
 0xa02   : > { %v12412_v25 = vpop.eup %12411  ;;  %v3756_v60 = vadd.f32 1.0, %v12410_v28  ;;  %12429 = vpow2.f32 %v9934_v8 }
 0xa03   : > { %v12414_v35 = vpop.eup %12413  ;;  %12431 = vrcp.f32 %v3758_v21  ;;  %v3759_v1 = vadd.f32 1.0, %v12412_v25 }
 0xa04   : > { %12433 = vrcp.f32 %v3756_v60  ;;  %v3757_v6 = vadd.f32 1.0, %v12414_v35  ;;  %v12416_v59 = vpop.eup %12415  ;;  %v3553_v60 = vadd.f32 %v14851_v18, %v14878_v10 }
 0xa05   : > { %12435 = vrcp.f32 %v3759_v1  ;;  %v12418_v27 = vpop.eup %12417  ;;  %v14884_v41 = vmul.f32 %v12416_v59, %v3537_v45 }
 0xa06   : > { %12437 = vrcp.f32 %v3757_v6  ;;  %v12420_v40 = vpop.eup %12419  ;;  %v14890_v52 = vmul.f32 %v12418_v27, %v3529_v2  ;;  %v3545_v2 = vadd.f32 %v14878_v10, %v14854_v47 }
 0xa07   : > { %v12422_v43 = vpop.eup %12421  ;;  %v14892_v29 = vmul.f32 %v12420_v40, %v3540_v62 }
 0xa08   : > { %v12424_v36 = vpop.eup %12423  ;;  %v14894_v37 = vmul.f32 %v12422_v43, %v3532_v16  ;;  %v3556_v43 = vadd.f32 %v14857_v24, %v14878_v10 }
 0xa09   : > { %v3762_v7 = vadd.f32 1.0, %v12424_v36  ;;  %v3833_v58 = vpack.c.bf16 %v14892_v29, %v14884_v41 }
 0xa0a   : > { %v12426_v54 = vpop.eup %12425  ;;  %v3832_v50 = vpack.c.bf16 %v14894_v37, %v14890_v52 }
 0xa0b   : > { %v12428_v8 = vpop.eup %12427  ;;  %v3760_v31 = vadd.f32 1.0, %v12426_v54  ;;  %v14898_v28 = vpop.f32.mrb[132].mxu1  ;;  %12439 = vrcp.f32 %v3762_v7 }
 0xa0c   : > { %v11255_v21 = vpop.f32.mrb[132].mxu0  ;;  %v12430_v25 = vpop.eup %12429  ;;  %v3763_v35 = vadd.f32 1.0, %v12428_v8  ;;  %11261 = vmatprep.mubr.msk.bf16.mxu1 %vm495_vm0, %v3832_v50 }
 0xa0d   : > { %v3698_v1 = vadd.f32 %v11255_v21, %v14837_v34  ;;  %v14905_v45 = vpop.f32.mrb[133].mxu1  ;;  %v3689_v6 = vpop.f32.mrb[133].mxu0  ;;  %12441 = vrcp.f32 %v3760_v31  ;;  %v3761_v27 = vadd.f32 1.0, %v12430_v25  ;;  %11262 = vmatmul.mubr.msk.bf16.vlgmr.msra.gmra.mrb[136].mxu1 %vm495_vm0, %v3833_v58  ;;  %v3548_v31 = vadd.f32 %v14878_v10, %v14860_v11  ;;  %v13455_v58 = vld [vmem:[%s17468_s2 + $0x8] sm:$0xff]  }
 0xa0e   : > { %v12432_v59 = vpop.eup %12431  ;;  %v3690_v62 = vadd.f32 %v14837_v34, %v3689_v6  ;;  %v14910_v40 = vpop.f32.mrb[134].mxu1  ;;  %12443 = vrcp.f32 %v3763_v35  ;;  %11298 = vmatpush3.bf16.msra.mxu1 %v14831_v49 }
 0xa0f   : > { %v11256_v16 = vpop.f32.mrb[134].mxu0  ;;  %v12434_v18 = vpop.eup %12433  ;;  %v9939_v36 = vmul.f32 -1.442695, %v3698_v1  ;;  %12445 = vrcp.f32 %v3761_v27  ;;  %v14925_v1 = vmul.f32 %v12432_v59, %v3553_v60  ;;  %11299 = vmatprep.subr.bf16.mxu1 %v13455_v58  ;;  %v14941_v60 = vld [vmem:[%s17468_s2 + $0x10] sm:$0xff]   ;;  %v3569_v59 = vadd.f32 %v14863_v38, %v14878_v10 }
 0xa10   : > { %v3701_v54 = vadd.f32 %v11256_v16, %v14837_v34  ;;  %v14916_v7 = vpop.f32.mrb[135].mxu1  ;;  %v3692_v47 = vpop.f32.mrb[135].mxu0  ;;  %v9937_v21 = vmul.f32 -1.442695, %v3690_v62  ;;  %v14923_v35 = vmul.f32 %v12434_v18, %v3545_v2  ;;  %v3561_v62 = vadd.f32 %v14878_v10, %v14866_v15 }
 0xa11   : > { %v12436_v8 = vpop.eup %12435  ;;  %v3693_v50 = vadd.f32 %v14837_v34, %v3692_v47  ;;  %12447 = vpow2.f32 %v9939_v36  ;;  %v3572_v18 = vadd.f32 %v14869_v46, %v14878_v10 }
 0xa12   : > { %v12438_v24 = vpop.eup %12437  ;;  %v9940_v25 = vmul.f32 -1.442695, %v3701_v54  ;;  %12449 = vpow2.f32 %v9937_v21  ;;  %v14932_v27 = vmul.f32 %v12436_v8, %v3556_v43  ;;  %11300 = vmatpush3.bf16.msra.mxu1 %v13455_v58  ;;  %v3564_v54 = vadd.f32 %v14878_v10, %v14872_v14 }
 0xa13   : > { %v9938_v11 = vmul.f32 -1.442695, %v3693_v50  ;;  %v14930_v6 = vmul.f32 %v12438_v24, %v3548_v31  ;;  %11337 = vmatprep.subr.bf16.mxu1 %v14941_v60 }
 0xa14   : > { %12451 = vpow2.f32 %v9940_v25  ;;  %v3835_v34 = vpack.c.bf16 %v14932_v27, %v14925_v1 }
 0xa15   : > { %12453 = vpow2.f32 %v9938_v11  ;;  %v3834_v49 = vpack.c.bf16 %v14930_v6, %v14923_v35  ;;  %v12440_v2 = vpop.eup %12439 }
 0xa16   : > { %v14952_v43 = vmul.f32 %v12440_v2, %v3569_v59  ;;  %v3577_v2 = vadd.f32 %v14878_v10, %v14905_v45 }
 0xa17   : > { %11265 = vmatprep.mubr.msk.bf16.mxu1 %vm495_vm0, %v3834_v49  ;;  %v12442_v16 = vpop.eup %12441 }
 0xa18   : > { %11266 = vmatmul.mubr.msk.bf16.gmra.mrb[140].mxu1 %vm495_vm0, %v3835_v34  ;;  %v12444_v36 = vpop.eup %12443  ;;  %v14956_v47 = vmul.f32 %v12442_v16, %v3561_v62  ;;  %v3585_v34 = vadd.f32 %v14898_v28, %v14878_v10  ;;  %v3588_v16 = vadd.f32 %v14910_v40, %v14878_v10  ;;  %v2344_v40 = vsub.f32 1.0, %v14364_v33 }
 0xa19   : > { %v12446_v38 = vpop.eup %12445  ;;  %v14958_v8 = vmul.f32 %v12444_v36, %v3572_v18  ;;  %v2347_v33 = vsub.f32 1.0, %v14377_v20 }
 0xa1a   : > { %v14960_v21 = vmul.f32 %v12446_v38, %v3564_v54  ;;  %v3580_v54 = vadd.f32 %v14878_v10, %v14916_v7  ;;  %v14994_v10 = vld [vmem:[%s17476_s10 + $0x1] ss:$0 sm:$0xff]  ;;  %v2345_v7 = vsub.f32 1.0, %v14367_v55 }
 0xa1b   : > { %v12448_v31 = vpop.eup %12447  ;;  %v3837_v24 = vpack.c.bf16 %v14958_v8, %v14952_v43 }
 0xa1c   : > { %v12450_v15 = vpop.eup %12449  ;;  %v3766_v50 = vadd.f32 1.0, %v12448_v31  ;;  %v3836_v58 = vpack.c.bf16 %v14960_v21, %v14956_v47 }
 0xa1d   : > { %v3764_v25 = vadd.f32 1.0, %v12450_v15 }
 0xa1e   : > { %v12452_v46 = vpop.eup %12451  ;;  %12455 = vrcp.f32 %v3766_v50  ;;  %11269 = vmatprep.mubr.msk.bf16.mxu1 %vm495_vm0, %v3836_v58 }
 0xa1f   : > { %v12454_v11 = vpop.eup %12453  ;;  %v3767_v14 = vadd.f32 1.0, %v12452_v46  ;;  %12457 = vrcp.f32 %v3764_v25  ;;  %v2346_v46 = vsub.f32 1.0, %v14370_v17 }
 0xa20   : > { %v3765_v49 = vadd.f32 1.0, %v12454_v11  ;;  %11270 = vmatmul.mubr.msk.bf16.gmra.mrb[144].mxu1 %vm495_vm0, %v3837_v24 }
 0xa21   : > { %12459 = vrcp.f32 %v3767_v14  ;;  %v15010_v17 = vadd.f32 1e-05, %v2346_v46 }
 0xa22   : > { %12461 = vrcp.f32 %v3765_v49  ;;  %v15000_v49 = vadd.f32 1e-05, %v2344_v40 }
 0xa23   : > { %17539 = vst [vmem:[#allocation9_spill] sm:$0xff] %v15010_v17 }
 0xa24   : > { %17537 = vst [vmem:[#allocation7_spill] sm:$0xff] %v15000_v49 }
 0xa28   : > { %v12456_v59 = vpop.eup %12455 }
 0xa29   : > { %v12458_v62 = vpop.eup %12457  ;;  %v14974_v18 = vmul.f32 %v12456_v59, %v3585_v34  ;;  %v15003_v59 = vadd.f32 1e-05, %v2345_v7 }
 0xa2a   : > { %v14978_v38 = vmul.f32 %v12458_v62, %v3577_v2 }
 0xa2b   : > { %v12460_v36 = vpop.eup %12459  ;;  %17538 = vst [vmem:[#allocation8_spill] sm:$0xff] %v15003_v59 }
 0xa2c   : > { %v12462_v31 = vpop.eup %12461  ;;  %v14980_v15 = vmul.f32 %v12460_v36, %v3588_v16  ;;  %v2348_v16 = vsub.f32 1.0, %v14386_v42 }
 0xa2d   : > { %v14982_v28 = vmul.f32 %v12462_v31, %v3580_v54  ;;  %v15021_v31 = vadd.f32 1e-05, %v2347_v33 }
 0xa2e   : > { %v3839_v45 = vpack.c.bf16 %v14980_v15, %v14974_v18  ;;  %v15030_v46 = vadd.f32 1e-05, %v2348_v16 }
 0xa2f   : > { %v3838_v50 = vpack.c.bf16 %v14982_v28, %v14978_v38  ;;  %17540 = vst [vmem:[#allocation10_spill] sm:$0xff] %v15021_v31 }
 0xa30   : > { %17541 = vst [vmem:[#allocation11_spill] sm:$0xff] %v15030_v46 }
 0xa31   : > { %11273 = vmatprep.mubr.msk.bf16.mxu1 %vm495_vm0, %v3838_v50  ;;  %v2350_v50 = vsub.f32 1.0, %v14398_v23  ;;  %v2351_v23 = vsub.f32 1.0, %v14403_v13 }
 0xa32   : > { %11274 = vmatmul.mubr.msk.bf16.gmra.mrb[148].mxu1 %vm495_vm0, %v3839_v45  ;;  %v2349_v45 = vsub.f32 1.0, %v14389_v26 }
 0xa34   : > { %v15037_v33 = vadd.f32 1e-05, %v2349_v45 }
 0xa36   : > { %17542 = vst [vmem:[#allocation12_spill] sm:$0xff] %v15037_v33 }
 0xae0   : > { %v11263_v24 = vpop.f32.mrb[136].mxu1 }
 0xae1   : > { %v3920_v25 = vpop.f32.mrb[137].mxu1  ;;  %v3929_v58 = vadd.f32 %v11263_v24, %v14994_v10 }
 0xae2   : > { %v3921_v11 = vadd.f32 %v14994_v10, %v3920_v25  ;;  %v11264_v14 = vpop.f32.mrb[138].mxu1 }
 0xae3   : > { %v3923_v34 = vpop.f32.mrb[139].mxu1  ;;  %v3932_v2 = vadd.f32 %v11264_v14, %v14994_v10  ;;  %v15019_v20 = vmul.f32 %v3929_v58, %v15010_v17 }
 0xae4   : > { %v3924_v55 = vadd.f32 %v14994_v10, %v3923_v34  ;;  %v15008_v62 = vmul.f32 %v3921_v11, %v15000_v49  ;;  %v15039_v34 = vadd.f32 1e-05, %v2350_v50  ;;  %v15056_v50 = vadd.f32 1e-05, %v2351_v23 }
 0xae5   : > { %v15028_v7 = vmul.f32 %v3932_v2, %v15021_v31  ;;  %v4005_v26 = vsel %vm495_vm0, %v15019_v20, -inf }
 0xae6   : > { %v3999_v36 = vsel %vm495_vm0, %v15008_v62, -inf  ;;  %v15016_v54 = vmul.f32 %v3924_v55, %v15003_v59  ;;  %17543 = vst [vmem:[#allocation13_spill] sm:$0xff] %v15039_v34  ;;  %17544 = vst [vmem:[#allocation14_spill] sm:$0xff] %v15056_v50 }
 0xae7   : > { %4000 = vmax.xlane.f32.xlu0 %v3999_v36  ;;  %v4008_v16 = vsel %vm495_vm0, %v15028_v7, -inf }
 0xae8   : > { %v4002_v42 = vsel %vm495_vm0, %v15016_v54, -inf }
 0xae9   : > { %4003 = vmax.xlane.f32.xlu1 %v4002_v42  ;;  %v2352_v42 = vsub.f32 1.0, %v14418_v32 }
 0xaeb   : > { %v11267_v40 = vpop.f32.mrb[140].mxu1  ;;  %4006 = vmax.xlane.f32.xlu0 %v4005_v26 }
 0xaec   : > { %v3936_v24 = vpop.f32.mrb[141].mxu1  ;;  %v3945_v25 = vadd.f32 %v11267_v40, %v14994_v10 }
 0xaed   : > { %v3937_v58 = vadd.f32 %v14994_v10, %v3936_v24  ;;  %v11268_v11 = vpop.f32.mrb[142].mxu1  ;;  %4009 = vmax.xlane.f32.xlu1 %v4008_v16 }
 0xaee   : > { %v3939_v14 = vpop.f32.mrb[143].mxu1  ;;  %v3948_v2 = vadd.f32 %v11268_v11, %v14994_v10  ;;  %v15054_v45 = vmul.f32 %v3945_v25, %v15039_v34  ;;  %v2353_v11 = vsub.f32 1.0, %v14421_v9 }
 0xaef   : > { %v3940_v55 = vadd.f32 %v14994_v10, %v3939_v14  ;;  %v15046_v36 = vmul.f32 %v3937_v58, %v15030_v46  ;;  %v2354_v14 = vsub.f32 1.0, %v14430_v19 }
 0xaf0   : > { %v15062_v58 = vmul.f32 %v3948_v2, %v15056_v50  ;;  %v4017_v25 = vsel %vm495_vm0, %v15054_v45, -inf  ;;  %v2355_v2 = vsub.f32 1.0, %v14433_v3 }
 0xaf1   : > { %v4011_v13 = vsel %vm495_vm0, %v15046_v36, -inf  ;;  %v15051_v40 = vmul.f32 %v3940_v55, %v15037_v33 }
 0xaf2   : > { %4012 = vmax.xlane.f32.xlu0 %v4011_v13  ;;  %v15070_v13 = vadd.f32 1e-05, %v2352_v42  ;;  %v4020_v9 = vsel %vm495_vm0, %v15062_v58, -inf }
 0xaf3   : > { %v4014_v24 = vsel %vm495_vm0, %v15051_v40, -inf  ;;  %v11271_v26 = vpop.f32.mrb[144].mxu1 }
 0xaf4   : > { %4015 = vmax.xlane.f32.xlu1 %v4014_v24  ;;  %v3952_v55 = vpop.f32.mrb[145].mxu1  ;;  %v3961_v23 = vadd.f32 %v11271_v26, %v14994_v10  ;;  %17545 = vst [vmem:[#allocation15_spill] sm:$0xff] %v15070_v13  ;;  %v15075_v24 = vadd.f32 1e-05, %v2353_v11  ;;  %v15092_v11 = vadd.f32 1e-05, %v2355_v2 }
 0xaf5   : > { %v3953_v32 = vadd.f32 %v14994_v10, %v3952_v55  ;;  %v11272_v16 = vpop.f32.mrb[146].mxu1  ;;  %v15082_v55 = vadd.f32 1e-05, %v2354_v14 }
 0xaf6   : > { %4018 = vmax.xlane.f32.xlu0 %v4017_v25  ;;  %v3955_v50 = vpop.f32.mrb[147].mxu1  ;;  %17546 = vst [vmem:[#allocation16_spill] sm:$0xff] %v15075_v24  ;;  %v3964_v19 = vadd.f32 %v11272_v16, %v14994_v10  ;;  %17548 = vst [vmem:[#allocation18_spill] sm:$0xff] %v15092_v11  ;;  %v2357_v16 = vsub.f32 1.0, %v14447_v39 }
 0xaf7   : > { %v3956_v34 = vadd.f32 %v14994_v10, %v3955_v50  ;;  %v15080_v26 = vmul.f32 %v3953_v32, %v15070_v13  ;;  %17547 = vst [vmem:[#allocation17_spill] sm:$0xff] %v15082_v55  ;;  %v15090_v25 = vmul.f32 %v3961_v23, %v15082_v55  ;;  %v2356_v23 = vsub.f32 1.0, %v14444_v53 }
 0xaf8   : > { %4021 = vmax.xlane.f32.xlu1 %v4020_v9  ;;  %v15097_v32 = vmul.f32 %v3964_v19, %v15092_v11  ;;  %v2358_v9 = vsub.f32 1.0, %v14454_v0  ;;  %v15111_v13 = vadd.f32 1e-05, %v2357_v16 }
 0xaf9   : > { %v4023_v42 = vsel %vm495_vm0, %v15080_v26, -inf  ;;  %v15087_v3 = vmul.f32 %v3956_v34, %v15075_v24  ;;  %v4029_v14 = vsel %vm495_vm0, %v15090_v25, -inf  ;;  %v15108_v55 = vadd.f32 1e-05, %v2356_v23 }
 0xafa   : > { %4024 = vmax.xlane.f32.xlu0 %v4023_v42  ;;  %v4032_v34 = vsel %vm495_vm0, %v15097_v32, -inf  ;;  %17550 = vst [vmem:[#allocation20_spill] sm:$0xff] %v15111_v13  ;;  %v15118_v0 = vadd.f32 1e-05, %v2358_v9 }
 0xafb   : > { %v4026_v50 = vsel %vm495_vm0, %v15087_v3, -inf  ;;  %17549 = vst [vmem:[#allocation19_spill] sm:$0xff] %v15108_v55 }
 0xafc   : > { %4027 = vmax.xlane.f32.xlu1 %v4026_v50  ;;  %17551 = vst [vmem:[#allocation21_spill] sm:$0xff] %v15118_v0 }
 0xafe   : > { %4030 = vmax.xlane.f32.xlu0 %v4029_v14  ;;  %v2359_v14 = vsub.f32 1.0, %v14457_v63 }
 0xb00   : > { %4033 = vmax.xlane.f32.xlu1 %v4032_v34  ;;  %v15128_v16 = vadd.f32 1e-05, %v2359_v14 }
 0xb02   : > { %17552 = vst [vmem:[#allocation22_spill] sm:$0xff] %v15128_v16 }
 0xb05   : > { %v11275_v2 = vpop.f32.mrb[148].mxu1 }
 0xb06   : > { %v3968_v42 = vpop.f32.mrb[149].mxu1  ;;  %v3977_v19 = vadd.f32 %v11275_v2, %v14994_v10 }
 0xb07   : > { %v3969_v50 = vadd.f32 %v14994_v10, %v3968_v42  ;;  %v11276_v11 = vpop.f32.mrb[150].mxu1 }
 0xb08   : > { %v3971_v24 = vpop.f32.mrb[151].mxu1  ;;  %v3980_v53 = vadd.f32 %v11276_v11, %v14994_v10  ;;  %v15126_v63 = vmul.f32 %v3977_v19, %v15118_v0 }
 0xb09   : > { %v3972_v39 = vadd.f32 %v14994_v10, %v3971_v24  ;;  %v15116_v34 = vmul.f32 %v3969_v50, %v15108_v55 }
 0xb0a   : > { %v15133_v24 = vmul.f32 %v3980_v53, %v15128_v16  ;;  %v4041_v11 = vsel %vm495_vm0, %v15126_v63, -inf }
 0xb0b   : > { %v4035_v2 = vsel %vm495_vm0, %v15116_v34, -inf  ;;  %v15123_v23 = vmul.f32 %v3972_v39, %v15111_v13 }
 0xb0c   : > { %4036 = vmax.xlane.f32.xlu0 %v4035_v2  ;;  %v4044_v9 = vsel %vm495_vm0, %v15133_v24, -inf }
 0xb0d   : > { %v4038_v10 = vsel %vm495_vm0, %v15123_v23, -inf }
 0xb0e   : > { %4039 = vmax.xlane.f32.xlu1 %v4038_v10 }
 0xb10   : > { %4042 = vmax.xlane.f32.xlu0 %v4041_v11 }
 0xb12   : > { %4045 = vmax.xlane.f32.xlu1 %v4044_v9 }
 0xb74   : > { %v4001_v42 = vpop.xlane.xlu0 %4000 }
 0xb75   : > { %v4047_v19 = vsub.f32 %v15008_v62, %v4001_v42 }
 0xb76   : > { %v4004_v50 = vpop.xlane.xlu1 %4003 }
 0xb77   : > { %v4063_v14 = vmul.f32 1.442695, %v4047_v19  ;;  %v4048_v39 = vsub.f32 %v15016_v54, %v4004_v50 }
 0xb78   : > { %v4007_v2 = vpop.xlane.xlu0 %4006 }
 0xb79   : > { %12463 = vpow2.f32 %v4063_v14  ;;  %v4065_v53 = vmul.f32 1.442695, %v4048_v39  ;;  %v4049_v10 = vsub.f32 %v15019_v20, %v4007_v2 }
 0xb7a   : > { %v4010_v16 = vpop.xlane.xlu1 %4009 }
 0xb7b   : > { %12465 = vpow2.f32 %v4065_v53  ;;  %v4067_v0 = vmul.f32 1.442695, %v4049_v10  ;;  %v4050_v11 = vsub.f32 %v15028_v7, %v4010_v16 }
 0xb7d   : > { %12467 = vpow2.f32 %v4067_v0  ;;  %v4069_v9 = vmul.f32 1.442695, %v4050_v11 }
 0xb7f   : > { %v4013_v13 = vpop.xlane.xlu0 %4012  ;;  %12469 = vpow2.f32 %v4069_v9 }
 0xb80   : > { %v4051_v55 = vsub.f32 %v15046_v36, %v4013_v13 }
 0xb81   : > { %v4016_v62 = vpop.xlane.xlu1 %4015 }
 0xb82   : > { %v4071_v42 = vmul.f32 1.442695, %v4051_v55  ;;  %v4052_v54 = vsub.f32 %v15051_v40, %v4016_v62 }
 0xb83   : > { %v4019_v19 = vpop.xlane.xlu0 %4018  ;;  %v15146_v39 = vpop.eup %12463 }
 0xb84   : > { %12471 = vpow2.f32 %v4071_v42  ;;  %v4073_v50 = vmul.f32 1.442695, %v4052_v54  ;;  %v4053_v20 = vsub.f32 %v15054_v45, %v4019_v19  ;;  %v4095_v36 = vsel %vm495_vm0, %v15146_v39, 0.0 }
 0xb85   : > { %v4022_v14 = vpop.xlane.xlu1 %4021  ;;  %v15151_v13 = vpop.eup %12465  ;;  %4096 = vadd.xlane.f32.xlu0 %v4095_v36 }
 0xb86   : > { %12473 = vpow2.f32 %v4073_v50  ;;  %v4075_v7 = vmul.f32 1.442695, %v4053_v20  ;;  %v4054_v0 = vsub.f32 %v15062_v58, %v4022_v14  ;;  %v4098_v45 = vsel %vm495_vm0, %v15151_v13, 0.0 }
 0xb87   : > { %v4025_v40 = vpop.xlane.xlu0 %4024  ;;  %v15156_v2 = vpop.eup %12467  ;;  %4099 = vadd.xlane.f32.xlu1 %v4098_v45 }
 0xb88   : > { %12475 = vpow2.f32 %v4075_v7  ;;  %v4077_v55 = vmul.f32 1.442695, %v4054_v0  ;;  %v4055_v16 = vsub.f32 %v15080_v26, %v4025_v40  ;;  %v4101_v11 = vsel %vm495_vm0, %v15156_v2, 0.0 }
 0xb89   : > { %v4028_v53 = vpop.xlane.xlu1 %4027  ;;  %v15161_v9 = vpop.eup %12469  ;;  %4102 = vadd.xlane.f32.xlu0 %v4101_v11 }
 0xb8a   : > { %12477 = vpow2.f32 %v4077_v55  ;;  %v4079_v58 = vmul.f32 1.442695, %v4055_v16  ;;  %v4056_v10 = vsub.f32 %v15087_v3, %v4028_v53  ;;  %v4104_v54 = vsel %vm495_vm0, %v15161_v9, 0.0 }
 0xb8b   : > { %v4031_v62 = vpop.xlane.xlu0 %4030  ;;  %4105 = vadd.xlane.f32.xlu1 %v4104_v54 }
 0xb8c   : > { %12479 = vpow2.f32 %v4079_v58  ;;  %v4081_v26 = vmul.f32 1.442695, %v4056_v10  ;;  %v4057_v42 = vsub.f32 %v15090_v25, %v4031_v62 }
 0xb8d   : > { %v4034_v50 = vpop.xlane.xlu1 %4033 }
 0xb8e   : > { %v15166_v19 = vpop.eup %12471  ;;  %12481 = vpow2.f32 %v4081_v26  ;;  %v4083_v3 = vmul.f32 1.442695, %v4057_v42  ;;  %v4058_v20 = vsub.f32 %v15097_v32, %v4034_v50 }
 0xb8f   : > { %v4107_v14 = vsel %vm495_vm0, %v15166_v19, 0.0 }
 0xb90   : > { %v15171_v7 = vpop.eup %12473  ;;  %4108 = vadd.xlane.f32.xlu0 %v4107_v14  ;;  %12483 = vpow2.f32 %v4083_v3  ;;  %v4085_v0 = vmul.f32 1.442695, %v4058_v20 }
 0xb91   : > { %v4110_v25 = vsel %vm495_vm0, %v15171_v7, 0.0 }
 0xb92   : > { %v15175_v36 = vpop.eup %12475  ;;  %4111 = vadd.xlane.f32.xlu1 %v4110_v25  ;;  %12485 = vpow2.f32 %v4085_v0 }
 0xb93   : > { %v4113_v55 = vsel %vm495_vm0, %v15175_v36, 0.0 }
 0xb94   : > { %v15179_v40 = vpop.eup %12477  ;;  %4114 = vadd.xlane.f32.xlu0 %v4113_v55 }
 0xb95   : > { %v4116_v32 = vsel %vm495_vm0, %v15179_v40, 0.0 }
 0xb96   : > { %4117 = vadd.xlane.f32.xlu1 %v4116_v32  ;;  %v15183_v16 = vpop.eup %12479 }
 0xb97   : > { %v4119_v45 = vsel %vm495_vm0, %v15183_v16, 0.0 }
 0xb98   : > { %v15187_v53 = vpop.eup %12481  ;;  %4120 = vadd.xlane.f32.xlu0 %v4119_v45 }
 0xb99   : > { %v4037_v58 = vpop.xlane.xlu0 %4036  ;;  %v4122_v11 = vsel %vm495_vm0, %v15187_v53, 0.0 }
 0xb9a   : > { %v4059_v10 = vsub.f32 %v15116_v34, %v4037_v58  ;;  %v15192_v62 = vpop.eup %12483  ;;  %4123 = vadd.xlane.f32.xlu1 %v4122_v11 }
 0xb9b   : > { %v4040_v26 = vpop.xlane.xlu1 %4039  ;;  %v4125_v50 = vsel %vm495_vm0, %v15192_v62, 0.0 }
 0xb9c   : > { %v4087_v42 = vmul.f32 1.442695, %v4059_v10  ;;  %v4060_v54 = vsub.f32 %v15123_v23, %v4040_v26  ;;  %v15197_v3 = vpop.eup %12485  ;;  %4126 = vadd.xlane.f32.xlu0 %v4125_v50 }
 0xb9d   : > { %v4043_v20 = vpop.xlane.xlu0 %4042  ;;  %v4128_v0 = vsel %vm495_vm0, %v15197_v3, 0.0 }
 0xb9e   : > { %12487 = vpow2.f32 %v4087_v42  ;;  %v4089_v14 = vmul.f32 1.442695, %v4060_v54  ;;  %v4061_v34 = vsub.f32 %v15126_v63, %v4043_v20  ;;  %4129 = vadd.xlane.f32.xlu1 %v4128_v0 }
 0xb9f   : > { %v4046_v25 = vpop.xlane.xlu1 %4045 }
 0xba0   : > { %12489 = vpow2.f32 %v4089_v14  ;;  %v4091_v55 = vmul.f32 1.442695, %v4061_v34  ;;  %v4062_v23 = vsub.f32 %v15133_v24, %v4046_v25 }
 0xba2   : > { %12491 = vpow2.f32 %v4091_v55  ;;  %v4093_v32 = vmul.f32 1.442695, %v4062_v23 }
 0xba4   : > { %12493 = vpow2.f32 %v4093_v32 }
 0xba8   : > { %v15203_v45 = vpop.eup %12487 }
 0xba9   : > { %v4131_v58 = vsel %vm495_vm0, %v15203_v45, 0.0 }
 0xbaa   : > { %v15207_v10 = vpop.eup %12489  ;;  %4132 = vadd.xlane.f32.xlu0 %v4131_v58 }
 0xbab   : > { %v4134_v63 = vsel %vm495_vm0, %v15207_v10, 0.0 }
 0xbac   : > { %v15211_v11 = vpop.eup %12491  ;;  %4135 = vadd.xlane.f32.xlu1 %v4134_v63 }
 0xbad   : > { %v4137_v24 = vsel %vm495_vm0, %v15211_v11, 0.0 }
 0xbae   : > { %v15215_v26 = vpop.eup %12493  ;;  %4138 = vadd.xlane.f32.xlu0 %v4137_v24 }
 0xbaf   : > { %v4140_v42 = vsel %vm495_vm0, %v15215_v26, 0.0 }
 0xbb0   : > { %4141 = vadd.xlane.f32.xlu1 %v4140_v42 }
 0xc12   : > { %v4097_v54 = vpop.xlane.xlu0 %4096 }
 0xc13   : > { %12495 = vrcp.f32 %v4097_v54  ;;  %v13457_v54 = vld [vmem:[%s13641_s20] sm:$0xff] }
 0xc14   : > { %v4100_v50 = vpop.xlane.xlu1 %4099 }
 0xc15   : > { %12497 = vrcp.f32 %v4100_v50 }
 0xc16   : > { %v4103_v20 = vpop.xlane.xlu0 %4102 }
 0xc17   : > { %12499 = vrcp.f32 %v4103_v20  ;;  %v13458_v20 = vld [vmem:[%s13641_s20 + $0x8] sm:$0xff] }
 0xc18   : > { %v4106_v14 = vpop.xlane.xlu1 %4105 }
 0xc19   : > { %12501 = vrcp.f32 %v4106_v14 }
 0xc1d   : > { %v4109_v34 = vpop.xlane.xlu0 %4108  ;;  %v12496_v25 = vpop.eup %12495 }
 0xc1e   : > { %12503 = vrcp.f32 %v4109_v34  ;;  %v15220_v23 = vmul.f32 %v12496_v25, %v15146_v39 }
 0xc1f   : > { %v4112_v0 = vpop.xlane.xlu1 %4111  ;;  %v12498_v32 = vpop.eup %12497 }
 0xc20   : > { %12505 = vrcp.f32 %v4112_v0  ;;  %v15223_v63 = vmul.f32 %v12498_v32, %v15151_v13  ;;  %v4175_v50 = vmul.f32 %v13457_v54, %v15220_v23  ;;  %v13459_v32 = vld [vmem:[%s13641_s20 + $0x10] sm:$0xff] }
 0xc21   : > { %v4115_v55 = vpop.xlane.xlu0 %4114  ;;  %v12500_v24 = vpop.eup %12499 }
 0xc22   : > { %12507 = vrcp.f32 %v4115_v55  ;;  %v15226_v42 = vmul.f32 %v12500_v24, %v15156_v2  ;;  %v4176_v39 = vmul.f32 %v13458_v20, %v15223_v63  ;;  %v13460_v2 = vld [vmem:[%s13641_s20 + $0x18] sm:$0xff] }
 0xc23   : > { %v4118_v58 = vpop.xlane.xlu1 %4117  ;;  %v12502_v14 = vpop.eup %12501 }
 0xc24   : > { %12509 = vrcp.f32 %v4118_v58  ;;  %v15233_v0 = vmul.f32 %v12502_v14, %v15161_v9  ;;  %v4239_v13 = vpack.c.bf16 %v4176_v39, %v4175_v50  ;;  %v4177_v58 = vmul.f32 %v13459_v32, %v15226_v42  ;;  %v13462_v32 = vld [vmem:[%s13641_s20 + $0x28] sm:$0xff] }
 0xc25   : > { %v4121_v34 = vpop.xlane.xlu0 %4120 }
 0xc26   : > { %17553 = vst [vmem:[#allocation23_spill] sm:$0xff] %v15233_v0  ;;  %12511 = vrcp.f32 %v4121_v34  ;;  %v4178_v24 = vmul.f32 %v13460_v2, %v15233_v0  ;;  %11281 = vmatprep.mubr.msk.bf16.mxu0 %vm495_vm0, %v4239_v13  ;;  %11301 = vmatprep.mubr.msk.bf16.mxu1 %vm495_vm0, %v4239_v13 }
 0xc27   : > { %v4124_v55 = vpop.xlane.xlu1 %4123 }
 0xc28   : > { %v12504_v25 = vpop.eup %12503  ;;  %12513 = vrcp.f32 %v4124_v55  ;;  %v4240_v20 = vpack.c.bf16 %v4178_v24, %v4177_v58  ;;  %v13461_v55 = vld [vmem:[%s13641_s20 + $0x20] sm:$0xff]  ;;  %v13463_v58 = vld [vmem:[%s17467_s1 + $0x10] sm:$0xff]  }
 0xc29   : > { %v15242_v9 = vmul.f32 %v12504_v25, %v15166_v19  ;;  %v4127_v50 = vpop.xlane.xlu0 %4126 }
 0xc2a   : > { %v12506_v54 = vpop.eup %12505  ;;  %12515 = vrcp.f32 %v4127_v50  ;;  %11282 = vmatmul.mubr.msk.bf16.vlgmr.msra.gmra.mrb[136].mxu0 %vm495_vm0, %v4240_v20  ;;  %11302 = vmatmul.mubr.msk.bf16.vlgmr.msra.gmra.mrb[152].mxu1 %vm495_vm0, %v4240_v20  ;;  %v13466_v50 = vld [vmem:[%s13641_s20 + $0x30] sm:$0xff]  ;;  %v13467_v20 = vld [vmem:[%s13641_s20 + $0x38] sm:$0xff] }
 0xc2b   : > { %17554 = vst [vmem:[#allocation24_spill] sm:$0xff] %v15242_v9  ;;  %v15245_v39 = vmul.f32 %v12506_v54, %v15171_v7  ;;  %v4130_v34 = vpop.xlane.xlu1 %4129  ;;  %v4179_v13 = vmul.f32 %v13461_v55, %v15242_v9  ;;  %11338 = vmatpush3.bf16.msra.mxu1 %v14941_v60  ;;  %11318 = vmatpush3.bf16.msra.mxu0 %v13463_v58  ;;  %v13464_v54 = vld [vmem:[%s17468_s2 + $0x18] sm:$0xff]  }
 0xc2c   : > { %v12508_v14 = vpop.eup %12507  ;;  %12517 = vrcp.f32 %v4130_v34  ;;  %11339 = vmatprep.subr.bf16.mxu1 %v13464_v54 }
 0xc2d   : > { %17555 = vst [vmem:[#allocation25_spill] sm:$0xff] %v15245_v39  ;;  %v4180_v19 = vmul.f32 %v13462_v32, %v15245_v39  ;;  %v15254_v25 = vmul.f32 %v12508_v14, %v15175_v36  ;;  %v13465_v36 = vld [vmem:[%s17467_s1 + $0x18] sm:$0xff]  }
 0xc2e   : > { %v12510_v7 = vpop.eup %12509  ;;  %11319 = vmatprep.subr.bf16.mxu0 %v13465_v36 }
 0xc2f   : > { %17556 = vst [vmem:[#allocation26_spill] sm:$0xff] %v15254_v25  ;;  %v4241_v2 = vpack.c.bf16 %v4180_v19, %v4179_v13  ;;  %v15261_v24 = vmul.f32 %v12510_v7, %v15179_v40  ;;  %v4181_v40 = vmul.f32 %v13466_v50, %v15254_v25  ;;  %11340 = vmatpush3.bf16.msra.mxu1 %v13464_v54  ;;  %v13468_v7 = vld [vmem:[%s13641_s20 + $0x40] sm:$0xff] }
 0xc30   : > { %v12512_v60 = vpop.eup %12511  ;;  %11320 = vmatpush3.bf16.msra.mxu0 %v13465_v36 }
 0xc31   : > { %17557 = vst [vmem:[#allocation27_spill] sm:$0xff] %v15261_v24  ;;  %11285 = vmatprep.mubr.msk.bf16.mxu0 %vm495_vm0, %v4241_v2  ;;  %11305 = vmatprep.mubr.msk.bf16.mxu1 %vm495_vm0, %v4241_v2  ;;  %v4182_v14 = vmul.f32 %v13467_v20, %v15261_v24  ;;  %v15276_v34 = vmul.f32 %v12512_v60, %v15183_v16  ;;  %v13469_v2 = vld [vmem:[%s13641_s20 + $0x48] sm:$0xff]  ;;  %v13470_v20 = vld [vmem:[%s13641_s20 + $0x50] sm:$0xff] }
 0xc32   : > { %v12514_v55 = vpop.eup %12513 }
 0xc33   : > { %17558 = vst [vmem:[#allocation28_spill] sm:$0xff] %v15276_v34  ;;  %v4242_v13 = vpack.c.bf16 %v4182_v14, %v4181_v40  ;;  %v15279_v32 = vmul.f32 %v12514_v55, %v15187_v53  ;;  %v4183_v58 = vmul.f32 %v13468_v7, %v15276_v34  ;;  %v13471_v55 = vld [vmem:[%s13641_s20 + $0x58] sm:$0xff] }
 0xc34   : > { %v12516_v19 = vpop.eup %12515 }
 0xc35   : > { %17559 = vst [vmem:[#allocation29_spill] sm:$0xff] %v15279_v32  ;;  %11286 = vmatmul.mubr.msk.bf16.gmra.mrb[140].mxu0 %vm495_vm0, %v4242_v13  ;;  %11306 = vmatmul.mubr.msk.bf16.gmra.mrb[156].mxu1 %vm495_vm0, %v4242_v13  ;;  %v4184_v16 = vmul.f32 %v13469_v2, %v15279_v32  ;;  %v15288_v54 = vmul.f32 %v12516_v19, %v15192_v62 }
 0xc36   : > { %v12518_v36 = vpop.eup %12517 }
 0xc37   : > { %17560 = vst [vmem:[#allocation30_spill] sm:$0xff] %v15288_v54  ;;  %v4133_v60 = vpop.xlane.xlu0 %4132  ;;  %v4243_v53 = vpack.c.bf16 %v4184_v16, %v4183_v58  ;;  %v15291_v50 = vmul.f32 %v12518_v36, %v15197_v3  ;;  %v4185_v14 = vmul.f32 %v13470_v20, %v15288_v54 }
 0xc38   : > { %12519 = vrcp.f32 %v4133_v60  ;;  %v13472_v60 = vld [vmem:[%s13641_s20 + $0x60] sm:$0xff] }
 0xc39   : > { %17561 = vst [vmem:[#allocation31_spill] sm:$0xff] %v15291_v50  ;;  %v4136_v40 = vpop.xlane.xlu1 %4135  ;;  %11289 = vmatprep.mubr.msk.bf16.mxu0 %vm495_vm0, %v4243_v53  ;;  %11309 = vmatprep.mubr.msk.bf16.mxu1 %vm495_vm0, %v4243_v53  ;;  %v4186_v62 = vmul.f32 %v13471_v55, %v15291_v50 }
 0xc3a   : > { %12521 = vrcp.f32 %v4136_v40  ;;  %v13473_v40 = vld [vmem:[%s13641_s20 + $0x68] sm:$0xff] }
 0xc3b   : > { %v4139_v13 = vpop.xlane.xlu0 %4138  ;;  %v4244_v19 = vpack.c.bf16 %v4186_v62, %v4185_v14 }
 0xc3c   : > { %12523 = vrcp.f32 %v4139_v13 }
 0xc3d   : > { %v4142_v7 = vpop.xlane.xlu1 %4141  ;;  %11290 = vmatmul.mubr.msk.bf16.gmra.mrb[144].mxu0 %vm495_vm0, %v4244_v19  ;;  %11310 = vmatmul.mubr.msk.bf16.gmra.mrb[160].mxu1 %vm495_vm0, %v4244_v19  ;;  %v13475_v19 = vld [vmem:[%s13641_s20 + $0x78] sm:$0xff] }
 0xc3e   : > { %12525 = vrcp.f32 %v4142_v7 }
 0xc42   : > { %v12520_v3 = vpop.eup %12519 }
 0xc43   : > { %v15302_v58 = vmul.f32 %v12520_v3, %v15203_v45 }
 0xc44   : > { %v12522_v2 = vpop.eup %12521 }
 0xc45   : > { %17562 = vst [vmem:[#allocation32_spill] sm:$0xff] %v15302_v58  ;;  %v15305_v16 = vmul.f32 %v12522_v2, %v15207_v10  ;;  %v4187_v53 = vmul.f32 %v13472_v60, %v15302_v58  ;;  %v13474_v10 = vld [vmem:[%s13641_s20 + $0x70] sm:$0xff] }
 0xc46   : > { %v12524_v36 = vpop.eup %12523 }
 0xc47   : > { %17563 = vst [vmem:[#allocation33_spill] sm:$0xff] %v15305_v16  ;;  %v4188_v20 = vmul.f32 %v13473_v40, %v15305_v16  ;;  %v15312_v14 = vmul.f32 %v12524_v36, %v15211_v11 }
 0xc48   : > { %v12526_v55 = vpop.eup %12525 }
 0xc49   : > { %17564 = vst [vmem:[#allocation34_spill] sm:$0xff] %v15312_v14  ;;  %v4245_v62 = vpack.c.bf16 %v4188_v20, %v4187_v53  ;;  %v15315_v45 = vmul.f32 %v12526_v55, %v15215_v26  ;;  %v4189_v13 = vmul.f32 %v13474_v10, %v15312_v14  ;;  %v15330_v26 = vld [vmem:[%s17470_s4] ss:$0 sm:$0xff] }
 0xc4b   : > { %17565 = vst [vmem:[#allocation35_spill] sm:$0xff] %v15315_v45  ;;  %11293 = vmatprep.mubr.msk.bf16.mxu0 %vm495_vm0, %v4245_v62  ;;  %11313 = vmatprep.mubr.msk.bf16.mxu1 %vm495_vm0, %v4245_v62  ;;  %v4190_v7 = vmul.f32 %v13475_v19, %v15315_v45 }
 0xc4d   : > { %v4246_v3 = vpack.c.bf16 %v4190_v7, %v4189_v13 }
 0xc4f   : > { %11294 = vmatmul.mubr.msk.bf16.gmra.mrb[148].mxu0 %vm495_vm0, %v4246_v3  ;;  %11314 = vmatmul.mubr.msk.bf16.gmra.mrb[164].mxu1 %vm495_vm0, %v4246_v3 }
 0xcfd   : > { %v15325_v11 = vpop.f32.mrb[136].mxu0  ;;  %v11303_v2 = vpop.f32.mrb[152].mxu1 }
 0xcfe   : > { %v4411_v36 = vadd.f32 %v15330_v26, %v11303_v2  ;;  %v15333_v60 = vpop.f32.mrb[137].mxu0  ;;  %v4402_v53 = vpop.f32.mrb[153].mxu1 }
 0xcff   : > { %v4403_v40 = vadd.f32 %v15330_v26, %v4402_v53  ;;  %v15336_v20 = vpop.f32.mrb[138].mxu0  ;;  %v11304_v55 = vpop.f32.mrb[154].mxu1 }
 0xd00   : > { %v9974_v62 = vmul.f32 -1.442695, %v4411_v36  ;;  %v4414_v10 = vadd.f32 %v15330_v26, %v11304_v55  ;;  %v15339_v13 = vpop.f32.mrb[139].mxu0  ;;  %v4405_v19 = vpop.f32.mrb[155].mxu1 }
 0xd01   : > { %v9972_v7 = vmul.f32 -1.442695, %v4403_v40  ;;  %v4406_v3 = vadd.f32 %v15330_v26, %v4405_v19 }
 0xd02   : > { %12527 = vpow2.f32 %v9974_v62  ;;  %v9975_v45 = vmul.f32 -1.442695, %v4414_v10 }
 0xd03   : > { %12529 = vpow2.f32 %v9972_v7  ;;  %v9973_v2 = vmul.f32 -1.442695, %v4406_v3 }
 0xd04   : > { %12531 = vpow2.f32 %v9975_v45 }
 0xd05   : > { %12533 = vpow2.f32 %v9973_v2 }
 0xd08   : > { %v15342_v14 = vpop.f32.mrb[140].mxu0  ;;  %v11307_v53 = vpop.f32.mrb[156].mxu1 }
 0xd09   : > { %v4427_v16 = vadd.f32 %v15330_v26, %v11307_v53  ;;  %v15345_v36 = vpop.f32.mrb[141].mxu0  ;;  %v4418_v55 = vpop.f32.mrb[157].mxu1 }
 0xd0a   : > { %v4419_v58 = vadd.f32 %v15330_v26, %v4418_v55  ;;  %v15348_v50 = vpop.f32.mrb[142].mxu0  ;;  %v11308_v40 = vpop.f32.mrb[158].mxu1 }
 0xd0b   : > { %v9978_v19 = vmul.f32 -1.442695, %v4427_v16  ;;  %v4430_v62 = vadd.f32 %v15330_v26, %v11308_v40  ;;  %v15351_v10 = vpop.f32.mrb[143].mxu0  ;;  %v4421_v45 = vpop.f32.mrb[159].mxu1 }
 0xd0c   : > { %v9976_v7 = vmul.f32 -1.442695, %v4419_v58  ;;  %v4422_v3 = vadd.f32 %v15330_v26, %v4421_v45  ;;  %v12528_v54 = vpop.eup %12527 }
 0xd0d   : > { %12535 = vpow2.f32 %v9978_v19  ;;  %v9979_v2 = vmul.f32 -1.442695, %v4430_v62  ;;  %v12530_v32 = vpop.eup %12529  ;;  %v4515_v55 = vadd.f32 1.0, %v12528_v54 }
 0xd0e   : > { %12537 = vpow2.f32 %v9976_v7  ;;  %v9977_v53 = vmul.f32 -1.442695, %v4422_v3  ;;  %v12532_v34 = vpop.eup %12531  ;;  %v4513_v33 = vadd.f32 1.0, %v12530_v32 }
 0xd0f   : > { %12539 = vpow2.f32 %v9979_v2  ;;  %v12534_v46 = vpop.eup %12533  ;;  %v4516_v24 = vadd.f32 1.0, %v12532_v34 }
 0xd10   : > { %12541 = vpow2.f32 %v9977_v53  ;;  %v15354_v16 = vpop.f32.mrb[144].mxu0  ;;  %v11311_v40 = vpop.f32.mrb[160].mxu1  ;;  %v4514_v62 = vadd.f32 1.0, %v12534_v46 }
 0xd11   : > { %12543 = vrcp.f32 %v4515_v55  ;;  %v4443_v58 = vadd.f32 %v15330_v26, %v11311_v40  ;;  %v15357_v45 = vpop.f32.mrb[145].mxu0  ;;  %v4434_v19 = vpop.f32.mrb[161].mxu1 }
 0xd12   : > { %12545 = vrcp.f32 %v4513_v33  ;;  %v4435_v7 = vadd.f32 %v15330_v26, %v4434_v19  ;;  %v15360_v3 = vpop.f32.mrb[146].mxu0  ;;  %v11312_v54 = vpop.f32.mrb[162].mxu1 }
 0xd13   : > { %12547 = vrcp.f32 %v4516_v24  ;;  %v9982_v32 = vmul.f32 -1.442695, %v4443_v58  ;;  %v4446_v2 = vadd.f32 %v15330_v26, %v11312_v54  ;;  %v15363_v53 = vpop.f32.mrb[147].mxu0  ;;  %v4437_v55 = vpop.f32.mrb[163].mxu1 }
 0xd14   : > { %12549 = vrcp.f32 %v4514_v62  ;;  %v9980_v34 = vmul.f32 -1.442695, %v4435_v7  ;;  %v4438_v40 = vadd.f32 %v15330_v26, %v4437_v55  ;;  %v15369_v62 = vld [vmem:[%s17469_s3] ss:$0 sm:$0xff] }
 0xd15   : > { %12551 = vpow2.f32 %v9982_v32  ;;  %v9983_v31 = vmul.f32 -1.442695, %v4446_v2  ;;  %v4314_v7 = vadd.f32 %v15369_v62, %v15325_v11 }
 0xd16   : > { %12553 = vpow2.f32 %v9980_v34  ;;  %v9981_v46 = vmul.f32 -1.442695, %v4438_v40  ;;  %v4309_v40 = vadd.f32 %v15369_v62, %v15339_v13 }
 0xd17   : > { %v12536_v33 = vpop.eup %12535  ;;  %12555 = vpow2.f32 %v9983_v31  ;;  %v4306_v31 = vadd.f32 %v15369_v62, %v15333_v60 }
 0xd18   : > { %v12538_v19 = vpop.eup %12537  ;;  %v4519_v17 = vadd.f32 1.0, %v12536_v33  ;;  %12557 = vpow2.f32 %v9981_v46 }
 0xd19   : > { %v12540_v25 = vpop.eup %12539  ;;  %v4517_v24 = vadd.f32 1.0, %v12538_v19 }
 0xd1a   : > { %v12542_v58 = vpop.eup %12541  ;;  %12559 = vrcp.f32 %v4519_v17  ;;  %v4520_v54 = vadd.f32 1.0, %v12540_v25  ;;  %v4317_v17 = vadd.f32 %v15369_v62, %v15336_v20 }
 0xd1b   : > { %12561 = vrcp.f32 %v4517_v24  ;;  %v4518_v32 = vadd.f32 1.0, %v12542_v58  ;;  %v12544_v2 = vpop.eup %12543 }
 0xd1c   : > { %12563 = vrcp.f32 %v4520_v54  ;;  %v12546_v55 = vpop.eup %12545  ;;  %v4563_v34 = vmul.f32 %v12544_v2, %v4314_v7 }
 0xd1d   : > { %12565 = vrcp.f32 %v4518_v32  ;;  %v12548_v25 = vpop.eup %12547  ;;  %v4561_v33 = vmul.f32 %v12546_v55, %v4306_v31  ;;  %v4330_v32 = vadd.f32 %v15369_v62, %v15342_v14  ;;  %v4333_v14 = vadd.f32 %v15369_v62, %v15348_v50 }
 0xd1e   : > { %v12550_v46 = vpop.eup %12549  ;;  %v4564_v11 = vmul.f32 %v12548_v25, %v4317_v17 }
 0xd1f   : > { %v12552_v19 = vpop.eup %12551  ;;  %v4562_v24 = vmul.f32 %v12550_v46, %v4309_v40 }
 0xd20   : > { %v12554_v58 = vpop.eup %12553  ;;  %v4523_v39 = vadd.f32 1.0, %v12552_v19  ;;  %v4578_v59 = vpack.c.bf16 %v4564_v11, %v4563_v34  ;;  %v4322_v34 = vadd.f32 %v15369_v62, %v15345_v36 }
 0xd21   : > { %v12556_v60 = vpop.eup %12555  ;;  %v4521_v54 = vadd.f32 1.0, %v12554_v58  ;;  %v4577_v2 = vpack.c.bf16 %v4562_v24, %v4561_v33 }
 0xd22   : > { %v15379_v49 = vpop.f32.mrb[148].mxu0  ;;  %v11315_v7 = vpop.f32.mrb[164].mxu1  ;;  %12567 = vrcp.f32 %v4523_v39  ;;  %v4524_v13 = vadd.f32 1.0, %v12556_v60 }
 0xd23   : > { %v12558_v20 = vpop.eup %12557  ;;  %v4459_v31 = vadd.f32 %v15330_v26, %v11315_v7  ;;  %v15384_v55 = vpop.f32.mrb[149].mxu0  ;;  %12569 = vrcp.f32 %v4521_v54  ;;  %11321 = vmatprep.mubr.msk.bf16.mxu0 %vm495_vm0, %v4577_v2  ;;  %11341 = vmatprep.mubr.msk.bf16.mxu1 %vm495_vm0, %v4577_v2  ;;  %v4325_v54 = vadd.f32 %v15369_v62, %v15351_v10  ;;  %v4346_v10 = vadd.f32 %v15369_v62, %v15354_v16 }
 0xd24   : > { %v4450_v17 = vpop.f32.mrb[165].mxu1  ;;  %v12560_v25 = vpop.eup %12559  ;;  %v4522_v40 = vadd.f32 1.0, %v12558_v20  ;;  %12571 = vrcp.f32 %v4524_v13  ;;  %11322 = vmatmul.mubr.msk.bf16.vlgmr.msra.gmra.mrb[152].mxu0 %vm495_vm0, %v4578_v59  ;;  %11342 = vmatmul.mubr.msk.bf16.vlgmr.msra.gmra.mrb[168].mxu1 %vm495_vm0, %v4578_v59  ;;  %v4341_v16 = vadd.f32 %v15369_v62, %v15363_v53  ;;  %v4362_v53 = vadd.f32 %v15369_v62, %v15379_v49  ;;  %v11857_v49 = vld [vmem:[%s17472_s6 + $0x40] sm:$0xff]  }
 0xd25   : > { %v4451_v46 = vadd.f32 %v15330_v26, %v4450_v17  ;;  %v15389_v33 = vpop.f32.mrb[150].mxu0  ;;  %v11316_v11 = vpop.f32.mrb[166].mxu1  ;;  %v9986_v19 = vmul.f32 -1.442695, %v4459_v31  ;;  %v4567_v31 = vmul.f32 %v12560_v25, %v4330_v32  ;;  %v4349_v25 = vadd.f32 %v15369_v62, %v15360_v3  ;;  %11377 = vmatprep.subr.bf16.mxu1 %v11857_v49 }
 0xd26   : > { %v12562_v39 = vpop.eup %12561  ;;  %v4462_v24 = vadd.f32 %v15330_v26, %v11316_v11  ;;  %v15396_v36 = vpop.f32.mrb[151].mxu0  ;;  %12573 = vrcp.f32 %v4522_v40  ;;  %11378 = vmatpush3.bf16.msra.mxu1 %v11857_v49 }
 0xd27   : > { %v4453_v58 = vpop.f32.mrb[167].mxu1  ;;  %v12564_v60 = vpop.eup %12563  ;;  %v9984_v7 = vmul.f32 -1.442695, %v4451_v46  ;;  %12575 = vpow2.f32 %v9986_v19  ;;  %v4565_v13 = vmul.f32 %v12562_v39, %v4322_v34  ;;  %v4338_v34 = vadd.f32 %v15369_v62, %v15357_v45 }
 0xd28   : > { %v4454_v2 = vadd.f32 %v15330_v26, %v4453_v58  ;;  %v12566_v50 = vpop.eup %12565  ;;  %v9987_v20 = vmul.f32 -1.442695, %v4462_v24  ;;  %v4568_v9 = vmul.f32 %v12564_v60, %v4333_v14 }
 0xd29   : > { %12577 = vpow2.f32 %v9984_v7  ;;  %v4566_v11 = vmul.f32 %v12566_v50, %v4325_v54 }
 0xd2a   : > { %v9985_v17 = vmul.f32 -1.442695, %v4454_v2  ;;  %12579 = vpow2.f32 %v9987_v20  ;;  %v4580_v0 = vpack.c.bf16 %v4568_v9, %v4567_v31 }
 0xd2b   : > { %v4579_v59 = vpack.c.bf16 %v4566_v11, %v4565_v13  ;;  %v4354_v13 = vadd.f32 %v15369_v62, %v15384_v55  ;;  %v11858_v55 = vld [vmem:[%s17472_s6 + $0x48] sm:$0xff]  }
 0xd2c   : > { %12581 = vpow2.f32 %v9985_v17  ;;  %v12568_v26 = vpop.eup %12567  ;;  %v4365_v17 = vadd.f32 %v15369_v62, %v15389_v33  ;;  %11379 = vmatprep.subr.bf16.mxu1 %v11858_v55  ;;  %v11860_v33 = vld [vmem:[%s17471_s5 + $0x48] sm:$0xff]  }
 0xd2d   : > { %11325 = vmatprep.mubr.msk.bf16.mxu0 %vm495_vm0, %v4579_v59  ;;  %11345 = vmatprep.mubr.msk.bf16.mxu1 %vm495_vm0, %v4579_v59  ;;  %v12570_v32 = vpop.eup %12569  ;;  %v4571_v9 = vmul.f32 %v12568_v26, %v4346_v10  ;;  %v4357_v10 = vadd.f32 %v15369_v62, %v15396_v36  ;;  %v11859_v62 = vld [vmem:[%s17471_s5 + $0x40] sm:$0xff]  }
 0xd2e   : > { %11326 = vmatmul.mubr.msk.bf16.gmra.mrb[156].mxu0 %vm495_vm0, %v4580_v0  ;;  %11346 = vmatmul.mubr.msk.bf16.gmra.mrb[172].mxu1 %vm495_vm0, %v4580_v0  ;;  %v12572_v40 = vpop.eup %12571  ;;  %v4569_v46 = vmul.f32 %v12570_v32, %v4338_v34 }
 0xd2f   : > { %v4572_v14 = vmul.f32 %v12572_v40, %v4349_v25  ;;  %11357 = vmatprep.subr.bf16.mxu0 %v11859_v62  ;;  %11380 = vmatpush3.bf16.msra.mxu1 %v11858_v55 }
 0xd30   : > { %v12574_v39 = vpop.eup %12573  ;;  %11358 = vmatpush3.bf16.msra.mxu0 %v11859_v62 }
 0xd31   : > { %v12576_v19 = vpop.eup %12575  ;;  %v4570_v24 = vmul.f32 %v12574_v39, %v4341_v16  ;;  %v4582_v60 = vpack.c.bf16 %v4572_v14, %v4571_v9  ;;  %11359 = vmatprep.subr.bf16.mxu0 %v11860_v33 }
 0xd32   : > { %v4527_v45 = vadd.f32 1.0, %v12576_v19 }
 0xd33   : > { %v12578_v58 = vpop.eup %12577  ;;  %v4581_v0 = vpack.c.bf16 %v4570_v24, %v4569_v46  ;;  %v15448_v46 = vld [vmem:[%s17470_s4 + $0x1] ss:$0 sm:$0xff] }
 0xd34   : > { %v12580_v54 = vpop.eup %12579  ;;  %v4525_v7 = vadd.f32 1.0, %v12578_v58  ;;  %12583 = vrcp.f32 %v4527_v45  ;;  %11360 = vmatpush3.bf16.msra.mxu0 %v11860_v33 }
 0xd35   : > { %v4528_v50 = vadd.f32 1.0, %v12580_v54  ;;  %11329 = vmatprep.mubr.msk.bf16.mxu0 %vm495_vm0, %v4581_v0  ;;  %11349 = vmatprep.mubr.msk.bf16.mxu1 %vm495_vm0, %v4581_v0 }
 0xd36   : > { %v12582_v2 = vpop.eup %12581  ;;  %12585 = vrcp.f32 %v4525_v7  ;;  %11330 = vmatmul.mubr.msk.bf16.gmra.mrb[160].mxu0 %vm495_vm0, %v4582_v60  ;;  %11350 = vmatmul.mubr.msk.bf16.gmra.mrb[176].mxu1 %vm495_vm0, %v4582_v60 }
 0xd37   : > { %v4526_v3 = vadd.f32 1.0, %v12582_v2  ;;  %12587 = vrcp.f32 %v4528_v50 }
 0xd39   : > { %12589 = vrcp.f32 %v4526_v3 }
 0xd3e   : > { %v12584_v20 = vpop.eup %12583 }
 0xd3f   : > { %v4575_v11 = vmul.f32 %v12584_v20, %v4362_v53 }
 0xd40   : > { %v12586_v31 = vpop.eup %12585 }
 0xd41   : > { %v12588_v59 = vpop.eup %12587  ;;  %v4573_v26 = vmul.f32 %v12586_v31, %v4354_v13 }
 0xd42   : > { %v4576_v32 = vmul.f32 %v12588_v59, %v4365_v17 }
 0xd43   : > { %v12590_v34 = vpop.eup %12589 }
 0xd44   : > { %v4574_v25 = vmul.f32 %v12590_v34, %v4357_v10  ;;  %v4584_v9 = vpack.c.bf16 %v4576_v32, %v4575_v11 }
 0xd46   : > { %v4583_v40 = vpack.c.bf16 %v4574_v25, %v4573_v26 }
 0xd48   : > { %11333 = vmatprep.mubr.msk.bf16.mxu0 %vm495_vm0, %v4583_v40  ;;  %11353 = vmatprep.mubr.msk.bf16.mxu1 %vm495_vm0, %v4583_v40 }
 0xd49   : > { %11334 = vmatmul.mubr.msk.bf16.gmra.mrb[164].mxu0 %vm495_vm0, %v4584_v9  ;;  %11354 = vmatmul.mubr.msk.bf16.gmra.mrb[180].mxu1 %vm495_vm0, %v4584_v9 }
 0xdf7   : > { %v15443_v36 = vpop.f32.mrb[152].mxu0  ;;  %v11343_v16 = vpop.f32.mrb[168].mxu1 }
 0xdf8   : > { %v4749_v39 = vadd.f32 %v15448_v46, %v11343_v16  ;;  %v15451_v14 = vpop.f32.mrb[153].mxu0  ;;  %v4740_v19 = vpop.f32.mrb[169].mxu1 }
 0xdf9   : > { %v4741_v24 = vadd.f32 %v15448_v46, %v4740_v19  ;;  %v15454_v58 = vpop.f32.mrb[154].mxu0  ;;  %v11344_v45 = vpop.f32.mrb[170].mxu1 }
 0xdfa   : > { %v10006_v60 = vmul.f32 -1.442695, %v4749_v39  ;;  %v4752_v54 = vadd.f32 %v15448_v46, %v11344_v45  ;;  %v15457_v7 = vpop.f32.mrb[155].mxu0  ;;  %v4743_v0 = vpop.f32.mrb[171].mxu1 }
 0xdfb   : > { %v10004_v2 = vmul.f32 -1.442695, %v4741_v24  ;;  %v4744_v50 = vadd.f32 %v15448_v46, %v4743_v0 }
 0xdfc   : > { %12591 = vpow2.f32 %v10006_v60  ;;  %v10007_v3 = vmul.f32 -1.442695, %v4752_v54 }
 0xdfd   : > { %12593 = vpow2.f32 %v10004_v2  ;;  %v10005_v53 = vmul.f32 -1.442695, %v4744_v50 }
 0xdfe   : > { %12595 = vpow2.f32 %v10007_v3 }
 0xdff   : > { %12597 = vpow2.f32 %v10005_v53 }
 0xe01   : > { %v15460_v20 = vpop.f32.mrb[156].mxu0  ;;  %v11347_v13 = vpop.f32.mrb[172].mxu1 }
 0xe02   : > { %v4765_v31 = vadd.f32 %v15448_v46, %v11347_v13  ;;  %v15463_v17 = vpop.f32.mrb[157].mxu0  ;;  %v4756_v11 = vpop.f32.mrb[173].mxu1 }
 0xe03   : > { %v4757_v59 = vadd.f32 %v15448_v46, %v4756_v11  ;;  %v15466_v10 = vpop.f32.mrb[158].mxu0  ;;  %v11348_v26 = vpop.f32.mrb[174].mxu1 }
 0xe04   : > { %v10010_v34 = vmul.f32 -1.442695, %v4765_v31  ;;  %v4768_v32 = vadd.f32 %v15448_v46, %v11348_v26  ;;  %v15469_v25 = vpop.f32.mrb[159].mxu0  ;;  %v4759_v9 = vpop.f32.mrb[175].mxu1 }
 0xe05   : > { %v10008_v40 = vmul.f32 -1.442695, %v4757_v59  ;;  %v4760_v49 = vadd.f32 %v15448_v46, %v4759_v9 }
 0xe06   : > { %12599 = vpow2.f32 %v10010_v34  ;;  %v10011_v62 = vmul.f32 -1.442695, %v4768_v32  ;;  %v12592_v33 = vpop.eup %12591 }
 0xe07   : > { %12601 = vpow2.f32 %v10008_v40  ;;  %v10009_v55 = vmul.f32 -1.442695, %v4760_v49  ;;  %v12594_v16 = vpop.eup %12593  ;;  %v4853_v39 = vadd.f32 1.0, %v12592_v33 }
 0xe08   : > { %12603 = vpow2.f32 %v10011_v62  ;;  %v12596_v19 = vpop.eup %12595  ;;  %v4851_v24 = vadd.f32 1.0, %v12594_v16 }
 0xe09   : > { %12605 = vpow2.f32 %v10009_v55  ;;  %v15472_v45 = vpop.f32.mrb[160].mxu0  ;;  %v11351_v60 = vpop.f32.mrb[176].mxu1  ;;  %v4854_v0 = vadd.f32 1.0, %v12596_v19 }
 0xe0a   : > { %v12598_v54 = vpop.eup %12597  ;;  %12607 = vrcp.f32 %v4853_v39  ;;  %v4781_v2 = vadd.f32 %v15448_v46, %v11351_v60  ;;  %v15475_v50 = vpop.f32.mrb[161].mxu0 }
 0xe0b   : > { %v4772_v3 = vpop.f32.mrb[177].mxu1  ;;  %12609 = vrcp.f32 %v4851_v24  ;;  %v4852_v53 = vadd.f32 1.0, %v12598_v54  ;;  %v15478_v31 = vpop.f32.mrb[162].mxu0  ;;  %v15487_v54 = vld [vmem:[%s17469_s3 + $0x1] ss:$0 sm:$0xff] }
 0xe0c   : > { %v4773_v13 = vadd.f32 %v15448_v46, %v4772_v3  ;;  %v11352_v11 = vpop.f32.mrb[178].mxu1  ;;  %12611 = vrcp.f32 %v4854_v0  ;;  %v10014_v59 = vmul.f32 -1.442695, %v4781_v2  ;;  %v15481_v34 = vpop.f32.mrb[163].mxu0  ;;  %v4652_v0 = vadd.f32 %v15487_v54, %v15443_v36 }
 0xe0d   : > { %v4784_v26 = vadd.f32 %v15448_v46, %v11352_v11  ;;  %v4775_v32 = vpop.f32.mrb[179].mxu1  ;;  %12613 = vrcp.f32 %v4852_v53  ;;  %v4644_v53 = vadd.f32 %v15487_v54, %v15451_v14 }
 0xe0e   : > { %v10012_v9 = vmul.f32 -1.442695, %v4773_v13  ;;  %v4776_v40 = vadd.f32 %v15448_v46, %v4775_v32  ;;  %12615 = vpow2.f32 %v10014_v59  ;;  %v4655_v59 = vadd.f32 %v15487_v54, %v15454_v58 }
 0xe0f   : > { %v10015_v49 = vmul.f32 -1.442695, %v4784_v26  ;;  %v4647_v32 = vadd.f32 %v15487_v54, %v15457_v7 }
 0xe10   : > { %v12600_v62 = vpop.eup %12599  ;;  %12617 = vpow2.f32 %v10012_v9  ;;  %v10013_v55 = vmul.f32 -1.442695, %v4776_v40 }
 0xe11   : > { %v12602_v33 = vpop.eup %12601  ;;  %v4857_v16 = vadd.f32 1.0, %v12600_v62  ;;  %12619 = vpow2.f32 %v10015_v49 }
 0xe12   : > { %v12604_v39 = vpop.eup %12603  ;;  %v4855_v19 = vadd.f32 1.0, %v12602_v33  ;;  %12621 = vpow2.f32 %v10013_v55 }
 0xe13   : > { %v12606_v24 = vpop.eup %12605  ;;  %12623 = vrcp.f32 %v4857_v16  ;;  %v4858_v60 = vadd.f32 1.0, %v12604_v39 }
 0xe14   : > { %12625 = vrcp.f32 %v4855_v19  ;;  %v4856_v2 = vadd.f32 1.0, %v12606_v24  ;;  %v12608_v3 = vpop.eup %12607 }
 0xe15   : > { %12627 = vrcp.f32 %v4858_v60  ;;  %v12610_v13 = vpop.eup %12609  ;;  %v4901_v11 = vmul.f32 %v12608_v3, %v4652_v0  ;;  %v4668_v0 = vadd.f32 %v15487_v54, %v15460_v20 }
 0xe16   : > { %12629 = vrcp.f32 %v4856_v2  ;;  %v12612_v26 = vpop.eup %12611  ;;  %v4899_v9 = vmul.f32 %v12610_v13, %v4644_v53 }
 0xe17   : > { %v12614_v40 = vpop.eup %12613  ;;  %v4902_v36 = vmul.f32 %v12612_v26, %v4655_v59 }
 0xe18   : > { %v12616_v49 = vpop.eup %12615  ;;  %v4900_v62 = vmul.f32 %v12614_v40, %v4647_v32  ;;  %v4671_v40 = vadd.f32 %v15487_v54, %v15466_v10 }
 0xe19   : > { %v4861_v33 = vadd.f32 1.0, %v12616_v49  ;;  %v4928_v16 = vpack.c.bf16 %v4902_v36, %v4901_v11  ;;  %v4660_v11 = vadd.f32 %v15487_v54, %v15463_v17 }
 0xe1a   : > { %v12618_v55 = vpop.eup %12617  ;;  %v4927_v60 = vpack.c.bf16 %v4900_v62, %v4899_v9 }
 0xe1b   : > { %v12620_v14 = vpop.eup %12619  ;;  %v4859_v39 = vadd.f32 1.0, %v12618_v55  ;;  %12631 = vrcp.f32 %v4861_v33  ;;  %v4663_v33 = vadd.f32 %v15487_v54, %v15469_v25  ;;  %v4684_v25 = vadd.f32 %v15487_v54, %v15472_v45 }
 0xe1c   : > { %v15497_v19 = vpop.f32.mrb[164].mxu0  ;;  %v11355_v24 = vpop.f32.mrb[180].mxu1  ;;  %v4862_v7 = vadd.f32 1.0, %v12620_v14  ;;  %11361 = vmatprep.mubr.msk.bf16.mxu0 %vm495_vm0, %v4927_v60  ;;  %11381 = vmatprep.mubr.msk.bf16.mxu1 %vm495_vm0, %v4927_v60  ;;  %v4679_v45 = vadd.f32 %v15487_v54, %v15481_v34 }
 0xe1d   : > { %v12622_v58 = vpop.eup %12621  ;;  %v4797_v2 = vadd.f32 %v15448_v46, %v11355_v24  ;;  %v15502_v3 = vpop.f32.mrb[165].mxu0  ;;  %12633 = vrcp.f32 %v4859_v39  ;;  %11362 = vmatmul.mubr.msk.bf16.vlgmr.msra.gmra.mrb[168].mxu0 %vm495_vm0, %v4928_v16  ;;  %11382 = vmatmul.mubr.msk.bf16.vlgmr.msra.gmra.mrb[184].mxu1 %vm495_vm0, %v4928_v16  ;;  %v4700_v34 = vadd.f32 %v15487_v54, %v15497_v19  ;;  %v11861_v19 = vld [vmem:[%s17472_s6 + $0x50] sm:$0xff]  }
 0xe1e   : > { %v4788_v53 = vpop.f32.mrb[181].mxu1  ;;  %v12624_v13 = vpop.eup %12623  ;;  %v4860_v59 = vadd.f32 1.0, %v12622_v58  ;;  %12635 = vrcp.f32 %v4862_v7  ;;  %11417 = vmatprep.subr.bf16.mxu1 %v11861_v19 }
 0xe1f   : > { %v4789_v26 = vadd.f32 %v15448_v46, %v4788_v53  ;;  %v15507_v32 = vpop.f32.mrb[166].mxu0  ;;  %v11356_v9 = vpop.f32.mrb[182].mxu1  ;;  %v10018_v36 = vmul.f32 -1.442695, %v4797_v2  ;;  %v4905_v58 = vmul.f32 %v12624_v13, %v4668_v0  ;;  %v4687_v13 = vadd.f32 %v15487_v54, %v15478_v31  ;;  %11418 = vmatpush3.bf16.msra.mxu1 %v11861_v19 }
 0xe20   : > { %v12626_v20 = vpop.eup %12625  ;;  %v4800_v49 = vadd.f32 %v15448_v46, %v11356_v9  ;;  %v15514_v17 = vpop.f32.mrb[167].mxu0  ;;  %12637 = vrcp.f32 %v4860_v59 }
 0xe21   : > { %v4791_v62 = vpop.f32.mrb[183].mxu1  ;;  %v12628_v55 = vpop.eup %12627  ;;  %v10016_v14 = vmul.f32 -1.442695, %v4789_v26  ;;  %12639 = vpow2.f32 %v10018_v36  ;;  %v4903_v60 = vmul.f32 %v12626_v20, %v4660_v11  ;;  %v4676_v11 = vadd.f32 %v15487_v54, %v15475_v50 }
 0xe22   : > { %v4792_v39 = vadd.f32 %v15448_v46, %v4791_v62  ;;  %v12630_v10 = vpop.eup %12629  ;;  %v10019_v24 = vmul.f32 -1.442695, %v4800_v49  ;;  %v4906_v53 = vmul.f32 %v12628_v55, %v4671_v40 }
 0xe23   : > { %12641 = vpow2.f32 %v10016_v14  ;;  %v4904_v2 = vmul.f32 %v12630_v10, %v4663_v33 }
 0xe24   : > { %v10017_v7 = vmul.f32 -1.442695, %v4792_v39  ;;  %12643 = vpow2.f32 %v10019_v24  ;;  %v4930_v9 = vpack.c.bf16 %v4906_v53, %v4905_v58  ;;  %v4703_v53 = vadd.f32 %v15487_v54, %v15507_v32  ;;  %v11864_v32 = vld [vmem:[%s17471_s5 + $0x58] sm:$0xff]  }
 0xe25   : > { %v4929_v16 = vpack.c.bf16 %v4904_v2, %v4903_v60  ;;  %v12632_v46 = vpop.eup %12631 }
 0xe26   : > { %12645 = vpow2.f32 %v10017_v7  ;;  %v4909_v59 = vmul.f32 %v12632_v46, %v4684_v25  ;;  %v4692_v7 = vadd.f32 %v15487_v54, %v15502_v3  ;;  %v4695_v25 = vadd.f32 %v15487_v54, %v15514_v17  ;;  %v11863_v54 = vld [vmem:[%s17471_s5 + $0x50] sm:$0xff]   ;;  %v11862_v3 = vld [vmem:[%s17472_s6 + $0x58] sm:$0xff]   ;;  %v15564_v17 = vld [vmem:[%s17467_s1] sm:$0xff]  }
 0xe27   : > { %11365 = vmatprep.mubr.msk.bf16.mxu0 %vm495_vm0, %v4929_v16  ;;  %11385 = vmatprep.mubr.msk.bf16.mxu1 %vm495_vm0, %v4929_v16  ;;  %v12634_v0 = vpop.eup %12633 }
 0xe28   : > { %11366 = vmatmul.mubr.msk.bf16.gmra.mrb[172].mxu0 %vm495_vm0, %v4930_v9  ;;  %11386 = vmatmul.mubr.msk.bf16.gmra.mrb[188].mxu1 %vm495_vm0, %v4930_v9  ;;  %v12636_v26 = vpop.eup %12635  ;;  %v4907_v20 = vmul.f32 %v12634_v0, %v4676_v11 }
 0xe29   : > { %v4910_v36 = vmul.f32 %v12636_v26, %v4687_v13  ;;  %11397 = vmatprep.subr.bf16.mxu0 %v11863_v54  ;;  %11419 = vmatprep.subr.bf16.mxu1 %v11862_v3 }
 0xe2a   : > { %v12638_v40 = vpop.eup %12637  ;;  %11398 = vmatpush3.bf16.msra.mxu0 %v11863_v54  ;;  %11420 = vmatpush3.bf16.msra.mxu1 %v11862_v3 }
 0xe2b   : > { %v12640_v49 = vpop.eup %12639  ;;  %v4908_v62 = vmul.f32 %v12638_v40, %v4679_v45  ;;  %v4932_v33 = vpack.c.bf16 %v4910_v36, %v4909_v59  ;;  %11457 = vmatprep.subr.bf16.mxu1 %v15564_v17  ;;  %11399 = vmatprep.subr.bf16.mxu0 %v11864_v32  ;;  %v15570_v45 = vld [vmem:[%s17474_s8 + $0x4] ss:$0 sm:$0xff] }
 0xe2c   : > { %v4865_v50 = vadd.f32 1.0, %v12640_v49 }
 0xe2d   : > { %v12642_v55 = vpop.eup %12641  ;;  %v4931_v10 = vpack.c.bf16 %v4908_v62, %v4907_v20 }
 0xe2e   : > { %v12644_v14 = vpop.eup %12643  ;;  %v4863_v39 = vadd.f32 1.0, %v12642_v55  ;;  %12647 = vrcp.f32 %v4865_v50  ;;  %11400 = vmatpush3.bf16.msra.mxu0 %v11864_v32 }
 0xe2f   : > { %v4866_v60 = vadd.f32 1.0, %v12644_v14  ;;  %11369 = vmatprep.mubr.msk.bf16.mxu0 %vm495_vm0, %v4931_v10  ;;  %11389 = vmatprep.mubr.msk.bf16.mxu1 %vm495_vm0, %v4931_v10 }
 0xe30   : > { %v12646_v24 = vpop.eup %12645  ;;  %12649 = vrcp.f32 %v4863_v39  ;;  %11370 = vmatmul.mubr.msk.bf16.gmra.mrb[176].mxu0 %vm495_vm0, %v4932_v33  ;;  %11390 = vmatmul.mubr.msk.bf16.gmra.mrb[192].mxu1 %vm495_vm0, %v4932_v33 }
 0xe31   : > { %v4864_v31 = vadd.f32 1.0, %v12646_v24  ;;  %12651 = vrcp.f32 %v4866_v60 }
 0xe33   : > { %12653 = vrcp.f32 %v4864_v31 }
 0xe38   : > { %v12648_v58 = vpop.eup %12647 }
 0xe39   : > { %v4913_v16 = vmul.f32 %v12648_v58, %v4700_v34 }
 0xe3a   : > { %v12650_v2 = vpop.eup %12649 }
 0xe3b   : > { %v12652_v9 = vpop.eup %12651  ;;  %v4911_v46 = vmul.f32 %v12650_v2, %v4692_v7 }
 0xe3c   : > { %v4914_v0 = vmul.f32 %v12652_v9, %v4703_v53 }
 0xe3d   : > { %v12654_v11 = vpop.eup %12653 }
 0xe3e   : > { %v4912_v13 = vmul.f32 %v12654_v11, %v4695_v25  ;;  %v4934_v59 = vpack.c.bf16 %v4914_v0, %v4913_v16 }
 0xe40   : > { %v4933_v26 = vpack.c.bf16 %v4912_v13, %v4911_v46 }
 0xe42   : > { %11373 = vmatprep.mubr.msk.bf16.mxu0 %vm495_vm0, %v4933_v26  ;;  %11393 = vmatprep.mubr.msk.bf16.mxu1 %vm495_vm0, %v4933_v26 }
 0xe43   : > { %11374 = vmatmul.mubr.msk.bf16.gmra.mrb[180].mxu0 %vm495_vm0, %v4934_v59  ;;  %11394 = vmatmul.mubr.msk.bf16.gmra.mrb[196].mxu1 %vm495_vm0, %v4934_v59 }
 0xef0   : > { %v15572_v20 = vpop.f32.mrb[168].mxu0  ;;  %v11383_v40 = vpop.f32.mrb[184].mxu1 }
 0xef1   : > { %v5131_v36 = vadd.f32 %v11383_v40, %v15570_v45  ;;  %v15575_v49 = vpop.f32.mrb[169].mxu0  ;;  %v5122_v62 = vpop.f32.mrb[185].mxu1 }
 0xef2   : > { %v5123_v55 = vadd.f32 %v15570_v45, %v5122_v62  ;;  %v15578_v50 = vpop.f32.mrb[170].mxu0  ;;  %v11384_v33 = vpop.f32.mrb[186].mxu1 }
 0xef3   : > { %v10052_v14 = vmul.f32 -1.442695, %v5131_v36  ;;  %v5134_v39 = vadd.f32 %v11384_v33, %v15570_v45  ;;  %v15581_v10 = vpop.f32.mrb[171].mxu0  ;;  %v5125_v24 = vpop.f32.mrb[187].mxu1 }
 0xef4   : > { %v10050_v60 = vmul.f32 -1.442695, %v5123_v55  ;;  %v5126_v31 = vadd.f32 %v15570_v45, %v5125_v24 }
 0xef5   : > { %12655 = vpow2.f32 %v10052_v14  ;;  %v10053_v34 = vmul.f32 -1.442695, %v5134_v39 }
 0xef6   : > { %12657 = vpow2.f32 %v10050_v60  ;;  %v10051_v58 = vmul.f32 -1.442695, %v5126_v31 }
 0xef7   : > { %12659 = vpow2.f32 %v10053_v34 }
 0xef8   : > { %12661 = vpow2.f32 %v10051_v58 }
 0xefb   : > { %v15584_v7 = vpop.f32.mrb[172].mxu0  ;;  %v11387_v2 = vpop.f32.mrb[188].mxu1 }
 0xefc   : > { %v5147_v53 = vadd.f32 %v11387_v2, %v15570_v45  ;;  %v15587_v16 = vpop.f32.mrb[173].mxu0  ;;  %v5138_v9 = vpop.f32.mrb[189].mxu1 }
 0xefd   : > { %v5139_v25 = vadd.f32 %v15570_v45, %v5138_v9  ;;  %v15590_v46 = vpop.f32.mrb[174].mxu0  ;;  %v11388_v11 = vpop.f32.mrb[190].mxu1 }
 0xefe   : > { %v10056_v0 = vmul.f32 -1.442695, %v5147_v53  ;;  %v5150_v13 = vadd.f32 %v11388_v11, %v15570_v45  ;;  %v15593_v59 = vpop.f32.mrb[175].mxu0  ;;  %v5141_v26 = vpop.f32.mrb[191].mxu1 }
 0xeff   : > { %v10054_v19 = vmul.f32 -1.442695, %v5139_v25  ;;  %v5142_v54 = vadd.f32 %v15570_v45, %v5141_v26  ;;  %v12656_v40 = vpop.eup %12655 }
 0xf00   : > { %12663 = vpow2.f32 %v10056_v0  ;;  %v10057_v3 = vmul.f32 -1.442695, %v5150_v13  ;;  %v12658_v36 = vpop.eup %12657  ;;  %v5235_v62 = vadd.f32 1.0, %v12656_v40 }
 0xf01   : > { %12665 = vpow2.f32 %v10054_v19  ;;  %v10055_v32 = vmul.f32 -1.442695, %v5142_v54  ;;  %v12660_v55 = vpop.eup %12659  ;;  %v5233_v33 = vadd.f32 1.0, %v12658_v36 }
 0xf02   : > { %12667 = vpow2.f32 %v10057_v3  ;;  %v12662_v24 = vpop.eup %12661  ;;  %v5236_v60 = vadd.f32 1.0, %v12660_v55 }
 0xf03   : > { %12669 = vpow2.f32 %v10055_v32  ;;  %v15596_v14 = vpop.f32.mrb[176].mxu0  ;;  %v11391_v39 = vpop.f32.mrb[192].mxu1  ;;  %v5234_v2 = vadd.f32 1.0, %v12662_v24 }
 0xf04   : > { %12671 = vrcp.f32 %v5235_v62  ;;  %v5163_v31 = vadd.f32 %v11391_v39, %v15570_v45  ;;  %v15599_v34 = vpop.f32.mrb[177].mxu0  ;;  %v5154_v58 = vpop.f32.mrb[193].mxu1  ;;  %v15611_v62 = vld [vmem:[%s17473_s7 + $0x4] ss:$0 sm:$0xff] }
 0xf05   : > { %12673 = vrcp.f32 %v5233_v33  ;;  %v5155_v53 = vadd.f32 %v15570_v45, %v5154_v58  ;;  %v15602_v9 = vpop.f32.mrb[178].mxu0  ;;  %v11392_v25 = vpop.f32.mrb[194].mxu1 }
 0xf06   : > { %12675 = vrcp.f32 %v5236_v60  ;;  %v10060_v11 = vmul.f32 -1.442695, %v5163_v31  ;;  %v5166_v0 = vadd.f32 %v11392_v25, %v15570_v45  ;;  %v15605_v13 = vpop.f32.mrb[179].mxu0  ;;  %v5157_v26 = vpop.f32.mrb[195].mxu1  ;;  %v5018_v31 = vadd.f32 %v15572_v20, %v15611_v62 }
 0xf07   : > { %12677 = vrcp.f32 %v5234_v2  ;;  %v10058_v19 = vmul.f32 -1.442695, %v5155_v53  ;;  %v5158_v54 = vadd.f32 %v15570_v45, %v5157_v26  ;;  %v5010_v53 = vadd.f32 %v15611_v62, %v15575_v49 }
 0xf08   : > { %12679 = vpow2.f32 %v10060_v11  ;;  %v10061_v3 = vmul.f32 -1.442695, %v5166_v0  ;;  %v5021_v0 = vadd.f32 %v15578_v50, %v15611_v62 }
 0xf09   : > { %12681 = vpow2.f32 %v10058_v19  ;;  %v10059_v40 = vmul.f32 -1.442695, %v5158_v54  ;;  %v5013_v19 = vadd.f32 %v15611_v62, %v15581_v10 }
 0xf0a   : > { %v12664_v32 = vpop.eup %12663  ;;  %12683 = vpow2.f32 %v10061_v3 }
 0xf0b   : > { %v12666_v36 = vpop.eup %12665  ;;  %v5239_v55 = vadd.f32 1.0, %v12664_v32  ;;  %12685 = vpow2.f32 %v10059_v40 }
 0xf0c   : > { %v12668_v33 = vpop.eup %12667  ;;  %v5237_v39 = vadd.f32 1.0, %v12666_v36 }
 0xf0d   : > { %v12670_v24 = vpop.eup %12669  ;;  %12687 = vrcp.f32 %v5239_v55  ;;  %v5240_v60 = vadd.f32 1.0, %v12668_v33 }
 0xf0e   : > { %12689 = vrcp.f32 %v5237_v39  ;;  %v5238_v58 = vadd.f32 1.0, %v12670_v24  ;;  %v12672_v2 = vpop.eup %12671 }
 0xf0f   : > { %12691 = vrcp.f32 %v5240_v60  ;;  %v12674_v25 = vpop.eup %12673  ;;  %v5283_v11 = vmul.f32 %v12672_v2, %v5018_v31 }
 0xf10   : > { %12693 = vrcp.f32 %v5238_v58  ;;  %v12676_v26 = vpop.eup %12675  ;;  %v5281_v54 = vmul.f32 %v12674_v25, %v5010_v53  ;;  %v5034_v58 = vadd.f32 %v15584_v7, %v15611_v62 }
 0xf11   : > { %v12678_v3 = vpop.eup %12677  ;;  %v5284_v20 = vmul.f32 %v12676_v26, %v5021_v0 }
 0xf12   : > { %v12680_v32 = vpop.eup %12679  ;;  %v5282_v40 = vmul.f32 %v12678_v3, %v5013_v19 }
 0xf13   : > { %v12682_v36 = vpop.eup %12681  ;;  %v5243_v55 = vadd.f32 1.0, %v12680_v32  ;;  %v5310_v33 = vpack.c.bf16 %v5284_v20, %v5283_v11  ;;  %v5026_v11 = vadd.f32 %v15611_v62, %v15587_v16  ;;  %v5037_v20 = vadd.f32 %v15590_v46, %v15611_v62 }
 0xf14   : > { %v12684_v49 = vpop.eup %12683  ;;  %v5241_v39 = vadd.f32 1.0, %v12682_v36  ;;  %v5309_v31 = vpack.c.bf16 %v5282_v40, %v5281_v54 }
 0xf15   : > { %v12686_v50 = vpop.eup %12685  ;;  %12695 = vrcp.f32 %v5243_v55  ;;  %v5244_v10 = vadd.f32 1.0, %v12684_v49  ;;  %v5029_v49 = vadd.f32 %v15611_v62, %v15593_v59 }
 0xf16   : > { %v15621_v24 = vpop.f32.mrb[180].mxu0  ;;  %v11395_v60 = vpop.f32.mrb[196].mxu1  ;;  %12697 = vrcp.f32 %v5241_v39  ;;  %v5242_v26 = vadd.f32 1.0, %v12686_v50  ;;  %11401 = vmatprep.mubr.msk.bf16.mxu0 %vm495_vm0, %v5309_v31  ;;  %11421 = vmatprep.mubr.msk.bf16.mxu1 %vm495_vm0, %v5309_v31 }
 0xf17   : > { %v5179_v2 = vadd.f32 %v11395_v60, %v15570_v45  ;;  %v15626_v53 = vpop.f32.mrb[181].mxu0  ;;  %v5170_v25 = vpop.f32.mrb[197].mxu1  ;;  %12699 = vrcp.f32 %v5244_v10  ;;  %11402 = vmatmul.mubr.msk.bf16.vlgmr.msra.gmra.mrb[184].mxu0 %vm495_vm0, %v5310_v33  ;;  %11422 = vmatmul.mubr.msk.bf16.vlgmr.msra.gmra.mrb[200].mxu1 %vm495_vm0, %v5310_v33 }
 0xf18   : > { %v12688_v0 = vpop.eup %12687  ;;  %v5171_v19 = vadd.f32 %v15570_v45, %v5170_v25  ;;  %v15631_v54 = vpop.f32.mrb[182].mxu0  ;;  %12701 = vrcp.f32 %v5242_v26  ;;  %11458 = vmatpush3.bf16.msra.mxu1 %v15564_v17  ;;  %v13482_v17 = vld [vmem:[%s17467_s1 + $0x10] sm:$0xff]  }
 0xf19   : > { %v11396_v3 = vpop.f32.mrb[198].mxu1  ;;  %v12690_v7 = vpop.eup %12689  ;;  %v10064_v32 = vmul.f32 -1.442695, %v5179_v2  ;;  %v5287_v10 = vmul.f32 %v12688_v0, %v5034_v58  ;;  %v13481_v2 = vld [vmem:[%s17467_s1 + $0x8] sm:$0xff]   ;;  %v5050_v58 = vadd.f32 %v15596_v14, %v15611_v62  ;;  %v5045_v14 = vadd.f32 %v15611_v62, %v15605_v13 }
 0xf1a   : > { %v5182_v40 = vadd.f32 %v11396_v3, %v15570_v45  ;;  %v15638_v16 = vpop.f32.mrb[183].mxu0  ;;  %v5173_v36 = vpop.f32.mrb[199].mxu1  ;;  %v10062_v39 = vmul.f32 -1.442695, %v5171_v19  ;;  %v5285_v50 = vmul.f32 %v12690_v7, %v5026_v11  ;;  %11459 = vmatprep.subr.bf16.mxu1 %v13481_v2  ;;  %v5042_v11 = vadd.f32 %v15611_v62, %v15599_v34 }
 0xf1b   : > { %v12692_v55 = vpop.eup %12691  ;;  %v5174_v60 = vadd.f32 %v15570_v45, %v5173_v36  ;;  %12703 = vpow2.f32 %v10064_v32  ;;  %v5053_v3 = vadd.f32 %v15602_v9, %v15611_v62  ;;  %v5066_v13 = vadd.f32 %v15621_v24, %v15611_v62  ;;  %v11865_v24 = vld [vmem:[%s17475_s9 + $0x20] sm:$0xff]  }
 0xf1c   : > { %v12694_v46 = vpop.eup %12693  ;;  %v10065_v31 = vmul.f32 -1.442695, %v5182_v40  ;;  %12705 = vpow2.f32 %v10062_v39  ;;  %v5288_v59 = vmul.f32 %v12692_v55, %v5037_v20  ;;  %11460 = vmatpush3.bf16.msra.mxu1 %v13481_v2  ;;  %11437 = vmatprep.subr.bf16.mxu0 %v11865_v24 }
 0xf1d   : > { %v10063_v33 = vmul.f32 -1.442695, %v5174_v60  ;;  %v5286_v25 = vmul.f32 %v12694_v46, %v5029_v49  ;;  %11497 = vmatprep.subr.bf16.mxu1 %v13482_v17  ;;  %11438 = vmatpush3.bf16.msra.mxu0 %v11865_v24 }
 0xf1e   : > { %12707 = vpow2.f32 %v10065_v31  ;;  %v5312_v45 = vpack.c.bf16 %v5288_v59, %v5287_v10 }
 0xf1f   : > { %12709 = vpow2.f32 %v10063_v33  ;;  %v5311_v26 = vpack.c.bf16 %v5286_v25, %v5285_v50  ;;  %v12696_v0 = vpop.eup %12695  ;;  %v5058_v25 = vadd.f32 %v15611_v62, %v15626_v53  ;;  %v15689_v53 = vld [vmem:[%s17468_s2] sm:$0xff]  }
 0xf20   : > { %v12698_v19 = vpop.eup %12697  ;;  %v5291_v7 = vmul.f32 %v12696_v0, %v5050_v58  ;;  %v5061_v58 = vadd.f32 %v15611_v62, %v15638_v16 }
 0xf21   : > { %11405 = vmatprep.mubr.msk.bf16.mxu0 %vm495_vm0, %v5311_v26  ;;  %11425 = vmatprep.mubr.msk.bf16.mxu1 %vm495_vm0, %v5311_v26  ;;  %v12700_v20 = vpop.eup %12699  ;;  %v5289_v32 = vmul.f32 %v12698_v19, %v5042_v11  ;;  %v5069_v26 = vadd.f32 %v15631_v54, %v15611_v62  ;;  %v11866_v62 = vld [vmem:[%s17475_s9 + $0x28] sm:$0xff]   ;;  %v15695_v54 = vld [vmem:[%s17474_s8 + $0x5] ss:$0 sm:$0xff] }
 0xf22   : > { %11406 = vmatmul.mubr.msk.bf16.gmra.mrb[188].mxu0 %vm495_vm0, %v5312_v45  ;;  %11426 = vmatmul.mubr.msk.bf16.gmra.mrb[204].mxu1 %vm495_vm0, %v5312_v45  ;;  %v12702_v40 = vpop.eup %12701  ;;  %v5292_v36 = vmul.f32 %v12700_v20, %v5053_v3 }
 0xf23   : > { %v5290_v49 = vmul.f32 %v12702_v40, %v5045_v14  ;;  %11439 = vmatprep.subr.bf16.mxu0 %v11866_v62 }
 0xf24   : > { %v5314_v60 = vpack.c.bf16 %v5292_v36, %v5291_v7  ;;  %11440 = vmatpush3.bf16.msra.mxu0 %v11866_v62 }
 0xf25   : > { %v12704_v55 = vpop.eup %12703  ;;  %v5313_v50 = vpack.c.bf16 %v5290_v49, %v5289_v32  ;;  %11477 = vmatprep.subr.bf16.mxu0 %v15689_v53 }
 0xf26   : > { %v12706_v39 = vpop.eup %12705  ;;  %v5247_v34 = vadd.f32 1.0, %v12704_v55 }
 0xf27   : > { %v5245_v31 = vadd.f32 1.0, %v12706_v39  ;;  %11409 = vmatprep.mubr.msk.bf16.mxu0 %vm495_vm0, %v5313_v50  ;;  %11429 = vmatprep.mubr.msk.bf16.mxu1 %vm495_vm0, %v5313_v50 }
 0xf28   : > { %v12708_v46 = vpop.eup %12707  ;;  %12711 = vrcp.f32 %v5247_v34 }
 0xf29   : > { %v12710_v10 = vpop.eup %12709  ;;  %v5248_v2 = vadd.f32 1.0, %v12708_v46  ;;  %12713 = vrcp.f32 %v5245_v31 }
 0xf2a   : > { %v5246_v9 = vadd.f32 1.0, %v12710_v10  ;;  %11410 = vmatmul.mubr.msk.bf16.gmra.mrb[192].mxu0 %vm495_vm0, %v5314_v60  ;;  %11430 = vmatmul.mubr.msk.bf16.gmra.mrb[208].mxu1 %vm495_vm0, %v5314_v60 }
 0xf2b   : > { %12715 = vrcp.f32 %v5248_v2 }
 0xf2c   : > { %12717 = vrcp.f32 %v5246_v9 }
 0xf32   : > { %v12712_v33 = vpop.eup %12711 }
 0xf33   : > { %v12714_v59 = vpop.eup %12713  ;;  %v5295_v45 = vmul.f32 %v12712_v33, %v5066_v13 }
 0xf34   : > { %v5293_v0 = vmul.f32 %v12714_v59, %v5058_v25 }
 0xf35   : > { %v12716_v17 = vpop.eup %12715 }
 0xf36   : > { %v12718_v11 = vpop.eup %12717  ;;  %v5296_v19 = vmul.f32 %v12716_v17, %v5069_v26 }
 0xf37   : > { %v5294_v3 = vmul.f32 %v12718_v11, %v5061_v58 }
 0xf38   : > { %v5316_v7 = vpack.c.bf16 %v5296_v19, %v5295_v45 }
 0xf39   : > { %v5315_v20 = vpack.c.bf16 %v5294_v3, %v5293_v0 }
 0xf3b   : > { %11413 = vmatprep.mubr.msk.bf16.mxu0 %vm495_vm0, %v5315_v20  ;;  %11433 = vmatprep.mubr.msk.bf16.mxu1 %vm495_vm0, %v5315_v20 }
 0xf3c   : > { %11414 = vmatmul.mubr.msk.bf16.gmra.mrb[196].mxu0 %vm495_vm0, %v5316_v7  ;;  %11434 = vmatmul.mubr.msk.bf16.gmra.mrb[212].mxu1 %vm495_vm0, %v5316_v7 }
 0xfea   : > { %v15697_v16 = vpop.f32.mrb[184].mxu0  ;;  %v11423_v14 = vpop.f32.mrb[200].mxu1 }
 0xfeb   : > { %v5513_v32 = vadd.f32 %v11423_v14, %v15695_v54  ;;  %v15700_v40 = vpop.f32.mrb[185].mxu0  ;;  %v5504_v36 = vpop.f32.mrb[201].mxu1 }
 0xfec   : > { %v5505_v55 = vadd.f32 %v15695_v54, %v5504_v36  ;;  %v15703_v49 = vpop.f32.mrb[186].mxu0  ;;  %v11424_v39 = vpop.f32.mrb[202].mxu1 }
 0xfed   : > { %v10098_v34 = vmul.f32 -1.442695, %v5513_v32  ;;  %v5516_v60 = vadd.f32 %v11424_v39, %v15695_v54  ;;  %v15706_v46 = vpop.f32.mrb[187].mxu0  ;;  %v5507_v31 = vpop.f32.mrb[203].mxu1 }
 0xfee   : > { %v10096_v50 = vmul.f32 -1.442695, %v5505_v55  ;;  %v5508_v10 = vadd.f32 %v15695_v54, %v5507_v31 }
 0xfef   : > { %12719 = vpow2.f32 %v10098_v34  ;;  %v10099_v2 = vmul.f32 -1.442695, %v5516_v60 }
 0xff0   : > { %12721 = vpow2.f32 %v10096_v50  ;;  %v10097_v9 = vmul.f32 -1.442695, %v5508_v10 }
 0xff1   : > { %12723 = vpow2.f32 %v10099_v2 }
 0xff2   : > { %12725 = vpow2.f32 %v10097_v9 }
 0xff5   : > { %v15709_v13 = vpop.f32.mrb[188].mxu0  ;;  %v11427_v33 = vpop.f32.mrb[204].mxu1 }
 0xff6   : > { %v5529_v25 = vadd.f32 %v11427_v33, %v15695_v54  ;;  %v15712_v59 = vpop.f32.mrb[189].mxu0  ;;  %v5520_v26 = vpop.f32.mrb[205].mxu1 }
 0xff7   : > { %v5521_v45 = vadd.f32 %v15695_v54, %v5520_v26  ;;  %v15715_v17 = vpop.f32.mrb[190].mxu0  ;;  %v11428_v58 = vpop.f32.mrb[206].mxu1 }
 0xff8   : > { %v10102_v0 = vmul.f32 -1.442695, %v5529_v25  ;;  %v5532_v11 = vadd.f32 %v11428_v58, %v15695_v54  ;;  %v15718_v19 = vpop.f32.mrb[191].mxu0  ;;  %v5523_v3 = vpop.f32.mrb[207].mxu1 }
 0xff9   : > { %v10100_v7 = vmul.f32 -1.442695, %v5521_v45  ;;  %v5524_v20 = vadd.f32 %v15695_v54, %v5523_v3  ;;  %v12720_v14 = vpop.eup %12719 }
 0xffa   : > { %12727 = vpow2.f32 %v10102_v0  ;;  %v10103_v24 = vmul.f32 -1.442695, %v5532_v11  ;;  %v12722_v32 = vpop.eup %12721  ;;  %v5617_v36 = vadd.f32 1.0, %v12720_v14 }
 0xffb   : > { %12729 = vpow2.f32 %v10100_v7  ;;  %v10101_v62 = vmul.f32 -1.442695, %v5524_v20  ;;  %v12724_v55 = vpop.eup %12723  ;;  %v5615_v39 = vadd.f32 1.0, %v12722_v32 }
 0xffc   : > { %12731 = vpow2.f32 %v10103_v24  ;;  %v12726_v31 = vpop.eup %12725  ;;  %v5618_v50 = vadd.f32 1.0, %v12724_v55 }
 0xffd   : > { %12733 = vpow2.f32 %v10101_v62  ;;  %v15721_v34 = vpop.f32.mrb[192].mxu0  ;;  %v11431_v60 = vpop.f32.mrb[208].mxu1  ;;  %v5616_v33 = vadd.f32 1.0, %v12726_v31 }
 0xffe   : > { %12735 = vrcp.f32 %v5617_v36  ;;  %v5545_v10 = vadd.f32 %v11431_v60, %v15695_v54  ;;  %v15724_v2 = vpop.f32.mrb[193].mxu0  ;;  %v5536_v9 = vpop.f32.mrb[209].mxu1  ;;  %v15736_v36 = vld [vmem:[%s17473_s7 + $0x5] ss:$0 sm:$0xff] }
 0xfff   : > { %12737 = vrcp.f32 %v5615_v39  ;;  %v5537_v25 = vadd.f32 %v15695_v54, %v5536_v9  ;;  %v15727_v26 = vpop.f32.mrb[194].mxu0  ;;  %v11432_v45 = vpop.f32.mrb[210].mxu1 }
0x1000   : > { %12739 = vrcp.f32 %v5618_v50  ;;  %v10106_v58 = vmul.f32 -1.442695, %v5545_v10  ;;  %v5548_v0 = vadd.f32 %v11432_v45, %v15695_v54  ;;  %v15730_v11 = vpop.f32.mrb[195].mxu0  ;;  %v5539_v3 = vpop.f32.mrb[211].mxu1  ;;  %v5400_v10 = vadd.f32 %v15697_v16, %v15736_v36 }
0x1001   : > { %12741 = vrcp.f32 %v5616_v33  ;;  %v10104_v7 = vmul.f32 -1.442695, %v5537_v25  ;;  %v5540_v20 = vadd.f32 %v15695_v54, %v5539_v3  ;;  %v5392_v25 = vadd.f32 %v15736_v36, %v15700_v40 }
0x1002   : > { %12743 = vpow2.f32 %v10106_v58  ;;  %v10107_v24 = vmul.f32 -1.442695, %v5548_v0  ;;  %v3818_v58 = vadd.f32 %v14884_v41, %v14110_v12  ;;  %v5403_v3 = vadd.f32 %v15703_v49, %v15736_v36 }
0x1003   : > { %12745 = vpow2.f32 %v10104_v7  ;;  %v10105_v14 = vmul.f32 -1.442695, %v5540_v20  ;;  %v3816_v16 = vadd.f32 %v14890_v52, %v14116_v56  ;;  %v5395_v20 = vadd.f32 %v15736_v36, %v15706_v46 }
0x1004   : > { %v12728_v62 = vpop.eup %12727  ;;  %12747 = vpow2.f32 %v10107_v24  ;;  %v3819_v40 = vadd.f32 %v14892_v29, %v14118_v57  ;;  %v3817_v12 = vadd.f32 %v14894_v37, %v14125_v51  ;;  %v3822_v56 = vadd.f32 %v14925_v1, %v14144_v22 }
0x1005   : > { %v12730_v32 = vpop.eup %12729  ;;  %v5621_v55 = vadd.f32 1.0, %v12728_v62  ;;  %12749 = vpow2.f32 %v10105_v14  ;;  %v3821_v57 = vadd.f32 %v14930_v6, %v14154_v61 }
0x1006   : > { %v12732_v39 = vpop.eup %12731  ;;  %v5619_v60 = vadd.f32 1.0, %v12730_v32  ;;  %v3820_v32 = vadd.f32 %v14923_v35, %v14148_v44 }
0x1007   : > { %v12734_v31 = vpop.eup %12733  ;;  %12751 = vrcp.f32 %v5621_v55  ;;  %v5622_v50 = vadd.f32 1.0, %v12732_v39 }
0x1008   : > { %12753 = vrcp.f32 %v5619_v60  ;;  %v5620_v9 = vadd.f32 1.0, %v12734_v31  ;;  %v12736_v33 = vpop.eup %12735  ;;  %v3823_v60 = vadd.f32 %v14932_v27, %v14151_v30  ;;  %v5408_v30 = vadd.f32 %v15736_v36, %v15712_v59 }
0x1009   : > { %12755 = vrcp.f32 %v5622_v50  ;;  %v12738_v45 = vpop.eup %12737  ;;  %v5665_v0 = vmul.f32 %v12736_v33, %v5400_v10  ;;  %v5416_v10 = vadd.f32 %v15709_v13, %v15736_v36 }
0x100a   : > { %12757 = vrcp.f32 %v5620_v9  ;;  %v12740_v7 = vpop.eup %12739  ;;  %v5663_v24 = vmul.f32 %v12738_v45, %v5392_v25 }
0x100b   : > { %v12742_v62 = vpop.eup %12741  ;;  %v15754_v41 = vadd.f32 %v5665_v0, %v3818_v58  ;;  %v5666_v14 = vmul.f32 %v12740_v7, %v5403_v3  ;;  %v5419_v3 = vadd.f32 %v15715_v17, %v15736_v36 }
0x100c   : > { %v12744_v49 = vpop.eup %12743  ;;  %v5664_v52 = vmul.f32 %v12742_v62, %v5395_v20  ;;  %v15760_v46 = vadd.f32 %v5663_v24, %v3816_v16  ;;  %v5411_v62 = vadd.f32 %v15736_v36, %v15718_v19 }
0x100d   : > { %v12746_v55 = vpop.eup %12745  ;;  %v15764_v29 = vadd.f32 %v5666_v14, %v3819_v40  ;;  %v5625_v51 = vadd.f32 1.0, %v12744_v49  ;;  %v5696_v37 = vpack.c.bf16 %v5666_v14, %v5665_v0 }
0x100e   : > { %v12748_v39 = vpop.eup %12747  ;;  %v5623_v31 = vadd.f32 1.0, %v12746_v55  ;;  %v15770_v22 = vadd.f32 %v5664_v52, %v3817_v12  ;;  %v5695_v1 = vpack.c.bf16 %v5664_v52, %v5663_v24  ;;  %v13484_v55 = vld [vmem:[%s17468_s2 + $0x8] sm:$0xff]  }
0x100f   : > { %v15768_v44 = vpop.f32.mrb[196].mxu0  ;;  %v11435_v35 = vpop.f32.mrb[212].mxu1  ;;  %12759 = vrcp.f32 %v5625_v51  ;;  %v5626_v61 = vadd.f32 1.0, %v12748_v39 }
0x1010   : > { %v12750_v50 = vpop.eup %12749  ;;  %v5561_v6 = vadd.f32 %v11435_v35, %v15695_v54  ;;  %v15775_v9 = vpop.f32.mrb[197].mxu0  ;;  %12761 = vrcp.f32 %v5623_v31  ;;  %11441 = vmatprep.mubr.msk.bf16.mxu0 %vm495_vm0, %v5695_v1 }
0x1011   : > { %v5552_v33 = vpop.f32.mrb[213].mxu1  ;;  %v12752_v25 = vpop.eup %12751  ;;  %v5624_v27 = vadd.f32 1.0, %v12750_v50  ;;  %12763 = vrcp.f32 %v5626_v61  ;;  %11442 = vmatmul.mubr.msk.bf16.vlgmr.msra.gmra.mrb[200].mxu0 %vm495_vm0, %v5696_v37  ;;  %v15807_v50 = vld [vmem:[%s17468_s2 + $0x10] sm:$0xff]   ;;  %v5435_v61 = vadd.f32 %v15727_v26, %v15736_v36 }
0x1012   : > { %v5553_v45 = vadd.f32 %v15695_v54, %v5552_v33  ;;  %v15780_v58 = vpop.f32.mrb[198].mxu0  ;;  %v11436_v0 = vpop.f32.mrb[214].mxu1  ;;  %v10110_v7 = vmul.f32 -1.442695, %v5561_v6  ;;  %11478 = vmatpush3.bf16.msra.mxu0 %v15689_v53  ;;  %v5669_v52 = vmul.f32 %v12752_v25, %v5416_v10  ;;  %v3826_v10 = vadd.f32 %v14952_v43, %v14171_v4  ;;  %v17566_v43 = vld [vmem:[#allocation2_spill] sm:$0xff] }
0x1013   : > { %v12754_v13 = vpop.eup %12753  ;;  %v5564_v16 = vadd.f32 %v11436_v0, %v15695_v54  ;;  %v15786_v20 = vpop.f32.mrb[199].mxu0  ;;  %12765 = vrcp.f32 %v5624_v27  ;;  %11479 = vmatprep.subr.bf16.mxu0 %v13484_v55  ;;  %v5427_v25 = vadd.f32 %v15736_v36, %v15730_v11  ;;  %v3825_v26 = vadd.f32 %v14960_v21, %v17566_v43 }
0x1014   : > { %v5555_v59 = vpop.f32.mrb[215].mxu1  ;;  %v12756_v24 = vpop.eup %12755  ;;  %v10108_v40 = vmul.f32 -1.442695, %v5553_v45  ;;  %12767 = vpow2.f32 %v10110_v7  ;;  %v5667_v49 = vmul.f32 %v12754_v13, %v5408_v30  ;;  %v5448_v21 = vadd.f32 %v15768_v44, %v15736_v36 }
0x1015   : > { %v5556_v12 = vadd.f32 %v15695_v54, %v5555_v59  ;;  %v12758_v17 = vpop.eup %12757  ;;  %v10111_v14 = vmul.f32 -1.442695, %v5564_v16  ;;  %v5670_v19 = vmul.f32 %v12756_v24, %v5419_v3  ;;  %v15798_v54 = vadd.f32 %v5669_v52, %v3822_v56 }
0x1016   : > { %12769 = vpow2.f32 %v10108_v40  ;;  %v5668_v37 = vmul.f32 %v12758_v17, %v5411_v62  ;;  %v15796_v39 = vadd.f32 %v5667_v49, %v3820_v32  ;;  %11480 = vmatpush3.bf16.msra.mxu0 %v13484_v55  ;;  %v5432_v32 = vadd.f32 %v15721_v34, %v15736_v36 }
0x1017   : > { %v10109_v51 = vmul.f32 -1.442695, %v5556_v12  ;;  %12771 = vpow2.f32 %v10111_v14  ;;  %v15802_v35 = vadd.f32 %v5670_v19, %v3823_v60  ;;  %v5698_v1 = vpack.c.bf16 %v5670_v19, %v5669_v52  ;;  %11517 = vmatprep.subr.bf16.mxu0 %v15807_v50  ;;  %v17568_v19 = vld [vmem:[#allocation4_spill] sm:$0xff] }
0x1018   : > { %v15800_v53 = vadd.f32 %v5668_v37, %v3821_v57  ;;  %v5697_v31 = vpack.c.bf16 %v5668_v37, %v5667_v49  ;;  %v5424_v57 = vadd.f32 %v15736_v36, %v15724_v2  ;;  %v3824_v34 = vadd.f32 %v14956_v47, %v14181_v5  ;;  %v17567_v49 = vld [vmem:[#allocation3_spill] sm:$0xff] }
0x1019   : > { %12773 = vpow2.f32 %v10109_v51  ;;  %v12760_v56 = vpop.eup %12759  ;;  %v3827_v2 = vadd.f32 %v14958_v8, %v14184_v48  ;;  %v5440_v17 = vadd.f32 %v15736_v36, %v15775_v9  ;;  %v3830_v52 = vadd.f32 %v14974_v18, %v17567_v49  ;;  %v17570_v18 = vld [vmem:[#allocation6_spill] sm:$0xff]  ;;  %v17577_v49 = vld [vmem:[#allocation9_spill] sm:$0xff] }
0x101a   : > { %11445 = vmatprep.mubr.msk.bf16.mxu0 %vm495_vm0, %v5697_v31  ;;  %v12762_v60 = vpop.eup %12761  ;;  %v5673_v6 = vmul.f32 %v12760_v56, %v5432_v32  ;;  %v5451_v55 = vadd.f32 %v15780_v58, %v15736_v36  ;;  %v3828_v31 = vadd.f32 %v14978_v38, %v17568_v19  ;;  %v17569_v56 = vld [vmem:[#allocation5_spill] sm:$0xff] }
0x101b   : > { %11446 = vmatmul.mubr.msk.bf16.gmra.mrb[204].mxu0 %vm495_vm0, %v5698_v1  ;;  %v12764_v33 = vpop.eup %12763  ;;  %v5671_v30 = vmul.f32 %v12762_v60, %v5424_v57  ;;  %v5443_v1 = vadd.f32 %v15736_v36, %v15786_v20  ;;  %v3831_v9 = vadd.f32 %v14980_v15, %v17569_v56  ;;  %v4191_v15 = vsub.f32 1.0, %v15220_v23 }
0x101c   : > { %v5674_v45 = vmul.f32 %v12764_v33, %v5435_v61  ;;  %v15826_v0 = vadd.f32 %v5673_v6, %v3826_v10  ;;  %v3829_v10 = vadd.f32 %v14982_v28, %v17570_v18  ;;  %v4192_v20 = vsub.f32 1.0, %v15223_v63  ;;  %v17571_v28 = vld [vmem:[#allocation23_spill] sm:$0xff] }
0x101d   : > { %v12766_v27 = vpop.eup %12765  ;;  %v15830_v3 = vadd.f32 %v5671_v30, %v3824_v34  ;;  %v4193_v34 = vsub.f32 1.0, %v15226_v42 }
0x101e   : > { %v12768_v4 = vpop.eup %12767  ;;  %v5672_v13 = vmul.f32 %v12766_v27, %v5427_v25  ;;  %v15832_v47 = vadd.f32 %v5674_v45, %v3827_v2  ;;  %v5700_v11 = vpack.c.bf16 %v5674_v45, %v5673_v6  ;;  %v4194_v25 = vsub.f32 1.0, %v17571_v28  ;;  %v15871_v27 = vld [vmem:[%s17476_s10 + $0x2] ss:$0 sm:$0xff] }
0x101f   : > { %v5629_v5 = vadd.f32 1.0, %v12768_v4  ;;  %v4208_v2 = vadd.f32 1e-05, %v4192_v20  ;;  %v4209_v4 = vadd.f32 1e-05, %v4193_v34 }
0x1020   : > { %v12770_v7 = vpop.eup %12769  ;;  %v15834_v24 = vadd.f32 %v5672_v13, %v3825_v26  ;;  %v5699_v48 = vpack.c.bf16 %v5672_v13, %v5671_v30  ;;  %v4207_v30 = vadd.f32 1e-05, %v4191_v15  ;;  %v4210_v26 = vadd.f32 1e-05, %v4194_v25  ;;  %v17572_v13 = vld [vmem:[#allocation24_spill] sm:$0xff] }
0x1021   : > { %v12772_v16 = vpop.eup %12771  ;;  %v5627_v59 = vadd.f32 1.0, %v12770_v7  ;;  %12775 = vrcp.f32 %v5629_v5  ;;  %v4195_v7 = vsub.f32 1.0, %v17572_v13  ;;  %v17573_v5 = vld [vmem:[#allocation7_spill] sm:$0xff] }
0x1022   : > { %v5630_v62 = vadd.f32 1.0, %v12772_v16  ;;  %11449 = vmatprep.mubr.msk.bf16.mxu0 %vm495_vm0, %v5699_v48 }
0x1023   : > { %v12774_v8 = vpop.eup %12773  ;;  %12777 = vrcp.f32 %v5627_v59  ;;  %11450 = vmatmul.mubr.msk.bf16.gmra.mrb[208].mxu0 %vm495_vm0, %v5700_v11  ;;  %v15877_v11 = vmul.f32 %v4207_v30, %v17573_v5  ;;  %v17574_v59 = vld [vmem:[#allocation8_spill] sm:$0xff] }
0x1024   : > { %v5628_v40 = vadd.f32 1.0, %v12774_v8  ;;  %12779 = vrcp.f32 %v5630_v62  ;;  %v15880_v48 = vmul.f32 %v4208_v2, %v17574_v59  ;;  %v17575_v8 = vld [vmem:[#allocation25_spill] sm:$0xff]  ;;  %v17582_v2 = vld [vmem:[#allocation12_spill] sm:$0xff]  ;;  %v17587_v59 = vld [vmem:[#allocation30_spill] sm:$0xff] }
0x1025   : > { %v4196_v62 = vsub.f32 1.0, %v17575_v8  ;;  %v4201_v8 = vsub.f32 1.0, %v17587_v59 }
0x1026   : > { %12781 = vrcp.f32 %v5628_v40  ;;  %v17576_v40 = vld [vmem:[#allocation26_spill] sm:$0xff] }
0x1027   : > { %v4212_v56 = vadd.f32 1e-05, %v4196_v62 }
0x102b   : > { %v12776_v12 = vpop.eup %12775 }
0x102c   : > { %v5677_v51 = vmul.f32 %v12776_v12, %v5448_v21  ;;  %v4197_v21 = vsub.f32 1.0, %v17576_v40 }
0x102d   : > { %v12778_v14 = vpop.eup %12777 }
0x102e   : > { %v12780_v37 = vpop.eup %12779  ;;  %v5675_v44 = vmul.f32 %v12778_v14, %v5440_v17  ;;  %v15852_v60 = vadd.f32 %v5677_v51, %v3830_v52  ;;  %v15890_v52 = vmul.f32 %v4209_v4, %v17577_v49  ;;  %v17584_v4 = vld [vmem:[#allocation13_spill] sm:$0xff] }
0x102f   : > { %v5678_v57 = vmul.f32 %v12780_v37, %v5451_v55  ;;  %v17578_v55 = vld [vmem:[#allocation10_spill] sm:$0xff]  ;;  %v4211_v37 = vadd.f32 1e-05, %v4195_v7  ;;  %v17586_v7 = vld [vmem:[#allocation29_spill] sm:$0xff] }
0x1030   : > { %v12782_v32 = vpop.eup %12781  ;;  %v15856_v61 = vadd.f32 %v5675_v44, %v3828_v31 }
0x1031   : > { %v5676_v58 = vmul.f32 %v12782_v32, %v5443_v1  ;;  %v15858_v6 = vadd.f32 %v5678_v57, %v3831_v9  ;;  %v5702_v38 = vpack.c.bf16 %v5678_v57, %v5677_v51  ;;  %v15893_v51 = vmul.f32 %v4210_v26, %v17578_v55  ;;  %v17585_v26 = vld [vmem:[#allocation28_spill] sm:$0xff]  ;;  %v17590_v55 = vld [vmem:[#allocation31_spill] sm:$0xff] }
0x1032   : > { %v4213_v9 = vadd.f32 1e-05, %v4197_v21  ;;  %v4199_v13 = vsub.f32 1.0, %v17585_v26 }
0x1033   : > { %v15860_v33 = vadd.f32 %v5676_v58, %v3829_v10  ;;  %v5701_v36 = vpack.c.bf16 %v5676_v58, %v5675_v44  ;;  %v17579_v44 = vld [vmem:[#allocation27_spill] sm:$0xff] }
0x1034   : > { %v4198_v32 = vsub.f32 1.0, %v17579_v44  ;;  %v4215_v49 = vadd.f32 1e-05, %v4199_v13 }
0x1035   : > { %11453 = vmatprep.mubr.msk.bf16.mxu0 %vm495_vm0, %v5701_v36 }
0x1036   : > { %11454 = vmatmul.mubr.msk.bf16.gmra.mrb[212].mxu0 %vm495_vm0, %v5702_v38  ;;  %v17580_v38 = vld [vmem:[#allocation11_spill] sm:$0xff]  ;;  %v4214_v25 = vadd.f32 1e-05, %v4198_v32 }
0x1037   : > { %v15910_v36 = vmul.f32 %v4211_v37, %v17580_v38  ;;  %v4202_v37 = vsub.f32 1.0, %v17590_v55 }
0x1039   : > { %17581 = vst [vmem:[#allocation2_spill] sm:$0xff] %v15910_v36 }
0x10e4   : > { %v11443_v45 = vpop.f32.mrb[200].mxu0 }
0x10e5   : > { %v5783_v43 = vpop.f32.mrb[201].mxu0  ;;  %v5792_v23 = vadd.f32 %v11443_v45, %v15871_v27  ;;  %v15917_v45 = vmul.f32 %v4212_v56, %v17582_v2  ;;  %v17593_v2 = vld [vmem:[#allocation16_spill] sm:$0xff] }
0x10e6   : > { %v5784_v63 = vadd.f32 %v15871_v27, %v5783_v43  ;;  %v11444_v42 = vpop.f32.mrb[202].mxu0  ;;  %v15920_v43 = vmul.f32 %v4213_v9, %v17584_v4  ;;  %v4217_v9 = vadd.f32 1e-05, %v4201_v8  ;;  %v17597_v8 = vld [vmem:[#allocation18_spill] sm:$0xff] }
0x10e7   : > { %v5786_v16 = vpop.f32.mrb[203].mxu0  ;;  %v5795_v12 = vadd.f32 %v11444_v42, %v15871_v27  ;;  %v15901_v1 = vmul.f32 %v5792_v23, %v15890_v52  ;;  %17583 = vst [vmem:[#allocation3_spill] sm:$0xff] %v15917_v45  ;;  %v4200_v23 = vsub.f32 1.0, %v17586_v7 }
0x10e8   : > { %v5787_v17 = vadd.f32 %v15871_v27, %v5786_v16  ;;  %v15887_v14 = vmul.f32 %v5784_v63, %v15877_v11 }
0x10e9   : > { %v15907_v10 = vmul.f32 %v5795_v12, %v15893_v51  ;;  %v5868_v28 = vsel %vm495_vm0, %v15901_v1, -inf  ;;  %v17588_v12 = vld [vmem:[#allocation14_spill] sm:$0xff]  ;;  %v4216_v32 = vadd.f32 1e-05, %v4200_v23  ;;  %v17595_v23 = vld [vmem:[#allocation17_spill] sm:$0xff] }
0x10ea   : > { %v5862_v19 = vsel %vm495_vm0, %v15887_v14, -inf  ;;  %v15898_v31 = vmul.f32 %v5787_v17, %v15880_v48  ;;  %v15941_v17 = vmul.f32 %v4214_v25, %v17588_v12 }
0x10eb   : > { %5863 = vmax.xlane.f32.xlu0 %v5862_v19  ;;  %v5871_v5 = vsel %vm495_vm0, %v15907_v10, -inf  ;;  %v15959_v4 = vmul.f32 %v4216_v32, %v17593_v2 }
0x10ec   : > { %v5865_v18 = vsel %vm495_vm0, %v15898_v31, -inf  ;;  %17589 = vst [vmem:[#allocation4_spill] sm:$0xff] %v15941_v17 }
0x10ed   : > { %5866 = vmax.xlane.f32.xlu1 %v5865_v18  ;;  %17594 = vst [vmem:[#allocation6_spill] sm:$0xff] %v15959_v4 }
0x10ee   : > { %v11447_v57 = vpop.f32.mrb[204].mxu0 }
0x10ef   : > { %v5799_v58 = vpop.f32.mrb[205].mxu0  ;;  %v5808_v15 = vadd.f32 %v11447_v57, %v15871_v27  ;;  %5869 = vmax.xlane.f32.xlu0 %v5868_v28  ;;  %v4218_v28 = vadd.f32 1e-05, %v4202_v37  ;;  %v17599_v37 = vld [vmem:[#allocation32_spill] sm:$0xff] }
0x10f0   : > { %v5800_v20 = vadd.f32 %v15871_v27, %v5799_v58  ;;  %v11448_v34 = vpop.f32.mrb[206].mxu0 }
0x10f1   : > { %v5802_v30 = vpop.f32.mrb[207].mxu0  ;;  %v5811_v63 = vadd.f32 %v11448_v34, %v15871_v27  ;;  %5872 = vmax.xlane.f32.xlu1 %v5871_v5  ;;  %v15938_v21 = vmul.f32 %v5808_v15, %v15920_v43 }
0x10f2   : > { %v5803_v42 = vadd.f32 %v15871_v27, %v5802_v30  ;;  %v15929_v16 = vmul.f32 %v5800_v20, %v15910_v36  ;;  %v17591_v20 = vld [vmem:[#allocation15_spill] sm:$0xff] }
0x10f3   : > { %v15947_v44 = vmul.f32 %v5811_v63, %v15941_v17  ;;  %v5880_v18 = vsel %vm495_vm0, %v15938_v21, -inf  ;;  %v15954_v34 = vmul.f32 %v4215_v49, %v17591_v20  ;;  %v15967_v63 = vmul.f32 %v4217_v9, %v17595_v23  ;;  %v17603_v23 = vld [vmem:[#allocation19_spill] sm:$0xff] }
0x10f4   : > { %v5874_v62 = vsel %vm495_vm0, %v15929_v16, -inf  ;;  %v15935_v40 = vmul.f32 %v5803_v42, %v15917_v45 }
0x10f5   : > { %5875 = vmax.xlane.f32.xlu0 %v5874_v62  ;;  %17592 = vst [vmem:[#allocation5_spill] sm:$0xff] %v15954_v34  ;;  %v5883_v30 = vsel %vm495_vm0, %v15947_v44, -inf  ;;  %17596 = vst [vmem:[#allocation23_spill] sm:$0xff] %v15967_v63  ;;  %v15978_v62 = vmul.f32 %v4218_v28, %v17597_v8 }
0x10f6   : > { %v5877_v19 = vsel %vm495_vm0, %v15935_v40, -inf  ;;  %v11451_v56 = vpop.f32.mrb[208].mxu0 }
0x10f7   : > { %5878 = vmax.xlane.f32.xlu1 %v5877_v19  ;;  %v5815_v57 = vpop.f32.mrb[209].mxu0  ;;  %v5824_v58 = vadd.f32 %v11451_v56, %v15871_v27  ;;  %17598 = vst [vmem:[#allocation24_spill] sm:$0xff] %v15978_v62  ;;  %v4203_v19 = vsub.f32 1.0, %v17599_v37  ;;  %v17600_v56 = vld [vmem:[#allocation33_spill] sm:$0xff] }
0x10f8   : > { %v5816_v38 = vadd.f32 %v15871_v27, %v5815_v57  ;;  %v11452_v15 = vpop.f32.mrb[210].mxu0  ;;  %v4204_v9 = vsub.f32 1.0, %v17600_v56  ;;  %v17601_v57 = vld [vmem:[#allocation34_spill] sm:$0xff] }
0x10f9   : > { %5881 = vmax.xlane.f32.xlu0 %v5880_v18  ;;  %v5818_v25 = vpop.f32.mrb[211].mxu0  ;;  %v5827_v26 = vadd.f32 %v11452_v15, %v15871_v27  ;;  %v15975_v59 = vmul.f32 %v5824_v58, %v15967_v63  ;;  %v4205_v18 = vsub.f32 1.0, %v17601_v57  ;;  %v4219_v58 = vadd.f32 1e-05, %v4203_v19 }
0x10fa   : > { %v5819_v13 = vadd.f32 %v15871_v27, %v5818_v25  ;;  %v15964_v7 = vmul.f32 %v5816_v38, %v15954_v34  ;;  %v17602_v38 = vld [vmem:[#allocation35_spill] sm:$0xff]  ;;  %v4220_v20 = vadd.f32 1e-05, %v4204_v9  ;;  %v17607_v9 = vld [vmem:[#allocation21_spill] sm:$0xff] }
0x10fb   : > { %5884 = vmax.xlane.f32.xlu1 %v5883_v30  ;;  %v15983_v49 = vmul.f32 %v5827_v26, %v15978_v62  ;;  %v5892_v55 = vsel %vm495_vm0, %v15975_v59, -inf  ;;  %v4206_v15 = vsub.f32 1.0, %v17602_v38  ;;  %v4221_v25 = vadd.f32 1e-05, %v4205_v18 }
0x10fc   : > { %v5886_v42 = vsel %vm495_vm0, %v15964_v7, -inf  ;;  %v15972_v5 = vmul.f32 %v5819_v13, %v15959_v4 }
0x10fd   : > { %5887 = vmax.xlane.f32.xlu0 %v5886_v42  ;;  %v5895_v32 = vsel %vm495_vm0, %v15983_v49, -inf  ;;  %v15996_v42 = vmul.f32 %v4219_v58, %v17603_v23  ;;  %v4222_v8 = vadd.f32 1e-05, %v4206_v15  ;;  %v16007_v57 = vmul.f32 %v4221_v25, %v17607_v9  ;;  %v17609_v15 = vld [vmem:[#allocation22_spill] sm:$0xff] }
0x10fe   : > { %v5889_v12 = vsel %vm495_vm0, %v15972_v5, -inf }
0x10ff   : > { %5890 = vmax.xlane.f32.xlu1 %v5889_v12  ;;  %17604 = vst [vmem:[#allocation7_spill] sm:$0xff] %v15996_v42  ;;  %17608 = vst [vmem:[#allocation25_spill] sm:$0xff] %v16007_v57 }
0x1101   : > { %5893 = vmax.xlane.f32.xlu0 %v5892_v55  ;;  %v17605_v55 = vld [vmem:[#allocation20_spill] sm:$0xff] }
0x1102   : > { %v15999_v37 = vmul.f32 %v4220_v20, %v17605_v55  ;;  %v16018_v20 = vmul.f32 %v4222_v8, %v17609_v15 }
0x1103   : > { %5896 = vmax.xlane.f32.xlu1 %v5895_v32 }
0x1104   : > { %17606 = vst [vmem:[#allocation8_spill] sm:$0xff] %v15999_v37  ;;  %17610 = vst [vmem:[#allocation26_spill] sm:$0xff] %v16018_v20 }
0x1109   : > { %v11455_v28 = vpop.f32.mrb[212].mxu0 }
0x110a   : > { %v5831_v30 = vpop.f32.mrb[213].mxu0  ;;  %v5840_v2 = vadd.f32 %v11455_v28, %v15871_v27 }
0x110b   : > { %v5832_v26 = vadd.f32 %v15871_v27, %v5831_v30  ;;  %v11456_v13 = vpop.f32.mrb[214].mxu0 }
0x110c   : > { %v5834_v12 = vpop.f32.mrb[215].mxu0  ;;  %v5843_v19 = vadd.f32 %v11456_v13, %v15871_v27  ;;  %v16015_v38 = vmul.f32 %v5840_v2, %v16007_v57 }
0x110d   : > { %v5835_v32 = vadd.f32 %v15871_v27, %v5834_v12  ;;  %v16004_v56 = vmul.f32 %v5832_v26, %v15996_v42 }
0x110e   : > { %v16023_v28 = vmul.f32 %v5843_v19, %v16018_v20  ;;  %v5904_v25 = vsel %vm495_vm0, %v16015_v38, -inf }
0x110f   : > { %v5898_v18 = vsel %vm495_vm0, %v16004_v56, -inf  ;;  %v16012_v58 = vmul.f32 %v5835_v32, %v15999_v37 }
0x1110   : > { %5899 = vmax.xlane.f32.xlu0 %v5898_v18  ;;  %v5907_v30 = vsel %vm495_vm0, %v16023_v28, -inf }
0x1111   : > { %v5901_v27 = vsel %vm495_vm0, %v16012_v58, -inf }
0x1112   : > { %5902 = vmax.xlane.f32.xlu1 %v5901_v27 }
0x1114   : > { %5905 = vmax.xlane.f32.xlu0 %v5904_v25 }
0x1116   : > { %5908 = vmax.xlane.f32.xlu1 %v5907_v30 }
0x1178   : > { %v5864_v2 = vpop.xlane.xlu0 %5863 }
0x1179   : > { %v5910_v26 = vsub.f32 %v15887_v14, %v5864_v2 }
0x117a   : > { %v5867_v13 = vpop.xlane.xlu1 %5866 }
0x117b   : > { %v5926_v23 = vmul.f32 1.442695, %v5910_v26  ;;  %v5911_v8 = vsub.f32 %v15898_v31, %v5867_v13 }
0x117c   : > { %v5870_v12 = vpop.xlane.xlu0 %5869 }
0x117d   : > { %12783 = vpow2.f32 %v5926_v23  ;;  %v5928_v55 = vmul.f32 1.442695, %v5911_v8  ;;  %v5912_v19 = vsub.f32 %v15901_v1, %v5870_v12 }
0x117e   : > { %v5873_v32 = vpop.xlane.xlu1 %5872 }
0x117f   : > { %12785 = vpow2.f32 %v5928_v55  ;;  %v5930_v9 = vmul.f32 1.442695, %v5912_v19  ;;  %v5913_v18 = vsub.f32 %v15907_v10, %v5873_v32 }
0x1181   : > { %12787 = vpow2.f32 %v5930_v9  ;;  %v5932_v27 = vmul.f32 1.442695, %v5913_v18 }
0x1182   : > { %v5876_v15 = vpop.xlane.xlu0 %5875 }
0x1183   : > { %v5914_v25 = vsub.f32 %v15929_v16, %v5876_v15  ;;  %12789 = vpow2.f32 %v5932_v27 }
0x1184   : > { %v5879_v14 = vpop.xlane.xlu1 %5878 }
0x1185   : > { %v5934_v30 = vmul.f32 1.442695, %v5914_v25  ;;  %v5915_v31 = vsub.f32 %v15935_v40, %v5879_v14 }
0x1186   : > { %v5882_v2 = vpop.xlane.xlu0 %5881 }
0x1187   : > { %12791 = vpow2.f32 %v5934_v30  ;;  %v5936_v26 = vmul.f32 1.442695, %v5915_v31  ;;  %v5916_v1 = vsub.f32 %v15938_v21, %v5882_v2  ;;  %v16036_v23 = vpop.eup %12783 }
0x1188   : > { %v5885_v13 = vpop.xlane.xlu1 %5884  ;;  %v5958_v16 = vsel %vm495_vm0, %v16036_v23, 0.0 }
0x1189   : > { %12793 = vpow2.f32 %v5936_v26  ;;  %v5938_v10 = vmul.f32 1.442695, %v5916_v1  ;;  %v5917_v8 = vsub.f32 %v15947_v44, %v5885_v13  ;;  %v16041_v12 = vpop.eup %12785  ;;  %5959 = vadd.xlane.f32.xlu0 %v5958_v16 }
0x118a   : > { %v5888_v40 = vpop.xlane.xlu0 %5887  ;;  %v5961_v21 = vsel %vm495_vm0, %v16041_v12, 0.0 }
0x118b   : > { %12795 = vpow2.f32 %v5938_v10  ;;  %v5940_v55 = vmul.f32 1.442695, %v5917_v8  ;;  %v5918_v19 = vsub.f32 %v15964_v7, %v5888_v40  ;;  %v16046_v32 = vpop.eup %12787  ;;  %5962 = vadd.xlane.f32.xlu1 %v5961_v21 }
0x118c   : > { %v5891_v9 = vpop.xlane.xlu1 %5890  ;;  %v5964_v15 = vsel %vm495_vm0, %v16046_v32, 0.0 }
0x118d   : > { %12797 = vpow2.f32 %v5940_v55  ;;  %v5942_v44 = vmul.f32 1.442695, %v5918_v19  ;;  %v5919_v18 = vsub.f32 %v15972_v5, %v5891_v9  ;;  %v16051_v27 = vpop.eup %12789  ;;  %5965 = vadd.xlane.f32.xlu0 %v5964_v15 }
0x118e   : > { %v5894_v25 = vpop.xlane.xlu0 %5893  ;;  %v5967_v30 = vsel %vm495_vm0, %v16051_v27, 0.0 }
0x118f   : > { %12799 = vpow2.f32 %v5942_v44  ;;  %v5944_v7 = vmul.f32 1.442695, %v5919_v18  ;;  %v5920_v14 = vsub.f32 %v15975_v59, %v5894_v25  ;;  %5968 = vadd.xlane.f32.xlu1 %v5967_v30 }
0x1190   : > { %v5897_v2 = vpop.xlane.xlu1 %5896 }
0x1191   : > { %v16056_v31 = vpop.eup %12791  ;;  %12801 = vpow2.f32 %v5944_v7  ;;  %v5946_v5 = vmul.f32 1.442695, %v5920_v14  ;;  %v5921_v26 = vsub.f32 %v15983_v49, %v5897_v2 }
0x1192   : > { %v5970_v1 = vsel %vm495_vm0, %v16056_v31, 0.0 }
0x1193   : > { %v16061_v13 = vpop.eup %12793  ;;  %5971 = vadd.xlane.f32.xlu0 %v5970_v1  ;;  %12803 = vpow2.f32 %v5946_v5  ;;  %v5948_v10 = vmul.f32 1.442695, %v5921_v26 }
0x1194   : > { %v5973_v59 = vsel %vm495_vm0, %v16061_v13, 0.0 }
0x1195   : > { %v16065_v8 = vpop.eup %12795  ;;  %5974 = vadd.xlane.f32.xlu1 %v5973_v59  ;;  %12805 = vpow2.f32 %v5948_v10 }
0x1196   : > { %v5976_v16 = vsel %vm495_vm0, %v16065_v8, 0.0 }
0x1197   : > { %v16069_v55 = vpop.eup %12797  ;;  %5977 = vadd.xlane.f32.xlu0 %v5976_v16 }
0x1198   : > { %v5979_v49 = vsel %vm495_vm0, %v16069_v55, 0.0 }
0x1199   : > { %5980 = vadd.xlane.f32.xlu1 %v5979_v49  ;;  %v16073_v40 = vpop.eup %12799 }
0x119a   : > { %v5982_v19 = vsel %vm495_vm0, %v16073_v40, 0.0 }
0x119b   : > { %v16077_v21 = vpop.eup %12801  ;;  %5983 = vadd.xlane.f32.xlu0 %v5982_v19 }
0x119c   : > { %v5985_v18 = vsel %vm495_vm0, %v16077_v21, 0.0 }
0x119d   : > { %v5900_v9 = vpop.xlane.xlu0 %5899  ;;  %v16082_v15 = vpop.eup %12803  ;;  %5986 = vadd.xlane.f32.xlu1 %v5985_v18 }
0x119e   : > { %v5922_v44 = vsub.f32 %v16004_v56, %v5900_v9  ;;  %v5988_v30 = vsel %vm495_vm0, %v16082_v15, 0.0 }
0x119f   : > { %v5903_v25 = vpop.xlane.xlu1 %5902  ;;  %v16087_v2 = vpop.eup %12805  ;;  %5989 = vadd.xlane.f32.xlu0 %v5988_v30 }
0x11a0   : > { %v5950_v7 = vmul.f32 1.442695, %v5922_v44  ;;  %v5923_v14 = vsub.f32 %v16012_v58, %v5903_v25  ;;  %v5991_v1 = vsel %vm495_vm0, %v16087_v2, 0.0 }
0x11a1   : > { %v5906_v5 = vpop.xlane.xlu0 %5905  ;;  %5992 = vadd.xlane.f32.xlu1 %v5991_v1 }
0x11a2   : > { %12807 = vpow2.f32 %v5950_v7  ;;  %v5952_v26 = vmul.f32 1.442695, %v5923_v14  ;;  %v5924_v56 = vsub.f32 %v16015_v38, %v5906_v5 }
0x11a3   : > { %v5909_v10 = vpop.xlane.xlu1 %5908 }
0x11a4   : > { %12809 = vpow2.f32 %v5952_v26  ;;  %v5954_v59 = vmul.f32 1.442695, %v5924_v56  ;;  %v5925_v58 = vsub.f32 %v16023_v28, %v5909_v10 }
0x11a6   : > { %12811 = vpow2.f32 %v5954_v59  ;;  %v5956_v16 = vmul.f32 1.442695, %v5925_v58 }
0x11a8   : > { %12813 = vpow2.f32 %v5956_v16 }
0x11ac   : > { %v16093_v49 = vpop.eup %12807 }
0x11ad   : > { %v5994_v19 = vsel %vm495_vm0, %v16093_v49, 0.0 }
0x11ae   : > { %v16097_v9 = vpop.eup %12809  ;;  %5995 = vadd.xlane.f32.xlu0 %v5994_v19 }
0x11af   : > { %v5997_v38 = vsel %vm495_vm0, %v16097_v9, 0.0 }
0x11b0   : > { %v16101_v44 = vpop.eup %12811  ;;  %5998 = vadd.xlane.f32.xlu1 %v5997_v38 }
0x11b1   : > { %v6000_v28 = vsel %vm495_vm0, %v16101_v44, 0.0 }
0x11b2   : > { %v16105_v18 = vpop.eup %12813  ;;  %6001 = vadd.xlane.f32.xlu0 %v6000_v28 }
0x11b3   : > { %v6003_v25 = vsel %vm495_vm0, %v16105_v18, 0.0 }
0x11b4   : > { %6004 = vadd.xlane.f32.xlu1 %v6003_v25  ;;  %v13486_v25 = vld [vmem:[%s13641_s20] sm:$0xff] }
0x1216   : > { %v5960_v7 = vpop.xlane.xlu0 %5959 }
0x1217   : > { %12815 = vrcp.f32 %v5960_v7 }
0x1218   : > { %v5963_v14 = vpop.xlane.xlu1 %5962 }
0x1219   : > { %12817 = vrcp.f32 %v5963_v14  ;;  %v13487_v14 = vld [vmem:[%s13641_s20 + $0x8] sm:$0xff] }
0x121a   : > { %v5966_v30 = vpop.xlane.xlu0 %5965 }
0x121b   : > { %12819 = vrcp.f32 %v5966_v30 }
0x121c   : > { %v5969_v5 = vpop.xlane.xlu1 %5968 }
0x121d   : > { %12821 = vrcp.f32 %v5969_v5 }
0x1220   : > { %v5972_v26 = vpop.xlane.xlu0 %5971 }
0x1221   : > { %12823 = vrcp.f32 %v5972_v26  ;;  %v12816_v1 = vpop.eup %12815 }
0x1222   : > { %v5975_v56 = vpop.xlane.xlu1 %5974  ;;  %v16110_v59 = vmul.f32 %v12816_v1, %v16036_v23 }
0x1223   : > { %12825 = vrcp.f32 %v5975_v56  ;;  %v12818_v58 = vpop.eup %12817 }
0x1224   : > { %v5978_v10 = vpop.xlane.xlu0 %5977  ;;  %v16113_v19 = vmul.f32 %v12818_v58, %v16041_v12  ;;  %v6038_v7 = vmul.f32 %v13486_v25, %v16110_v59 }
0x1225   : > { %12827 = vrcp.f32 %v5978_v10  ;;  %v12820_v38 = vpop.eup %12819  ;;  %v13488_v10 = vld [vmem:[%s13641_s20 + $0x10] sm:$0xff] }
0x1226   : > { %v5981_v16 = vpop.xlane.xlu1 %5980  ;;  %v16116_v28 = vmul.f32 %v12820_v38, %v16046_v32  ;;  %v6039_v23 = vmul.f32 %v13487_v14, %v16113_v19  ;;  %v13489_v32 = vld [vmem:[%s13641_s20 + $0x18] sm:$0xff] }
0x1227   : > { %12829 = vrcp.f32 %v5981_v16  ;;  %v12822_v30 = vpop.eup %12821 }
0x1228   : > { %v5984_v5 = vpop.xlane.xlu0 %5983  ;;  %v16123_v26 = vmul.f32 %v12822_v30, %v16051_v27  ;;  %v6102_v12 = vpack.c.bf16 %v6039_v23, %v6038_v7  ;;  %v6040_v58 = vmul.f32 %v13488_v10, %v16116_v28  ;;  %v13492_v10 = vld [vmem:[%s17467_s1 + $0x10] sm:$0xff]  }
0x1229   : > { %12831 = vrcp.f32 %v5984_v5  ;;  %v13490_v5 = vld [vmem:[%s13641_s20 + $0x20] sm:$0xff] }
0x122a   : > { %v5987_v1 = vpop.xlane.xlu1 %5986  ;;  %v6041_v16 = vmul.f32 %v13489_v32, %v16123_v26  ;;  %11461 = vmatprep.mubr.msk.bf16.mxu1 %vm495_vm0, %v6102_v12  ;;  %11481 = vmatprep.mubr.msk.bf16.mxu0 %vm495_vm0, %v6102_v12 }
0x122b   : > { %v12824_v56 = vpop.eup %12823  ;;  %12833 = vrcp.f32 %v5987_v1  ;;  %v13491_v1 = vld [vmem:[%s13641_s20 + $0x28] sm:$0xff] }
0x122c   : > { %v16132_v27 = vmul.f32 %v12824_v56, %v16056_v31  ;;  %v5990_v25 = vpop.xlane.xlu0 %5989  ;;  %v6103_v7 = vpack.c.bf16 %v6041_v16, %v6040_v58  ;;  %v13493_v16 = vld [vmem:[%s17468_s2 + $0x18] sm:$0xff]  }
0x122d   : > { %v12826_v38 = vpop.eup %12825  ;;  %12835 = vrcp.f32 %v5990_v25  ;;  %v13496_v25 = vld [vmem:[%s13641_s20 + $0x38] sm:$0xff] }
0x122e   : > { %v16135_v14 = vmul.f32 %v12826_v38, %v16061_v13  ;;  %v5993_v30 = vpop.xlane.xlu1 %5992  ;;  %11462 = vmatmul.mubr.msk.bf16.vlgmr.msra.gmra.mrb[216].mxu1 %vm495_vm0, %v6103_v7  ;;  %11482 = vmatmul.mubr.msk.bf16.vlgmr.msra.gmra.mrb[216].mxu0 %vm495_vm0, %v6103_v7  ;;  %v6042_v12 = vmul.f32 %v13490_v5, %v16132_v27  ;;  %v13495_v38 = vld [vmem:[%s13641_s20 + $0x30] sm:$0xff] }
0x122f   : > { %v12828_v23 = vpop.eup %12827  ;;  %12837 = vrcp.f32 %v5993_v30  ;;  %11518 = vmatpush3.bf16.msra.mxu0 %v15807_v50  ;;  %11498 = vmatpush3.bf16.msra.mxu1 %v13492_v10  ;;  %v13498_v10 = vld [vmem:[%s13641_s20 + $0x48] sm:$0xff] }
0x1230   : > { %v6043_v31 = vmul.f32 %v13491_v1, %v16135_v14  ;;  %v16144_v56 = vmul.f32 %v12828_v23, %v16065_v8  ;;  %11519 = vmatprep.subr.bf16.mxu0 %v13493_v16  ;;  %v13494_v8 = vld [vmem:[%s17467_s1 + $0x18] sm:$0xff]  }
0x1231   : > { %v12830_v13 = vpop.eup %12829  ;;  %11499 = vmatprep.subr.bf16.mxu1 %v13494_v8 }
0x1232   : > { %v6104_v58 = vpack.c.bf16 %v6043_v31, %v6042_v12  ;;  %v16151_v32 = vmul.f32 %v12830_v13, %v16069_v55  ;;  %v6044_v55 = vmul.f32 %v13495_v38, %v16144_v56  ;;  %v13497_v31 = vld [vmem:[%s13641_s20 + $0x40] sm:$0xff] }
0x1233   : > { %v12832_v50 = vpop.eup %12831  ;;  %11520 = vmatpush3.bf16.msra.mxu0 %v13493_v16  ;;  %11500 = vmatpush3.bf16.msra.mxu1 %v13494_v8 }
0x1234   : > { %11465 = vmatprep.mubr.msk.bf16.mxu1 %vm495_vm0, %v6104_v58  ;;  %11485 = vmatprep.mubr.msk.bf16.mxu0 %vm495_vm0, %v6104_v58  ;;  %v6045_v7 = vmul.f32 %v13496_v25, %v16151_v32  ;;  %v16166_v23 = vmul.f32 %v12832_v50, %v16073_v40 }
0x1235   : > { %v12834_v30 = vpop.eup %12833 }
0x1236   : > { %17611 = vst [vmem:[#allocation9_spill] sm:$0xff] %v16166_v23  ;;  %v6105_v5 = vpack.c.bf16 %v6045_v7, %v6044_v55  ;;  %v16169_v12 = vmul.f32 %v12834_v30, %v16077_v21  ;;  %v6046_v13 = vmul.f32 %v13497_v31, %v16166_v23  ;;  %v13499_v55 = vld [vmem:[%s13641_s20 + $0x50] sm:$0xff]  ;;  %v13500_v7 = vld [vmem:[%s13641_s20 + $0x58] sm:$0xff] }
0x1237   : > { %v12836_v1 = vpop.eup %12835 }
0x1238   : > { %17612 = vst [vmem:[#allocation10_spill] sm:$0xff] %v16169_v12  ;;  %11466 = vmatmul.mubr.msk.bf16.gmra.mrb[220].mxu1 %vm495_vm0, %v6105_v5  ;;  %11486 = vmatmul.mubr.msk.bf16.gmra.mrb[220].mxu0 %vm495_vm0, %v6105_v5  ;;  %v6047_v40 = vmul.f32 %v13498_v10, %v16169_v12  ;;  %v16178_v58 = vmul.f32 %v12836_v1, %v16082_v15 }
0x1239   : > { %v12838_v16 = vpop.eup %12837 }
0x123a   : > { %v6106_v21 = vpack.c.bf16 %v6047_v40, %v6046_v13  ;;  %v16181_v50 = vmul.f32 %v12838_v16, %v16087_v2  ;;  %v6048_v25 = vmul.f32 %v13499_v55, %v16178_v58  ;;  %v13501_v16 = vld [vmem:[%s13641_s20 + $0x60] sm:$0xff] }
0x123b   : > { %v5996_v8 = vpop.xlane.xlu0 %5995 }
0x123c   : > { %12839 = vrcp.f32 %v5996_v8  ;;  %17613 = vst [vmem:[#allocation27_spill] sm:$0xff] %v16181_v50  ;;  %11469 = vmatprep.mubr.msk.bf16.mxu1 %vm495_vm0, %v6106_v21  ;;  %11489 = vmatprep.mubr.msk.bf16.mxu0 %vm495_vm0, %v6106_v21  ;;  %v6049_v15 = vmul.f32 %v13500_v7, %v16181_v50  ;;  %v13502_v21 = vld [vmem:[%s13641_s20 + $0x68] sm:$0xff] }
0x123d   : > { %v5999_v38 = vpop.xlane.xlu1 %5998 }
0x123e   : > { %12841 = vrcp.f32 %v5999_v38  ;;  %v6107_v5 = vpack.c.bf16 %v6049_v15, %v6048_v25 }
0x123f   : > { %v6002_v30 = vpop.xlane.xlu0 %6001 }
0x1240   : > { %12843 = vrcp.f32 %v6002_v30  ;;  %11470 = vmatmul.mubr.msk.bf16.gmra.mrb[224].mxu1 %vm495_vm0, %v6107_v5  ;;  %11490 = vmatmul.mubr.msk.bf16.gmra.mrb[224].mxu0 %vm495_vm0, %v6107_v5  ;;  %v13504_v30 = vld [vmem:[%s13641_s20 + $0x78] sm:$0xff] }
0x1241   : > { %v6005_v1 = vpop.xlane.xlu1 %6004 }
0x1242   : > { %12845 = vrcp.f32 %v6005_v1 }
0x1246   : > { %v12840_v2 = vpop.eup %12839 }
0x1247   : > { %v16192_v31 = vmul.f32 %v12840_v2, %v16093_v49 }
0x1248   : > { %v12842_v13 = vpop.eup %12841 }
0x1249   : > { %17614 = vst [vmem:[#allocation11_spill] sm:$0xff] %v16192_v31  ;;  %v16195_v10 = vmul.f32 %v12842_v13, %v16097_v9  ;;  %v6050_v8 = vmul.f32 %v13501_v16, %v16192_v31  ;;  %v13503_v9 = vld [vmem:[%s13641_s20 + $0x70] sm:$0xff] }
0x124a   : > { %v12844_v40 = vpop.eup %12843 }
0x124b   : > { %17615 = vst [vmem:[#allocation12_spill] sm:$0xff] %v16195_v10  ;;  %v6051_v38 = vmul.f32 %v13502_v21, %v16195_v10  ;;  %v16202_v55 = vmul.f32 %v12844_v40, %v16101_v44 }
0x124c   : > { %v12846_v25 = vpop.eup %12845 }
0x124d   : > { %17616 = vst [vmem:[#allocation13_spill] sm:$0xff] %v16202_v55  ;;  %v6108_v7 = vpack.c.bf16 %v6051_v38, %v6050_v8  ;;  %v16205_v49 = vmul.f32 %v12846_v25, %v16105_v18  ;;  %v6052_v15 = vmul.f32 %v13503_v9, %v16202_v55  ;;  %v16220_v18 = vld [vmem:[%s17470_s4] ss:$0 sm:$0xff] }
0x124f   : > { %17617 = vst [vmem:[#allocation28_spill] sm:$0xff] %v16205_v49  ;;  %11473 = vmatprep.mubr.msk.bf16.mxu1 %vm495_vm0, %v6108_v7  ;;  %11493 = vmatprep.mubr.msk.bf16.mxu0 %vm495_vm0, %v6108_v7  ;;  %v6053_v5 = vmul.f32 %v13504_v30, %v16205_v49 }
0x1251   : > { %v6109_v1 = vpack.c.bf16 %v6053_v5, %v6052_v15 }
0x1253   : > { %11474 = vmatmul.mubr.msk.bf16.gmra.mrb[228].mxu1 %vm495_vm0, %v6109_v1  ;;  %11494 = vmatmul.mubr.msk.bf16.gmra.mrb[228].mxu0 %vm495_vm0, %v6109_v1 }
0x1301   : > { %v16215_v44 = vpop.f32.mrb[216].mxu1  ;;  %v11483_v2 = vpop.f32.mrb[216].mxu0 }
0x1302   : > { %v6274_v13 = vadd.f32 %v16220_v18, %v11483_v2  ;;  %v16223_v40 = vpop.f32.mrb[217].mxu1  ;;  %v6265_v16 = vpop.f32.mrb[217].mxu0 }
0x1303   : > { %v6266_v8 = vadd.f32 %v16220_v18, %v6265_v16  ;;  %v16226_v21 = vpop.f32.mrb[218].mxu1  ;;  %v11484_v38 = vpop.f32.mrb[218].mxu0 }
0x1304   : > { %v10145_v25 = vmul.f32 -1.442695, %v6274_v13  ;;  %v6277_v7 = vadd.f32 %v16220_v18, %v11484_v38  ;;  %v16229_v9 = vpop.f32.mrb[219].mxu1  ;;  %v6268_v15 = vpop.f32.mrb[219].mxu0 }
0x1305   : > { %v10143_v30 = vmul.f32 -1.442695, %v6266_v8  ;;  %v6269_v5 = vadd.f32 %v16220_v18, %v6268_v15 }
0x1306   : > { %12847 = vpow2.f32 %v10145_v25  ;;  %v10146_v1 = vmul.f32 -1.442695, %v6277_v7 }
0x1307   : > { %12849 = vpow2.f32 %v10143_v30  ;;  %v10144_v2 = vmul.f32 -1.442695, %v6269_v5 }
0x1308   : > { %12851 = vpow2.f32 %v10146_v1 }
0x1309   : > { %12853 = vpow2.f32 %v10144_v2 }
0x130b   : > { %v16232_v37 = vpop.f32.mrb[220].mxu1  ;;  %v11487_v16 = vpop.f32.mrb[220].mxu0 }
0x130c   : > { %v6290_v20 = vadd.f32 %v16220_v18, %v11487_v16  ;;  %v16235_v13 = vpop.f32.mrb[221].mxu1  ;;  %v6281_v38 = vpop.f32.mrb[221].mxu0 }
0x130d   : > { %v6282_v42 = vadd.f32 %v16220_v18, %v6281_v38  ;;  %v16238_v57 = vpop.f32.mrb[222].mxu1  ;;  %v11488_v8 = vpop.f32.mrb[222].mxu0 }
0x130e   : > { %v10149_v15 = vmul.f32 -1.442695, %v6290_v20  ;;  %v6293_v25 = vadd.f32 %v16220_v18, %v11488_v8  ;;  %v16241_v7 = vpop.f32.mrb[223].mxu1  ;;  %v6284_v30 = vpop.f32.mrb[223].mxu0 }
0x130f   : > { %v10147_v5 = vmul.f32 -1.442695, %v6282_v42  ;;  %v6285_v1 = vadd.f32 %v16220_v18, %v6284_v30 }
0x1310   : > { %12855 = vpow2.f32 %v10149_v15  ;;  %v10150_v2 = vmul.f32 -1.442695, %v6293_v25  ;;  %v12848_v10 = vpop.eup %12847 }
0x1311   : > { %12857 = vpow2.f32 %v10147_v5  ;;  %v10148_v16 = vmul.f32 -1.442695, %v6285_v1  ;;  %v12850_v49 = vpop.eup %12849  ;;  %v6378_v38 = vadd.f32 1.0, %v12848_v10 }
0x1312   : > { %12859 = vpow2.f32 %v10150_v2  ;;  %v12852_v31 = vpop.eup %12851  ;;  %v6376_v55 = vadd.f32 1.0, %v12850_v49 }
0x1313   : > { %12861 = vpow2.f32 %v10148_v16  ;;  %v16244_v20 = vpop.f32.mrb[224].mxu1  ;;  %v11491_v8 = vpop.f32.mrb[224].mxu0  ;;  %v6379_v62 = vadd.f32 1.0, %v12852_v31 }
0x1314   : > { %v12854_v4 = vpop.eup %12853  ;;  %12863 = vrcp.f32 %v6378_v38  ;;  %v6306_v42 = vadd.f32 %v16220_v18, %v11491_v8  ;;  %v16247_v30 = vpop.f32.mrb[225].mxu1 }
0x1315   : > { %v6297_v15 = vpop.f32.mrb[225].mxu0  ;;  %12865 = vrcp.f32 %v6376_v55  ;;  %v6377_v25 = vadd.f32 1.0, %v12854_v4  ;;  %v16250_v1 = vpop.f32.mrb[226].mxu1 }
0x1316   : > { %v6298_v5 = vadd.f32 %v16220_v18, %v6297_v15  ;;  %v11492_v10 = vpop.f32.mrb[226].mxu0  ;;  %12867 = vrcp.f32 %v6379_v62  ;;  %v10153_v49 = vmul.f32 -1.442695, %v6306_v42  ;;  %v16253_v16 = vpop.f32.mrb[227].mxu1 }
0x1317   : > { %v6309_v2 = vadd.f32 %v16220_v18, %v11492_v10  ;;  %v6300_v38 = vpop.f32.mrb[227].mxu0  ;;  %12869 = vrcp.f32 %v6377_v25  ;;  %v16259_v25 = vld [vmem:[%s17469_s3] ss:$0 sm:$0xff] }
0x1318   : > { %v10151_v31 = vmul.f32 -1.442695, %v6298_v5  ;;  %v6301_v8 = vadd.f32 %v16220_v18, %v6300_v38  ;;  %12871 = vpow2.f32 %v10153_v49  ;;  %v6177_v5 = vadd.f32 %v16259_v25, %v16215_v44 }
0x1319   : > { %v10154_v34 = vmul.f32 -1.442695, %v6309_v2 }
0x131a   : > { %v12856_v55 = vpop.eup %12855  ;;  %12873 = vpow2.f32 %v10151_v31  ;;  %v10152_v4 = vmul.f32 -1.442695, %v6301_v8  ;;  %v6172_v8 = vadd.f32 %v16259_v25, %v16229_v9 }
0x131b   : > { %v12858_v15 = vpop.eup %12857  ;;  %v6382_v63 = vadd.f32 1.0, %v12856_v55  ;;  %12875 = vpow2.f32 %v10154_v34  ;;  %v6169_v34 = vadd.f32 %v16259_v25, %v16223_v40 }
0x131c   : > { %v12860_v12 = vpop.eup %12859  ;;  %v6380_v62 = vadd.f32 1.0, %v12858_v15  ;;  %12877 = vpow2.f32 %v10152_v4 }
0x131d   : > { %v12862_v42 = vpop.eup %12861  ;;  %12879 = vrcp.f32 %v6382_v63  ;;  %v6383_v10 = vadd.f32 1.0, %v12860_v12  ;;  %v6180_v63 = vadd.f32 %v16259_v25, %v16226_v21 }
0x131e   : > { %12881 = vrcp.f32 %v6380_v62  ;;  %v6381_v49 = vadd.f32 1.0, %v12862_v42  ;;  %v12864_v2 = vpop.eup %12863 }
0x131f   : > { %12883 = vrcp.f32 %v6383_v10  ;;  %v12866_v38 = vpop.eup %12865  ;;  %v6426_v31 = vmul.f32 %v12864_v2, %v6177_v5 }
0x1320   : > { %12885 = vrcp.f32 %v6381_v49  ;;  %v12868_v12 = vpop.eup %12867  ;;  %v6424_v55 = vmul.f32 %v12866_v38, %v6169_v34  ;;  %v6193_v49 = vadd.f32 %v16259_v25, %v16232_v37  ;;  %v6196_v37 = vadd.f32 %v16259_v25, %v16238_v57 }
0x1321   : > { %v12870_v4 = vpop.eup %12869  ;;  %v6427_v44 = vmul.f32 %v12868_v12, %v6180_v63 }
0x1322   : > { %v12872_v15 = vpop.eup %12871  ;;  %v6425_v62 = vmul.f32 %v12870_v4, %v6172_v8 }
0x1323   : > { %v6386_v45 = vadd.f32 1.0, %v12872_v15  ;;  %v6441_v50 = vpack.c.bf16 %v6427_v44, %v6426_v31  ;;  %v6185_v31 = vadd.f32 %v16259_v25, %v16235_v13 }
0x1324   : > { %v12874_v42 = vpop.eup %12873  ;;  %v6440_v2 = vpack.c.bf16 %v6425_v62, %v6424_v55 }
0x1325   : > { %v12876_v40 = vpop.eup %12875  ;;  %v6384_v10 = vadd.f32 1.0, %v12874_v42  ;;  %12887 = vrcp.f32 %v6386_v45 }
0x1326   : > { %v16269_v23 = vpop.f32.mrb[228].mxu1  ;;  %v11495_v5 = vpop.f32.mrb[228].mxu0  ;;  %v6387_v9 = vadd.f32 1.0, %v12876_v40  ;;  %11501 = vmatprep.mubr.msk.bf16.mxu1 %vm495_vm0, %v6440_v2  ;;  %11521 = vmatprep.mubr.msk.bf16.mxu0 %vm495_vm0, %v6440_v2 }
0x1327   : > { %v12878_v21 = vpop.eup %12877  ;;  %v6322_v34 = vadd.f32 %v16220_v18, %v11495_v5  ;;  %v16274_v38 = vpop.f32.mrb[229].mxu1  ;;  %12889 = vrcp.f32 %v6384_v10  ;;  %11502 = vmatmul.mubr.msk.bf16.vlgmr.msra.gmra.mrb[232].mxu1 %vm495_vm0, %v6441_v50  ;;  %11522 = vmatmul.mubr.msk.bf16.vlgmr.msra.gmra.mrb[232].mxu0 %vm495_vm0, %v6441_v50  ;;  %v6188_v10 = vadd.f32 %v16259_v25, %v16241_v7  ;;  %v6209_v7 = vadd.f32 %v16259_v25, %v16244_v20 }
0x1328   : > { %v6313_v63 = vpop.f32.mrb[229].mxu0  ;;  %v12880_v12 = vpop.eup %12879  ;;  %v6385_v8 = vadd.f32 1.0, %v12878_v21  ;;  %12891 = vrcp.f32 %v6387_v9  ;;  %v6204_v20 = vadd.f32 %v16259_v25, %v16253_v16  ;;  %v6225_v16 = vadd.f32 %v16259_v25, %v16269_v23  ;;  %v11867_v23 = vld [vmem:[%s17472_s6 + $0x60] sm:$0xff]  }
0x1329   : > { %v6314_v4 = vadd.f32 %v16220_v18, %v6313_v63  ;;  %v16279_v55 = vpop.f32.mrb[230].mxu1  ;;  %v11496_v44 = vpop.f32.mrb[230].mxu0  ;;  %v10157_v15 = vmul.f32 -1.442695, %v6322_v34  ;;  %v6430_v34 = vmul.f32 %v12880_v12, %v6193_v49  ;;  %v6212_v12 = vadd.f32 %v16259_v25, %v16250_v1  ;;  %11557 = vmatprep.subr.bf16.mxu0 %v11867_v23 }
0x132a   : > { %v12882_v45 = vpop.eup %12881  ;;  %v6325_v62 = vadd.f32 %v16220_v18, %v11496_v44  ;;  %v16286_v13 = vpop.f32.mrb[231].mxu1  ;;  %12893 = vrcp.f32 %v6385_v8  ;;  %11558 = vmatpush3.bf16.msra.mxu0 %v11867_v23 }
0x132b   : > { %v6316_v42 = vpop.f32.mrb[231].mxu0  ;;  %v12884_v40 = vpop.eup %12883  ;;  %v10155_v5 = vmul.f32 -1.442695, %v6314_v4  ;;  %12895 = vpow2.f32 %v10157_v15  ;;  %v6428_v9 = vmul.f32 %v12882_v45, %v6185_v31  ;;  %v6201_v31 = vadd.f32 %v16259_v25, %v16247_v30 }
0x132c   : > { %v6317_v2 = vadd.f32 %v16220_v18, %v6316_v42  ;;  %v12886_v57 = vpop.eup %12885  ;;  %v10158_v21 = vmul.f32 -1.442695, %v6325_v62  ;;  %v6431_v17 = vmul.f32 %v12884_v40, %v6196_v37 }
0x132d   : > { %12897 = vpow2.f32 %v10155_v5  ;;  %v6429_v44 = vmul.f32 %v12886_v57, %v6188_v10 }
0x132e   : > { %v10156_v63 = vmul.f32 -1.442695, %v6317_v2  ;;  %12899 = vpow2.f32 %v10158_v21  ;;  %v6443_v36 = vpack.c.bf16 %v6431_v17, %v6430_v34 }
0x132f   : > { %v6442_v50 = vpack.c.bf16 %v6429_v44, %v6428_v9  ;;  %v12888_v18 = vpop.eup %12887  ;;  %v6217_v9 = vadd.f32 %v16259_v25, %v16274_v38  ;;  %v11868_v38 = vld [vmem:[%s17472_s6 + $0x68] sm:$0xff]  }
0x1330   : > { %12901 = vpow2.f32 %v10156_v63  ;;  %v6434_v17 = vmul.f32 %v12888_v18, %v6209_v7  ;;  %v6228_v63 = vadd.f32 %v16259_v25, %v16279_v55  ;;  %v6220_v7 = vadd.f32 %v16259_v25, %v16286_v13  ;;  %v11869_v25 = vld [vmem:[%s17471_s5 + $0x60] sm:$0xff]   ;;  %v11870_v55 = vld [vmem:[%s17471_s5 + $0x68] sm:$0xff]   ;;  %11559 = vmatprep.subr.bf16.mxu0 %v11868_v38 }
0x1331   : > { %11505 = vmatprep.mubr.msk.bf16.mxu1 %vm495_vm0, %v6442_v50  ;;  %11525 = vmatprep.mubr.msk.bf16.mxu0 %vm495_vm0, %v6442_v50  ;;  %v12890_v49 = vpop.eup %12889 }
0x1332   : > { %11506 = vmatmul.mubr.msk.bf16.gmra.mrb[236].mxu1 %vm495_vm0, %v6443_v36  ;;  %11526 = vmatmul.mubr.msk.bf16.gmra.mrb[236].mxu0 %vm495_vm0, %v6443_v36  ;;  %v12892_v8 = vpop.eup %12891  ;;  %v6432_v4 = vmul.f32 %v12890_v49, %v6201_v31 }
0x1333   : > { %v6435_v37 = vmul.f32 %v12892_v8, %v6212_v12  ;;  %11537 = vmatprep.subr.bf16.mxu1 %v11869_v25  ;;  %11560 = vmatpush3.bf16.msra.mxu0 %v11868_v38 }
0x1334   : > { %v12894_v45 = vpop.eup %12893  ;;  %11538 = vmatpush3.bf16.msra.mxu1 %v11869_v25 }
0x1335   : > { %v12896_v15 = vpop.eup %12895  ;;  %v6433_v62 = vmul.f32 %v12894_v45, %v6204_v20  ;;  %v6445_v40 = vpack.c.bf16 %v6435_v37, %v6434_v17  ;;  %11539 = vmatprep.subr.bf16.mxu1 %v11870_v55 }
0x1336   : > { %v6390_v30 = vadd.f32 1.0, %v12896_v15 }
0x1337   : > { %v12898_v42 = vpop.eup %12897  ;;  %v6444_v36 = vpack.c.bf16 %v6433_v62, %v6432_v4  ;;  %v16338_v4 = vld [vmem:[%s17470_s4 + $0x1] ss:$0 sm:$0xff] }
0x1338   : > { %v12900_v10 = vpop.eup %12899  ;;  %v6388_v5 = vadd.f32 1.0, %v12898_v42  ;;  %12903 = vrcp.f32 %v6390_v30  ;;  %11540 = vmatpush3.bf16.msra.mxu1 %v11870_v55 }
0x1339   : > { %v6391_v57 = vadd.f32 1.0, %v12900_v10  ;;  %11509 = vmatprep.mubr.msk.bf16.mxu1 %vm495_vm0, %v6444_v36  ;;  %11529 = vmatprep.mubr.msk.bf16.mxu0 %vm495_vm0, %v6444_v36 }
0x133a   : > { %v12902_v2 = vpop.eup %12901  ;;  %12905 = vrcp.f32 %v6388_v5  ;;  %11510 = vmatmul.mubr.msk.bf16.gmra.mrb[240].mxu1 %vm495_vm0, %v6445_v40  ;;  %11530 = vmatmul.mubr.msk.bf16.gmra.mrb[240].mxu0 %vm495_vm0, %v6445_v40 }
0x133b   : > { %v6389_v1 = vadd.f32 1.0, %v12902_v2  ;;  %12907 = vrcp.f32 %v6391_v57 }
0x133d   : > { %12909 = vrcp.f32 %v6389_v1 }
0x1342   : > { %v12904_v21 = vpop.eup %12903 }
0x1343   : > { %v6438_v44 = vmul.f32 %v12904_v21, %v6225_v16 }
0x1344   : > { %v12906_v34 = vpop.eup %12905 }
0x1345   : > { %v12908_v50 = vpop.eup %12907  ;;  %v6436_v18 = vmul.f32 %v12906_v34, %v6217_v9 }
0x1346   : > { %v6439_v49 = vmul.f32 %v12908_v50, %v6228_v63 }
0x1347   : > { %v12910_v31 = vpop.eup %12909 }
0x1348   : > { %v6437_v12 = vmul.f32 %v12910_v31, %v6220_v7  ;;  %v6447_v17 = vpack.c.bf16 %v6439_v49, %v6438_v44 }
0x134a   : > { %v6446_v8 = vpack.c.bf16 %v6437_v12, %v6436_v18 }
0x134c   : > { %11513 = vmatprep.mubr.msk.bf16.mxu1 %vm495_vm0, %v6446_v8  ;;  %11533 = vmatprep.mubr.msk.bf16.mxu0 %vm495_vm0, %v6446_v8 }
0x134d   : > { %11514 = vmatmul.mubr.msk.bf16.gmra.mrb[244].mxu1 %vm495_vm0, %v6447_v17  ;;  %11534 = vmatmul.mubr.msk.bf16.gmra.mrb[244].mxu0 %vm495_vm0, %v6447_v17 }
0x13fa   : > { %v16333_v13 = vpop.f32.mrb[232].mxu1  ;;  %v11523_v20 = vpop.f32.mrb[232].mxu0 }
0x13fb   : > { %v6612_v45 = vadd.f32 %v16338_v4, %v11523_v20  ;;  %v16341_v37 = vpop.f32.mrb[233].mxu1  ;;  %v6603_v15 = vpop.f32.mrb[233].mxu0 }
0x13fc   : > { %v6604_v62 = vadd.f32 %v16338_v4, %v6603_v15  ;;  %v16344_v42 = vpop.f32.mrb[234].mxu1  ;;  %v11524_v30 = vpop.f32.mrb[234].mxu0 }
0x13fd   : > { %v10177_v40 = vmul.f32 -1.442695, %v6612_v45  ;;  %v6615_v10 = vadd.f32 %v16338_v4, %v11524_v30  ;;  %v16347_v5 = vpop.f32.mrb[235].mxu1  ;;  %v6606_v36 = vpop.f32.mrb[235].mxu0 }
0x13fe   : > { %v10175_v2 = vmul.f32 -1.442695, %v6604_v62  ;;  %v6607_v57 = vadd.f32 %v16338_v4, %v6606_v36 }
0x13ff   : > { %12911 = vpow2.f32 %v10177_v40  ;;  %v10178_v1 = vmul.f32 -1.442695, %v6615_v10 }
0x1400   : > { %12913 = vpow2.f32 %v10175_v2  ;;  %v10176_v16 = vmul.f32 -1.442695, %v6607_v57 }
0x1401   : > { %12915 = vpow2.f32 %v10178_v1 }
0x1402   : > { %12917 = vpow2.f32 %v10176_v16 }
0x1405   : > { %v16350_v21 = vpop.f32.mrb[236].mxu1  ;;  %v11527_v9 = vpop.f32.mrb[236].mxu0 }
0x1406   : > { %v6628_v34 = vadd.f32 %v16338_v4, %v11527_v9  ;;  %v16353_v63 = vpop.f32.mrb[237].mxu1  ;;  %v6619_v44 = vpop.f32.mrb[237].mxu0 }
0x1407   : > { %v6620_v50 = vadd.f32 %v16338_v4, %v6619_v44  ;;  %v16356_v7 = vpop.f32.mrb[238].mxu1  ;;  %v11528_v18 = vpop.f32.mrb[238].mxu0 }
0x1408   : > { %v10181_v31 = vmul.f32 -1.442695, %v6628_v34  ;;  %v6631_v49 = vadd.f32 %v16338_v4, %v11528_v18  ;;  %v16359_v12 = vpop.f32.mrb[239].mxu1  ;;  %v6622_v17 = vpop.f32.mrb[239].mxu0 }
0x1409   : > { %v10179_v8 = vmul.f32 -1.442695, %v6620_v50  ;;  %v6623_v23 = vadd.f32 %v16338_v4, %v6622_v17  ;;  %v12912_v55 = vpop.eup %12911 }
0x140a   : > { %12919 = vpow2.f32 %v10181_v31  ;;  %v10182_v25 = vmul.f32 -1.442695, %v6631_v49  ;;  %v12914_v20 = vpop.eup %12913  ;;  %v6716_v45 = vadd.f32 1.0, %v12912_v55 }
0x140b   : > { %12921 = vpow2.f32 %v10179_v8  ;;  %v10180_v38 = vmul.f32 -1.442695, %v6623_v23  ;;  %v12916_v15 = vpop.eup %12915  ;;  %v6714_v62 = vadd.f32 1.0, %v12914_v20 }
0x140c   : > { %12923 = vpow2.f32 %v10182_v25  ;;  %v12918_v10 = vpop.eup %12917  ;;  %v6717_v36 = vadd.f32 1.0, %v12916_v15 }
0x140d   : > { %12925 = vpow2.f32 %v10180_v38  ;;  %v16362_v30 = vpop.f32.mrb[240].mxu1  ;;  %v11531_v40 = vpop.f32.mrb[240].mxu0  ;;  %v6715_v16 = vadd.f32 1.0, %v12918_v10  ;;  %v16377_v10 = vld [vmem:[%s17469_s3 + $0x1] ss:$0 sm:$0xff] }
0x140e   : > { %12927 = vrcp.f32 %v6716_v45  ;;  %v6644_v2 = vadd.f32 %v16338_v4, %v11531_v40  ;;  %v16365_v57 = vpop.f32.mrb[241].mxu1  ;;  %v6635_v1 = vpop.f32.mrb[241].mxu0 }
0x140f   : > { %12929 = vrcp.f32 %v6714_v62  ;;  %v6636_v9 = vadd.f32 %v16338_v4, %v6635_v1  ;;  %v16368_v34 = vpop.f32.mrb[242].mxu1  ;;  %v11532_v44 = vpop.f32.mrb[242].mxu0 }
0x1410   : > { %12931 = vrcp.f32 %v6717_v36  ;;  %v10185_v50 = vmul.f32 -1.442695, %v6644_v2  ;;  %v6647_v18 = vadd.f32 %v16338_v4, %v11532_v44  ;;  %v16371_v31 = vpop.f32.mrb[243].mxu1  ;;  %v6638_v49 = vpop.f32.mrb[243].mxu0  ;;  %v6515_v36 = vadd.f32 %v16377_v10, %v16333_v13 }
0x1411   : > { %12933 = vrcp.f32 %v6715_v16  ;;  %v10183_v17 = vmul.f32 -1.442695, %v6636_v9  ;;  %v6639_v8 = vadd.f32 %v16338_v4, %v6638_v49  ;;  %v6507_v16 = vadd.f32 %v16377_v10, %v16341_v37 }
0x1412   : > { %12935 = vpow2.f32 %v10185_v50  ;;  %v10186_v23 = vmul.f32 -1.442695, %v6647_v18  ;;  %v6518_v50 = vadd.f32 %v16377_v10, %v16344_v42  ;;  %v6510_v49 = vadd.f32 %v16377_v10, %v16347_v5 }
0x1413   : > { %12937 = vpow2.f32 %v10183_v17  ;;  %v10184_v38 = vmul.f32 -1.442695, %v6639_v8 }
0x1414   : > { %v12920_v25 = vpop.eup %12919  ;;  %12939 = vpow2.f32 %v10186_v23 }
0x1415   : > { %v12922_v55 = vpop.eup %12921  ;;  %v6720_v20 = vadd.f32 1.0, %v12920_v25  ;;  %12941 = vpow2.f32 %v10184_v38 }
0x1416   : > { %v12924_v45 = vpop.eup %12923  ;;  %v6718_v15 = vadd.f32 1.0, %v12922_v55 }
0x1417   : > { %v12926_v62 = vpop.eup %12925  ;;  %12943 = vrcp.f32 %v6720_v20  ;;  %v6721_v40 = vadd.f32 1.0, %v12924_v45 }
0x1418   : > { %12945 = vrcp.f32 %v6718_v15  ;;  %v6719_v2 = vadd.f32 1.0, %v12926_v62  ;;  %v12928_v1 = vpop.eup %12927 }
0x1419   : > { %12947 = vrcp.f32 %v6721_v40  ;;  %v12930_v9 = vpop.eup %12929  ;;  %v6764_v44 = vmul.f32 %v12928_v1, %v6515_v36  ;;  %v6531_v36 = vadd.f32 %v16377_v10, %v16350_v21 }
0x141a   : > { %12949 = vrcp.f32 %v6719_v2  ;;  %v12932_v18 = vpop.eup %12931  ;;  %v6762_v17 = vmul.f32 %v12930_v9, %v6507_v16 }
0x141b   : > { %v12934_v8 = vpop.eup %12933  ;;  %v6765_v13 = vmul.f32 %v12932_v18, %v6518_v50 }
0x141c   : > { %v12936_v23 = vpop.eup %12935  ;;  %v6763_v25 = vmul.f32 %v12934_v8, %v6510_v49  ;;  %v6534_v8 = vadd.f32 %v16377_v10, %v16356_v7 }
0x141d   : > { %v12938_v38 = vpop.eup %12937  ;;  %v6724_v55 = vadd.f32 1.0, %v12936_v23  ;;  %v6791_v20 = vpack.c.bf16 %v6765_v13, %v6764_v44  ;;  %v6523_v44 = vadd.f32 %v16377_v10, %v16353_v63 }
0x141e   : > { %v12940_v37 = vpop.eup %12939  ;;  %v6722_v45 = vadd.f32 1.0, %v12938_v38  ;;  %v6790_v40 = vpack.c.bf16 %v6763_v25, %v6762_v17 }
0x141f   : > { %v12942_v42 = vpop.eup %12941  ;;  %12951 = vrcp.f32 %v6724_v55  ;;  %v6725_v5 = vadd.f32 1.0, %v12940_v37  ;;  %v6526_v55 = vadd.f32 %v16377_v10, %v16359_v12  ;;  %v6547_v12 = vadd.f32 %v16377_v10, %v16362_v30 }
0x1420   : > { %v16387_v15 = vpop.f32.mrb[244].mxu1  ;;  %v11535_v62 = vpop.f32.mrb[244].mxu0  ;;  %12953 = vrcp.f32 %v6722_v45  ;;  %v6723_v50 = vadd.f32 1.0, %v12942_v42  ;;  %11541 = vmatprep.mubr.msk.bf16.mxu1 %vm495_vm0, %v6790_v40  ;;  %11561 = vmatprep.mubr.msk.bf16.mxu0 %vm495_vm0, %v6790_v40  ;;  %v6542_v30 = vadd.f32 %v16377_v10, %v16371_v31 }
0x1421   : > { %v6660_v2 = vadd.f32 %v16338_v4, %v11535_v62  ;;  %v16392_v1 = vpop.f32.mrb[245].mxu1  ;;  %v6651_v16 = vpop.f32.mrb[245].mxu0  ;;  %12955 = vrcp.f32 %v6725_v5  ;;  %11542 = vmatmul.mubr.msk.bf16.vlgmr.msra.gmra.mrb[248].mxu1 %vm495_vm0, %v6791_v20  ;;  %11562 = vmatmul.mubr.msk.bf16.vlgmr.msra.gmra.mrb[248].mxu0 %vm495_vm0, %v6791_v20  ;;  %v6563_v31 = vadd.f32 %v16377_v10, %v16387_v15  ;;  %v11871_v15 = vld [vmem:[%s17472_s6 + $0x70] sm:$0xff]  }
0x1422   : > { %v12944_v9 = vpop.eup %12943  ;;  %v6652_v18 = vadd.f32 %v16338_v4, %v6651_v16  ;;  %v16397_v49 = vpop.f32.mrb[246].mxu1  ;;  %12957 = vrcp.f32 %v6723_v50  ;;  %v6550_v50 = vadd.f32 %v16377_v10, %v16368_v34  ;;  %11597 = vmatprep.subr.bf16.mxu0 %v11871_v15 }
0x1423   : > { %v11536_v17 = vpop.f32.mrb[246].mxu0  ;;  %v12946_v21 = vpop.eup %12945  ;;  %v10189_v13 = vmul.f32 -1.442695, %v6660_v2  ;;  %v6768_v42 = vmul.f32 %v12944_v9, %v6531_v36  ;;  %11598 = vmatpush3.bf16.msra.mxu0 %v11871_v15 }
0x1424   : > { %v6663_v23 = vadd.f32 %v16338_v4, %v11536_v17  ;;  %v16404_v63 = vpop.f32.mrb[247].mxu1  ;;  %v6654_v25 = vpop.f32.mrb[247].mxu0  ;;  %v10187_v37 = vmul.f32 -1.442695, %v6652_v18  ;;  %v6766_v40 = vmul.f32 %v12946_v21, %v6523_v44  ;;  %v6539_v44 = vadd.f32 %v16377_v10, %v16365_v57 }
0x1425   : > { %v12948_v38 = vpop.eup %12947  ;;  %v6655_v45 = vadd.f32 %v16338_v4, %v6654_v25  ;;  %12959 = vpow2.f32 %v10189_v13 }
0x1426   : > { %v12950_v7 = vpop.eup %12949  ;;  %v10190_v62 = vmul.f32 -1.442695, %v6663_v23  ;;  %12961 = vpow2.f32 %v10187_v37  ;;  %v6769_v16 = vmul.f32 %v12948_v38, %v6534_v8 }
0x1427   : > { %v10188_v5 = vmul.f32 -1.442695, %v6655_v45  ;;  %v6767_v2 = vmul.f32 %v12950_v7, %v6526_v55 }
0x1428   : > { %12963 = vpow2.f32 %v10190_v62  ;;  %v6793_v17 = vpack.c.bf16 %v6769_v16, %v6768_v42 }
0x1429   : > { %12965 = vpow2.f32 %v10188_v5  ;;  %v6792_v20 = vpack.c.bf16 %v6767_v2, %v6766_v40  ;;  %v12952_v4 = vpop.eup %12951  ;;  %v6555_v5 = vadd.f32 %v16377_v10, %v16392_v1  ;;  %v11872_v1 = vld [vmem:[%s17472_s6 + $0x78] sm:$0xff]  }
0x142a   : > { %v12954_v36 = vpop.eup %12953  ;;  %v6772_v9 = vmul.f32 %v12952_v4, %v6547_v12  ;;  %v6558_v12 = vadd.f32 %v16377_v10, %v16404_v63  ;;  %11599 = vmatprep.subr.bf16.mxu0 %v11872_v1  ;;  %v16454_v63 = vld [vmem:[%s17467_s1] sm:$0xff]  }
0x142b   : > { %11545 = vmatprep.mubr.msk.bf16.mxu1 %vm495_vm0, %v6792_v20  ;;  %11565 = vmatprep.mubr.msk.bf16.mxu0 %vm495_vm0, %v6792_v20  ;;  %v12956_v18 = vpop.eup %12955  ;;  %v6770_v21 = vmul.f32 %v12954_v36, %v6539_v44  ;;  %v6566_v20 = vadd.f32 %v16377_v10, %v16397_v49  ;;  %v11873_v10 = vld [vmem:[%s17471_s5 + $0x70] sm:$0xff]   ;;  %v11874_v49 = vld [vmem:[%s17471_s5 + $0x78] sm:$0xff]  }
0x142c   : > { %11546 = vmatmul.mubr.msk.bf16.gmra.mrb[252].mxu1 %vm495_vm0, %v6793_v17  ;;  %11566 = vmatmul.mubr.msk.bf16.gmra.mrb[252].mxu0 %vm495_vm0, %v6793_v17  ;;  %v12958_v8 = vpop.eup %12957  ;;  %v6773_v13 = vmul.f32 %v12956_v18, %v6550_v50 }
0x142d   : > { %v6771_v25 = vmul.f32 %v12958_v8, %v6542_v30  ;;  %11577 = vmatprep.subr.bf16.mxu1 %v11873_v10  ;;  %11600 = vmatpush3.bf16.msra.mxu0 %v11872_v1  ;;  %v16460_v30 = vld [vmem:[%s17474_s8 + $0x6] ss:$0 sm:$0xff] }
0x142e   : > { %v6795_v57 = vpack.c.bf16 %v6773_v13, %v6772_v9  ;;  %11578 = vmatpush3.bf16.msra.mxu1 %v11873_v10  ;;  %11637 = vmatprep.subr.bf16.mxu0 %v16454_v63 }
0x142f   : > { %v12960_v23 = vpop.eup %12959  ;;  %v6794_v7 = vpack.c.bf16 %v6771_v25, %v6770_v21  ;;  %11579 = vmatprep.subr.bf16.mxu1 %v11874_v49 }
0x1430   : > { %v12962_v38 = vpop.eup %12961  ;;  %v6728_v55 = vadd.f32 1.0, %v12960_v23 }
0x1431   : > { %v6726_v45 = vadd.f32 1.0, %v12962_v38  ;;  %11549 = vmatprep.mubr.msk.bf16.mxu1 %vm495_vm0, %v6794_v7  ;;  %11569 = vmatprep.mubr.msk.bf16.mxu0 %vm495_vm0, %v6794_v7 }
0x1432   : > { %v12964_v37 = vpop.eup %12963  ;;  %12967 = vrcp.f32 %v6728_v55  ;;  %11580 = vmatpush3.bf16.msra.mxu1 %v11874_v49 }
0x1433   : > { %v12966_v62 = vpop.eup %12965  ;;  %v6729_v40 = vadd.f32 1.0, %v12964_v37  ;;  %12969 = vrcp.f32 %v6726_v45 }
0x1434   : > { %v6727_v34 = vadd.f32 1.0, %v12966_v62  ;;  %11550 = vmatmul.mubr.msk.bf16.gmra.mrb[0].mxu1 %vm495_vm0, %v6795_v57  ;;  %11570 = vmatmul.mubr.msk.bf16.gmra.mrb[0].mxu0 %vm495_vm0, %v6795_v57 }
0x1435   : > { %12971 = vrcp.f32 %v6729_v40 }
0x1436   : > { %12973 = vrcp.f32 %v6727_v34 }
0x143c   : > { %v12968_v42 = vpop.eup %12967 }
0x143d   : > { %v12970_v2 = vpop.eup %12969  ;;  %v6776_v16 = vmul.f32 %v12968_v42, %v6563_v31 }
0x143e   : > { %v6774_v4 = vmul.f32 %v12970_v2, %v6555_v5 }
0x143f   : > { %v12972_v17 = vpop.eup %12971 }
0x1440   : > { %v12974_v44 = vpop.eup %12973  ;;  %v6777_v36 = vmul.f32 %v12972_v17, %v6566_v20 }
0x1441   : > { %v6775_v9 = vmul.f32 %v12974_v44, %v6558_v12 }
0x1442   : > { %v6797_v50 = vpack.c.bf16 %v6777_v36, %v6776_v16 }
0x1443   : > { %v6796_v18 = vpack.c.bf16 %v6775_v9, %v6774_v4 }
0x1445   : > { %11553 = vmatprep.mubr.msk.bf16.mxu1 %vm495_vm0, %v6796_v18  ;;  %11573 = vmatprep.mubr.msk.bf16.mxu0 %vm495_vm0, %v6796_v18 }
0x1446   : > { %11554 = vmatmul.mubr.msk.bf16.gmra.mrb[4].mxu1 %vm495_vm0, %v6797_v50  ;;  %11574 = vmatmul.mubr.msk.bf16.gmra.mrb[4].mxu0 %vm495_vm0, %v6797_v50 }
0x14f4   : > { %v16462_v21 = vpop.f32.mrb[248].mxu1  ;;  %v11563_v8 = vpop.f32.mrb[248].mxu0 }
0x14f5   : > { %v6994_v13 = vadd.f32 %v11563_v8, %v16460_v30  ;;  %v16465_v23 = vpop.f32.mrb[249].mxu1  ;;  %v6985_v25 = vpop.f32.mrb[249].mxu0 }
0x14f6   : > { %v6986_v38 = vadd.f32 %v16460_v30, %v6985_v25  ;;  %v16468_v57 = vpop.f32.mrb[250].mxu1  ;;  %v11564_v55 = vpop.f32.mrb[250].mxu0 }
0x14f7   : > { %v10223_v37 = vmul.f32 -1.442695, %v6994_v13  ;;  %v6997_v45 = vadd.f32 %v11564_v55, %v16460_v30  ;;  %v16471_v7 = vpop.f32.mrb[251].mxu1  ;;  %v6988_v62 = vpop.f32.mrb[251].mxu0 }
0x14f8   : > { %v10221_v40 = vmul.f32 -1.442695, %v6986_v38  ;;  %v6989_v34 = vadd.f32 %v16460_v30, %v6988_v62 }
0x14f9   : > { %12975 = vpow2.f32 %v10223_v37  ;;  %v10224_v31 = vmul.f32 -1.442695, %v6997_v45 }
0x14fa   : > { %12977 = vpow2.f32 %v10221_v40  ;;  %v10222_v42 = vmul.f32 -1.442695, %v6989_v34 }
0x14fb   : > { %12979 = vpow2.f32 %v10224_v31 }
0x14fc   : > { %12981 = vpow2.f32 %v10222_v42 }
0x14ff   : > { %v16474_v5 = vpop.f32.mrb[252].mxu1  ;;  %v11567_v2 = vpop.f32.mrb[252].mxu0 }
0x1500   : > { %v7010_v16 = vadd.f32 %v11567_v2, %v16460_v30  ;;  %v16477_v20 = vpop.f32.mrb[253].mxu1  ;;  %v7001_v17 = vpop.f32.mrb[253].mxu0 }
0x1501   : > { %v7002_v12 = vadd.f32 %v16460_v30, %v7001_v17  ;;  %v16480_v4 = vpop.f32.mrb[254].mxu1  ;;  %v11568_v44 = vpop.f32.mrb[254].mxu0 }
0x1502   : > { %v10227_v36 = vmul.f32 -1.442695, %v7010_v16  ;;  %v7013_v9 = vadd.f32 %v11568_v44, %v16460_v30  ;;  %v16483_v50 = vpop.f32.mrb[255].mxu1  ;;  %v7004_v18 = vpop.f32.mrb[255].mxu0 }
0x1503   : > { %v10225_v15 = vmul.f32 -1.442695, %v7002_v12  ;;  %v7005_v10 = vadd.f32 %v16460_v30, %v7004_v18  ;;  %v12976_v8 = vpop.eup %12975 }
0x1504   : > { %12983 = vpow2.f32 %v10227_v36  ;;  %v10228_v1 = vmul.f32 -1.442695, %v7013_v9  ;;  %v12978_v13 = vpop.eup %12977  ;;  %v7098_v25 = vadd.f32 1.0, %v12976_v8 }
0x1505   : > { %12985 = vpow2.f32 %v10225_v15  ;;  %v10226_v49 = vmul.f32 -1.442695, %v7005_v10  ;;  %v12980_v38 = vpop.eup %12979  ;;  %v7096_v55 = vadd.f32 1.0, %v12978_v13 }
0x1506   : > { %12987 = vpow2.f32 %v10228_v1  ;;  %v12982_v62 = vpop.eup %12981  ;;  %v7099_v40 = vadd.f32 1.0, %v12980_v38 }
0x1507   : > { %12989 = vpow2.f32 %v10226_v49  ;;  %v16486_v37 = vpop.f32.mrb[0].mxu1  ;;  %v11571_v45 = vpop.f32.mrb[0].mxu0  ;;  %v7097_v2 = vadd.f32 1.0, %v12982_v62 }
0x1508   : > { %12991 = vrcp.f32 %v7098_v25  ;;  %v7026_v34 = vadd.f32 %v11571_v45, %v16460_v30  ;;  %v16489_v31 = vpop.f32.mrb[1].mxu1  ;;  %v7017_v42 = vpop.f32.mrb[1].mxu0  ;;  %v16501_v25 = vld [vmem:[%s17473_s7 + $0x6] ss:$0 sm:$0xff] }
0x1509   : > { %12993 = vrcp.f32 %v7096_v55  ;;  %v7018_v16 = vadd.f32 %v16460_v30, %v7017_v42  ;;  %v16492_v17 = vpop.f32.mrb[2].mxu1  ;;  %v11572_v12 = vpop.f32.mrb[2].mxu0 }
0x150a   : > { %12995 = vrcp.f32 %v7099_v40  ;;  %v10231_v44 = vmul.f32 -1.442695, %v7026_v34  ;;  %v7029_v36 = vadd.f32 %v11572_v12, %v16460_v30  ;;  %v16495_v9 = vpop.f32.mrb[3].mxu1  ;;  %v7020_v18 = vpop.f32.mrb[3].mxu0  ;;  %v6881_v34 = vadd.f32 %v16462_v21, %v16501_v25 }
0x150b   : > { %12997 = vrcp.f32 %v7097_v2  ;;  %v10229_v15 = vmul.f32 -1.442695, %v7018_v16  ;;  %v7021_v10 = vadd.f32 %v16460_v30, %v7020_v18  ;;  %v6873_v16 = vadd.f32 %v16501_v25, %v16465_v23 }
0x150c   : > { %12999 = vpow2.f32 %v10231_v44  ;;  %v10232_v1 = vmul.f32 -1.442695, %v7029_v36  ;;  %v6884_v36 = vadd.f32 %v16468_v57, %v16501_v25 }
0x150d   : > { %13001 = vpow2.f32 %v10229_v15  ;;  %v10230_v8 = vmul.f32 -1.442695, %v7021_v10  ;;  %v6876_v15 = vadd.f32 %v16501_v25, %v16471_v7 }
0x150e   : > { %v12984_v49 = vpop.eup %12983  ;;  %13003 = vpow2.f32 %v10232_v1 }
0x150f   : > { %v12986_v13 = vpop.eup %12985  ;;  %v7102_v38 = vadd.f32 1.0, %v12984_v49  ;;  %13005 = vpow2.f32 %v10230_v8 }
0x1510   : > { %v12988_v55 = vpop.eup %12987  ;;  %v7100_v45 = vadd.f32 1.0, %v12986_v13 }
0x1511   : > { %v12990_v62 = vpop.eup %12989  ;;  %13007 = vrcp.f32 %v7102_v38  ;;  %v7103_v40 = vadd.f32 1.0, %v12988_v55 }
0x1512   : > { %13009 = vrcp.f32 %v7100_v45  ;;  %v7101_v42 = vadd.f32 1.0, %v12990_v62  ;;  %v12992_v2 = vpop.eup %12991 }
0x1513   : > { %13011 = vrcp.f32 %v7103_v40  ;;  %v12994_v12 = vpop.eup %12993  ;;  %v7146_v44 = vmul.f32 %v12992_v2, %v6881_v34 }
0x1514   : > { %13013 = vrcp.f32 %v7101_v42  ;;  %v12996_v18 = vpop.eup %12995  ;;  %v7144_v10 = vmul.f32 %v12994_v12, %v6873_v16  ;;  %v6897_v42 = vadd.f32 %v16474_v5, %v16501_v25 }
0x1515   : > { %v12998_v1 = vpop.eup %12997  ;;  %v7147_v21 = vmul.f32 %v12996_v18, %v6884_v36 }
0x1516   : > { %v13000_v49 = vpop.eup %12999  ;;  %v7145_v8 = vmul.f32 %v12998_v1, %v6876_v15 }
0x1517   : > { %v13002_v13 = vpop.eup %13001  ;;  %v7173_v38 = vpack.c.bf16 %v7147_v21, %v7146_v44  ;;  %v7106_v55 = vadd.f32 1.0, %v13000_v49  ;;  %v6889_v44 = vadd.f32 %v16501_v25, %v16477_v20  ;;  %v6900_v49 = vadd.f32 %v16480_v4, %v16501_v25 }
0x1518   : > { %v13004_v23 = vpop.eup %13003  ;;  %v7104_v45 = vadd.f32 1.0, %v13002_v13  ;;  %v7172_v34 = vpack.c.bf16 %v7145_v8, %v7144_v10 }
0x1519   : > { %v16511_v62 = vpop.f32.mrb[4].mxu1  ;;  %v11575_v40 = vpop.f32.mrb[4].mxu0  ;;  %13015 = vrcp.f32 %v7106_v55  ;;  %v7107_v7 = vadd.f32 1.0, %v13004_v23  ;;  %v6892_v23 = vadd.f32 %v16501_v25, %v16483_v50 }
0x151a   : > { %v13006_v57 = vpop.eup %13005  ;;  %v7042_v2 = vadd.f32 %v11575_v40, %v16460_v30  ;;  %v16516_v16 = vpop.f32.mrb[5].mxu1  ;;  %13017 = vrcp.f32 %v7104_v45  ;;  %11581 = vmatprep.mubr.msk.bf16.mxu1 %vm495_vm0, %v7172_v34  ;;  %11601 = vmatprep.mubr.msk.bf16.mxu0 %vm495_vm0, %v7172_v34 }
0x151b   : > { %v7033_v12 = vpop.f32.mrb[5].mxu0  ;;  %v13008_v36 = vpop.eup %13007  ;;  %v7105_v18 = vadd.f32 1.0, %v13006_v57  ;;  %13019 = vrcp.f32 %v7107_v7  ;;  %11582 = vmatmul.mubr.msk.bf16.vlgmr.msra.gmra.mrb[8].mxu1 %vm495_vm0, %v7173_v38  ;;  %11602 = vmatmul.mubr.msk.bf16.vlgmr.msra.gmra.mrb[8].mxu0 %vm495_vm0, %v7173_v38  ;;  %v13510_v38 = vld [vmem:[%s17467_s1 + $0x8] sm:$0xff]  }
0x151c   : > { %v7034_v15 = vadd.f32 %v16460_v30, %v7033_v12  ;;  %v16521_v10 = vpop.f32.mrb[6].mxu1  ;;  %v11576_v1 = vpop.f32.mrb[6].mxu0  ;;  %v7150_v21 = vmul.f32 %v13008_v36, %v6897_v42  ;;  %v10235_v8 = vmul.f32 -1.442695, %v7042_v2  ;;  %11638 = vmatpush3.bf16.msra.mxu0 %v16454_v63  ;;  %v13511_v63 = vld [vmem:[%s17467_s1 + $0x10] sm:$0xff]  }
0x151d   : > { %v13010_v5 = vpop.eup %13009  ;;  %v16527_v13 = vpop.f32.mrb[7].mxu1  ;;  %13021 = vrcp.f32 %v7105_v18  ;;  %v7045_v40 = vadd.f32 %v11576_v1, %v16460_v30  ;;  %11639 = vmatprep.subr.bf16.mxu0 %v13510_v38  ;;  %v6905_v18 = vadd.f32 %v16501_v25, %v16489_v31 }
0x151e   : > { %v7036_v20 = vpop.f32.mrb[7].mxu0  ;;  %v13012_v55 = vpop.eup %13011  ;;  %v10233_v45 = vmul.f32 -1.442695, %v7034_v15  ;;  %13023 = vpow2.f32 %v10235_v8  ;;  %v7148_v42 = vmul.f32 %v13010_v5, %v6889_v44  ;;  %v6916_v5 = vadd.f32 %v16492_v17, %v16501_v25 }
0x151f   : > { %v13014_v4 = vpop.eup %13013  ;;  %v7151_v34 = vmul.f32 %v13012_v55, %v6900_v49  ;;  %v7037_v57 = vadd.f32 %v16460_v30, %v7036_v20  ;;  %v10236_v7 = vmul.f32 -1.442695, %v7045_v40  ;;  %v6913_v30 = vadd.f32 %v16486_v37, %v16501_v25 }
0x1520   : > { %13025 = vpow2.f32 %v10233_v45  ;;  %v7149_v50 = vmul.f32 %v13014_v4, %v6892_v23  ;;  %11640 = vmatpush3.bf16.msra.mxu0 %v13510_v38  ;;  %v6908_v37 = vadd.f32 %v16501_v25, %v16495_v9  ;;  %v6929_v9 = vadd.f32 %v16511_v62, %v16501_v25  ;;  %v11875_v62 = vld [vmem:[%s17475_s9 + $0x30] sm:$0xff]  }
0x1521   : > { %v7175_v2 = vpack.c.bf16 %v7151_v34, %v7150_v21  ;;  %v10234_v12 = vmul.f32 -1.442695, %v7037_v57  ;;  %13027 = vpow2.f32 %v10236_v7  ;;  %11677 = vmatprep.subr.bf16.mxu0 %v13511_v63  ;;  %11617 = vmatprep.subr.bf16.mxu1 %v11875_v62 }
0x1522   : > { %v7174_v36 = vpack.c.bf16 %v7149_v50, %v7148_v42  ;;  %v6921_v50 = vadd.f32 %v16501_v25, %v16516_v16  ;;  %11618 = vmatpush3.bf16.msra.mxu1 %v11875_v62  ;;  %v16579_v16 = vld [vmem:[%s17468_s2] sm:$0xff]  }
0x1523   : > { %13029 = vpow2.f32 %v10234_v12  ;;  %v13016_v44 = vpop.eup %13015 }
0x1524   : > { %11585 = vmatprep.mubr.msk.bf16.mxu1 %vm495_vm0, %v7174_v36  ;;  %11605 = vmatprep.mubr.msk.bf16.mxu0 %vm495_vm0, %v7174_v36  ;;  %v13018_v15 = vpop.eup %13017  ;;  %v7154_v1 = vmul.f32 %v13016_v44, %v6913_v30  ;;  %v6932_v36 = vadd.f32 %v16521_v10, %v16501_v25  ;;  %v6924_v44 = vadd.f32 %v16501_v25, %v16527_v13  ;;  %v11876_v25 = vld [vmem:[%s17475_s9 + $0x38] sm:$0xff]   ;;  %v16585_v10 = vld [vmem:[%s17474_s8 + $0x7] ss:$0 sm:$0xff] }
0x1525   : > { %11586 = vmatmul.mubr.msk.bf16.gmra.mrb[12].mxu1 %vm495_vm0, %v7175_v2  ;;  %11606 = vmatmul.mubr.msk.bf16.gmra.mrb[12].mxu0 %vm495_vm0, %v7175_v2  ;;  %v13020_v21 = vpop.eup %13019  ;;  %v7152_v49 = vmul.f32 %v13018_v15, %v6905_v18 }
0x1526   : > { %v7155_v20 = vmul.f32 %v13020_v21, %v6916_v5  ;;  %11619 = vmatprep.subr.bf16.mxu1 %v11876_v25 }
0x1527   : > { %v13022_v8 = vpop.eup %13021  ;;  %11620 = vmatpush3.bf16.msra.mxu1 %v11876_v25 }
0x1528   : > { %v13024_v55 = vpop.eup %13023  ;;  %v7153_v23 = vmul.f32 %v13022_v8, %v6908_v37  ;;  %v7177_v31 = vpack.c.bf16 %v7155_v20, %v7154_v1  ;;  %11657 = vmatprep.subr.bf16.mxu1 %v16579_v16 }
0x1529   : > { %v7110_v40 = vadd.f32 1.0, %v13024_v55 }
0x152a   : > { %v13026_v45 = vpop.eup %13025  ;;  %v7176_v34 = vpack.c.bf16 %v7153_v23, %v7152_v49 }
0x152b   : > { %v7108_v4 = vadd.f32 1.0, %v13026_v45  ;;  %v13028_v57 = vpop.eup %13027  ;;  %13031 = vrcp.f32 %v7110_v40 }
0x152c   : > { %v7111_v38 = vadd.f32 1.0, %v13028_v57  ;;  %11589 = vmatprep.mubr.msk.bf16.mxu1 %vm495_vm0, %v7176_v34  ;;  %11609 = vmatprep.mubr.msk.bf16.mxu0 %vm495_vm0, %v7176_v34 }
0x152d   : > { %v13030_v42 = vpop.eup %13029  ;;  %13033 = vrcp.f32 %v7108_v4  ;;  %11590 = vmatmul.mubr.msk.bf16.gmra.mrb[16].mxu1 %vm495_vm0, %v7177_v31  ;;  %11610 = vmatmul.mubr.msk.bf16.gmra.mrb[16].mxu0 %vm495_vm0, %v7177_v31 }
0x152e   : > { %v7109_v17 = vadd.f32 1.0, %v13030_v42  ;;  %13035 = vrcp.f32 %v7111_v38 }
0x1530   : > { %13037 = vrcp.f32 %v7109_v17 }
0x1535   : > { %v13032_v7 = vpop.eup %13031 }
0x1536   : > { %v7158_v12 = vmul.f32 %v13032_v7, %v6929_v9 }
0x1537   : > { %v13034_v2 = vpop.eup %13033 }
0x1538   : > { %v7156_v63 = vmul.f32 %v13034_v2, %v6921_v50  ;;  %v13036_v30 = vpop.eup %13035 }
0x1539   : > { %v7159_v15 = vmul.f32 %v13036_v30, %v6932_v36 }
0x153a   : > { %v13038_v18 = vpop.eup %13037 }
0x153b   : > { %v7157_v1 = vmul.f32 %v13038_v18, %v6924_v44  ;;  %v7179_v5 = vpack.c.bf16 %v7159_v15, %v7158_v12 }
0x153d   : > { %v7178_v21 = vpack.c.bf16 %v7157_v1, %v7156_v63 }
0x153f   : > { %11593 = vmatprep.mubr.msk.bf16.mxu1 %vm495_vm0, %v7178_v21  ;;  %11613 = vmatprep.mubr.msk.bf16.mxu0 %vm495_vm0, %v7178_v21 }
0x1540   : > { %11594 = vmatmul.mubr.msk.bf16.gmra.mrb[20].mxu1 %vm495_vm0, %v7179_v5  ;;  %11614 = vmatmul.mubr.msk.bf16.gmra.mrb[20].mxu0 %vm495_vm0, %v7179_v5 }
0x15ee   : > { %v16587_v13 = vpop.f32.mrb[8].mxu1  ;;  %v11603_v37 = vpop.f32.mrb[8].mxu0 }
0x15ef   : > { %v7376_v49 = vadd.f32 %v11603_v37, %v16585_v10  ;;  %v16590_v8 = vpop.f32.mrb[9].mxu1  ;;  %v7367_v20 = vpop.f32.mrb[9].mxu0 }
0x15f0   : > { %v7368_v55 = vadd.f32 %v16585_v10, %v7367_v20  ;;  %v16593_v23 = vpop.f32.mrb[10].mxu1  ;;  %v11604_v45 = vpop.f32.mrb[10].mxu0 }
0x15f1   : > { %v10269_v31 = vmul.f32 -1.442695, %v7376_v49  ;;  %v7379_v40 = vadd.f32 %v11604_v45, %v16585_v10  ;;  %v16596_v4 = vpop.f32.mrb[11].mxu1  ;;  %v7370_v34 = vpop.f32.mrb[11].mxu0 }
0x15f2   : > { %v10267_v57 = vmul.f32 -1.442695, %v7368_v55  ;;  %v7371_v42 = vadd.f32 %v16585_v10, %v7370_v34 }
0x15f3   : > { %13039 = vpow2.f32 %v10269_v31  ;;  %v10270_v38 = vmul.f32 -1.442695, %v7379_v40 }
0x15f4   : > { %13041 = vpow2.f32 %v10267_v57  ;;  %v10268_v17 = vmul.f32 -1.442695, %v7371_v42 }
0x15f5   : > { %13043 = vpow2.f32 %v10270_v38 }
0x15f6   : > { %13045 = vpow2.f32 %v10268_v17 }
0x15f8   : > { %v16599_v9 = vpop.f32.mrb[12].mxu1  ;;  %v11607_v7 = vpop.f32.mrb[12].mxu0 }
0x15f9   : > { %v7392_v50 = vadd.f32 %v11607_v7, %v16585_v10  ;;  %v16602_v2 = vpop.f32.mrb[13].mxu1  ;;  %v7383_v12 = vpop.f32.mrb[13].mxu0 }
0x15fa   : > { %v7384_v36 = vadd.f32 %v16585_v10, %v7383_v12  ;;  %v16605_v63 = vpop.f32.mrb[14].mxu1  ;;  %v11608_v30 = vpop.f32.mrb[14].mxu0 }
0x15fb   : > { %v10273_v44 = vmul.f32 -1.442695, %v7392_v50  ;;  %v7395_v18 = vadd.f32 %v11608_v30, %v16585_v10  ;;  %v16608_v15 = vpop.f32.mrb[15].mxu1  ;;  %v7386_v1 = vpop.f32.mrb[15].mxu0 }
0x15fc   : > { %v10271_v5 = vmul.f32 -1.442695, %v7384_v36  ;;  %v7387_v21 = vadd.f32 %v16585_v10, %v7386_v1 }
0x15fd   : > { %13047 = vpow2.f32 %v10273_v44  ;;  %v10274_v62 = vmul.f32 -1.442695, %v7395_v18  ;;  %v13040_v37 = vpop.eup %13039 }
0x15fe   : > { %13049 = vpow2.f32 %v10271_v5  ;;  %v10272_v25 = vmul.f32 -1.442695, %v7387_v21  ;;  %v13042_v49 = vpop.eup %13041  ;;  %v7480_v20 = vadd.f32 1.0, %v13040_v37 }
0x15ff   : > { %13051 = vpow2.f32 %v10274_v62  ;;  %v13044_v55 = vpop.eup %13043  ;;  %v7478_v45 = vadd.f32 1.0, %v13042_v49 }
0x1600   : > { %13053 = vpow2.f32 %v10272_v25  ;;  %v16611_v31 = vpop.f32.mrb[16].mxu1  ;;  %v11611_v40 = vpop.f32.mrb[16].mxu0  ;;  %v7481_v57 = vadd.f32 1.0, %v13044_v55 }
0x1601   : > { %v13046_v34 = vpop.eup %13045  ;;  %13055 = vrcp.f32 %v7480_v20  ;;  %v7408_v42 = vadd.f32 %v11611_v40, %v16585_v10  ;;  %v16614_v38 = vpop.f32.mrb[17].mxu1  ;;  %v16626_v20 = vld [vmem:[%s17473_s7 + $0x7] ss:$0 sm:$0xff] }
0x1602   : > { %v7399_v17 = vpop.f32.mrb[17].mxu0  ;;  %13057 = vrcp.f32 %v7478_v45  ;;  %v7479_v7 = vadd.f32 1.0, %v13046_v34  ;;  %v16617_v12 = vpop.f32.mrb[18].mxu1 }
0x1603   : > { %v7400_v50 = vadd.f32 %v16585_v10, %v7399_v17  ;;  %v11612_v36 = vpop.f32.mrb[18].mxu0  ;;  %13059 = vrcp.f32 %v7481_v57  ;;  %v10277_v30 = vmul.f32 -1.442695, %v7408_v42  ;;  %v16620_v18 = vpop.f32.mrb[19].mxu1  ;;  %v7263_v42 = vadd.f32 %v16587_v13, %v16626_v20 }
0x1604   : > { %v7411_v44 = vadd.f32 %v11612_v36, %v16585_v10  ;;  %v7402_v1 = vpop.f32.mrb[19].mxu0  ;;  %13061 = vrcp.f32 %v7479_v7 }
0x1605   : > { %v10275_v5 = vmul.f32 -1.442695, %v7400_v50  ;;  %v7403_v21 = vadd.f32 %v16585_v10, %v7402_v1  ;;  %13063 = vpow2.f32 %v10277_v30  ;;  %v7255_v50 = vadd.f32 %v16626_v20, %v16590_v8 }
0x1606   : > { %v10278_v62 = vmul.f32 -1.442695, %v7411_v44  ;;  %v7266_v44 = vadd.f32 %v16593_v23, %v16626_v20 }
0x1607   : > { %v13048_v25 = vpop.eup %13047  ;;  %13065 = vpow2.f32 %v10275_v5  ;;  %v10276_v37 = vmul.f32 -1.442695, %v7403_v21  ;;  %v7258_v5 = vadd.f32 %v16626_v20, %v16596_v4 }
0x1608   : > { %v13050_v49 = vpop.eup %13049  ;;  %v7484_v55 = vadd.f32 1.0, %v13048_v25  ;;  %13067 = vpow2.f32 %v10278_v62 }
0x1609   : > { %v13052_v45 = vpop.eup %13051  ;;  %v7482_v40 = vadd.f32 1.0, %v13050_v49  ;;  %13069 = vpow2.f32 %v10276_v37 }
0x160a   : > { %v13054_v34 = vpop.eup %13053  ;;  %13071 = vrcp.f32 %v7484_v55  ;;  %v7485_v57 = vadd.f32 1.0, %v13052_v45 }
0x160b   : > { %13073 = vrcp.f32 %v7482_v40  ;;  %v7483_v17 = vadd.f32 1.0, %v13054_v34  ;;  %v13056_v7 = vpop.eup %13055 }
0x160c   : > { %13075 = vrcp.f32 %v7485_v57  ;;  %v13058_v36 = vpop.eup %13057  ;;  %v7528_v30 = vmul.f32 %v13056_v7, %v7263_v42 }
0x160d   : > { %13077 = vrcp.f32 %v7483_v17  ;;  %v13060_v1 = vpop.eup %13059  ;;  %v7526_v21 = vmul.f32 %v13058_v36, %v7255_v50  ;;  %v7279_v17 = vadd.f32 %v16599_v9, %v16626_v20  ;;  %v7282_v9 = vadd.f32 %v16605_v63, %v16626_v20 }
0x160e   : > { %v13062_v62 = vpop.eup %13061  ;;  %v16637_v13 = vadd.f32 %v7528_v30, %v15754_v41  ;;  %v7529_v25 = vmul.f32 %v13060_v1, %v7266_v44 }
0x160f   : > { %v13064_v37 = vpop.eup %13063  ;;  %v7527_v49 = vmul.f32 %v13062_v62, %v7258_v5  ;;  %v16640_v8 = vadd.f32 %v7526_v21, %v15760_v46 }
0x1610   : > { %v16643_v45 = vadd.f32 %v7529_v25, %v15764_v29  ;;  %v7559_v23 = vpack.c.bf16 %v7529_v25, %v7528_v30  ;;  %v7488_v40 = vadd.f32 1.0, %v13064_v37 }
0x1611   : > { %v13066_v55 = vpop.eup %13065  ;;  %v7558_v4 = vpack.c.bf16 %v7527_v49, %v7526_v21  ;;  %v16646_v42 = vadd.f32 %v7527_v49, %v15770_v22  ;;  %v7271_v49 = vadd.f32 %v16626_v20, %v16602_v2  ;;  %v13513_v2 = vld [vmem:[%s17468_s2 + $0x8] sm:$0xff]  }
0x1612   : > { %v13068_v34 = vpop.eup %13067  ;;  %v7486_v57 = vadd.f32 1.0, %v13066_v55  ;;  %13079 = vrcp.f32 %v7488_v40 }
0x1613   : > { %v13070_v41 = vpop.eup %13069  ;;  %v7489_v7 = vadd.f32 1.0, %v13068_v34  ;;  %v16650_v46 = vpop.f32.mrb[20].mxu1  ;;  %11621 = vmatprep.mubr.msk.bf16.mxu1 %vm495_vm0, %v7558_v4 }
0x1614   : > { %v11615_v50 = vpop.f32.mrb[20].mxu0  ;;  %v13072_v36 = vpop.eup %13071  ;;  %13081 = vrcp.f32 %v7486_v57  ;;  %v7487_v29 = vadd.f32 1.0, %v13070_v41  ;;  %11622 = vmatmul.mubr.msk.bf16.vlgmr.msra.gmra.mrb[24].mxu1 %vm495_vm0, %v7559_v23  ;;  %v7274_v23 = vadd.f32 %v16626_v20, %v16608_v15 }
0x1615   : > { %v7424_v30 = vadd.f32 %v11615_v50, %v16585_v10  ;;  %v16653_v44 = vpop.f32.mrb[21].mxu1  ;;  %v7415_v1 = vpop.f32.mrb[21].mxu0  ;;  %v7532_v5 = vmul.f32 %v13072_v36, %v7279_v17  ;;  %13083 = vrcp.f32 %v7489_v7  ;;  %11658 = vmatpush3.bf16.msra.mxu1 %v16579_v16 }
0x1616   : > { %v13074_v22 = vpop.eup %13073  ;;  %v7416_v21 = vadd.f32 %v16585_v10, %v7415_v1  ;;  %v16659_v62 = vpop.f32.mrb[22].mxu1  ;;  %13085 = vrcp.f32 %v7487_v29  ;;  %11659 = vmatprep.subr.bf16.mxu1 %v13513_v2 }
0x1617   : > { %v11616_v25 = vpop.f32.mrb[22].mxu0  ;;  %v13076_v37 = vpop.eup %13075  ;;  %v10281_v55 = vmul.f32 -1.442695, %v7424_v30  ;;  %v16669_v4 = vadd.f32 %v7532_v5, %v15798_v54  ;;  %v7530_v36 = vmul.f32 %v13074_v22, %v7271_v49 }
0x1618   : > { %v7427_v40 = vadd.f32 %v11616_v25, %v16585_v10  ;;  %v16665_v34 = vpop.f32.mrb[23].mxu1  ;;  %v7418_v57 = vpop.f32.mrb[23].mxu0  ;;  %v7533_v41 = vmul.f32 %v13076_v37, %v7282_v9  ;;  %v10279_v17 = vmul.f32 -1.442695, %v7416_v21  ;;  %v16686_v9 = vld [vmem:[%s17468_s2 + $0x10] sm:$0xff]   ;;  %v7298_v25 = vadd.f32 %v16617_v12, %v16626_v20 }
0x1619   : > { %v13078_v63 = vpop.eup %13077  ;;  %13087 = vpow2.f32 %v10281_v55  ;;  %v7419_v50 = vadd.f32 %v16585_v10, %v7418_v57  ;;  %11660 = vmatpush3.bf16.msra.mxu1 %v13513_v2  ;;  %v16681_v15 = vadd.f32 %v7530_v36, %v15796_v39  ;;  %v7295_v10 = vadd.f32 %v16611_v31, %v16626_v20 }
0x161a   : > { %v10282_v7 = vmul.f32 -1.442695, %v7427_v40  ;;  %v16678_v16 = vadd.f32 %v7533_v41, %v15802_v35  ;;  %v7561_v54 = vpack.c.bf16 %v7533_v41, %v7532_v5  ;;  %13089 = vpow2.f32 %v10279_v17  ;;  %11697 = vmatprep.subr.bf16.mxu1 %v16686_v9 }
0x161b   : > { %v7531_v29 = vmul.f32 %v13078_v63, %v7274_v23  ;;  %v10280_v30 = vmul.f32 -1.442695, %v7419_v50  ;;  %v7287_v39 = vadd.f32 %v16626_v20, %v16614_v38 }
0x161c   : > { %13091 = vpow2.f32 %v10282_v7  ;;  %v13080_v22 = vpop.eup %13079 }
0x161d   : > { %v7560_v1 = vpack.c.bf16 %v7531_v29, %v7530_v36  ;;  %v16690_v35 = vadd.f32 %v7531_v29, %v15800_v53  ;;  %13093 = vpow2.f32 %v10280_v30  ;;  %v7536_v21 = vmul.f32 %v13080_v22, %v7295_v10 }
0x161e   : > { %v13082_v5 = vpop.eup %13081  ;;  %v7290_v53 = vadd.f32 %v16626_v20, %v16620_v18 }
0x161f   : > { %11625 = vmatprep.mubr.msk.bf16.mxu1 %vm495_vm0, %v7560_v1  ;;  %v13084_v37 = vpop.eup %13083  ;;  %v7534_v49 = vmul.f32 %v13082_v5, %v7287_v39  ;;  %v16703_v55 = vadd.f32 %v7536_v21, %v15826_v0  ;;  %v7314_v1 = vadd.f32 %v16659_v62, %v16626_v20 }
0x1620   : > { %11626 = vmatmul.mubr.msk.bf16.gmra.mrb[28].mxu1 %vm495_vm0, %v7561_v54  ;;  %v13086_v31 = vpop.eup %13085  ;;  %v7537_v40 = vmul.f32 %v13084_v37, %v7298_v25 }
0x1621   : > { %v7535_v38 = vmul.f32 %v13086_v31, %v7290_v53  ;;  %v16706_v57 = vadd.f32 %v7534_v49, %v15830_v3  ;;  %v16745_v31 = vld [vmem:[%s17476_s10 + $0x3] ss:$0 sm:$0xff] }
0x1622   : > { %v16709_v41 = vadd.f32 %v7537_v40, %v15832_v47  ;;  %v7563_v12 = vpack.c.bf16 %v7537_v40, %v7536_v21  ;;  %v7311_v47 = vadd.f32 %v16650_v46, %v16626_v20  ;;  %v7306_v21 = vadd.f32 %v16626_v20, %v16665_v34 }
0x1623   : > { %v13088_v63 = vpop.eup %13087  ;;  %v7562_v2 = vpack.c.bf16 %v7535_v38, %v7534_v49  ;;  %v16712_v18 = vadd.f32 %v7535_v38, %v15834_v24  ;;  %v7303_v24 = vadd.f32 %v16626_v20, %v16653_v44  ;;  %v6054_v20 = vsub.f32 1.0, %v16110_v59 }
0x1624   : > { %v13090_v23 = vpop.eup %13089  ;;  %v7492_v17 = vadd.f32 1.0, %v13088_v63  ;;  %v6055_v34 = vsub.f32 1.0, %v16113_v19 }
0x1625   : > { %v7490_v50 = vadd.f32 1.0, %v13090_v23  ;;  %11629 = vmatprep.mubr.msk.bf16.mxu1 %vm495_vm0, %v7562_v2  ;;  %v6058_v2 = vsub.f32 1.0, %v16132_v27 }
0x1626   : > { %v13092_v7 = vpop.eup %13091  ;;  %13095 = vrcp.f32 %v7492_v17  ;;  %v6071_v63 = vadd.f32 1e-05, %v6055_v34  ;;  %v6060_v17 = vsub.f32 1.0, %v16144_v56  ;;  %v6059_v56 = vsub.f32 1.0, %v16135_v14 }
0x1627   : > { %v7493_v0 = vadd.f32 1.0, %v13092_v7  ;;  %v13094_v36 = vpop.eup %13093  ;;  %13097 = vrcp.f32 %v7490_v50 }
0x1628   : > { %11630 = vmatmul.mubr.msk.bf16.gmra.mrb[32].mxu1 %vm495_vm0, %v7563_v12  ;;  %v7491_v3 = vadd.f32 1.0, %v13094_v36 }
0x1629   : > { %13099 = vrcp.f32 %v7493_v0 }
0x162a   : > { %13101 = vrcp.f32 %v7491_v3 }
0x1630   : > { %v13096_v54 = vpop.eup %13095 }
0x1631   : > { %v13098_v29 = vpop.eup %13097  ;;  %v7540_v30 = vmul.f32 %v13096_v54, %v7311_v47  ;;  %v6087_v54 = vmul.f32 %v6071_v63, %v15880_v48 }
0x1632   : > { %v7538_v22 = vmul.f32 %v13098_v29, %v7303_v24  ;;  %v6076_v24 = vadd.f32 1e-05, %v6060_v17  ;;  %v6074_v29 = vadd.f32 1e-05, %v6058_v2 }
0x1633   : > { %v13100_v10 = vpop.eup %13099  ;;  %v16723_v39 = vadd.f32 %v7540_v30, %v15852_v60  ;;  %v6056_v60 = vsub.f32 1.0, %v16116_v28 }
0x1634   : > { %v7541_v5 = vmul.f32 %v13100_v10, %v7314_v1  ;;  %v13102_v25 = vpop.eup %13101  ;;  %v16728_v46 = vadd.f32 %v7538_v22, %v15856_v61  ;;  %v6057_v61 = vsub.f32 1.0, %v16123_v26  ;;  %v6075_v10 = vadd.f32 1e-05, %v6059_v56  ;;  %v17624_v56 = vld [vmem:[#allocation23_spill] sm:$0xff] }
0x1635   : > { %v7539_v53 = vmul.f32 %v13102_v25, %v7306_v21  ;;  %v6092_v48 = vmul.f32 %v6076_v24, %v15920_v43  ;;  %v6064_v21 = vsub.f32 1.0, %v16178_v58  ;;  %v17618_v25 = vld [vmem:[#allocation2_spill] sm:$0xff] }
0x1636   : > { %v16731_v44 = vadd.f32 %v7541_v5, %v15858_v6  ;;  %v7565_v37 = vpack.c.bf16 %v7541_v5, %v7540_v30  ;;  %v6072_v6 = vadd.f32 1e-05, %v6056_v60  ;;  %v6073_v40 = vadd.f32 1e-05, %v6057_v61  ;;  %v17620_v61 = vld [vmem:[#allocation9_spill] sm:$0xff] }
0x1637   : > { %v7564_v49 = vpack.c.bf16 %v7539_v53, %v7538_v22  ;;  %v16734_v62 = vadd.f32 %v7539_v53, %v15860_v33  ;;  %v6070_v33 = vadd.f32 1e-05, %v6054_v20  ;;  %v6062_v34 = vsub.f32 1.0, %v17620_v61 }
0x1638   : > { %v6088_v12 = vmul.f32 %v6072_v6, %v15890_v52  ;;  %v6089_v50 = vmul.f32 %v6073_v40, %v15893_v51  ;;  %v6061_v52 = vsub.f32 1.0, %v16151_v32  ;;  %v6080_v17 = vadd.f32 1e-05, %v6064_v21 }
0x1639   : > { %11633 = vmatprep.mubr.msk.bf16.mxu1 %vm495_vm0, %v7564_v49  ;;  %v6086_v19 = vmul.f32 %v6070_v33, %v15877_v11  ;;  %v17619_v49 = vld [vmem:[#allocation4_spill] sm:$0xff] }
0x163a   : > { %11634 = vmatmul.mubr.msk.bf16.gmra.mrb[36].mxu1 %vm495_vm0, %v7565_v37  ;;  %v6077_v30 = vadd.f32 1e-05, %v6061_v52  ;;  %v6090_v37 = vmul.f32 %v6074_v29, %v17618_v25 }
0x163c   : > { %v6093_v60 = vmul.f32 %v6077_v30, %v17619_v49  ;;  %v17625_v30 = vld [vmem:[#allocation5_spill] sm:$0xff] }
0x16e7   : > { %v11623_v38 = vpop.f32.mrb[24].mxu1 }
0x16e8   : > { %v7655_v28 = vadd.f32 %v11623_v38, %v16745_v31  ;;  %v7646_v23 = vpop.f32.mrb[25].mxu1  ;;  %v17621_v38 = vld [vmem:[#allocation27_spill] sm:$0xff] }
0x16e9   : > { %v7647_v59 = vadd.f32 %v16745_v31, %v7646_v23  ;;  %v11624_v26 = vpop.f32.mrb[26].mxu1  ;;  %v6065_v58 = vsub.f32 1.0, %v17621_v38  ;;  %v17628_v38 = vld [vmem:[#allocation13_spill] sm:$0xff] }
0x16ea   : > { %v16753_v7 = vmul.f32 %v7655_v28, %v6088_v12  ;;  %v7658_v0 = vadd.f32 %v11624_v26, %v16745_v31  ;;  %v7649_v36 = vpop.f32.mrb[27].mxu1  ;;  %v17622_v12 = vld [vmem:[#allocation3_spill] sm:$0xff] }
0x16eb   : > { %v7650_v3 = vadd.f32 %v16745_v31, %v7649_v36  ;;  %v16759_v47 = vmul.f32 %v7647_v59, %v6086_v19  ;;  %v6091_v28 = vmul.f32 %v6075_v10, %v17622_v12  ;;  %v17623_v59 = vld [vmem:[#allocation10_spill] sm:$0xff]  ;;  %v6081_v36 = vadd.f32 1e-05, %v6065_v58 }
0x16ec   : > { %v16762_v11 = vmul.f32 %v7658_v0, %v6089_v50  ;;  %v7731_v5 = vsel %vm495_vm0, %v16753_v7, -inf  ;;  %v6063_v26 = vsub.f32 1.0, %v17623_v59  ;;  %v6078_v0 = vadd.f32 1e-05, %v6062_v34  ;;  %v17630_v59 = vld [vmem:[#allocation28_spill] sm:$0xff] }
0x16ed   : > { %v7725_v27 = vsel %vm495_vm0, %v16759_v47, -inf  ;;  %v16767_v51 = vmul.f32 %v7650_v3, %v6087_v54  ;;  %v6068_v58 = vsub.f32 1.0, %v17628_v38 }
0x16ee   : > { %7726 = vmax.xlane.f32.xlu0 %v7725_v27  ;;  %v7734_v40 = vsel %vm495_vm0, %v16762_v11, -inf  ;;  %v6079_v54 = vadd.f32 1e-05, %v6063_v26  ;;  %v6096_v27 = vmul.f32 %v6080_v17, %v17624_v56  ;;  %v6069_v26 = vsub.f32 1.0, %v17630_v59  ;;  %v17631_v17 = vld [vmem:[#allocation12_spill] sm:$0xff]  ;;  %v17632_v56 = vld [vmem:[#allocation25_spill] sm:$0xff] }
0x16ef   : > { %v7728_v32 = vsel %vm495_vm0, %v16767_v51, -inf }
0x16f0   : > { %7729 = vmax.xlane.f32.xlu1 %v7728_v32  ;;  %v6094_v32 = vmul.f32 %v6078_v0, %v17625_v30  ;;  %v6084_v0 = vadd.f32 1e-05, %v6068_v58  ;;  %v17633_v30 = vld [vmem:[#allocation7_spill] sm:$0xff] }
0x16f2   : > { %7732 = vmax.xlane.f32.xlu0 %v7731_v5 }
0x16f3   : > { %v11627_v1 = vpop.f32.mrb[28].mxu1 }
0x16f4   : > { %v7671_v22 = vadd.f32 %v11627_v1, %v16745_v31  ;;  %v7662_v14 = vpop.f32.mrb[29].mxu1  ;;  %7735 = vmax.xlane.f32.xlu1 %v7734_v40 }
0x16f5   : > { %v7663_v53 = vadd.f32 %v16745_v31, %v7662_v14  ;;  %v11628_v20 = vpop.f32.mrb[30].mxu1  ;;  %v17626_v14 = vld [vmem:[#allocation24_spill] sm:$0xff] }
0x16f6   : > { %v16780_v6 = vmul.f32 %v7671_v22, %v6092_v48  ;;  %v7674_v43 = vadd.f32 %v11628_v20, %v16745_v31  ;;  %v7665_v33 = vpop.f32.mrb[31].mxu1  ;;  %v6097_v5 = vmul.f32 %v6081_v36, %v17626_v14  ;;  %v17634_v14 = vld [vmem:[#allocation26_spill] sm:$0xff] }
0x16f7   : > { %v16786_v63 = vmul.f32 %v7663_v53, %v6090_v37  ;;  %v7666_v23 = vadd.f32 %v16745_v31, %v7665_v33  ;;  %v17627_v53 = vld [vmem:[#allocation6_spill] sm:$0xff] }
0x16f8   : > { %v16791_v19 = vmul.f32 %v7674_v43, %v6093_v60  ;;  %v7743_v48 = vsel %vm495_vm0, %v16780_v6, -inf  ;;  %v6095_v49 = vmul.f32 %v6079_v54, %v17627_v53 }
0x16f9   : > { %v16793_v2 = vmul.f32 %v7666_v23, %v6091_v28  ;;  %v7737_v50 = vsel %vm495_vm0, %v16786_v63, -inf  ;;  %v17629_v28 = vld [vmem:[#allocation11_spill] sm:$0xff] }
0x16fa   : > { %7738 = vmax.xlane.f32.xlu0 %v7737_v50  ;;  %v7746_v20 = vsel %vm495_vm0, %v16791_v19, -inf  ;;  %v6066_v23 = vsub.f32 1.0, %v17629_v28  ;;  %v6067_v50 = vsub.f32 1.0, %v17631_v17 }
0x16fb   : > { %v11631_v52 = vpop.f32.mrb[32].mxu1  ;;  %v7740_v3 = vsel %vm495_vm0, %v16793_v2, -inf }
0x16fc   : > { %v7687_v24 = vadd.f32 %v11631_v52, %v16745_v31  ;;  %v7678_v29 = vpop.f32.mrb[33].mxu1  ;;  %7741 = vmax.xlane.f32.xlu1 %v7740_v3  ;;  %v6082_v36 = vadd.f32 1e-05, %v6066_v23  ;;  %v6085_v52 = vadd.f32 1e-05, %v6069_v26 }
0x16fd   : > { %v7679_v1 = vadd.f32 %v16745_v31, %v7678_v29  ;;  %v11632_v10 = vpop.f32.mrb[34].mxu1  ;;  %v6083_v54 = vadd.f32 1e-05, %v6067_v50 }
0x16fe   : > { %v16805_v22 = vmul.f32 %v7687_v24, %v6096_v27  ;;  %v7690_v21 = vadd.f32 %v11632_v10, %v16745_v31  ;;  %v7681_v25 = vpop.f32.mrb[35].mxu1  ;;  %7744 = vmax.xlane.f32.xlu0 %v7743_v48  ;;  %v6100_v27 = vmul.f32 %v6084_v0, %v17632_v56 }
0x16ff   : > { %v16809_v37 = vmul.f32 %v7679_v1, %v6094_v32  ;;  %v7682_v60 = vadd.f32 %v16745_v31, %v7681_v25  ;;  %v6098_v32 = vmul.f32 %v6082_v36, %v17633_v30 }
0x1700   : > { %v16815_v61 = vmul.f32 %v7690_v21, %v6097_v5  ;;  %7747 = vmax.xlane.f32.xlu1 %v7746_v20  ;;  %v7755_v40 = vsel %vm495_vm0, %v16805_v22, -inf  ;;  %v6101_v5 = vmul.f32 %v6085_v52, %v17634_v14 }
0x1701   : > { %v16817_v34 = vmul.f32 %v7682_v60, %v6095_v49  ;;  %v7749_v43 = vsel %vm495_vm0, %v16809_v37, -inf  ;;  %v17635_v49 = vld [vmem:[#allocation8_spill] sm:$0xff] }
0x1702   : > { %7750 = vmax.xlane.f32.xlu0 %v7749_v43  ;;  %v7758_v12 = vsel %vm495_vm0, %v16815_v61, -inf  ;;  %v6099_v60 = vmul.f32 %v6083_v54, %v17635_v49 }
0x1703   : > { %v7752_v33 = vsel %vm495_vm0, %v16817_v34, -inf }
0x1704   : > { %7753 = vmax.xlane.f32.xlu1 %v7752_v33 }
0x1706   : > { %7756 = vmax.xlane.f32.xlu0 %v7755_v40 }
0x1708   : > { %7759 = vmax.xlane.f32.xlu1 %v7758_v12 }
0x170d   : > { %v11635_v3 = vpop.f32.mrb[36].mxu1 }
0x170e   : > { %v7703_v24 = vadd.f32 %v11635_v3, %v16745_v31  ;;  %v7694_v29 = vpop.f32.mrb[37].mxu1 }
0x170f   : > { %v7695_v1 = vadd.f32 %v16745_v31, %v7694_v29  ;;  %v11636_v10 = vpop.f32.mrb[38].mxu1 }
0x1710   : > { %v16835_v48 = vmul.f32 %v7703_v24, %v6100_v27  ;;  %v7706_v21 = vadd.f32 %v11636_v10, %v16745_v31  ;;  %v7697_v25 = vpop.f32.mrb[39].mxu1 }
0x1711   : > { %v16839_v53 = vmul.f32 %v7695_v1, %v6098_v32  ;;  %v7698_v20 = vadd.f32 %v16745_v31, %v7697_v25 }
0x1712   : > { %v16843_v43 = vmul.f32 %v7706_v21, %v6101_v5  ;;  %v7767_v58 = vsel %vm495_vm0, %v16835_v48, -inf }
0x1713   : > { %v16845_v33 = vmul.f32 %v7698_v20, %v6099_v60  ;;  %v7761_v40 = vsel %vm495_vm0, %v16839_v53, -inf }
0x1714   : > { %7762 = vmax.xlane.f32.xlu0 %v7761_v40  ;;  %v7770_v12 = vsel %vm495_vm0, %v16843_v43, -inf }
0x1715   : > { %v7764_v38 = vsel %vm495_vm0, %v16845_v33, -inf }
0x1716   : > { %7765 = vmax.xlane.f32.xlu1 %v7764_v38 }
0x1718   : > { %7768 = vmax.xlane.f32.xlu0 %v7767_v58 }
0x171a   : > { %7771 = vmax.xlane.f32.xlu1 %v7770_v12 }
0x177b   : > { %v7727_v31 = vpop.xlane.xlu0 %7726 }
0x177c   : > { %v7773_v28 = vsub.f32 %v16759_v47, %v7727_v31 }
0x177d   : > { %v7730_v23 = vpop.xlane.xlu1 %7729 }
0x177e   : > { %v7789_v59 = vmul.f32 1.442695, %v7773_v28  ;;  %v7774_v26 = vsub.f32 %v16767_v51, %v7730_v23 }
0x177f   : > { %v7733_v17 = vpop.xlane.xlu0 %7732 }
0x1780   : > { %13103 = vpow2.f32 %v7789_v59  ;;  %v7791_v50 = vmul.f32 1.442695, %v7774_v26  ;;  %v7775_v0 = vsub.f32 %v16753_v7, %v7733_v17 }
0x1781   : > { %v7736_v36 = vpop.xlane.xlu1 %7735 }
0x1782   : > { %13105 = vpow2.f32 %v7791_v50  ;;  %v7793_v52 = vmul.f32 1.442695, %v7775_v0  ;;  %v7776_v3 = vsub.f32 %v16762_v11, %v7736_v36 }
0x1784   : > { %13107 = vpow2.f32 %v7793_v52  ;;  %v7795_v54 = vmul.f32 1.442695, %v7776_v3 }
0x1786   : > { %13109 = vpow2.f32 %v7795_v54 }
0x1787   : > { %v7739_v56 = vpop.xlane.xlu0 %7738 }
0x1788   : > { %v7777_v27 = vsub.f32 %v16786_v63, %v7739_v56 }
0x1789   : > { %v7742_v47 = vpop.xlane.xlu1 %7741 }
0x178a   : > { %v7797_v24 = vmul.f32 1.442695, %v7777_v27  ;;  %v7778_v51 = vsub.f32 %v16793_v2, %v7742_v47  ;;  %v16862_v32 = vpop.eup %13103 }
0x178b   : > { %v7745_v29 = vpop.xlane.xlu0 %7744  ;;  %v7821_v63 = vsel %vm495_vm0, %v16862_v32, 0.0 }
0x178c   : > { %13111 = vpow2.f32 %v7797_v24  ;;  %v7799_v30 = vmul.f32 1.442695, %v7778_v51  ;;  %v7779_v7 = vsub.f32 %v16780_v6, %v7745_v29  ;;  %v16867_v14 = vpop.eup %13105  ;;  %7822 = vadd.xlane.f32.xlu0 %v7821_v63 }
0x178d   : > { %v7748_v1 = vpop.xlane.xlu1 %7747  ;;  %v7824_v6 = vsel %vm495_vm0, %v16867_v14, 0.0 }
0x178e   : > { %13113 = vpow2.f32 %v7799_v30  ;;  %v7801_v11 = vmul.f32 1.442695, %v7779_v7  ;;  %v7780_v10 = vsub.f32 %v16791_v19, %v7748_v1  ;;  %v16872_v25 = vpop.eup %13107  ;;  %7825 = vadd.xlane.f32.xlu1 %v7824_v6 }
0x178f   : > { %v7751_v5 = vpop.xlane.xlu0 %7750  ;;  %v7827_v20 = vsel %vm495_vm0, %v16872_v25, 0.0 }
0x1790   : > { %13115 = vpow2.f32 %v7801_v11  ;;  %v7803_v2 = vmul.f32 1.442695, %v7780_v10  ;;  %v7781_v21 = vsub.f32 %v16809_v37, %v7751_v5  ;;  %v16877_v40 = vpop.eup %13109  ;;  %7828 = vadd.xlane.f32.xlu0 %v7827_v20 }
0x1791   : > { %v7754_v49 = vpop.xlane.xlu1 %7753  ;;  %v7830_v12 = vsel %vm495_vm0, %v16877_v40, 0.0 }
0x1792   : > { %13117 = vpow2.f32 %v7803_v2  ;;  %v7805_v19 = vmul.f32 1.442695, %v7781_v21  ;;  %v7782_v60 = vsub.f32 %v16817_v34, %v7754_v49  ;;  %7831 = vadd.xlane.f32.xlu1 %v7830_v12 }
0x1793   : > { %v7757_v38 = vpop.xlane.xlu0 %7756 }
0x1794   : > { %13119 = vpow2.f32 %v7805_v19  ;;  %v7807_v37 = vmul.f32 1.442695, %v7782_v60  ;;  %v7783_v58 = vsub.f32 %v16805_v22, %v7757_v38 }
0x1795   : > { %v7760_v31 = vpop.xlane.xlu1 %7759 }
0x1796   : > { %v16882_v28 = vpop.eup %13111  ;;  %13121 = vpow2.f32 %v7807_v37  ;;  %v7809_v34 = vmul.f32 1.442695, %v7783_v58  ;;  %v7784_v23 = vsub.f32 %v16815_v61, %v7760_v31 }
0x1797   : > { %v7833_v59 = vsel %vm495_vm0, %v16882_v28, 0.0 }
0x1798   : > { %v16887_v26 = vpop.eup %13113  ;;  %13123 = vpow2.f32 %v7809_v34  ;;  %v7811_v17 = vmul.f32 1.442695, %v7784_v23  ;;  %7834 = vadd.xlane.f32.xlu0 %v7833_v59 }
0x1799   : > { %v7836_v22 = vsel %vm495_vm0, %v16887_v26, 0.0 }
0x179a   : > { %v16891_v50 = vpop.eup %13115  ;;  %13125 = vpow2.f32 %v7811_v17  ;;  %7837 = vadd.xlane.f32.xlu1 %v7836_v22 }
0x179b   : > { %v7839_v0 = vsel %vm495_vm0, %v16891_v50, 0.0 }
0x179c   : > { %v16895_v36 = vpop.eup %13117  ;;  %7840 = vadd.xlane.f32.xlu0 %v7839_v0 }
0x179d   : > { %v7842_v61 = vsel %vm495_vm0, %v16895_v36, 0.0 }
0x179e   : > { %v16899_v52 = vpop.eup %13119  ;;  %7843 = vadd.xlane.f32.xlu1 %v7842_v61 }
0x179f   : > { %v7845_v3 = vsel %vm495_vm0, %v16899_v52, 0.0 }
0x17a0   : > { %v16903_v54 = vpop.eup %13121  ;;  %7846 = vadd.xlane.f32.xlu0 %v7845_v3 }
0x17a1   : > { %v7848_v56 = vsel %vm495_vm0, %v16903_v54, 0.0  ;;  %v7763_v47 = vpop.xlane.xlu0 %7762 }
0x17a2   : > { %v16907_v27 = vpop.eup %13123  ;;  %7849 = vadd.xlane.f32.xlu1 %v7848_v56  ;;  %v7785_v24 = vsub.f32 %v16839_v53, %v7763_v47 }
0x17a3   : > { %v7851_v51 = vsel %vm495_vm0, %v16907_v27, 0.0  ;;  %v7766_v30 = vpop.xlane.xlu1 %7765 }
0x17a4   : > { %v16912_v29 = vpop.eup %13125  ;;  %7852 = vadd.xlane.f32.xlu0 %v7851_v51  ;;  %v7813_v7 = vmul.f32 1.442695, %v7785_v24  ;;  %v7786_v1 = vsub.f32 %v16845_v33, %v7766_v30  ;;  %v13515_v24 = vld [vmem:[%s13641_s20] sm:$0xff]  ;;  %v13516_v30 = vld [vmem:[%s13641_s20 + $0x8] sm:$0xff] }
0x17a5   : > { %v7854_v11 = vsel %vm495_vm0, %v16912_v29, 0.0  ;;  %v7769_v10 = vpop.xlane.xlu0 %7768 }
0x17a6   : > { %7855 = vadd.xlane.f32.xlu1 %v7854_v11  ;;  %13127 = vpow2.f32 %v7813_v7  ;;  %v7815_v63 = vmul.f32 1.442695, %v7786_v1  ;;  %v7787_v5 = vsub.f32 %v16835_v48, %v7769_v10 }
0x17a7   : > { %v7772_v53 = vpop.xlane.xlu1 %7771 }
0x17a8   : > { %13129 = vpow2.f32 %v7815_v63  ;;  %v7817_v2 = vmul.f32 1.442695, %v7787_v5  ;;  %v7788_v21 = vsub.f32 %v16843_v43, %v7772_v53 }
0x17aa   : > { %13131 = vpow2.f32 %v7817_v2  ;;  %v7819_v6 = vmul.f32 1.442695, %v7788_v21  ;;  %v13518_v2 = vld [vmem:[%s13641_s20 + $0x18] sm:$0xff] }
0x17ac   : > { %13133 = vpow2.f32 %v7819_v6 }
0x17b0   : > { %v16919_v49 = vpop.eup %13127 }
0x17b1   : > { %v7857_v33 = vsel %vm495_vm0, %v16919_v49, 0.0 }
0x17b2   : > { %v16923_v19 = vpop.eup %13129  ;;  %7858 = vadd.xlane.f32.xlu0 %v7857_v33 }
0x17b3   : > { %v7860_v60 = vsel %vm495_vm0, %v16923_v19, 0.0 }
0x17b4   : > { %v16927_v48 = vpop.eup %13131  ;;  %7861 = vadd.xlane.f32.xlu1 %v7860_v60 }
0x17b5   : > { %v7863_v43 = vsel %vm495_vm0, %v16927_v48, 0.0 }
0x17b6   : > { %v16931_v20 = vpop.eup %13133  ;;  %7864 = vadd.xlane.f32.xlu0 %v7863_v43 }
0x17b7   : > { %v7866_v38 = vsel %vm495_vm0, %v16931_v20, 0.0 }
0x17b8   : > { %7867 = vadd.xlane.f32.xlu1 %v7866_v38 }
0x1819   : > { %v7823_v37 = vpop.xlane.xlu0 %7822 }
0x181a   : > { %13135 = vrcp.f32 %v7823_v37 }
0x181b   : > { %v7826_v58 = vpop.xlane.xlu1 %7825 }
0x181c   : > { %13137 = vrcp.f32 %v7826_v58  ;;  %v13519_v58 = vld [vmem:[%s13641_s20 + $0x20] sm:$0xff] }
0x181d   : > { %v7829_v12 = vpop.xlane.xlu0 %7828 }
0x181e   : > { %13139 = vrcp.f32 %v7829_v12 }
0x181f   : > { %v7832_v31 = vpop.xlane.xlu1 %7831 }
0x1820   : > { %13141 = vrcp.f32 %v7832_v31  ;;  %v13520_v31 = vld [vmem:[%s13641_s20 + $0x28] sm:$0xff] }
0x1824   : > { %v13136_v23 = vpop.eup %13135 }
0x1825   : > { %v7835_v34 = vpop.xlane.xlu0 %7834  ;;  %v7885_v17 = vmul.f32 %v13136_v23, %v16862_v32  ;;  %v13522_v23 = vld [vmem:[%s17468_s2 + $0x18] sm:$0xff]  }
0x1826   : > { %13143 = vrcp.f32 %v7835_v34  ;;  %v13138_v22 = vpop.eup %13137 }
0x1827   : > { %v7838_v59 = vpop.xlane.xlu1 %7837  ;;  %v7886_v61 = vmul.f32 %v13138_v22, %v16867_v14  ;;  %v7901_v51 = vmul.f32 %v13515_v24, %v7885_v17  ;;  %v13517_v14 = vld [vmem:[%s13641_s20 + $0x10] sm:$0xff] }
0x1828   : > { %13145 = vrcp.f32 %v7838_v59  ;;  %v13140_v3 = vpop.eup %13139  ;;  %v13524_v22 = vld [vmem:[%s13641_s20 + $0x30] sm:$0xff] }
0x1829   : > { %v7841_v0 = vpop.xlane.xlu0 %7840  ;;  %v7887_v47 = vmul.f32 %v13140_v3, %v16872_v25  ;;  %v7902_v7 = vmul.f32 %v13516_v30, %v7886_v61  ;;  %v13525_v61 = vld [vmem:[%s13641_s20 + $0x38] sm:$0xff] }
0x182a   : > { %13147 = vrcp.f32 %v7841_v0  ;;  %v13142_v1 = vpop.eup %13141 }
0x182b   : > { %v7844_v56 = vpop.xlane.xlu1 %7843  ;;  %v7888_v32 = vmul.f32 %v13142_v1, %v16877_v40  ;;  %v7917_v10 = vpack.c.bf16 %v7902_v7, %v7901_v51  ;;  %v7903_v53 = vmul.f32 %v13517_v14, %v7887_v47  ;;  %v13526_v7 = vld [vmem:[%s13641_s20 + $0x40] sm:$0xff]  ;;  %v13528_v14 = vld [vmem:[%s13641_s20 + $0x50] sm:$0xff] }
0x182c   : > { %13149 = vrcp.f32 %v7844_v56 }
0x182d   : > { %v7847_v11 = vpop.xlane.xlu0 %7846  ;;  %v7904_v21 = vmul.f32 %v13518_v2, %v7888_v32  ;;  %11641 = vmatprep.mubr.msk.bf16.mxu0 %vm495_vm0, %v7917_v10  ;;  %11661 = vmatprep.mubr.msk.bf16.mxu1 %vm495_vm0, %v7917_v10  ;;  %v13529_v2 = vld [vmem:[%s13641_s20 + $0x58] sm:$0xff] }
0x182e   : > { %13151 = vrcp.f32 %v7847_v11  ;;  %v13527_v11 = vld [vmem:[%s13641_s20 + $0x48] sm:$0xff] }
0x182f   : > { %v7850_v63 = vpop.xlane.xlu1 %7849  ;;  %v7918_v40 = vpack.c.bf16 %v7904_v21, %v7903_v53 }
0x1830   : > { %v13144_v5 = vpop.eup %13143  ;;  %13153 = vrcp.f32 %v7850_v63 }
0x1831   : > { %v7853_v25 = vpop.xlane.xlu0 %7852  ;;  %v7889_v6 = vmul.f32 %v13144_v5, %v16882_v28  ;;  %11642 = vmatmul.mubr.msk.bf16.vlgmr.msra.gmra.mrb[24].mxu0 %vm495_vm0, %v7918_v40  ;;  %11662 = vmatmul.mubr.msk.bf16.vlgmr.msra.gmra.mrb[40].mxu1 %vm495_vm0, %v7918_v40 }
0x1832   : > { %v13146_v33 = vpop.eup %13145  ;;  %13155 = vrcp.f32 %v7853_v25  ;;  %11698 = vmatpush3.bf16.msra.mxu1 %v16686_v9 }
0x1833   : > { %v7856_v60 = vpop.xlane.xlu1 %7855  ;;  %v7890_v43 = vmul.f32 %v13146_v33, %v16887_v26  ;;  %v7905_v12 = vmul.f32 %v13519_v58, %v7889_v6  ;;  %v13521_v26 = vld [vmem:[%s17467_s1 + $0x10] sm:$0xff]   ;;  %11699 = vmatprep.subr.bf16.mxu1 %v13522_v23 }
0x1834   : > { %v13148_v38 = vpop.eup %13147  ;;  %13157 = vrcp.f32 %v7856_v60  ;;  %11678 = vmatpush3.bf16.msra.mxu0 %v13521_v26 }
0x1835   : > { %v7891_v37 = vmul.f32 %v13148_v38, %v16891_v50  ;;  %v7906_v28 = vmul.f32 %v13520_v31, %v7890_v43  ;;  %v13523_v50 = vld [vmem:[%s17467_s1 + $0x18] sm:$0xff]  }
0x1836   : > { %v13150_v34 = vpop.eup %13149  ;;  %11679 = vmatprep.subr.bf16.mxu0 %v13523_v50  ;;  %11700 = vmatpush3.bf16.msra.mxu1 %v13522_v23  ;;  %v13532_v23 = vld [vmem:[%s13641_s20 + $0x70] sm:$0xff] }
0x1837   : > { %v7892_v59 = vmul.f32 %v13150_v34, %v16895_v36  ;;  %v7919_v17 = vpack.c.bf16 %v7906_v28, %v7905_v12  ;;  %v7907_v0 = vmul.f32 %v13524_v22, %v7891_v37  ;;  %v13530_v37 = vld [vmem:[%s13641_s20 + $0x60] sm:$0xff]  ;;  %v13531_v12 = vld [vmem:[%s13641_s20 + $0x68] sm:$0xff] }
0x1838   : > { %v13152_v9 = vpop.eup %13151  ;;  %11680 = vmatpush3.bf16.msra.mxu0 %v13523_v50 }
0x1839   : > { %v7908_v3 = vmul.f32 %v13525_v61, %v7892_v59  ;;  %11645 = vmatprep.mubr.msk.bf16.mxu0 %vm495_vm0, %v7919_v17  ;;  %11665 = vmatprep.mubr.msk.bf16.mxu1 %vm495_vm0, %v7919_v17  ;;  %v7893_v56 = vmul.f32 %v13152_v9, %v16899_v52  ;;  %v13533_v59 = vld [vmem:[%s13641_s20 + $0x78] sm:$0xff] }
0x183a   : > { %v13154_v47 = vpop.eup %13153 }
0x183b   : > { %v7920_v24 = vpack.c.bf16 %v7908_v3, %v7907_v0  ;;  %v7894_v36 = vmul.f32 %v13154_v47, %v16903_v54  ;;  %v7909_v1 = vmul.f32 %v13526_v7, %v7893_v56 }
0x183c   : > { %v13156_v51 = vpop.eup %13155 }
0x183d   : > { %v7895_v30 = vmul.f32 %v13156_v51, %v16907_v27  ;;  %11646 = vmatmul.mubr.msk.bf16.gmra.mrb[28].mxu0 %vm495_vm0, %v7920_v24  ;;  %11666 = vmatmul.mubr.msk.bf16.gmra.mrb[44].mxu1 %vm495_vm0, %v7920_v24  ;;  %v7910_v32 = vmul.f32 %v13527_v11, %v7894_v36 }
0x183e   : > { %v13158_v52 = vpop.eup %13157 }
0x183f   : > { %v7896_v10 = vmul.f32 %v13158_v52, %v16912_v29  ;;  %v7921_v63 = vpack.c.bf16 %v7910_v32, %v7909_v1  ;;  %v7859_v5 = vpop.xlane.xlu0 %7858  ;;  %v7911_v53 = vmul.f32 %v13528_v14, %v7895_v30 }
0x1840   : > { %13159 = vrcp.f32 %v7859_v5 }
0x1841   : > { %v7912_v54 = vmul.f32 %v13529_v2, %v7896_v10  ;;  %11649 = vmatprep.mubr.msk.bf16.mxu0 %vm495_vm0, %v7921_v63  ;;  %11669 = vmatprep.mubr.msk.bf16.mxu1 %vm495_vm0, %v7921_v63  ;;  %v7862_v27 = vpop.xlane.xlu1 %7861 }
0x1842   : > { %13161 = vrcp.f32 %v7862_v27 }
0x1843   : > { %v7922_v21 = vpack.c.bf16 %v7912_v54, %v7911_v53  ;;  %v7865_v25 = vpop.xlane.xlu0 %7864 }
0x1844   : > { %13163 = vrcp.f32 %v7865_v25 }
0x1845   : > { %11650 = vmatmul.mubr.msk.bf16.gmra.mrb[32].mxu0 %vm495_vm0, %v7922_v21  ;;  %11670 = vmatmul.mubr.msk.bf16.gmra.mrb[48].mxu1 %vm495_vm0, %v7922_v21  ;;  %v7868_v29 = vpop.xlane.xlu1 %7867 }
0x1846   : > { %13165 = vrcp.f32 %v7868_v29 }
0x184a   : > { %v13160_v6 = vpop.eup %13159 }
0x184b   : > { %v7897_v33 = vmul.f32 %v13160_v6, %v16919_v49 }
0x184c   : > { %v13162_v40 = vpop.eup %13161 }
0x184d   : > { %v7898_v60 = vmul.f32 %v13162_v40, %v16923_v19  ;;  %v7913_v58 = vmul.f32 %v13530_v37, %v7897_v33 }
0x184e   : > { %v13164_v43 = vpop.eup %13163 }
0x184f   : > { %v7899_v38 = vmul.f32 %v13164_v43, %v16927_v48  ;;  %v7914_v31 = vmul.f32 %v13531_v12, %v7898_v60 }
0x1850   : > { %v13166_v28 = vpop.eup %13165 }
0x1851   : > { %v7900_v26 = vmul.f32 %v13166_v28, %v16931_v20  ;;  %v7923_v34 = vpack.c.bf16 %v7914_v31, %v7913_v58  ;;  %v7915_v50 = vmul.f32 %v13532_v23, %v7899_v38  ;;  %v16998_v20 = vld [vmem:[%s17470_s4] ss:$0 sm:$0xff] }
0x1853   : > { %v7916_v17 = vmul.f32 %v13533_v59, %v7900_v26  ;;  %11653 = vmatprep.mubr.msk.bf16.mxu0 %vm495_vm0, %v7923_v34  ;;  %11673 = vmatprep.mubr.msk.bf16.mxu1 %vm495_vm0, %v7923_v34 }
0x1855   : > { %v7924_v49 = vpack.c.bf16 %v7916_v17, %v7915_v50 }
0x1857   : > { %11654 = vmatmul.mubr.msk.bf16.gmra.mrb[36].mxu0 %vm495_vm0, %v7924_v49  ;;  %11674 = vmatmul.mubr.msk.bf16.gmra.mrb[52].mxu1 %vm495_vm0, %v7924_v49 }
0x1904   : > { %v16993_v19 = vpop.f32.mrb[24].mxu0  ;;  %v11663_v48 = vpop.f32.mrb[40].mxu1 }
0x1905   : > { %v8089_v9 = vadd.f32 %v16998_v20, %v11663_v48  ;;  %v17001_v22 = vpop.f32.mrb[25].mxu0  ;;  %v8080_v0 = vpop.f32.mrb[41].mxu1 }
0x1906   : > { %v8081_v61 = vadd.f32 %v16998_v20, %v8080_v0  ;;  %v17004_v3 = vpop.f32.mrb[26].mxu0  ;;  %v11664_v56 = vpop.f32.mrb[42].mxu1 }
0x1907   : > { %v10316_v47 = vmul.f32 -1.442695, %v8089_v9  ;;  %v8092_v24 = vadd.f32 %v16998_v20, %v11664_v56  ;;  %v17007_v36 = vpop.f32.mrb[27].mxu0  ;;  %v8083_v51 = vpop.f32.mrb[43].mxu1 }
0x1908   : > { %v10314_v30 = vmul.f32 -1.442695, %v8081_v61  ;;  %v8084_v7 = vadd.f32 %v16998_v20, %v8083_v51 }
0x1909   : > { %13167 = vpow2.f32 %v10316_v47  ;;  %v10317_v1 = vmul.f32 -1.442695, %v8092_v24 }
0x190a   : > { %13169 = vpow2.f32 %v10314_v30  ;;  %v10315_v11 = vmul.f32 -1.442695, %v8084_v7 }
0x190b   : > { %13171 = vpow2.f32 %v10317_v1 }
0x190c   : > { %13173 = vpow2.f32 %v10315_v11 }
0x1910   : > { %v17010_v32 = vpop.f32.mrb[28].mxu0  ;;  %v11667_v52 = vpop.f32.mrb[44].mxu1 }
0x1911   : > { %v8105_v10 = vadd.f32 %v16998_v20, %v11667_v52  ;;  %v17013_v63 = vpop.f32.mrb[29].mxu0  ;;  %v8096_v5 = vpop.f32.mrb[45].mxu1 }
0x1912   : > { %v8097_v14 = vadd.f32 %v16998_v20, %v8096_v5  ;;  %v17016_v53 = vpop.f32.mrb[30].mxu0  ;;  %v11668_v2 = vpop.f32.mrb[46].mxu1 }
0x1913   : > { %v10320_v54 = vmul.f32 -1.442695, %v8105_v10  ;;  %v8108_v27 = vadd.f32 %v16998_v20, %v11668_v2  ;;  %v17019_v21 = vpop.f32.mrb[31].mxu0  ;;  %v8099_v25 = vpop.f32.mrb[47].mxu1 }
0x1914   : > { %v10318_v29 = vmul.f32 -1.442695, %v8097_v14  ;;  %v8100_v6 = vadd.f32 %v16998_v20, %v8099_v25  ;;  %v13168_v40 = vpop.eup %13167  ;;  %v17037_v14 = vld [vmem:[%s17469_s3] ss:$0 sm:$0xff] }
0x1915   : > { %13175 = vpow2.f32 %v10320_v54  ;;  %v10321_v33 = vmul.f32 -1.442695, %v8108_v27  ;;  %v13170_v43 = vpop.eup %13169  ;;  %v8193_v38 = vadd.f32 1.0, %v13168_v40  ;;  %v7992_v2 = vadd.f32 %v17037_v14, %v16993_v19 }
0x1916   : > { %13177 = vpow2.f32 %v10318_v29  ;;  %v10319_v60 = vmul.f32 -1.442695, %v8100_v6  ;;  %v13172_v37 = vpop.eup %13171  ;;  %v8191_v58 = vadd.f32 1.0, %v13170_v43  ;;  %v7984_v25 = vadd.f32 %v17037_v14, %v17001_v22 }
0x1917   : > { %13179 = vpow2.f32 %v10321_v33  ;;  %v13174_v28 = vpop.eup %13173  ;;  %v8194_v26 = vadd.f32 1.0, %v13172_v37  ;;  %v7995_v40 = vadd.f32 %v17037_v14, %v17004_v3  ;;  %v7987_v43 = vadd.f32 %v17037_v14, %v17007_v36 }
0x1918   : > { %13181 = vpow2.f32 %v10319_v60  ;;  %v17022_v12 = vpop.f32.mrb[32].mxu0  ;;  %v11671_v31 = vpop.f32.mrb[48].mxu1  ;;  %v8192_v59 = vadd.f32 1.0, %v13174_v28 }
0x1919   : > { %13183 = vrcp.f32 %v8193_v38  ;;  %v8121_v34 = vadd.f32 %v16998_v20, %v11671_v31  ;;  %v17025_v23 = vpop.f32.mrb[33].mxu0  ;;  %v8112_v50 = vpop.f32.mrb[49].mxu1 }
0x191a   : > { %13185 = vrcp.f32 %v8191_v58  ;;  %v8113_v17 = vadd.f32 %v16998_v20, %v8112_v50  ;;  %v17028_v49 = vpop.f32.mrb[34].mxu0  ;;  %v11672_v48 = vpop.f32.mrb[50].mxu1 }
0x191b   : > { %13187 = vrcp.f32 %v8194_v26  ;;  %v10324_v9 = vmul.f32 -1.442695, %v8121_v34  ;;  %v8124_v0 = vadd.f32 %v16998_v20, %v11672_v48  ;;  %v17031_v61 = vpop.f32.mrb[35].mxu0  ;;  %v8115_v56 = vpop.f32.mrb[51].mxu1  ;;  %v8008_v48 = vadd.f32 %v17037_v14, %v17010_v32 }
0x191c   : > { %13189 = vrcp.f32 %v8192_v59  ;;  %v10322_v47 = vmul.f32 -1.442695, %v8113_v17  ;;  %v8116_v24 = vadd.f32 %v16998_v20, %v8115_v56 }
0x191d   : > { %13191 = vpow2.f32 %v10324_v9  ;;  %v10325_v51 = vmul.f32 -1.442695, %v8124_v0 }
0x191e   : > { %13193 = vpow2.f32 %v10322_v47  ;;  %v10323_v30 = vmul.f32 -1.442695, %v8116_v24  ;;  %v8000_v47 = vadd.f32 %v17037_v14, %v17013_v63 }
0x191f   : > { %v13176_v7 = vpop.eup %13175  ;;  %13195 = vpow2.f32 %v10325_v51 }
0x1920   : > { %v13178_v1 = vpop.eup %13177  ;;  %v8197_v11 = vadd.f32 1.0, %v13176_v7  ;;  %13197 = vpow2.f32 %v10323_v30 }
0x1921   : > { %v13180_v52 = vpop.eup %13179  ;;  %v8195_v10 = vadd.f32 1.0, %v13178_v1  ;;  %v8011_v1 = vadd.f32 %v17037_v14, %v17016_v53 }
0x1922   : > { %v13182_v5 = vpop.eup %13181  ;;  %13199 = vrcp.f32 %v8197_v11  ;;  %v8198_v54 = vadd.f32 1.0, %v13180_v52 }
0x1923   : > { %v13184_v27 = vpop.eup %13183  ;;  %13201 = vrcp.f32 %v8195_v10  ;;  %v8196_v29 = vadd.f32 1.0, %v13182_v5  ;;  %v8003_v5 = vadd.f32 %v17037_v14, %v17019_v21  ;;  %v8024_v21 = vadd.f32 %v17037_v14, %v17022_v12 }
0x1924   : > { %v13186_v6 = vpop.eup %13185  ;;  %v8241_v33 = vmul.f32 %v13184_v27, %v7992_v2  ;;  %13203 = vrcp.f32 %v8198_v54  ;;  %v8019_v12 = vadd.f32 %v17037_v14, %v17031_v61 }
0x1925   : > { %v13188_v60 = vpop.eup %13187  ;;  %13205 = vrcp.f32 %v8196_v29  ;;  %v8239_v19 = vmul.f32 %v13186_v6, %v7984_v25 }
0x1926   : > { %v13190_v38 = vpop.eup %13189  ;;  %v8242_v37 = vmul.f32 %v13188_v60, %v7995_v40 }
0x1927   : > { %v13192_v58 = vpop.eup %13191  ;;  %v8240_v31 = vmul.f32 %v13190_v38, %v7987_v43 }
0x1928   : > { %v13194_v28 = vpop.eup %13193  ;;  %v8256_v22 = vpack.c.bf16 %v8242_v37, %v8241_v33  ;;  %v8201_v26 = vadd.f32 1.0, %v13192_v58 }
0x1929   : > { %v13196_v34 = vpop.eup %13195  ;;  %v8199_v50 = vadd.f32 1.0, %v13194_v28  ;;  %v8255_v59 = vpack.c.bf16 %v8240_v31, %v8239_v19  ;;  %v8016_v31 = vadd.f32 %v17037_v14, %v17025_v23 }
0x192a   : > { %v13198_v17 = vpop.eup %13197  ;;  %13207 = vrcp.f32 %v8201_v26  ;;  %v8202_v3 = vadd.f32 1.0, %v13196_v34  ;;  %v17049_v9 = vpop.f32.mrb[36].mxu0 }
0x192b   : > { %13209 = vrcp.f32 %v8199_v50  ;;  %v8200_v36 = vadd.f32 1.0, %v13198_v17  ;;  %v11675_v0 = vpop.f32.mrb[52].mxu1  ;;  %11681 = vmatprep.mubr.msk.bf16.mxu0 %vm495_vm0, %v8255_v59  ;;  %11701 = vmatprep.mubr.msk.bf16.mxu1 %vm495_vm0, %v8255_v59  ;;  %v17056_v51 = vpop.f32.mrb[37].mxu0 }
0x192c   : > { %v13200_v56 = vpop.eup %13199  ;;  %13211 = vrcp.f32 %v8202_v3  ;;  %v8137_v24 = vadd.f32 %v16998_v20, %v11675_v0  ;;  %v8128_v30 = vpop.f32.mrb[53].mxu1  ;;  %11682 = vmatmul.mubr.msk.bf16.vlgmr.msra.gmra.mrb[40].mxu0 %vm495_vm0, %v8256_v22  ;;  %11702 = vmatmul.mubr.msk.bf16.vlgmr.msra.gmra.mrb[56].mxu1 %vm495_vm0, %v8256_v22  ;;  %v8027_v22 = vadd.f32 %v17037_v14, %v17028_v49 }
0x192d   : > { %v13202_v32 = vpop.eup %13201  ;;  %v8245_v7 = vmul.f32 %v13200_v56, %v8008_v48  ;;  %13213 = vrcp.f32 %v8200_v36  ;;  %v8129_v11 = vadd.f32 %v16998_v20, %v8128_v30  ;;  %v11656_v52 = vpop.f32.mrb[38].mxu0  ;;  %v8040_v30 = vadd.f32 %v17037_v14, %v17049_v9  ;;  %v11877_v9 = vld [vmem:[%s17472_s6 + $0x80] sm:$0xff]  }
0x192e   : > { %v11676_v63 = vpop.f32.mrb[54].mxu1  ;;  %v13204_v10 = vpop.eup %13203  ;;  %v10328_v2 = vmul.f32 -1.442695, %v8137_v24  ;;  %v8243_v29 = vmul.f32 %v13202_v32, %v8000_v47  ;;  %11737 = vmatprep.subr.bf16.mxu1 %v11877_v9 }
0x192f   : > { %v8140_v54 = vadd.f32 %v16998_v20, %v11676_v63  ;;  %v8034_v27 = vpop.f32.mrb[39].mxu0  ;;  %v8131_v25 = vpop.f32.mrb[55].mxu1  ;;  %v8246_v33 = vmul.f32 %v13204_v10, %v8011_v1  ;;  %v10326_v40 = vmul.f32 -1.442695, %v8129_v11  ;;  %v8043_v63 = vadd.f32 %v17037_v14, %v11656_v52  ;;  %11738 = vmatpush3.bf16.msra.mxu1 %v11877_v9  ;;  %v11880_v52 = vld [vmem:[%s17471_s5 + $0x88] sm:$0xff]  }
0x1930   : > { %v13206_v6 = vpop.eup %13205  ;;  %v8132_v53 = vadd.f32 %v16998_v20, %v8131_v25  ;;  %13215 = vpow2.f32 %v10328_v2 }
0x1931   : > { %v10329_v60 = vmul.f32 -1.442695, %v8140_v54  ;;  %v8244_v43 = vmul.f32 %v13206_v6, %v8003_v5  ;;  %v8258_v19 = vpack.c.bf16 %v8246_v33, %v8245_v7  ;;  %13217 = vpow2.f32 %v10326_v40 }
0x1932   : > { %v10327_v38 = vmul.f32 -1.442695, %v8132_v53  ;;  %v8032_v7 = vadd.f32 %v17037_v14, %v17056_v51  ;;  %v8035_v5 = vadd.f32 %v17037_v14, %v8034_v27  ;;  %v11879_v14 = vld [vmem:[%s17471_s5 + $0x80] sm:$0xff]   ;;  %v11878_v51 = vld [vmem:[%s17472_s6 + $0x88] sm:$0xff]  }
0x1933   : > { %13219 = vpow2.f32 %v10329_v60  ;;  %v8257_v37 = vpack.c.bf16 %v8244_v43, %v8243_v29  ;;  %11717 = vmatprep.subr.bf16.mxu0 %v11879_v14  ;;  %11739 = vmatprep.subr.bf16.mxu1 %v11878_v51  ;;  %v17110_v53 = vld [vmem:[%s17470_s4 + $0x1] ss:$0 sm:$0xff] }
0x1934   : > { %13221 = vpow2.f32 %v10327_v38  ;;  %v13208_v58 = vpop.eup %13207  ;;  %11718 = vmatpush3.bf16.msra.mxu0 %v11879_v14  ;;  %11740 = vmatpush3.bf16.msra.mxu1 %v11878_v51 }
0x1935   : > { %11685 = vmatprep.mubr.msk.bf16.mxu0 %vm495_vm0, %v8257_v37  ;;  %11705 = vmatprep.mubr.msk.bf16.mxu1 %vm495_vm0, %v8257_v37  ;;  %v13210_v20 = vpop.eup %13209  ;;  %v8249_v28 = vmul.f32 %v13208_v58, %v8024_v21 }
0x1936   : > { %11686 = vmatmul.mubr.msk.bf16.gmra.mrb[44].mxu0 %vm495_vm0, %v8258_v19  ;;  %11706 = vmatmul.mubr.msk.bf16.gmra.mrb[60].mxu1 %vm495_vm0, %v8258_v19  ;;  %v13212_v26 = vpop.eup %13211  ;;  %v8247_v34 = vmul.f32 %v13210_v20, %v8016_v31 }
0x1937   : > { %v13214_v50 = vpop.eup %13213  ;;  %v8250_v23 = vmul.f32 %v13212_v26, %v8027_v22  ;;  %11719 = vmatprep.subr.bf16.mxu0 %v11880_v52 }
0x1938   : > { %v8248_v59 = vmul.f32 %v13214_v50, %v8019_v12  ;;  %11720 = vmatpush3.bf16.msra.mxu0 %v11880_v52 }
0x1939   : > { %v8260_v17 = vpack.c.bf16 %v8250_v23, %v8249_v28 }
0x193a   : > { %v13216_v3 = vpop.eup %13215  ;;  %v8259_v48 = vpack.c.bf16 %v8248_v59, %v8247_v34 }
0x193b   : > { %v13218_v36 = vpop.eup %13217  ;;  %v8205_v0 = vadd.f32 1.0, %v13216_v3 }
0x193c   : > { %v8203_v47 = vadd.f32 1.0, %v13218_v36  ;;  %11689 = vmatprep.mubr.msk.bf16.mxu0 %vm495_vm0, %v8259_v48  ;;  %11709 = vmatprep.mubr.msk.bf16.mxu1 %vm495_vm0, %v8259_v48 }
0x193d   : > { %v13220_v56 = vpop.eup %13219  ;;  %13223 = vrcp.f32 %v8205_v0 }
0x193e   : > { %v13222_v49 = vpop.eup %13221  ;;  %v8206_v24 = vadd.f32 1.0, %v13220_v56  ;;  %11690 = vmatmul.mubr.msk.bf16.gmra.mrb[48].mxu0 %vm495_vm0, %v8260_v17  ;;  %11710 = vmatmul.mubr.msk.bf16.gmra.mrb[64].mxu1 %vm495_vm0, %v8260_v17  ;;  %13225 = vrcp.f32 %v8203_v47 }
0x193f   : > { %v8204_v61 = vadd.f32 1.0, %v13222_v49 }
0x1940   : > { %13227 = vrcp.f32 %v8206_v24 }
0x1941   : > { %13229 = vrcp.f32 %v8204_v61 }
0x1947   : > { %v13224_v32 = vpop.eup %13223 }
0x1948   : > { %v13226_v1 = vpop.eup %13225  ;;  %v8253_v11 = vmul.f32 %v13224_v32, %v8040_v30 }
0x1949   : > { %v8251_v2 = vmul.f32 %v13226_v1, %v8032_v7 }
0x194a   : > { %v13228_v10 = vpop.eup %13227 }
0x194b   : > { %v13230_v54 = vpop.eup %13229  ;;  %v8254_v25 = vmul.f32 %v13228_v10, %v8043_v63 }
0x194c   : > { %v8252_v29 = vmul.f32 %v13230_v54, %v8035_v5 }
0x194d   : > { %v8262_v6 = vpack.c.bf16 %v8254_v25, %v8253_v11 }
0x194e   : > { %v8261_v33 = vpack.c.bf16 %v8252_v29, %v8251_v2 }
0x1950   : > { %11693 = vmatprep.mubr.msk.bf16.mxu0 %vm495_vm0, %v8261_v33  ;;  %11713 = vmatprep.mubr.msk.bf16.mxu1 %vm495_vm0, %v8261_v33 }
0x1951   : > { %11694 = vmatmul.mubr.msk.bf16.gmra.mrb[52].mxu0 %vm495_vm0, %v8262_v6  ;;  %11714 = vmatmul.mubr.msk.bf16.gmra.mrb[68].mxu1 %vm495_vm0, %v8262_v6 }
0x19ff   : > { %v17105_v27 = vpop.f32.mrb[40].mxu0  ;;  %v11703_v40 = vpop.f32.mrb[56].mxu1 }
0x1a00   : > { %v8427_v60 = vadd.f32 %v17110_v53, %v11703_v40  ;;  %v17113_v43 = vpop.f32.mrb[41].mxu0  ;;  %v8418_v19 = vpop.f32.mrb[57].mxu1 }
0x1a01   : > { %v8419_v38 = vadd.f32 %v17110_v53, %v8418_v19  ;;  %v17116_v37 = vpop.f32.mrb[42].mxu0  ;;  %v11704_v21 = vpop.f32.mrb[58].mxu1 }
0x1a02   : > { %v10348_v58 = vmul.f32 -1.442695, %v8427_v60  ;;  %v8430_v31 = vadd.f32 %v17110_v53, %v11704_v21  ;;  %v17119_v20 = vpop.f32.mrb[43].mxu0  ;;  %v8421_v28 = vpop.f32.mrb[59].mxu1 }
0x1a03   : > { %v10346_v22 = vmul.f32 -1.442695, %v8419_v38  ;;  %v8422_v26 = vadd.f32 %v17110_v53, %v8421_v28 }
0x1a04   : > { %13231 = vpow2.f32 %v10348_v58  ;;  %v10349_v12 = vmul.f32 -1.442695, %v8430_v31 }
0x1a05   : > { %13233 = vpow2.f32 %v10346_v22  ;;  %v10347_v34 = vmul.f32 -1.442695, %v8422_v26 }
0x1a06   : > { %13235 = vpow2.f32 %v10349_v12 }
0x1a07   : > { %13237 = vpow2.f32 %v10347_v34 }
0x1a09   : > { %v17122_v50 = vpop.f32.mrb[44].mxu0  ;;  %v11707_v23 = vpop.f32.mrb[60].mxu1 }
0x1a0a   : > { %v8443_v59 = vadd.f32 %v17110_v53, %v11707_v23  ;;  %v17125_v17 = vpop.f32.mrb[45].mxu0  ;;  %v8434_v3 = vpop.f32.mrb[61].mxu1 }
0x1a0b   : > { %v8435_v48 = vadd.f32 %v17110_v53, %v8434_v3  ;;  %v17128_v36 = vpop.f32.mrb[46].mxu0  ;;  %v11708_v0 = vpop.f32.mrb[62].mxu1 }
0x1a0c   : > { %v10352_v56 = vmul.f32 -1.442695, %v8443_v59  ;;  %v8446_v47 = vadd.f32 %v17110_v53, %v11708_v0  ;;  %v17131_v49 = vpop.f32.mrb[47].mxu0  ;;  %v8437_v24 = vpop.f32.mrb[63].mxu1 }
0x1a0d   : > { %v10350_v61 = vmul.f32 -1.442695, %v8435_v48  ;;  %v8438_v30 = vadd.f32 %v17110_v53, %v8437_v24  ;;  %v17149_v48 = vld [vmem:[%s17469_s3 + $0x1] ss:$0 sm:$0xff] }
0x1a0e   : > { %13239 = vpow2.f32 %v10352_v56  ;;  %v10353_v32 = vmul.f32 -1.442695, %v8446_v47  ;;  %v13232_v7 = vpop.eup %13231  ;;  %v8330_v0 = vadd.f32 %v17149_v48, %v17105_v27  ;;  %v8322_v24 = vadd.f32 %v17149_v48, %v17113_v43 }
0x1a0f   : > { %13241 = vpow2.f32 %v10350_v61  ;;  %v10351_v1 = vmul.f32 -1.442695, %v8438_v30  ;;  %v13234_v11 = vpop.eup %13233  ;;  %v8531_v63 = vadd.f32 1.0, %v13232_v7  ;;  %v8333_v7 = vadd.f32 %v17149_v48, %v17116_v37 }
0x1a10   : > { %13243 = vpow2.f32 %v10353_v32  ;;  %v13236_v10 = vpop.eup %13235  ;;  %v8529_v5 = vadd.f32 1.0, %v13234_v11  ;;  %v8325_v11 = vadd.f32 %v17149_v48, %v17119_v20 }
0x1a11   : > { %13245 = vpow2.f32 %v10351_v1  ;;  %v17134_v2 = vpop.f32.mrb[48].mxu0  ;;  %v11711_v54 = vpop.f32.mrb[64].mxu1  ;;  %v8532_v29 = vadd.f32 1.0, %v13236_v10 }
0x1a12   : > { %v13238_v25 = vpop.eup %13237  ;;  %13247 = vrcp.f32 %v8531_v63  ;;  %v8459_v6 = vadd.f32 %v17110_v53, %v11711_v54  ;;  %v17137_v33 = vpop.f32.mrb[49].mxu0 }
0x1a13   : > { %v8450_v9 = vpop.f32.mrb[65].mxu1  ;;  %13249 = vrcp.f32 %v8529_v5  ;;  %v8530_v14 = vadd.f32 1.0, %v13238_v25  ;;  %v17140_v52 = vpop.f32.mrb[50].mxu0 }
0x1a14   : > { %v8451_v51 = vadd.f32 %v17110_v53, %v8450_v9  ;;  %v11712_v40 = vpop.f32.mrb[66].mxu1  ;;  %13251 = vrcp.f32 %v8532_v29  ;;  %v10356_v60 = vmul.f32 -1.442695, %v8459_v6  ;;  %v17143_v38 = vpop.f32.mrb[51].mxu0 }
0x1a15   : > { %v8462_v19 = vadd.f32 %v17110_v53, %v11712_v40  ;;  %v8453_v21 = vpop.f32.mrb[67].mxu1  ;;  %13253 = vrcp.f32 %v8530_v14  ;;  %v8346_v40 = vadd.f32 %v17149_v48, %v17122_v50 }
0x1a16   : > { %v10354_v58 = vmul.f32 -1.442695, %v8451_v51  ;;  %v8454_v31 = vadd.f32 %v17110_v53, %v8453_v21  ;;  %13255 = vpow2.f32 %v10356_v60 }
0x1a17   : > { %v10357_v28 = vmul.f32 -1.442695, %v8462_v19 }
0x1a18   : > { %13257 = vpow2.f32 %v10354_v58  ;;  %v10355_v22 = vmul.f32 -1.442695, %v8454_v31  ;;  %v13240_v26 = vpop.eup %13239  ;;  %v8338_v58 = vadd.f32 %v17149_v48, %v17125_v17 }
0x1a19   : > { %13259 = vpow2.f32 %v10357_v28  ;;  %v13242_v12 = vpop.eup %13241  ;;  %v8535_v34 = vadd.f32 1.0, %v13240_v26 }
0x1a1a   : > { %13261 = vpow2.f32 %v10355_v22  ;;  %v13244_v23 = vpop.eup %13243  ;;  %v8533_v59 = vadd.f32 1.0, %v13242_v12  ;;  %v8349_v12 = vadd.f32 %v17149_v48, %v17128_v36 }
0x1a1b   : > { %v13246_v3 = vpop.eup %13245  ;;  %13263 = vrcp.f32 %v8535_v34  ;;  %v8536_v56 = vadd.f32 1.0, %v13244_v23 }
0x1a1c   : > { %v13248_v47 = vpop.eup %13247  ;;  %13265 = vrcp.f32 %v8533_v59  ;;  %v8534_v61 = vadd.f32 1.0, %v13246_v3  ;;  %v8341_v3 = vadd.f32 %v17149_v48, %v17131_v49  ;;  %v8362_v49 = vadd.f32 %v17149_v48, %v17134_v2 }
0x1a1d   : > { %v13250_v30 = vpop.eup %13249  ;;  %v8579_v32 = vmul.f32 %v13248_v47, %v8330_v0  ;;  %13267 = vrcp.f32 %v8536_v56  ;;  %v8357_v2 = vadd.f32 %v17149_v48, %v17143_v38 }
0x1a1e   : > { %v13252_v1 = vpop.eup %13251  ;;  %13269 = vrcp.f32 %v8534_v61  ;;  %v8577_v27 = vmul.f32 %v13250_v30, %v8322_v24 }
0x1a1f   : > { %v13254_v63 = vpop.eup %13253  ;;  %v8580_v10 = vmul.f32 %v13252_v1, %v8333_v7 }
0x1a20   : > { %v13256_v5 = vpop.eup %13255  ;;  %v8578_v54 = vmul.f32 %v13254_v63, %v8325_v11 }
0x1a21   : > { %v8606_v43 = vpack.c.bf16 %v8580_v10, %v8579_v32  ;;  %v8539_v29 = vadd.f32 1.0, %v13256_v5 }
0x1a22   : > { %v13258_v25 = vpop.eup %13257  ;;  %v8605_v14 = vpack.c.bf16 %v8578_v54, %v8577_v27  ;;  %v8354_v54 = vadd.f32 %v17149_v48, %v17137_v33 }
0x1a23   : > { %v13260_v6 = vpop.eup %13259  ;;  %v8537_v9 = vadd.f32 1.0, %v13258_v25  ;;  %13271 = vrcp.f32 %v8539_v29 }
0x1a24   : > { %v13262_v51 = vpop.eup %13261  ;;  %v8540_v37 = vadd.f32 1.0, %v13260_v6  ;;  %v17161_v60 = vpop.f32.mrb[52].mxu0  ;;  %11721 = vmatprep.mubr.msk.bf16.mxu0 %vm495_vm0, %v8605_v14  ;;  %11741 = vmatprep.mubr.msk.bf16.mxu1 %vm495_vm0, %v8605_v14 }
0x1a25   : > { %13273 = vrcp.f32 %v8537_v9  ;;  %v8538_v20 = vadd.f32 1.0, %v13262_v51  ;;  %v11715_v19 = vpop.f32.mrb[68].mxu1  ;;  %v13264_v21 = vpop.eup %13263  ;;  %11722 = vmatmul.mubr.msk.bf16.vlgmr.msra.gmra.mrb[56].mxu0 %vm495_vm0, %v8606_v43  ;;  %11742 = vmatmul.mubr.msk.bf16.vlgmr.msra.gmra.mrb[72].mxu1 %vm495_vm0, %v8606_v43  ;;  %v8365_v43 = vadd.f32 %v17149_v48, %v17140_v52 }
0x1a26   : > { %13275 = vrcp.f32 %v8540_v37  ;;  %v8475_v31 = vadd.f32 %v17110_v53, %v11715_v19  ;;  %v17168_v28 = vpop.f32.mrb[53].mxu0  ;;  %v8466_v22 = vpop.f32.mrb[69].mxu1  ;;  %v8583_v26 = vmul.f32 %v13264_v21, %v8346_v40 }
0x1a27   : > { %v13266_v50 = vpop.eup %13265  ;;  %13277 = vrcp.f32 %v8538_v20  ;;  %v8467_v34 = vadd.f32 %v17110_v53, %v8466_v22  ;;  %v11696_v23 = vpop.f32.mrb[54].mxu0  ;;  %v8378_v22 = vadd.f32 %v17149_v48, %v17161_v60  ;;  %v11881_v60 = vld [vmem:[%s17472_s6 + $0x90] sm:$0xff]  }
0x1a28   : > { %v11716_v17 = vpop.f32.mrb[70].mxu1  ;;  %v13268_v59 = vpop.eup %13267  ;;  %v10360_v0 = vmul.f32 -1.442695, %v8475_v31  ;;  %v8581_v61 = vmul.f32 %v13266_v50, %v8338_v58  ;;  %11777 = vmatprep.subr.bf16.mxu1 %v11881_v60 }
0x1a29   : > { %v8478_v56 = vadd.f32 %v17110_v53, %v11716_v17  ;;  %v8372_v47 = vpop.f32.mrb[55].mxu0  ;;  %v8469_v24 = vpop.f32.mrb[71].mxu1  ;;  %v8584_v32 = vmul.f32 %v13268_v59, %v8349_v12  ;;  %v10358_v7 = vmul.f32 -1.442695, %v8467_v34  ;;  %v8381_v17 = vadd.f32 %v17149_v48, %v11696_v23  ;;  %11778 = vmatpush3.bf16.msra.mxu1 %v11881_v60  ;;  %v11884_v23 = vld [vmem:[%s17471_s5 + $0x98] sm:$0xff]  }
0x1a2a   : > { %v13270_v30 = vpop.eup %13269  ;;  %v8470_v36 = vadd.f32 %v17110_v53, %v8469_v24  ;;  %13279 = vpow2.f32 %v10360_v0 }
0x1a2b   : > { %v10361_v1 = vmul.f32 -1.442695, %v8478_v56  ;;  %v8582_v11 = vmul.f32 %v13270_v30, %v8341_v3  ;;  %v8608_v27 = vpack.c.bf16 %v8584_v32, %v8583_v26  ;;  %13281 = vpow2.f32 %v10358_v7 }
0x1a2c   : > { %v10359_v63 = vmul.f32 -1.442695, %v8470_v36  ;;  %v8370_v26 = vadd.f32 %v17149_v48, %v17168_v28  ;;  %v8373_v3 = vadd.f32 %v17149_v48, %v8372_v47  ;;  %v11883_v48 = vld [vmem:[%s17471_s5 + $0x90] sm:$0xff]   ;;  %v11882_v28 = vld [vmem:[%s17472_s6 + $0x98] sm:$0xff]   ;;  %v17220_v47 = vld [vmem:[%s17474_s8 + $0x8] ss:$0 sm:$0xff] }
0x1a2d   : > { %13283 = vpow2.f32 %v10361_v1  ;;  %v8607_v10 = vpack.c.bf16 %v8582_v11, %v8581_v61  ;;  %v13272_v5 = vpop.eup %13271  ;;  %11757 = vmatprep.subr.bf16.mxu0 %v11883_v48  ;;  %11779 = vmatprep.subr.bf16.mxu1 %v11882_v28 }
0x1a2e   : > { %13285 = vpow2.f32 %v10359_v63  ;;  %v8587_v25 = vmul.f32 %v13272_v5, %v8362_v49  ;;  %11758 = vmatpush3.bf16.msra.mxu0 %v11883_v48  ;;  %11780 = vmatpush3.bf16.msra.mxu1 %v11882_v28 }
0x1a2f   : > { %11725 = vmatprep.mubr.msk.bf16.mxu0 %vm495_vm0, %v8607_v10  ;;  %11745 = vmatprep.mubr.msk.bf16.mxu1 %vm495_vm0, %v8607_v10  ;;  %v13274_v53 = vpop.eup %13273 }
0x1a30   : > { %11726 = vmatmul.mubr.msk.bf16.gmra.mrb[60].mxu0 %vm495_vm0, %v8608_v27  ;;  %11746 = vmatmul.mubr.msk.bf16.gmra.mrb[76].mxu1 %vm495_vm0, %v8608_v27  ;;  %v13276_v29 = vpop.eup %13275  ;;  %v8585_v6 = vmul.f32 %v13274_v53, %v8354_v54 }
0x1a31   : > { %v13278_v9 = vpop.eup %13277  ;;  %v8588_v33 = vmul.f32 %v13276_v29, %v8365_v43  ;;  %11759 = vmatprep.subr.bf16.mxu0 %v11884_v23 }
0x1a32   : > { %v8586_v14 = vmul.f32 %v13278_v9, %v8357_v2  ;;  %11760 = vmatpush3.bf16.msra.mxu0 %v11884_v23 }
0x1a33   : > { %v8610_v51 = vpack.c.bf16 %v8588_v33, %v8587_v25 }
0x1a34   : > { %v13280_v37 = vpop.eup %13279  ;;  %v8609_v40 = vpack.c.bf16 %v8586_v14, %v8585_v6 }
0x1a35   : > { %v13282_v20 = vpop.eup %13281  ;;  %v8543_v19 = vadd.f32 1.0, %v13280_v37 }
0x1a36   : > { %v8541_v58 = vadd.f32 1.0, %v13282_v20  ;;  %11729 = vmatprep.mubr.msk.bf16.mxu0 %vm495_vm0, %v8609_v40  ;;  %11749 = vmatprep.mubr.msk.bf16.mxu1 %vm495_vm0, %v8609_v40 }
0x1a37   : > { %v13284_v21 = vpop.eup %13283  ;;  %13287 = vrcp.f32 %v8543_v19 }
0x1a38   : > { %v13286_v52 = vpop.eup %13285  ;;  %v8544_v31 = vadd.f32 1.0, %v13284_v21  ;;  %11730 = vmatmul.mubr.msk.bf16.gmra.mrb[64].mxu0 %vm495_vm0, %v8610_v51  ;;  %11750 = vmatmul.mubr.msk.bf16.gmra.mrb[80].mxu1 %vm495_vm0, %v8610_v51  ;;  %13289 = vrcp.f32 %v8541_v58 }
0x1a39   : > { %v8542_v38 = vadd.f32 1.0, %v13286_v52 }
0x1a3a   : > { %13291 = vrcp.f32 %v8544_v31 }
0x1a3b   : > { %13293 = vrcp.f32 %v8542_v38 }
0x1a41   : > { %v13288_v50 = vpop.eup %13287 }
0x1a42   : > { %v13290_v12 = vpop.eup %13289  ;;  %v8591_v34 = vmul.f32 %v13288_v50, %v8378_v22 }
0x1a43   : > { %v8589_v0 = vmul.f32 %v13290_v12, %v8370_v26 }
0x1a44   : > { %v13292_v59 = vpop.eup %13291 }
0x1a45   : > { %v13294_v56 = vpop.eup %13293  ;;  %v8592_v24 = vmul.f32 %v13292_v59, %v8381_v17 }
0x1a46   : > { %v8590_v61 = vmul.f32 %v13294_v56, %v8373_v3 }
0x1a47   : > { %v8612_v30 = vpack.c.bf16 %v8592_v24, %v8591_v34 }
0x1a48   : > { %v8611_v32 = vpack.c.bf16 %v8590_v61, %v8589_v0 }
0x1a4a   : > { %11733 = vmatprep.mubr.msk.bf16.mxu0 %vm495_vm0, %v8611_v32  ;;  %11753 = vmatprep.mubr.msk.bf16.mxu1 %vm495_vm0, %v8611_v32 }
0x1a4b   : > { %11734 = vmatmul.mubr.msk.bf16.gmra.mrb[68].mxu0 %vm495_vm0, %v8612_v30  ;;  %11754 = vmatmul.mubr.msk.bf16.gmra.mrb[84].mxu1 %vm495_vm0, %v8612_v30 }
0x1af8   : > { %v17222_v7 = vpop.f32.mrb[56].mxu0  ;;  %v11743_v36 = vpop.f32.mrb[72].mxu1 }
0x1af9   : > { %v8809_v1 = vadd.f32 %v11743_v36, %v17220_v47  ;;  %v17225_v11 = vpop.f32.mrb[57].mxu0  ;;  %v8800_v27 = vpop.f32.mrb[73].mxu1 }
0x1afa   : > { %v8801_v63 = vadd.f32 %v17220_v47, %v8800_v27  ;;  %v17228_v10 = vpop.f32.mrb[58].mxu0  ;;  %v11744_v49 = vpop.f32.mrb[74].mxu1 }
0x1afb   : > { %v10394_v5 = vmul.f32 -1.442695, %v8809_v1  ;;  %v8812_v54 = vadd.f32 %v11744_v49, %v17220_v47  ;;  %v17231_v53 = vpop.f32.mrb[59].mxu0  ;;  %v8803_v25 = vpop.f32.mrb[75].mxu1 }
0x1afc   : > { %v10392_v43 = vmul.f32 -1.442695, %v8801_v63  ;;  %v8804_v29 = vadd.f32 %v17220_v47, %v8803_v25 }
0x1afd   : > { %13295 = vpow2.f32 %v10394_v5  ;;  %v10395_v2 = vmul.f32 -1.442695, %v8812_v54 }
0x1afe   : > { %13297 = vpow2.f32 %v10392_v43  ;;  %v10393_v6 = vmul.f32 -1.442695, %v8804_v29 }
0x1aff   : > { %13299 = vpow2.f32 %v10395_v2  ;;  %v17261_v2 = vld [vmem:[%s17473_s7 + $0x8] ss:$0 sm:$0xff] }
0x1b00   : > { %13301 = vpow2.f32 %v10393_v6 }
0x1b03   : > { %v17234_v9 = vpop.f32.mrb[60].mxu0  ;;  %v11747_v33 = vpop.f32.mrb[76].mxu1 }
0x1b04   : > { %v8825_v14 = vadd.f32 %v11747_v33, %v17220_v47  ;;  %v17237_v51 = vpop.f32.mrb[61].mxu0  ;;  %v8816_v37 = vpop.f32.mrb[77].mxu1 }
0x1b05   : > { %v8817_v40 = vadd.f32 %v17220_v47, %v8816_v37  ;;  %v17240_v20 = vpop.f32.mrb[62].mxu0  ;;  %v11748_v19 = vpop.f32.mrb[78].mxu1 }
0x1b06   : > { %v10398_v21 = vmul.f32 -1.442695, %v8825_v14  ;;  %v8828_v58 = vadd.f32 %v11748_v19, %v17220_v47  ;;  %v17243_v52 = vpop.f32.mrb[63].mxu0  ;;  %v8819_v31 = vpop.f32.mrb[79].mxu1  ;;  %v8696_v19 = vadd.f32 %v17222_v7, %v17261_v2 }
0x1b07   : > { %v10396_v38 = vmul.f32 -1.442695, %v8817_v40  ;;  %v8820_v22 = vadd.f32 %v17220_v47, %v8819_v31  ;;  %v13296_v26 = vpop.eup %13295  ;;  %v8688_v31 = vadd.f32 %v17261_v2, %v17225_v11 }
0x1b08   : > { %13303 = vpow2.f32 %v10398_v21  ;;  %v10399_v50 = vmul.f32 -1.442695, %v8828_v58  ;;  %v13298_v34 = vpop.eup %13297  ;;  %v8913_v17 = vadd.f32 1.0, %v13296_v26  ;;  %v8699_v26 = vadd.f32 %v17228_v10, %v17261_v2 }
0x1b09   : > { %13305 = vpow2.f32 %v10396_v38  ;;  %v10397_v12 = vmul.f32 -1.442695, %v8820_v22  ;;  %v13300_v59 = vpop.eup %13299  ;;  %v8911_v3 = vadd.f32 1.0, %v13298_v34  ;;  %v8691_v34 = vadd.f32 %v17261_v2, %v17231_v53 }
0x1b0a   : > { %13307 = vpow2.f32 %v10399_v50  ;;  %v13302_v24 = vpop.eup %13301  ;;  %v8914_v61 = vadd.f32 1.0, %v13300_v59 }
0x1b0b   : > { %13309 = vpow2.f32 %v10397_v12  ;;  %v17246_v0 = vpop.f32.mrb[64].mxu0  ;;  %v11751_v56 = vpop.f32.mrb[80].mxu1  ;;  %v8912_v48 = vadd.f32 1.0, %v13302_v24 }
0x1b0c   : > { %13311 = vrcp.f32 %v8913_v17  ;;  %v8841_v30 = vadd.f32 %v11751_v56, %v17220_v47  ;;  %v17249_v32 = vpop.f32.mrb[65].mxu0  ;;  %v8832_v60 = vpop.f32.mrb[81].mxu1 }
0x1b0d   : > { %13313 = vrcp.f32 %v8911_v3  ;;  %v8833_v28 = vadd.f32 %v17220_v47, %v8832_v60  ;;  %v17252_v23 = vpop.f32.mrb[66].mxu0  ;;  %v11752_v36 = vpop.f32.mrb[82].mxu1 }
0x1b0e   : > { %13315 = vrcp.f32 %v8914_v61  ;;  %v10402_v1 = vmul.f32 -1.442695, %v8841_v30  ;;  %v8844_v27 = vadd.f32 %v11752_v36, %v17220_v47  ;;  %v17255_v63 = vpop.f32.mrb[67].mxu0  ;;  %v8835_v49 = vpop.f32.mrb[83].mxu1  ;;  %v8712_v36 = vadd.f32 %v17234_v9, %v17261_v2 }
0x1b0f   : > { %13317 = vrcp.f32 %v8912_v48  ;;  %v10400_v5 = vmul.f32 -1.442695, %v8833_v28  ;;  %v8836_v54 = vadd.f32 %v17220_v47, %v8835_v49 }
0x1b10   : > { %13319 = vpow2.f32 %v10402_v1  ;;  %v10403_v25 = vmul.f32 -1.442695, %v8844_v27 }
0x1b11   : > { %13321 = vpow2.f32 %v10400_v5  ;;  %v10401_v43 = vmul.f32 -1.442695, %v8836_v54  ;;  %v8704_v5 = vadd.f32 %v17261_v2, %v17237_v51 }
0x1b12   : > { %v13304_v29 = vpop.eup %13303  ;;  %13323 = vpow2.f32 %v10403_v25 }
0x1b13   : > { %v13306_v6 = vpop.eup %13305  ;;  %v8917_v33 = vadd.f32 1.0, %v13304_v29  ;;  %13325 = vpow2.f32 %v10401_v43 }
0x1b14   : > { %v13308_v14 = vpop.eup %13307  ;;  %v8915_v37 = vadd.f32 1.0, %v13306_v6  ;;  %v8715_v6 = vadd.f32 %v17240_v20, %v17261_v2 }
0x1b15   : > { %v13310_v40 = vpop.eup %13309  ;;  %13327 = vrcp.f32 %v8917_v33  ;;  %v8918_v21 = vadd.f32 1.0, %v13308_v14 }
0x1b16   : > { %v13312_v58 = vpop.eup %13311  ;;  %13329 = vrcp.f32 %v8915_v37  ;;  %v8916_v38 = vadd.f32 1.0, %v13310_v40  ;;  %v8707_v40 = vadd.f32 %v17261_v2, %v17243_v52  ;;  %v8728_v52 = vadd.f32 %v17246_v0, %v17261_v2 }
0x1b17   : > { %v13314_v22 = vpop.eup %13313  ;;  %v8961_v50 = vmul.f32 %v13312_v58, %v8696_v19  ;;  %13331 = vrcp.f32 %v8918_v21  ;;  %v8723_v0 = vadd.f32 %v17261_v2, %v17255_v63 }
0x1b18   : > { %v13316_v12 = vpop.eup %13315  ;;  %13333 = vrcp.f32 %v8916_v38  ;;  %v8959_v7 = vmul.f32 %v13314_v22, %v8688_v31 }
0x1b19   : > { %v13318_v17 = vpop.eup %13317  ;;  %v8962_v59 = vmul.f32 %v13316_v12, %v8699_v26 }
0x1b1a   : > { %v13320_v3 = vpop.eup %13319  ;;  %v8960_v56 = vmul.f32 %v13318_v17, %v8691_v34 }
0x1b1b   : > { %v13322_v24 = vpop.eup %13321  ;;  %v8988_v11 = vpack.c.bf16 %v8962_v59, %v8961_v50  ;;  %v8921_v61 = vadd.f32 1.0, %v13320_v3 }
0x1b1c   : > { %v13324_v30 = vpop.eup %13323  ;;  %v8919_v60 = vadd.f32 1.0, %v13322_v24  ;;  %v8987_v48 = vpack.c.bf16 %v8960_v56, %v8959_v7  ;;  %v8720_v56 = vadd.f32 %v17261_v2, %v17249_v32 }
0x1b1d   : > { %v13326_v28 = vpop.eup %13325  ;;  %13335 = vrcp.f32 %v8921_v61  ;;  %v8922_v10 = vadd.f32 1.0, %v13324_v30 }
0x1b1e   : > { %13337 = vrcp.f32 %v8919_v60  ;;  %v8920_v53 = vadd.f32 1.0, %v13326_v28  ;;  %v17273_v1 = vpop.f32.mrb[68].mxu0  ;;  %v11755_v27 = vpop.f32.mrb[84].mxu1  ;;  %11761 = vmatprep.mubr.msk.bf16.mxu0 %vm495_vm0, %v8987_v48  ;;  %11781 = vmatprep.mubr.msk.bf16.mxu1 %vm495_vm0, %v8987_v48 }
0x1b1f   : > { %v13328_v49 = vpop.eup %13327  ;;  %13339 = vrcp.f32 %v8922_v10  ;;  %v8857_v54 = vadd.f32 %v11755_v27, %v17220_v47  ;;  %v17280_v25 = vpop.f32.mrb[69].mxu0  ;;  %11762 = vmatmul.mubr.msk.bf16.vlgmr.msra.gmra.mrb[72].mxu0 %vm495_vm0, %v8988_v11  ;;  %11782 = vmatmul.mubr.msk.bf16.vlgmr.msra.gmra.mrb[88].mxu1 %vm495_vm0, %v8988_v11  ;;  %v8731_v11 = vadd.f32 %v17252_v23, %v17261_v2 }
0x1b20   : > { %v8848_v43 = vpop.f32.mrb[85].mxu1  ;;  %v13330_v9 = vpop.eup %13329  ;;  %v8965_v29 = vmul.f32 %v13328_v49, %v8712_v36  ;;  %13341 = vrcp.f32 %v8920_v53 }
0x1b21   : > { %v8849_v33 = vadd.f32 %v17220_v47, %v8848_v43  ;;  %v11736_v14 = vpop.f32.mrb[70].mxu0  ;;  %v11756_v51 = vpop.f32.mrb[86].mxu1  ;;  %v10406_v19 = vmul.f32 -1.442695, %v8857_v54  ;;  %v8963_v38 = vmul.f32 %v13330_v9, %v8704_v5  ;;  %v8744_v43 = vadd.f32 %v17273_v1, %v17261_v2  ;;  %v11885_v1 = vld [vmem:[%s17477_s11] sm:$0xff]  }
0x1b22   : > { %v13332_v37 = vpop.eup %13331  ;;  %v8860_v21 = vadd.f32 %v11756_v51, %v17220_v47  ;;  %v8738_v58 = vpop.f32.mrb[71].mxu0  ;;  %v8747_v51 = vadd.f32 %v11736_v14, %v17261_v2  ;;  %11797 = vmatprep.subr.bf16.mxu0 %v11885_v1 }
0x1b23   : > { %v8851_v31 = vpop.f32.mrb[87].mxu1  ;;  %v13334_v22 = vpop.eup %13333  ;;  %v8966_v50 = vmul.f32 %v13332_v37, %v8715_v6  ;;  %v10404_v26 = vmul.f32 -1.442695, %v8849_v33  ;;  %13343 = vpow2.f32 %v10406_v19  ;;  %11798 = vmatpush3.bf16.msra.mxu0 %v11885_v1 }
0x1b24   : > { %v8852_v20 = vadd.f32 %v17220_v47, %v8851_v31  ;;  %v10407_v12 = vmul.f32 -1.442695, %v8860_v21  ;;  %v8964_v34 = vmul.f32 %v13334_v22, %v8707_v40  ;;  %v8739_v40 = vadd.f32 %v17261_v2, %v8738_v58 }
0x1b25   : > { %v8990_v7 = vpack.c.bf16 %v8966_v50, %v8965_v29  ;;  %13345 = vpow2.f32 %v10404_v26  ;;  %v8736_v29 = vadd.f32 %v17261_v2, %v17280_v25  ;;  %v11886_v2 = vld [vmem:[%s17477_s11 + $0x8] sm:$0xff]  }
0x1b26   : > { %v10405_v17 = vmul.f32 -1.442695, %v8852_v20  ;;  %13347 = vpow2.f32 %v10407_v12  ;;  %v8989_v59 = vpack.c.bf16 %v8964_v34, %v8963_v38  ;;  %11799 = vmatprep.subr.bf16.mxu0 %v11886_v2  ;;  %v17326_v25 = vld [vmem:[%s17474_s8 + $0x9] ss:$0 sm:$0xff] }
0x1b27   : > { %v13336_v3 = vpop.eup %13335  ;;  %11800 = vmatpush3.bf16.msra.mxu0 %v11886_v2 }
0x1b28   : > { %13349 = vpow2.f32 %v10405_v17  ;;  %11765 = vmatprep.mubr.msk.bf16.mxu0 %vm495_vm0, %v8989_v59  ;;  %11785 = vmatprep.mubr.msk.bf16.mxu1 %vm495_vm0, %v8989_v59  ;;  %v13338_v47 = vpop.eup %13337  ;;  %v8969_v24 = vmul.f32 %v13336_v3, %v8728_v52 }
0x1b29   : > { %11766 = vmatmul.mubr.msk.bf16.gmra.mrb[76].mxu0 %vm495_vm0, %v8990_v7  ;;  %11786 = vmatmul.mubr.msk.bf16.gmra.mrb[92].mxu1 %vm495_vm0, %v8990_v7  ;;  %v13340_v61 = vpop.eup %13339  ;;  %v8967_v30 = vmul.f32 %v13338_v47, %v8720_v56 }
0x1b2a   : > { %v13342_v60 = vpop.eup %13341  ;;  %v8970_v32 = vmul.f32 %v13340_v61, %v8731_v11 }
0x1b2b   : > { %v8968_v48 = vmul.f32 %v13342_v60, %v8723_v0 }
0x1b2c   : > { %v8992_v28 = vpack.c.bf16 %v8970_v32, %v8969_v24 }
0x1b2d   : > { %v13344_v10 = vpop.eup %13343  ;;  %v8991_v36 = vpack.c.bf16 %v8968_v48, %v8967_v30 }
0x1b2e   : > { %v8925_v27 = vadd.f32 1.0, %v13344_v10 }
0x1b2f   : > { %v13346_v53 = vpop.eup %13345  ;;  %11769 = vmatprep.mubr.msk.bf16.mxu0 %vm495_vm0, %v8991_v36  ;;  %11789 = vmatprep.mubr.msk.bf16.mxu1 %vm495_vm0, %v8991_v36 }
0x1b30   : > { %v13348_v49 = vpop.eup %13347  ;;  %v8923_v5 = vadd.f32 1.0, %v13346_v53  ;;  %13351 = vrcp.f32 %v8925_v27 }
0x1b31   : > { %v8926_v54 = vadd.f32 1.0, %v13348_v49  ;;  %11770 = vmatmul.mubr.msk.bf16.gmra.mrb[80].mxu0 %vm495_vm0, %v8992_v28  ;;  %11790 = vmatmul.mubr.msk.bf16.gmra.mrb[96].mxu1 %vm495_vm0, %v8992_v28 }
0x1b32   : > { %v13350_v23 = vpop.eup %13349  ;;  %13353 = vrcp.f32 %v8923_v5 }
0x1b33   : > { %v8924_v63 = vadd.f32 1.0, %v13350_v23  ;;  %13355 = vrcp.f32 %v8926_v54 }
0x1b35   : > { %13357 = vrcp.f32 %v8924_v63 }
0x1b3a   : > { %v13352_v9 = vpop.eup %13351 }
0x1b3b   : > { %v8973_v33 = vmul.f32 %v13352_v9, %v8744_v43 }
0x1b3c   : > { %v13354_v6 = vpop.eup %13353 }
0x1b3d   : > { %v13356_v37 = vpop.eup %13355  ;;  %v8971_v19 = vmul.f32 %v13354_v6, %v8736_v29 }
0x1b3e   : > { %v8974_v31 = vmul.f32 %v13356_v37, %v8747_v51 }
0x1b3f   : > { %v13358_v21 = vpop.eup %13357 }
0x1b40   : > { %v8972_v38 = vmul.f32 %v13358_v21, %v8739_v40  ;;  %v8994_v22 = vpack.c.bf16 %v8974_v31, %v8973_v33 }
0x1b42   : > { %v8993_v50 = vpack.c.bf16 %v8972_v38, %v8971_v19 }
0x1b44   : > { %11773 = vmatprep.mubr.msk.bf16.mxu0 %vm495_vm0, %v8993_v50  ;;  %11793 = vmatprep.mubr.msk.bf16.mxu1 %vm495_vm0, %v8993_v50 }
0x1b45   : > { %11774 = vmatmul.mubr.msk.bf16.gmra.mrb[84].mxu0 %vm495_vm0, %v8994_v22  ;;  %11794 = vmatmul.mubr.msk.bf16.gmra.mrb[100].mxu1 %vm495_vm0, %v8994_v22 }
0x1bf2   : > { %v17328_v14 = vpop.f32.mrb[72].mxu0  ;;  %v11783_v58 = vpop.f32.mrb[88].mxu1 }
0x1bf3   : > { %v9191_v26 = vadd.f32 %v11783_v58, %v17326_v25  ;;  %v17331_v20 = vpop.f32.mrb[73].mxu0  ;;  %v9182_v12 = vpop.f32.mrb[89].mxu1 }
0x1bf4   : > { %v9183_v34 = vadd.f32 %v17326_v25, %v9182_v12  ;;  %v17334_v7 = vpop.f32.mrb[74].mxu0  ;;  %v11784_v17 = vpop.f32.mrb[90].mxu1 }
0x1bf5   : > { %v10440_v59 = vmul.f32 -1.442695, %v9191_v26  ;;  %v9194_v52 = vadd.f32 %v11784_v17, %v17326_v25  ;;  %v17337_v3 = vpop.f32.mrb[75].mxu0  ;;  %v9185_v56 = vpop.f32.mrb[91].mxu1 }
0x1bf6   : > { %v10438_v47 = vmul.f32 -1.442695, %v9183_v34  ;;  %v9186_v24 = vadd.f32 %v17326_v25, %v9185_v56 }
0x1bf7   : > { %13359 = vpow2.f32 %v10440_v59  ;;  %v10441_v11 = vmul.f32 -1.442695, %v9194_v52 }
0x1bf8   : > { %13361 = vpow2.f32 %v10438_v47  ;;  %v10439_v61 = vmul.f32 -1.442695, %v9186_v24 }
0x1bf9   : > { %13363 = vpow2.f32 %v10441_v11  ;;  %v17367_v11 = vld [vmem:[%s17473_s7 + $0x9] ss:$0 sm:$0xff] }
0x1bfa   : > { %13365 = vpow2.f32 %v10439_v61 }
0x1bfc   : > { %v17340_v0 = vpop.f32.mrb[76].mxu0  ;;  %v11787_v30 = vpop.f32.mrb[92].mxu1 }
0x1bfd   : > { %v9207_v60 = vadd.f32 %v11787_v30, %v17326_v25  ;;  %v17343_v32 = vpop.f32.mrb[77].mxu0  ;;  %v9198_v48 = vpop.f32.mrb[93].mxu1 }
0x1bfe   : > { %v9199_v28 = vadd.f32 %v17326_v25, %v9198_v48  ;;  %v17346_v10 = vpop.f32.mrb[78].mxu0  ;;  %v11788_v36 = vpop.f32.mrb[94].mxu1 }
0x1bff   : > { %v10444_v53 = vmul.f32 -1.442695, %v9207_v60  ;;  %v9210_v27 = vadd.f32 %v11788_v36, %v17326_v25  ;;  %v17349_v49 = vpop.f32.mrb[79].mxu0  ;;  %v9201_v5 = vpop.f32.mrb[95].mxu1  ;;  %v9078_v36 = vadd.f32 %v17328_v14, %v17367_v11 }
0x1c00   : > { %v10442_v23 = vmul.f32 -1.442695, %v9199_v28  ;;  %v9202_v54 = vadd.f32 %v17326_v25, %v9201_v5  ;;  %v9070_v5 = vadd.f32 %v17367_v11, %v17331_v20 }
0x1c01   : > { %13367 = vpow2.f32 %v10444_v53  ;;  %v10445_v63 = vmul.f32 -1.442695, %v9210_v27  ;;  %v13360_v43 = vpop.eup %13359 }
0x1c02   : > { %13369 = vpow2.f32 %v10442_v23  ;;  %v10443_v9 = vmul.f32 -1.442695, %v9202_v54  ;;  %v13362_v29 = vpop.eup %13361  ;;  %v9295_v6 = vadd.f32 1.0, %v13360_v43  ;;  %v9081_v43 = vadd.f32 %v17334_v7, %v17367_v11 }
0x1c03   : > { %13371 = vpow2.f32 %v10445_v63  ;;  %v13364_v33 = vpop.eup %13363  ;;  %v9293_v51 = vadd.f32 1.0, %v13362_v29  ;;  %v9073_v29 = vadd.f32 %v17367_v11, %v17337_v3 }
0x1c04   : > { %13373 = vpow2.f32 %v10443_v9  ;;  %v17352_v37 = vpop.f32.mrb[80].mxu0  ;;  %v11791_v40 = vpop.f32.mrb[96].mxu1  ;;  %v9296_v21 = vadd.f32 1.0, %v13364_v33 }
0x1c05   : > { %v13366_v19 = vpop.eup %13365  ;;  %13375 = vrcp.f32 %v9295_v6  ;;  %v9223_v31 = vadd.f32 %v11791_v40, %v17326_v25  ;;  %v17355_v38 = vpop.f32.mrb[81].mxu0 }
0x1c06   : > { %v9214_v22 = vpop.f32.mrb[97].mxu1  ;;  %13377 = vrcp.f32 %v9293_v51  ;;  %v9294_v50 = vadd.f32 1.0, %v13366_v19  ;;  %v17358_v2 = vpop.f32.mrb[82].mxu0 }
0x1c07   : > { %v9215_v1 = vadd.f32 %v17326_v25, %v9214_v22  ;;  %v11792_v58 = vpop.f32.mrb[98].mxu1  ;;  %13379 = vrcp.f32 %v9296_v21  ;;  %v10448_v26 = vmul.f32 -1.442695, %v9223_v31  ;;  %v17361_v34 = vpop.f32.mrb[83].mxu0 }
0x1c08   : > { %v9226_v12 = vadd.f32 %v11792_v58, %v17326_v25  ;;  %v9217_v17 = vpop.f32.mrb[99].mxu1  ;;  %13381 = vrcp.f32 %v9294_v50 }
0x1c09   : > { %v10446_v59 = vmul.f32 -1.442695, %v9215_v1  ;;  %v9218_v52 = vadd.f32 %v17326_v25, %v9217_v17  ;;  %13383 = vpow2.f32 %v10448_v26 }
0x1c0a   : > { %v10449_v56 = vmul.f32 -1.442695, %v9226_v12 }
0x1c0b   : > { %13385 = vpow2.f32 %v10446_v59  ;;  %v10447_v47 = vmul.f32 -1.442695, %v9218_v52  ;;  %v13368_v24 = vpop.eup %13367 }
0x1c0c   : > { %13387 = vpow2.f32 %v10449_v56  ;;  %v13370_v61 = vpop.eup %13369  ;;  %v9299_v30 = vadd.f32 1.0, %v13368_v24 }
0x1c0d   : > { %13389 = vpow2.f32 %v10447_v47  ;;  %v13372_v60 = vpop.eup %13371  ;;  %v9297_v48 = vadd.f32 1.0, %v13370_v61 }
0x1c0e   : > { %v13374_v28 = vpop.eup %13373  ;;  %13391 = vrcp.f32 %v9299_v30  ;;  %v9300_v53 = vadd.f32 1.0, %v13372_v60 }
0x1c0f   : > { %v13376_v27 = vpop.eup %13375  ;;  %13393 = vrcp.f32 %v9297_v48  ;;  %v9298_v23 = vadd.f32 1.0, %v13374_v28  ;;  %v9089_v28 = vadd.f32 %v17367_v11, %v17349_v49 }
0x1c10   : > { %v13378_v54 = vpop.eup %13377  ;;  %v9343_v63 = vmul.f32 %v13376_v27, %v9078_v36  ;;  %13395 = vrcp.f32 %v9300_v53 }
0x1c11   : > { %v13380_v9 = vpop.eup %13379  ;;  %13397 = vrcp.f32 %v9298_v23  ;;  %v9341_v14 = vmul.f32 %v13378_v54, %v9070_v5 }
0x1c12   : > { %v13382_v6 = vpop.eup %13381  ;;  %v9359_v33 = vadd.f32 %v9343_v63, %v16637_v13  ;;  %v9344_v51 = vmul.f32 %v13380_v9, %v9081_v43  ;;  %v9094_v13 = vadd.f32 %v17340_v0, %v17367_v11  ;;  %v9097_v0 = vadd.f32 %v17346_v10, %v17367_v11 }
0x1c13   : > { %v13384_v40 = vpop.eup %13383  ;;  %v9342_v20 = vmul.f32 %v13382_v6, %v9073_v29  ;;  %v9357_v19 = vadd.f32 %v9341_v14, %v16640_v8 }
0x1c14   : > { %v9360_v31 = vadd.f32 %v9344_v51, %v16643_v45  ;;  %v9303_v22 = vadd.f32 1.0, %v13384_v40  ;;  %v9086_v45 = vadd.f32 %v17367_v11, %v17343_v32 }
0x1c15   : > { %v13386_v21 = vpop.eup %13385  ;;  %v9358_v1 = vadd.f32 %v9342_v20, %v16646_v42 }
0x1c16   : > { %v13388_v7 = vpop.eup %13387  ;;  %v9301_v50 = vadd.f32 1.0, %v13386_v21  ;;  %v9374_v3 = vpack.c.bf16 %v9360_v31, %v9359_v33  ;;  %13399 = vrcp.f32 %v9303_v22  ;;  %v9105_v22 = vadd.f32 %v17367_v11, %v17361_v34 }
0x1c17   : > { %v13390_v58 = vpop.eup %13389  ;;  %v9304_v26 = vadd.f32 1.0, %v13388_v7  ;;  %v9373_v59 = vpack.c.bf16 %v9358_v1, %v9357_v19  ;;  %v9102_v19 = vadd.f32 %v17367_v11, %v17355_v38 }
0x1c18   : > { %13401 = vrcp.f32 %v9301_v50  ;;  %v9302_v12 = vadd.f32 1.0, %v13390_v58  ;;  %v17383_v17 = vpop.f32.mrb[84].mxu0  ;;  %v11795_v8 = vpop.f32.mrb[100].mxu1 }
0x1c19   : > { %v13392_v52 = vpop.eup %13391  ;;  %13403 = vrcp.f32 %v9304_v26  ;;  %v9239_v42 = vadd.f32 %v11795_v8, %v17326_v25  ;;  %v17388_v56 = vpop.f32.mrb[85].mxu0  ;;  %11801 = vmatprep.mubr.msk.bf16.mxu0 %vm495_vm0, %v9373_v59 }
0x1c1a   : > { %v9230_v47 = vpop.f32.mrb[101].mxu1  ;;  %v13394_v24 = vpop.eup %13393  ;;  %v9347_v61 = vmul.f32 %v13392_v52, %v9094_v13  ;;  %13405 = vrcp.f32 %v9302_v12  ;;  %11802 = vmatmul.mubr.msk.bf16.vlgmr.msra.gmra.mrb[88].mxu0 %vm495_vm0, %v9374_v3 }
0x1c1b   : > { %v9231_v30 = vadd.f32 %v17326_v25, %v9230_v47  ;;  %v17393_v60 = vpop.f32.mrb[86].mxu0  ;;  %v11796_v48 = vpop.f32.mrb[102].mxu1  ;;  %v10452_v36 = vmul.f32 -1.442695, %v9239_v42  ;;  %v9345_v10 = vmul.f32 %v13394_v24, %v9086_v45 }
0x1c1c   : > { %v13396_v32 = vpop.eup %13395  ;;  %v9242_v53 = vadd.f32 %v11796_v48, %v17326_v25  ;;  %v17399_v27 = vpop.f32.mrb[87].mxu0  ;;  %v9363_v54 = vadd.f32 %v9347_v61, %v16669_v4  ;;  %v9110_v4 = vadd.f32 %v17352_v37, %v17367_v11  ;;  %v9129_v24 = vadd.f32 %v17393_v60, %v17367_v11 }
0x1c1d   : > { %v9233_v5 = vpop.f32.mrb[103].mxu1  ;;  %v13398_v23 = vpop.eup %13397  ;;  %v9348_v63 = vmul.f32 %v13396_v32, %v9097_v0  ;;  %v10450_v43 = vmul.f32 -1.442695, %v9231_v30  ;;  %13407 = vpow2.f32 %v10452_v36  ;;  %v9361_v6 = vadd.f32 %v9345_v10, %v16681_v15 }
0x1c1e   : > { %v10453_v9 = vmul.f32 -1.442695, %v9242_v53  ;;  %v9234_v29 = vadd.f32 %v17326_v25, %v9233_v5  ;;  %v9346_v14 = vmul.f32 %v13398_v23, %v9089_v28  ;;  %v9121_v32 = vadd.f32 %v17367_v11, %v17399_v27 }
0x1c1f   : > { %v9364_v49 = vadd.f32 %v9348_v63, %v16678_v16  ;;  %13409 = vpow2.f32 %v10450_v43  ;;  %v9113_v16 = vadd.f32 %v17358_v2, %v17367_v11 }
0x1c20   : > { %13411 = vpow2.f32 %v10453_v9  ;;  %v10451_v33 = vmul.f32 -1.442695, %v9234_v29  ;;  %v9362_v51 = vadd.f32 %v9346_v14, %v16690_v35  ;;  %v13400_v20 = vpop.eup %13399 }
0x1c21   : > { %v9376_v40 = vpack.c.bf16 %v9364_v49, %v9363_v54  ;;  %v9351_v31 = vmul.f32 %v13400_v20, %v9110_v4 }
0x1c22   : > { %13413 = vpow2.f32 %v10451_v33  ;;  %v9375_v25 = vpack.c.bf16 %v9362_v51, %v9361_v6  ;;  %v13402_v21 = vpop.eup %13401 }
0x1c23   : > { %v13404_v15 = vpop.eup %13403  ;;  %v9349_v35 = vmul.f32 %v13402_v21, %v9102_v19  ;;  %v9367_v37 = vadd.f32 %v9351_v31, %v16703_v55 }
0x1c24   : > { %11805 = vmatprep.mubr.msk.bf16.mxu0 %vm495_vm0, %v9375_v25  ;;  %v13406_v7 = vpop.eup %13405  ;;  %v9352_v50 = vmul.f32 %v13404_v15, %v9113_v16 }
0x1c25   : > { %11806 = vmatmul.mubr.msk.bf16.gmra.mrb[92].mxu0 %vm495_vm0, %v9376_v40  ;;  %v9350_v38 = vmul.f32 %v13406_v7, %v9105_v22  ;;  %v9365_v1 = vadd.f32 %v9349_v35, %v16706_v57  ;;  %v9126_v57 = vadd.f32 %v17383_v17, %v17367_v11 }
0x1c26   : > { %v9368_v58 = vadd.f32 %v9352_v50, %v16709_v41 }
0x1c27   : > { %v13408_v3 = vpop.eup %13407  ;;  %v9366_v2 = vadd.f32 %v9350_v38, %v16712_v18  ;;  %v9118_v18 = vadd.f32 %v17367_v11, %v17388_v56 }
0x1c28   : > { %v9378_v13 = vpack.c.bf16 %v9368_v58, %v9367_v37  ;;  %v9307_v34 = vadd.f32 1.0, %v13408_v3 }
0x1c29   : > { %v13410_v26 = vpop.eup %13409  ;;  %v9377_v59 = vpack.c.bf16 %v9366_v2, %v9365_v1 }
0x1c2a   : > { %v13412_v12 = vpop.eup %13411  ;;  %v9305_v8 = vadd.f32 1.0, %v13410_v26  ;;  %13415 = vrcp.f32 %v9307_v34 }
0x1c2b   : > { %v9308_v52 = vadd.f32 1.0, %v13412_v12  ;;  %11809 = vmatprep.mubr.msk.bf16.mxu0 %vm495_vm0, %v9377_v59 }
0x1c2c   : > { %v13414_v55 = vpop.eup %13413  ;;  %13417 = vrcp.f32 %v9305_v8 }
0x1c2d   : > { %13419 = vrcp.f32 %v9308_v52  ;;  %v9306_v45 = vadd.f32 1.0, %v13414_v55  ;;  %11810 = vmatmul.mubr.msk.bf16.gmra.mrb[96].mxu0 %vm495_vm0, %v9378_v13 }
0x1c2f   : > { %13421 = vrcp.f32 %v9306_v45 }
0x1c34   : > { %v13416_v41 = vpop.eup %13415 }
0x1c35   : > { %v9355_v47 = vmul.f32 %v13416_v41, %v9126_v57 }
0x1c36   : > { %v13418_v42 = vpop.eup %13417 }
0x1c37   : > { %v13420_v61 = vpop.eup %13419  ;;  %v9353_v0 = vmul.f32 %v13418_v42, %v9118_v18  ;;  %v9371_v30 = vadd.f32 %v9355_v47, %v16723_v39  ;;  %v10454_v39 = vld [vmem:[%s17478_s12] ss:$0 sm:$0xff] }
0x1c38   : > { %v9356_v48 = vmul.f32 %v13420_v61, %v9129_v24 }
0x1c39   : > { %v13422_v28 = vpop.eup %13421  ;;  %v9369_v17 = vadd.f32 %v9353_v0, %v16728_v46 }
0x1c3a   : > { %v9372_v36 = vadd.f32 %v9356_v48, %v16731_v44  ;;  %v9354_v56 = vmul.f32 %v13422_v28, %v9121_v32 }
0x1c3c   : > { %v9380_v53 = vpack.c.bf16 %v9372_v36, %v9371_v30  ;;  %v9370_v5 = vadd.f32 %v9354_v56, %v16734_v62 }
0x1c3e   : > { %v9379_v10 = vpack.c.bf16 %v9370_v5, %v9369_v17 }
0x1c40   : > { %11813 = vmatprep.mubr.msk.bf16.mxu0 %vm495_vm0, %v9379_v10 }
0x1c41   : > { %11814 = vmatmul.mubr.msk.bf16.gmra.mrb[100].mxu0 %vm495_vm0, %v9380_v53 }
0x1ced   : > { %v11803_v46 = vpop.f32.mrb[88].mxu0 }
0x1cee   : > { %v9471_v44 = vadd.f32 %v11803_v46, %v10454_v39  ;;  %v9462_v62 = vpop.f32.mrb[89].mxu0 }
0x1cef   : > { %v9463_v11 = vadd.f32 %v10454_v39, %v9462_v62  ;;  %v11804_v60 = vpop.f32.mrb[90].mxu0 }
0x1cf0   : > { %9527 = vst [vmem:[%s17445_s15 + $0x10] sm:$0xff] %v9471_v44  ;;  %v9474_v27 = vadd.f32 %v11804_v60, %v10454_v39  ;;  %v9465_v23 = vpop.f32.mrb[91].mxu0 }
0x1cf1   : > { %9525 = vst [vmem:[%s17445_s15] sm:$0xff] %v9463_v11  ;;  %v9466_v54 = vadd.f32 %v10454_v39, %v9465_v23 }
0x1cf2   : > { %9528 = vst [vmem:[%s17445_s15 + $0x18] sm:$0xff] %v9474_v27 }
0x1cf3   : > { %9526 = vst [vmem:[%s17445_s15 + $0x8] sm:$0xff] %v9466_v54 }
0x1cf8   : > { %v11807_v63 = vpop.f32.mrb[92].mxu0 }
0x1cf9   : > { %v9487_v43 = vadd.f32 %v11807_v63, %v10454_v39  ;;  %v9478_v9 = vpop.f32.mrb[93].mxu0 }
0x1cfa   : > { %v9479_v29 = vadd.f32 %v10454_v39, %v9478_v9  ;;  %v11808_v14 = vpop.f32.mrb[94].mxu0 }
0x1cfb   : > { %9531 = vst [vmem:[%s17445_s15 + $0x30] sm:$0xff] %v9487_v43  ;;  %v9490_v49 = vadd.f32 %v11808_v14, %v10454_v39  ;;  %v9481_v6 = vpop.f32.mrb[95].mxu0 }
0x1cfc   : > { %9529 = vst [vmem:[%s17445_s15 + $0x20] sm:$0xff] %v9479_v29  ;;  %v9482_v33 = vadd.f32 %v10454_v39, %v9481_v6 }
0x1cfd   : > { %9532 = vst [vmem:[%s17445_s15 + $0x38] sm:$0xff] %v9490_v49 }
0x1cfe   : > { %9530 = vst [vmem:[%s17445_s15 + $0x28] sm:$0xff] %v9482_v33 }
0x1d00   : > { %v11811_v51 = vpop.f32.mrb[96].mxu0 }
0x1d01   : > { %v9503_v40 = vadd.f32 %v11811_v51, %v10454_v39  ;;  %v9494_v4 = vpop.f32.mrb[97].mxu0 }
0x1d02   : > { %v9495_v20 = vadd.f32 %v10454_v39, %v9494_v4  ;;  %v11812_v19 = vpop.f32.mrb[98].mxu0 }
0x1d03   : > { %9535 = vst [vmem:[%s17445_s15 + $0x50] sm:$0xff] %v9503_v40  ;;  %v9506_v25 = vadd.f32 %v11812_v19, %v10454_v39  ;;  %v9497_v21 = vpop.f32.mrb[99].mxu0 }
0x1d04   : > { %9533 = vst [vmem:[%s17445_s15 + $0x40] sm:$0xff] %v9495_v20  ;;  %v9498_v31 = vadd.f32 %v10454_v39, %v9497_v21 }
0x1d05   : > { %9536 = vst [vmem:[%s17445_s15 + $0x58] sm:$0xff] %v9506_v25 }
0x1d06   : > { %9534 = vst [vmem:[%s17445_s15 + $0x48] sm:$0xff] %v9498_v31 }
0x1d14   : > { %v11815_v16 = vpop.f32.mrb[100].mxu0 }
0x1d15   : > { %v9519_v15 = vadd.f32 %v11815_v16, %v10454_v39  ;;  %v9510_v22 = vpop.f32.mrb[101].mxu0 }
0x1d16   : > { %v9511_v35 = vadd.f32 %v10454_v39, %v9510_v22  ;;  %v11816_v7 = vpop.f32.mrb[102].mxu0 }
0x1d17   : > { %9539 = vst [vmem:[%s17445_s15 + $0x70] sm:$0xff] %v9519_v15  ;;  %v9522_v37 = vadd.f32 %v11816_v7, %v10454_v39  ;;  %v9513_v50 = vpop.f32.mrb[103].mxu0 }
0x1d18   : > { %9537 = vst [vmem:[%s17445_s15 + $0x60] sm:$0xff] %v9511_v35  ;;  %v9514_v38 = vadd.f32 %v10454_v39, %v9513_v50 }
0x1d19   : > { %9540 = vst [vmem:[%s17445_s15 + $0x78] sm:$0xff] %v9522_v37 }
0x1d1a   : > { %9538 = vst [vmem:[%s17445_s15 + $0x68] sm:$0xff] %v9514_v38 }
0x1d1b PF: > { %s23_s25 = sadd.s32 1, %s13544_s25  }
0x1d1c   : > { %p20_p4 = scmp.ge.s32.totalorder %s23_s25, 4  }
0x1d1e   :  { %22 = sbr.rel (!%p20_p4) target bundleno = 1 (0x1), region = 125 }

</bundles_post_ra>
